<compile_context>
chip_gen: v6e
topology: v6e:2x2x1
jax: 0.10.0
libtpu: 0.0.40
codegen_flags: <defaults>
</compile_context>

<pallas_src>
import functools

import numpy as np

import jax
import jax.numpy as jnp
from jax.experimental import pallas as pl
from jax.experimental.pallas import tpu as pltpu


# -----------------------------------------------------------------------------
# In-kernel math helpers
# -----------------------------------------------------------------------------
def _elu(x):
    """F.elu(alpha=1.0): x>0 -> x, else exp(x)-1 (exp on the clamped negative
    branch only; exact -1 in the underflow limit)."""
    xn = jnp.minimum(x, 0.0)
    return jnp.where(x > 0, x, jnp.exp(xn) - 1.0)


# -----------------------------------------------------------------------------
# Fused forward kernel: 4 folded conv matmuls + ELU -> GRUCell -> [pi | V]
# -----------------------------------------------------------------------------
def _fused_forward_kernel(
    n_actions,                              # static (bound via functools.partial)
    x_ref, h_ref,                           # (B, H*W*Cin) bf16 ; (B, hidden) f32
    m1_ref, b1_ref, m2_ref, b2_ref,         # folded conv matrices (bf16) + tiled
    m3_ref, b3_ref, m4_ref, b4_ref,         #   bias rows (f32)
    wih_ref, whh_ref, bih_ref, bhh_ref,     # GRU: (in,3H),(H,3H) bf16; (1,3H) f32
    whd_ref, bhd_ref,                       # heads: (H, 128) bf16, (1, 128) f32
    h_out_ref, head_out_ref,                # (B, hidden) f32 ; (B, 128) f32
):
    f32 = jnp.float32
    bf16 = jnp.bfloat16

    def conv_elu(x_bf, m_ref, b_ref):
        y = jnp.dot(x_bf, m_ref[...], preferred_element_type=f32) + b_ref[...]
        return _elu(y)

    # Conv stack (conv4 reuses cv3's weights, exactly like the PyTorch forward;
    # its folded matrix m4 was built from cv3's weights at the 2x2->1x1 extent).
    c1 = conv_elu(x_ref[...], m1_ref, b1_ref)
    c2 = conv_elu(c1.astype(bf16), m2_ref, b2_ref)
    c3 = conv_elu(c2.astype(bf16), m3_ref, b3_ref)
    c4 = conv_elu(c3.astype(bf16), m4_ref, b4_ref)   # (B, 32) == flattened conv state

    # GRUCell (PyTorch gate order [r, z, n]).
    h = h_ref[...]                                   # f32
    hid = h.shape[1]
    gi = jnp.dot(c4.astype(bf16), wih_ref[...], preferred_element_type=f32) + bih_ref[...]
    gh = jnp.dot(h.astype(bf16), whh_ref[...], preferred_element_type=f32) + bhh_ref[...]
    r = jax.nn.sigmoid(gi[:, 0:hid] + gh[:, 0:hid])
    z = jax.nn.sigmoid(gi[:, hid:2 * hid] + gh[:, hid:2 * hid])
    n = jnp.tanh(gi[:, 2 * hid:3 * hid] + r * gh[:, 2 * hid:3 * hid])
    h_new = (1.0 - z) * n + z * h
    h_out_ref[...] = h_new

    # Fused, lane-dense heads: columns [0:n_actions]=pi logits, [n_actions]=V,
    # the rest are zero padding.  Log-softmax over the masked logit columns.
    heads = jnp.dot(h_new.astype(bf16), whd_ref[...], preferred_element_type=f32) + bhd_ref[...]
    col = jax.lax.broadcasted_iota(jnp.int32, heads.shape, 1)
    is_logit = col < n_actions
    logits_m = jnp.where(is_logit, heads, jnp.float32(-1e30))
    m = jnp.max(logits_m, axis=1, keepdims=True)
    lse = m + jnp.log(jnp.sum(jnp.exp(logits_m - m), axis=1, keepdims=True))
    # logit columns -> log_probs, all other columns (V, padding) pass through.
    head_out_ref[...] = jnp.where(is_logit, heads - lse, heads)


# -----------------------------------------------------------------------------
# Static helpers
# -----------------------------------------------------------------------------
def _conv_out_dim(n):   # 3x3, stride 2, padding 1
    return (n - 1) // 2 + 1


def _full_block(shape):
    nd = len(shape)

    def idx(i):
        return (0,) * nd

    return pl.BlockSpec(tuple(shape), idx)


# -----------------------------------------------------------------------------
# Parameters: PyTorch-style init, then a one-time pack to kernel-ready layouts
# -----------------------------------------------------------------------------
def init_params(key, input_dims, n_actions, hidden=256):
    cin = input_dims[0]

    def uinit(k, shape, fan_in):
        bound = 1.0 / jnp.sqrt(jnp.float32(fan_in))
        return jax.random.uniform(k, shape, jnp.float32, -bound, bound)

    keys = jax.random.split(key, 16)
    conv_flat = 32 * 1 * 1  # 16x16 -> 8 -> 4 -> 2 -> 1 spatial, 32 channels
    return {
        "cv1_w": uinit(keys[0], (32, cin, 3, 3), cin * 9),
        "cv1_b": uinit(keys[1], (32,), cin * 9),
        "cv2_w": uinit(keys[2], (32, 32, 3, 3), 32 * 9),
        "cv2_b": uinit(keys[3], (32,), 32 * 9),
        "cv3_w": uinit(keys[4], (32, 32, 3, 3), 32 * 9),
        "cv3_b": uinit(keys[5], (32,), 32 * 9),
        "cv4_w": uinit(keys[6], (32, 32, 3, 3), 32 * 9),  # unused in forward (matches PyTorch source)
        "cv4_b": uinit(keys[7], (32,), 32 * 9),
        "gru_wih": uinit(keys[8], (3 * hidden, conv_flat), hidden),
        "gru_whh": uinit(keys[9], (3 * hidden, hidden), hidden),
        "gru_bih": uinit(keys[10], (3 * hidden,), hidden),
        "gru_bhh": uinit(keys[11], (3 * hidden,), hidden),
        "pi_w": uinit(keys[12], (n_actions, hidden), hidden),
        "pi_b": uinit(keys[13], (n_actions,), hidden),
        "V_w": uinit(keys[14], (1, hidden), hidden),
        "V_b": uinit(keys[15], (1,), hidden),
    }


def pack_params(p, input_dims):
    """One-time host-side conversion: fold each conv (weights + stride-2 gather
    + zero padding) into one dense bf16 matrix and a spatially tiled f32 bias
    row; transpose GRU weights; build a 128-column zero-padded [pi | V] head."""
    cin, H, W = input_dims

    def fold_conv(w, b, h, w_in, channel_major_input):
        # w: (Cout, Cin, 3, 3), b: (Cout,)
        w_np = np.asarray(w, np.float32)
        b_np = np.asarray(b, np.float32)
        cout, ci = w_np.shape[0], w_np.shape[1]
        ho, wo = _conv_out_dim(h), _conv_out_dim(w_in)
        M = np.zeros((h * w_in * ci, ho * wo * cout), np.float32)
        for i in range(ho):
            for j in range(wo):
                col0 = (i * wo + j) * cout
                for ky in range(3):
                    y = 2 * i + ky - 1
                    if not 0 <= y < h:
                        continue
                    for kx in range(3):
                        x = 2 * j + kx - 1
                        if not 0 <= x < w_in:
                            continue
                        blk = w_np[:, :, ky, kx].T          # (Cin, Cout)
                        if channel_major_input:
                            # layer-1 input is NCHW reshaped: row = c*H*W + y*W + x
                            rows = np.arange(ci) * (h * w_in) + y * w_in + x
                            M[rows, col0:col0 + cout] = blk
                        else:
                            # interior layers: row = (y*W + x)*Cin + c
                            row0 = (y * w_in + x) * ci
                            M[row0:row0 + ci, col0:col0 + cout] = blk
        bias = np.tile(b_np, ho * wo).reshape(1, ho * wo * cout)
        return (jnp.asarray(M, jnp.bfloat16), jnp.asarray(bias, jnp.float32), ho, wo)

    m1, bt1, h1, w1 = fold_conv(p["cv1_w"], p["cv1_b"], H, W, True)
    m2, bt2, h2, w2 = fold_conv(p["cv2_w"], p["cv2_b"], h1, w1, False)
    m3, bt3, h3, w3 = fold_conv(p["cv3_w"], p["cv3_b"], h2, w2, False)
    # conv4 reuses cv3's weights (faithful to the PyTorch forward), but at its
    # own spatial extent -> its own folded matrix.
    m4, bt4, h4, w4 = fold_conv(p["cv3_w"], p["cv3_b"], h3, w3, False)
    if h4 != 1 or w4 != 1:
        raise ValueError("kernel assumes the conv stack reduces spatial dims to 1x1")

    hidden = p["gru_whh"].shape[1]
    n_actions = p["pi_w"].shape[0]
    head_pad = max(128, ((n_actions + 1 + 127) // 128) * 128)
    w_heads = np.zeros((hidden, head_pad), np.float32)
    w_heads[:, :n_actions] = np.asarray(p["pi_w"], np.float32).T
    w_heads[:, n_actions] = np.asarray(p["V_w"], np.float32)[0]
    b_heads = np.zeros((1, head_pad), np.float32)
    b_heads[0, :n_actions] = np.asarray(p["pi_b"], np.float32)
    b_heads[0, n_actions] = np.asarray(p["V_b"], np.float32)[0]

    return {
        "m1": m1, "b1": bt1, "m2": m2, "b2": bt2,
        "m3": m3, "b3": bt3, "m4": m4, "b4": bt4,
        "gru_wih_t": jnp.asarray(np.asarray(p["gru_wih"], np.float32).T, jnp.bfloat16),
        "gru_whh_t": jnp.asarray(np.asarray(p["gru_whh"], np.float32).T, jnp.bfloat16),
        "gru_bih": p["gru_bih"].reshape(1, -1).astype(jnp.float32),
        "gru_bhh": p["gru_bhh"].reshape(1, -1).astype(jnp.float32),
        "w_heads": jnp.asarray(w_heads, jnp.bfloat16),
        "b_heads": jnp.asarray(b_heads, jnp.float32),
    }


# -----------------------------------------------------------------------------
# Forward pass (matches ActorCriticNetwork.forward semantics)
# -----------------------------------------------------------------------------
@functools.partial(jax.jit, static_argnums=(4,), donate_argnums=(2,))
def forward(params, state_nchw, hidden_state, sample_key, n_actions):
    B, C, H, W = state_nchw.shape
    hidden = hidden_state.shape[1]
    head_pad = params["w_heads"].shape[1]

    # Single input conversion: NCHW -> flat (B, C*H*W), bf16 for the MXU.
    x0 = state_nchw.reshape(B, C * H * W).astype(jnp.bfloat16)

    operands = [
        x0, hidden_state,
        params["m1"], params["b1"], params["m2"], params["b2"],
        params["m3"], params["b3"], params["m4"], params["b4"],
        params["gru_wih_t"], params["gru_whh_t"],
        params["gru_bih"], params["gru_bhh"],
        params["w_heads"], params["b_heads"],
    ]
    out_shapes = (
        jax.ShapeDtypeStruct((B, hidden), jnp.float32),      # h_new
        jax.ShapeDtypeStruct((B, head_pad), jnp.float32),    # [log_probs | V | pad]
    )

    # Advisory cost estimate for the XLA scheduler.
    mm_weights = (params["m1"], params["m2"], params["m3"], params["m4"],
                  params["gru_wih_t"], params["gru_whh_t"], params["w_heads"])
    flops = int(2 * B * sum(w.shape[0] * w.shape[1] for w in mm_weights))
    transcendentals = int(B * (sum(w.shape[1] for w in
                                   (params["m1"], params["m2"], params["m3"], params["m4"]))
                               + 3 * hidden + head_pad))
    bytes_accessed = int(sum(a.size * a.dtype.itemsize for a in operands)
                         + B * hidden * 4 + B * head_pad * 4)

    kernel = functools.partial(_fused_forward_kernel, n_actions)
    h_new, head = pl.pallas_call(
        kernel,
        out_shape=out_shapes,
        grid=(1,),
        in_specs=[_full_block(a.shape) for a in operands],
        out_specs=tuple(_full_block(s.shape) for s in out_shapes),
        input_output_aliases={1: 0},   # hidden_state buffer (donated) -> h_new
        compiler_params=pltpu.CompilerParams(
            dimension_semantics=("arbitrary",),
            vmem_limit_bytes=32 * 1024 * 1024),
        cost_estimate=pl.CostEstimate(flops=flops,
                                      transcendentals=transcendentals,
                                      bytes_accessed=bytes_accessed),
    )(*operands)

    log_probs = head[:, :n_actions]
    V = head[:, n_actions:n_actions + 1]

    # Categorical(softmax(pi)).sample() / .log_prob — sampling RNG lives outside
    # the kernel (jax.random key semantics; torch's RNG has no Pallas equivalent).
    action = jax.random.categorical(sample_key, log_probs, axis=-1)
    log_prob = jnp.take_along_axis(log_probs, action[:, None], axis=1)[:, 0]
    return action, V, log_prob, h_new


if __name__ == "__main__":
    input_dims = (4, 16, 16)
    n_actions = 6
    batch = 2
    hidden = 256

    root = jax.random.PRNGKey(0)
    k_params, k_state, k_sample = jax.random.split(root, 3)

    params = pack_params(init_params(k_params, input_dims, n_actions, hidden), input_dims)
    state = jax.random.normal(k_state, (batch,) + input_dims, jnp.float32)
    hidden_state = jnp.zeros((batch, hidden), jnp.float32)

    action, V, log_prob, h_new = forward(params, state, hidden_state, k_sample, n_actions)
    jax.block_until_ready((action, V, log_prob, h_new))

    # mirror the module's return convention: (action[0], V, log_prob, hidden_state)
    _ = (int(action[0]), V, log_prob, h_new)
    print("KERNEL_OK")
</pallas_src>

<mosaic_0001>
module attributes {stable_mosaic.version = 11 : i64} {
  func.func @_fused_forward_kernel(%arg0: i32, %arg1: memref<2x1024xbf16, #tpu.memory_space<vmem>>, %arg2: memref<2x256xf32, #tpu.memory_space<vmem>>, %arg3: memref<1024x2048xbf16, #tpu.memory_space<vmem>>, %arg4: memref<1x2048xf32, #tpu.memory_space<vmem>>, %arg5: memref<2048x512xbf16, #tpu.memory_space<vmem>>, %arg6: memref<1x512xf32, #tpu.memory_space<vmem>>, %arg7: memref<512x128xbf16, #tpu.memory_space<vmem>>, %arg8: memref<1x128xf32, #tpu.memory_space<vmem>>, %arg9: memref<128x32xbf16, #tpu.memory_space<vmem>>, %arg10: memref<1x32xf32, #tpu.memory_space<vmem>>, %arg11: memref<32x768xbf16, #tpu.memory_space<vmem>>, %arg12: memref<256x768xbf16, #tpu.memory_space<vmem>>, %arg13: memref<1x768xf32, #tpu.memory_space<vmem>>, %arg14: memref<1x768xf32, #tpu.memory_space<vmem>>, %arg15: memref<256x128xbf16, #tpu.memory_space<vmem>>, %arg16: memref<1x128xf32, #tpu.memory_space<vmem>>, %arg17: memref<2x256xf32, #tpu.memory_space<vmem>>, %arg18: memref<2x128xf32, #tpu.memory_space<vmem>>) attributes {dimension_semantics = [#tpu.dimension_semantics<arbitrary>], iteration_bounds = array<i64: 1>, scalar_prefetch = 0 : i64, scratch_operands = 0 : i64, tpu.core_type = #tpu.core_type<tc>, window_params = [{pipeline_mode = #tpu.pipeline_mode<synchronous>, transform_indices = @transform_0, window_bounds = array<i64: 2, 1024>}, {pipeline_mode = #tpu.pipeline_mode<synchronous>, transform_indices = @transform_1, window_bounds = array<i64: 2, 256>}, {pipeline_mode = #tpu.pipeline_mode<synchronous>, transform_indices = @transform_2, window_bounds = array<i64: 1024, 2048>}, {pipeline_mode = #tpu.pipeline_mode<synchronous>, transform_indices = @transform_3, window_bounds = array<i64: 1, 2048>}, {pipeline_mode = #tpu.pipeline_mode<synchronous>, transform_indices = @transform_4, window_bounds = array<i64: 2048, 512>}, {pipeline_mode = #tpu.pipeline_mode<synchronous>, transform_indices = @transform_5, window_bounds = array<i64: 1, 512>}, {pipeline_mode = #tpu.pipeline_mode<synchronous>, transform_indices = @transform_6, window_bounds = array<i64: 512, 128>}, {pipeline_mode = #tpu.pipeline_mode<synchronous>, transform_indices = @transform_7, window_bounds = array<i64: 1, 128>}, {pipeline_mode = #tpu.pipeline_mode<synchronous>, transform_indices = @transform_8, window_bounds = array<i64: 128, 32>}, {pipeline_mode = #tpu.pipeline_mode<synchronous>, transform_indices = @transform_9, window_bounds = array<i64: 1, 32>}, {pipeline_mode = #tpu.pipeline_mode<synchronous>, transform_indices = @transform_10, window_bounds = array<i64: 32, 768>}, {pipeline_mode = #tpu.pipeline_mode<synchronous>, transform_indices = @transform_11, window_bounds = array<i64: 256, 768>}, {pipeline_mode = #tpu.pipeline_mode<synchronous>, transform_indices = @transform_12, window_bounds = array<i64: 1, 768>}, {pipeline_mode = #tpu.pipeline_mode<synchronous>, transform_indices = @transform_13, window_bounds = array<i64: 1, 768>}, {pipeline_mode = #tpu.pipeline_mode<synchronous>, transform_indices = @transform_14, window_bounds = array<i64: 256, 128>}, {pipeline_mode = #tpu.pipeline_mode<synchronous>, transform_indices = @transform_15, window_bounds = array<i64: 1, 128>}, {pipeline_mode = #tpu.pipeline_mode<synchronous>, transform_indices = @transform_16, window_bounds = array<i64: 2, 256>}, {pipeline_mode = #tpu.pipeline_mode<synchronous>, transform_indices = @transform_17, window_bounds = array<i64: 2, 128>}]} {
    %c0 = arith.constant 0 : index
    %c0_0 = arith.constant 0 : index
    %0 = vector.load %arg1[%c0, %c0_0] : memref<2x1024xbf16, #tpu.memory_space<vmem>>, vector<2x1024xbf16>
    %c0_1 = arith.constant 0 : index
    %c0_2 = arith.constant 0 : index
    %1 = vector.load %arg3[%c0_1, %c0_2] : memref<1024x2048xbf16, #tpu.memory_space<vmem>>, vector<1024x2048xbf16>
    %cst = arith.constant dense<0.000000e+00> : vector<2x2048xf32>
    %2 = tpu.matmul %0, %1, %cst {dimension_numbers = #tpu.dot_dimension_numbers<[1], [0], [0], [1], [0, 0, 1, 1], [], []>} : vector<2x1024xbf16>, vector<1024x2048xbf16>, vector<2x2048xf32> -> vector<2x2048xf32>
    %c0_3 = arith.constant 0 : index
    %c0_4 = arith.constant 0 : index
    %3 = vector.load %arg4[%c0_3, %c0_4] : memref<1x2048xf32, #tpu.memory_space<vmem>>, vector<1x2048xf32>
    %4 = vector.broadcast %3 : vector<1x2048xf32> to vector<2x2048xf32>
    %5 = arith.addf %2, %4 : vector<2x2048xf32>
    %cst_5 = arith.constant 0.000000e+00 : f32
    %6 = vector.broadcast %cst_5 : f32 to vector<2x2048xf32>
    %7 = arith.minimumf %5, %6 : vector<2x2048xf32>
    %cst_6 = arith.constant 0.000000e+00 : f32
    %8 = vector.broadcast %cst_6 : f32 to vector<2x2048xf32>
    %9 = arith.cmpf ogt, %5, %8 : vector<2x2048xf32>
    %10 = math.exp %7 : vector<2x2048xf32>
    %cst_7 = arith.constant 1.000000e+00 : f32
    %11 = vector.broadcast %cst_7 : f32 to vector<2x2048xf32>
    %12 = arith.subf %10, %11 : vector<2x2048xf32>
    %13 = arith.select %9, %5, %12 : vector<2x2048xi1>, vector<2x2048xf32>
    %14 = arith.truncf %13 : vector<2x2048xf32> to vector<2x2048xbf16>
    %c0_8 = arith.constant 0 : index
    %c0_9 = arith.constant 0 : index
    %15 = vector.load %arg5[%c0_8, %c0_9] : memref<2048x512xbf16, #tpu.memory_space<vmem>>, vector<2048x512xbf16>
    %cst_10 = arith.constant dense<0.000000e+00> : vector<2x512xf32>
    %16 = tpu.matmul %14, %15, %cst_10 {dimension_numbers = #tpu.dot_dimension_numbers<[1], [0], [0], [1], [0, 0, 1, 1], [], []>} : vector<2x2048xbf16>, vector<2048x512xbf16>, vector<2x512xf32> -> vector<2x512xf32>
    %c0_11 = arith.constant 0 : index
    %c0_12 = arith.constant 0 : index
    %17 = vector.load %arg6[%c0_11, %c0_12] : memref<1x512xf32, #tpu.memory_space<vmem>>, vector<1x512xf32>
    %18 = vector.broadcast %17 : vector<1x512xf32> to vector<2x512xf32>
    %19 = arith.addf %16, %18 : vector<2x512xf32>
    %cst_13 = arith.constant 0.000000e+00 : f32
    %20 = vector.broadcast %cst_13 : f32 to vector<2x512xf32>
    %21 = arith.minimumf %19, %20 : vector<2x512xf32>
    %cst_14 = arith.constant 0.000000e+00 : f32
    %22 = vector.broadcast %cst_14 : f32 to vector<2x512xf32>
    %23 = arith.cmpf ogt, %19, %22 : vector<2x512xf32>
    %24 = math.exp %21 : vector<2x512xf32>
    %cst_15 = arith.constant 1.000000e+00 : f32
    %25 = vector.broadcast %cst_15 : f32 to vector<2x512xf32>
    %26 = arith.subf %24, %25 : vector<2x512xf32>
    %27 = arith.select %23, %19, %26 : vector<2x512xi1>, vector<2x512xf32>
    %28 = arith.truncf %27 : vector<2x512xf32> to vector<2x512xbf16>
    %c0_16 = arith.constant 0 : index
    %c0_17 = arith.constant 0 : index
    %29 = vector.load %arg7[%c0_16, %c0_17] : memref<512x128xbf16, #tpu.memory_space<vmem>>, vector<512x128xbf16>
    %cst_18 = arith.constant dense<0.000000e+00> : vector<2x128xf32>
    %30 = tpu.matmul %28, %29, %cst_18 {dimension_numbers = #tpu.dot_dimension_numbers<[1], [0], [0], [1], [0, 0, 1, 1], [], []>} : vector<2x512xbf16>, vector<512x128xbf16>, vector<2x128xf32> -> vector<2x128xf32>
    %c0_19 = arith.constant 0 : index
    %c0_20 = arith.constant 0 : index
    %31 = vector.load %arg8[%c0_19, %c0_20] : memref<1x128xf32, #tpu.memory_space<vmem>>, vector<1x128xf32>
    %32 = vector.broadcast %31 : vector<1x128xf32> to vector<2x128xf32>
    %33 = arith.addf %30, %32 : vector<2x128xf32>
    %cst_21 = arith.constant 0.000000e+00 : f32
    %34 = vector.broadcast %cst_21 : f32 to vector<2x128xf32>
    %35 = arith.minimumf %33, %34 : vector<2x128xf32>
    %cst_22 = arith.constant 0.000000e+00 : f32
    %36 = vector.broadcast %cst_22 : f32 to vector<2x128xf32>
    %37 = arith.cmpf ogt, %33, %36 : vector<2x128xf32>
    %38 = math.exp %35 : vector<2x128xf32>
    %cst_23 = arith.constant 1.000000e+00 : f32
    %39 = vector.broadcast %cst_23 : f32 to vector<2x128xf32>
    %40 = arith.subf %38, %39 : vector<2x128xf32>
    %41 = arith.select %37, %33, %40 : vector<2x128xi1>, vector<2x128xf32>
    %42 = arith.truncf %41 : vector<2x128xf32> to vector<2x128xbf16>
    %c0_24 = arith.constant 0 : index
    %c0_25 = arith.constant 0 : index
    %43 = vector.load %arg9[%c0_24, %c0_25] : memref<128x32xbf16, #tpu.memory_space<vmem>>, vector<128x32xbf16>
    %cst_26 = arith.constant dense<0.000000e+00> : vector<2x32xf32>
    %44 = tpu.matmul %42, %43, %cst_26 {dimension_numbers = #tpu.dot_dimension_numbers<[1], [0], [0], [1], [0, 0, 1, 1], [], []>} : vector<2x128xbf16>, vector<128x32xbf16>, vector<2x32xf32> -> vector<2x32xf32>
    %c0_27 = arith.constant 0 : index
    %c0_28 = arith.constant 0 : index
    %45 = vector.load %arg10[%c0_27, %c0_28] : memref<1x32xf32, #tpu.memory_space<vmem>>, vector<1x32xf32>
    %46 = vector.broadcast %45 : vector<1x32xf32> to vector<2x32xf32>
    %47 = arith.addf %44, %46 : vector<2x32xf32>
    %cst_29 = arith.constant 0.000000e+00 : f32
    %48 = vector.broadcast %cst_29 : f32 to vector<2x32xf32>
    %49 = arith.minimumf %47, %48 : vector<2x32xf32>
    %cst_30 = arith.constant 0.000000e+00 : f32
    %50 = vector.broadcast %cst_30 : f32 to vector<2x32xf32>
    %51 = arith.cmpf ogt, %47, %50 : vector<2x32xf32>
    %52 = math.exp %49 : vector<2x32xf32>
    %cst_31 = arith.constant 1.000000e+00 : f32
    %53 = vector.broadcast %cst_31 : f32 to vector<2x32xf32>
    %54 = arith.subf %52, %53 : vector<2x32xf32>
    %55 = arith.select %51, %47, %54 : vector<2x32xi1>, vector<2x32xf32>
    %c0_32 = arith.constant 0 : index
    %c0_33 = arith.constant 0 : index
    %56 = vector.load %arg2[%c0_32, %c0_33] : memref<2x256xf32, #tpu.memory_space<vmem>>, vector<2x256xf32>
    %57 = arith.truncf %55 : vector<2x32xf32> to vector<2x32xbf16>
    %c0_34 = arith.constant 0 : index
    %c0_35 = arith.constant 0 : index
    %58 = vector.load %arg11[%c0_34, %c0_35] : memref<32x768xbf16, #tpu.memory_space<vmem>>, vector<32x768xbf16>
    %cst_36 = arith.constant dense<0.000000e+00> : vector<2x768xf32>
    %59 = tpu.matmul %57, %58, %cst_36 {dimension_numbers = #tpu.dot_dimension_numbers<[1], [0], [0], [1], [0, 0, 1, 1], [], []>} : vector<2x32xbf16>, vector<32x768xbf16>, vector<2x768xf32> -> vector<2x768xf32>
    %c0_37 = arith.constant 0 : index
    %c0_38 = arith.constant 0 : index
    %60 = vector.load %arg13[%c0_37, %c0_38] : memref<1x768xf32, #tpu.memory_space<vmem>>, vector<1x768xf32>
    %61 = vector.broadcast %60 : vector<1x768xf32> to vector<2x768xf32>
    %62 = arith.addf %59, %61 : vector<2x768xf32>
    %63 = arith.truncf %56 : vector<2x256xf32> to vector<2x256xbf16>
    %c0_39 = arith.constant 0 : index
    %c0_40 = arith.constant 0 : index
    %64 = vector.load %arg12[%c0_39, %c0_40] : memref<256x768xbf16, #tpu.memory_space<vmem>>, vector<256x768xbf16>
    %cst_41 = arith.constant dense<0.000000e+00> : vector<2x768xf32>
    %65 = tpu.matmul %63, %64, %cst_41 {dimension_numbers = #tpu.dot_dimension_numbers<[1], [0], [0], [1], [0, 0, 1, 1], [], []>} : vector<2x256xbf16>, vector<256x768xbf16>, vector<2x768xf32> -> vector<2x768xf32>
    %c0_42 = arith.constant 0 : index
    %c0_43 = arith.constant 0 : index
    %66 = vector.load %arg14[%c0_42, %c0_43] : memref<1x768xf32, #tpu.memory_space<vmem>>, vector<1x768xf32>
    %67 = vector.broadcast %66 : vector<1x768xf32> to vector<2x768xf32>
    %68 = arith.addf %65, %67 : vector<2x768xf32>
    %69 = vector.extract_strided_slice %62 {offsets = [0, 0], sizes = [2, 256], strides = [1, 1]} : vector<2x768xf32> to vector<2x256xf32>
    %70 = vector.extract_strided_slice %68 {offsets = [0, 0], sizes = [2, 256], strides = [1, 1]} : vector<2x768xf32> to vector<2x256xf32>
    %71 = arith.addf %69, %70 : vector<2x256xf32>
    %72 = arith.negf %71 : vector<2x256xf32>
    %73 = math.exp %72 : vector<2x256xf32>
    %cst_44 = arith.constant 1.000000e+00 : f32
    %74 = vector.broadcast %cst_44 : f32 to vector<2x256xf32>
    %75 = arith.addf %74, %73 : vector<2x256xf32>
    %76 = arith.divf %74, %75 : vector<2x256xf32>
    %77 = vector.extract_strided_slice %62 {offsets = [0, 256], sizes = [2, 256], strides = [1, 1]} : vector<2x768xf32> to vector<2x256xf32>
    %78 = vector.extract_strided_slice %68 {offsets = [0, 256], sizes = [2, 256], strides = [1, 1]} : vector<2x768xf32> to vector<2x256xf32>
    %79 = arith.addf %77, %78 : vector<2x256xf32>
    %80 = arith.negf %79 : vector<2x256xf32>
    %81 = math.exp %80 : vector<2x256xf32>
    %cst_45 = arith.constant 1.000000e+00 : f32
    %82 = vector.broadcast %cst_45 : f32 to vector<2x256xf32>
    %83 = arith.addf %82, %81 : vector<2x256xf32>
    %84 = arith.divf %82, %83 : vector<2x256xf32>
    %85 = vector.extract_strided_slice %62 {offsets = [0, 512], sizes = [2, 256], strides = [1, 1]} : vector<2x768xf32> to vector<2x256xf32>
    %86 = vector.extract_strided_slice %68 {offsets = [0, 512], sizes = [2, 256], strides = [1, 1]} : vector<2x768xf32> to vector<2x256xf32>
    %87 = arith.mulf %76, %86 : vector<2x256xf32>
    %88 = arith.addf %85, %87 : vector<2x256xf32>
    %89 = math.tanh %88 : vector<2x256xf32>
    %cst_46 = arith.constant 1.000000e+00 : f32
    %90 = vector.broadcast %cst_46 : f32 to vector<2x256xf32>
    %91 = arith.subf %90, %84 : vector<2x256xf32>
    %92 = arith.mulf %91, %89 : vector<2x256xf32>
    %93 = arith.mulf %84, %56 : vector<2x256xf32>
    %94 = arith.addf %92, %93 : vector<2x256xf32>
    %c0_47 = arith.constant 0 : index
    %c0_48 = arith.constant 0 : index
    %95 = vector.load %arg17[%c0_47, %c0_48] : memref<2x256xf32, #tpu.memory_space<vmem>>, vector<2x256xf32>
    tpu.vector_store %arg17[%c0_47, %c0_48], %94 {strides = array<i32>} : memref<2x256xf32, #tpu.memory_space<vmem>>, vector<2x256xf32>,
    %96 = arith.truncf %94 : vector<2x256xf32> to vector<2x256xbf16>
    %c0_49 = arith.constant 0 : index
    %c0_50 = arith.constant 0 : index
    %97 = vector.load %arg15[%c0_49, %c0_50] : memref<256x128xbf16, #tpu.memory_space<vmem>>, vector<256x128xbf16>
    %cst_51 = arith.constant dense<0.000000e+00> : vector<2x128xf32>
    %98 = tpu.matmul %96, %97, %cst_51 {dimension_numbers = #tpu.dot_dimension_numbers<[1], [0], [0], [1], [0, 0, 1, 1], [], []>} : vector<2x256xbf16>, vector<256x128xbf16>, vector<2x128xf32> -> vector<2x128xf32>
    %c0_52 = arith.constant 0 : index
    %c0_53 = arith.constant 0 : index
    %99 = vector.load %arg16[%c0_52, %c0_53] : memref<1x128xf32, #tpu.memory_space<vmem>>, vector<1x128xf32>
    %100 = vector.broadcast %99 : vector<1x128xf32> to vector<2x128xf32>
    %101 = arith.addf %98, %100 : vector<2x128xf32>
    %102 = tpu.iota {dimensions = array<i32: 1>} : vector<2x128xi32>
    %c6_i32 = arith.constant 6 : i32
    %103 = vector.broadcast %c6_i32 : i32 to vector<2x128xi32>
    %104 = arith.cmpi slt, %102, %103 : vector<2x128xi32>
    %cst_54 = arith.constant -1.000000e+30 : f32
    %105 = vector.broadcast %cst_54 : f32 to vector<2x128xf32>
    %106 = arith.select %104, %101, %105 : vector<2x128xi1>, vector<2x128xf32>
    %cst_55 = arith.constant dense<0xFF800000> : vector<2xf32>
    %107 = vector.multi_reduction <maximumf>, %106, %cst_55 [1] : vector<2x128xf32> to vector<2xf32>
    %108 = vector.shape_cast %107 : vector<2xf32> to vector<2x1xf32>
    %109 = vector.broadcast %108 : vector<2x1xf32> to vector<2x128xf32>
    %110 = arith.subf %106, %109 : vector<2x128xf32>
    %111 = math.exp %110 : vector<2x128xf32>
    %cst_56 = arith.constant dense<0.000000e+00> : vector<2xf32>
    %112 = vector.multi_reduction <add>, %111, %cst_56 [1] : vector<2x128xf32> to vector<2xf32>
    %113 = vector.shape_cast %112 : vector<2xf32> to vector<2x1xf32>
    %114 = math.log %113 : vector<2x1xf32>
    %115 = arith.addf %108, %114 : vector<2x1xf32>
    %116 = vector.broadcast %115 : vector<2x1xf32> to vector<2x128xf32>
    %117 = arith.subf %101, %116 : vector<2x128xf32>
    %118 = arith.select %104, %117, %101 : vector<2x128xi1>, vector<2x128xf32>
    %c0_57 = arith.constant 0 : index
    %c0_58 = arith.constant 0 : index
    %119 = vector.load %arg18[%c0_57, %c0_58] : memref<2x128xf32, #tpu.memory_space<vmem>>, vector<2x128xf32>
    tpu.vector_store %arg18[%c0_57, %c0_58], %118 {strides = array<i32>} : memref<2x128xf32, #tpu.memory_space<vmem>>, vector<2x128xf32>,
    return
  }
  func.func @transform_0(%arg0: i32) -> (i32, i32) {
    %c0_i32 = arith.constant 0 : i32
    %c0_i32_0 = arith.constant 0 : i32
    %c0_i32_1 = arith.constant 0 : i32
    return %c0_i32, %c0_i32_0 : i32, i32
  }
  func.func @transform_1(%arg0: i32) -> (i32, i32) {
    %c0_i32 = arith.constant 0 : i32
    %c0_i32_0 = arith.constant 0 : i32
    %c0_i32_1 = arith.constant 0 : i32
    return %c0_i32, %c0_i32_0 : i32, i32
  }
  func.func @transform_2(%arg0: i32) -> (i32, i32) {
    %c0_i32 = arith.constant 0 : i32
    %c0_i32_0 = arith.constant 0 : i32
    %c0_i32_1 = arith.constant 0 : i32
    return %c0_i32, %c0_i32_0 : i32, i32
  }
  func.func @transform_3(%arg0: i32) -> (i32, i32) {
    %c0_i32 = arith.constant 0 : i32
    %c0_i32_0 = arith.constant 0 : i32
    %c0_i32_1 = arith.constant 0 : i32
    return %c0_i32, %c0_i32_0 : i32, i32
  }
  func.func @transform_4(%arg0: i32) -> (i32, i32) {
    %c0_i32 = arith.constant 0 : i32
    %c0_i32_0 = arith.constant 0 : i32
    %c0_i32_1 = arith.constant 0 : i32
    return %c0_i32, %c0_i32_0 : i32, i32
  }
  func.func @transform_5(%arg0: i32) -> (i32, i32) {
    %c0_i32 = arith.constant 0 : i32
    %c0_i32_0 = arith.constant 0 : i32
    %c0_i32_1 = arith.constant 0 : i32
    return %c0_i32, %c0_i32_0 : i32, i32
  }
  func.func @transform_6(%arg0: i32) -> (i32, i32) {
    %c0_i32 = arith.constant 0 : i32
    %c0_i32_0 = arith.constant 0 : i32
    %c0_i32_1 = arith.constant 0 : i32
    return %c0_i32, %c0_i32_0 : i32, i32
  }
  func.func @transform_7(%arg0: i32) -> (i32, i32) {
    %c0_i32 = arith.constant 0 : i32
    %c0_i32_0 = arith.constant 0 : i32
    %c0_i32_1 = arith.constant 0 : i32
    return %c0_i32, %c0_i32_0 : i32, i32
  }
  func.func @transform_8(%arg0: i32) -> (i32, i32) {
    %c0_i32 = arith.constant 0 : i32
    %c0_i32_0 = arith.constant 0 : i32
    %c0_i32_1 = arith.constant 0 : i32
    return %c0_i32, %c0_i32_0 : i32, i32
  }
  func.func @transform_9(%arg0: i32) -> (i32, i32) {
    %c0_i32 = arith.constant 0 : i32
    %c0_i32_0 = arith.constant 0 : i32
    %c0_i32_1 = arith.constant 0 : i32
    return %c0_i32, %c0_i32_0 : i32, i32
  }
  func.func @transform_10(%arg0: i32) -> (i32, i32) {
    %c0_i32 = arith.constant 0 : i32
    %c0_i32_0 = arith.constant 0 : i32
    %c0_i32_1 = arith.constant 0 : i32
    return %c0_i32, %c0_i32_0 : i32, i32
  }
  func.func @transform_11(%arg0: i32) -> (i32, i32) {
    %c0_i32 = arith.constant 0 : i32
    %c0_i32_0 = arith.constant 0 : i32
    %c0_i32_1 = arith.constant 0 : i32
    return %c0_i32, %c0_i32_0 : i32, i32
  }
  func.func @transform_12(%arg0: i32) -> (i32, i32) {
    %c0_i32 = arith.constant 0 : i32
    %c0_i32_0 = arith.constant 0 : i32
    %c0_i32_1 = arith.constant 0 : i32
    return %c0_i32, %c0_i32_0 : i32, i32
  }
  func.func @transform_13(%arg0: i32) -> (i32, i32) {
    %c0_i32 = arith.constant 0 : i32
    %c0_i32_0 = arith.constant 0 : i32
    %c0_i32_1 = arith.constant 0 : i32
    return %c0_i32, %c0_i32_0 : i32, i32
  }
  func.func @transform_14(%arg0: i32) -> (i32, i32) {
    %c0_i32 = arith.constant 0 : i32
    %c0_i32_0 = arith.constant 0 : i32
    %c0_i32_1 = arith.constant 0 : i32
    return %c0_i32, %c0_i32_0 : i32, i32
  }
  func.func @transform_15(%arg0: i32) -> (i32, i32) {
    %c0_i32 = arith.constant 0 : i32
    %c0_i32_0 = arith.constant 0 : i32
    %c0_i32_1 = arith.constant 0 : i32
    return %c0_i32, %c0_i32_0 : i32, i32
  }
  func.func @transform_16(%arg0: i32) -> (i32, i32) {
    %c0_i32 = arith.constant 0 : i32
    %c0_i32_0 = arith.constant 0 : i32
    %c0_i32_1 = arith.constant 0 : i32
    return %c0_i32, %c0_i32_0 : i32, i32
  }
  func.func @transform_17(%arg0: i32) -> (i32, i32) {
    %c0_i32 = arith.constant 0 : i32
    %c0_i32_0 = arith.constant 0 : i32
    %c0_i32_1 = arith.constant 0 : i32
    return %c0_i32, %c0_i32_0 : i32, i32
  }
}

</mosaic_0001>

<bundles_post_ra>
// kernel: forward.1
= control target key start
LH: loop header
LB: loop body
LE: loop exit
PB: predicated region body
PF: predicated region fallthrough
CT: control target
= control target key end

     0   :  { %s17334_s0 = inlined_call_operand.vmem [shape: bf16[2,1024], index: 0, kind: input, shape index: {}]   ;;  %s17335_s1 = inlined_call_operand.hbm [shape: f32[2,256], index: 1, kind: input, shape index: {}, may-alias: {1,16}]   ;;  %s17336_s2 = inlined_call_operand.hbm [shape: bf16[1024,2048], index: 2, kind: input, shape index: {}]   ;;  %s17337_s3 = inlined_call_operand.hbm [shape: f32[1,2048], index: 3, kind: input, shape index: {}]   ;;  %s17338_s4 = inlined_call_operand.hbm [shape: bf16[2048,512], index: 4, kind: input, shape index: {}]   ;;  %s17339_s5 = inlined_call_operand.hbm [shape: f32[1,512], index: 5, kind: input, shape index: {}]   ;;  %s17340_s6 = inlined_call_operand.hbm [shape: bf16[512,128], index: 6, kind: input, shape index: {}]   ;;  %s17341_s7 = inlined_call_operand.hbm [shape: f32[1,128], index: 7, kind: input, shape index: {}]   ;;  %s17342_s8 = inlined_call_operand.vmem [shape: bf16[128,32], index: 8, kind: input, shape index: {}]   ;;  %s17343_s9 = inlined_call_operand.hbm [shape: f32[1,32], index: 9, kind: input, shape index: {}]   ;;  %s17344_s10 = inlined_call_operand.hbm [shape: bf16[32,768], index: 10, kind: input, shape index: {}]   ;;  %s17345_s11 = inlined_call_operand.hbm [shape: bf16[256,768], index: 11, kind: input, shape index: {}]   ;;  %s17346_s12 = inlined_call_operand.hbm [shape: f32[1,768], index: 12, kind: input, shape index: {}]   ;;  %s17347_s13 = inlined_call_operand.hbm [shape: f32[1,768], index: 13, kind: input, shape index: {}]   ;;  %s17348_s14 = inlined_call_operand.hbm [shape: bf16[256,128], index: 14, kind: input, shape index: {}]   ;;  %s17349_s15 = inlined_call_operand.hbm [shape: f32[1,128], index: 15, kind: input, shape index: {}]   ;;  %s17350_s16 = inlined_call_operand.hbm [shape: f32[2,256], index: 16, kind: output, shape index: {0}, may-alias: {1,16}]   ;;  %s17351_s17 = inlined_call_operand.vmem [shape: f32[2,128], index: 17, kind: output, shape index: {1}]  }
   0x1   :  { %17352 = sst [smem:[#allocation35_spill]] %s17334_s0 }
   0x2   :  { %17353 = sst [smem:[#allocation36_spill]] %s17335_s1 }
   0x3   :  { %23 = vsyncpa [#allocation3], 0 }
   0x4   :  { %24 = vsyncpa [#allocation6], 0 }
   0x5   :  { %25 = vsyncpa [#allocation9], 0 }
   0x6   :  { %26 = vsyncpa [#allocation12], 0 }
   0x7   :  { %27 = vsyncpa [#allocation15], 0 }
   0x8   :  { %28 = vsyncpa [#allocation18], 0 }
   0x9   :  { %29 = vsyncpa [#allocation21], 0 }
   0xa   :  { %30 = vsyncpa [#allocation24], 0 }
   0xb   :  { %31 = vsyncpa [#allocation4], 0  ;;  %s16673_s24 = smov [#allocation5]  }
   0xc   :  { %s49_s25 = sshll.u32 %s16673_s24, 4  ;;  %s50_s25 = int_to_ptr.vmem [resolvable:$true] %s49_s25 }
   0xd   :  { %s16363_s26 = scalar_lea.vmem %s50_s25, 131072  ;;  %p16368_p1 = scmp.lt.s32.totalorder %s50_s25, %s50_s25 }
   0xe   :  { %p16364_p0 = scmp.ne.s32.totalorder %s50_s25, %s16363_s26  ;;  %p16369_p2 = scmp.lt.s32.totalorder %s16363_s26, %s16363_s26 }
  0x10   :  { %p16370_p3 = por %p16369_p2, %p16368_p1 }
  0x12   :  { %p16371_p4 = pnand %p16370_p3, %p16364_p0 }
  0x14   :  { %16374 = shalt.err (!%p16371_p4)
}
  0x15   :  { %s16674_s27 = smov 1024   ;;  %s16675_s28 = smov 64  }
  0x16   :  { %55 = dma.hbm_to_vmem [thread:$0]  %s17336_s2, 131072, %s50_s25, [#allocation6], %s16674_s27, %s16674_s27, %s16675_s28  }
  0x17   :  { %s16676_s30 = smov [#allocation8]  }
  0x18   :  { %s71_s18 = sshll.u32 %s16676_s30, 4  ;;  %s72_s18 = int_to_ptr.vmem [resolvable:$true] %s71_s18 }
  0x19   :  { %s16383_s19 = scalar_lea.vmem %s72_s18, 65536  ;;  %p16388_p6 = scmp.lt.s32.totalorder %s72_s18, %s72_s18 }
  0x1a   :  { %p16384_p5 = scmp.ne.s32.totalorder %s72_s18, %s16383_s19  ;;  %p16389_p7 = scmp.lt.s32.totalorder %s16383_s19, %s16383_s19 }
  0x1c   :  { %p16390_p8 = por %p16389_p7, %p16388_p6 }
  0x1e   :  { %p16391_p9 = pnand %p16390_p8, %p16384_p5 }
  0x20   :  { %16394 = shalt.err (!%p16391_p9)
}
  0x21   :  { %s16677_s1 = smov 256   ;;  %s16678_s20 = smov 16  }
  0x22   :  { %77 = dma.hbm_to_vmem [thread:$0]  %s17338_s4, 65536, %s72_s18, [#allocation9], %s16677_s1, %s16677_s1, %s16678_s20  }
  0x23   :  { %s16679_s23 = smov [#allocation11]   ;;  %s16680_s2 = smov [#allocation14]  }
  0x24   :  { %s93_s24 = sshll.u32 %s16679_s23, 4  ;;  %s118_s25 = sshll.u32 %s16680_s2, 4  ;;  %s94_s24 = int_to_ptr.vmem [resolvable:$true] %s93_s24  ;;  %s119_s25 = int_to_ptr.vmem [resolvable:$true] %s118_s25 }
  0x25   :  { %s16403_s26 = scalar_lea.vmem %s94_s24, 4096  ;;  %p16408_p11 = scmp.lt.s32.totalorder %s94_s24, %s94_s24 }
  0x26   :  { %p16404_p10 = scmp.ne.s32.totalorder %s94_s24, %s16403_s26  ;;  %p16409_p12 = scmp.lt.s32.totalorder %s16403_s26, %s16403_s26 }
  0x28   :  { %p16410_p13 = por %p16409_p12, %p16408_p11 }
  0x2a   :  { %p16411_p0 = pnand %p16410_p13, %p16404_p10 }
  0x2c   :  { %16414 = shalt.err (!%p16411_p0)
}
  0x2d   :  { %s16681_s27 = smov 4   ;;  %s16423_s4 = scalar_lea.vmem %s119_s25, 16 }
  0x2e   :  { %99 = dma.hbm_to_vmem [thread:$0]  %s17340_s6, 4096, %s94_s24, [#allocation12], %s16675_s28, %s16675_s28, %s16681_s27  }
  0x2f   :  { %p16424_p1 = scmp.ne.s32.totalorder %s119_s25, %s16423_s4  ;;  %s16427_s30 = scalar_lea.vmem %s119_s25, 32 }
  0x30   :  { %p16428_p2 = scmp.lt.s32.totalorder %s119_s25, %s119_s25  ;;  %p16429_p3 = scmp.lt.s32.totalorder %s16427_s30, %s16423_s4 }
  0x32   :  { %p16430_p4 = por %p16429_p3, %p16428_p2 }
  0x34   :  { %p16431_p5 = pnand %p16430_p4, %p16424_p1 }
  0x36   :  { %16434 = shalt.err (!%p16431_p5)
}
  0x37   :  { %121 = dma.hbm_to_vmem [thread:$0]  %s17343_s9, 16, %s119_s25, [#allocation15]  }
  0x38   :  { %s16682_s1 = smov [#allocation17]   ;;  %s16683_s21 = smov [#allocation20]  }
  0x39   :  { %s139_s20 = sshll.u32 %s16682_s1, 4  ;;  %s162_s22 = sshll.u32 %s16683_s21, 4  ;;  %s140_s20 = int_to_ptr.vmem [resolvable:$true] %s139_s20  ;;  %s163_s22 = int_to_ptr.vmem [resolvable:$true] %s162_s22 }
  0x3a   :  { %s16443_s23 = scalar_lea.vmem %s140_s20, 12288  ;;  %p16448_p7 = scmp.lt.s32.totalorder %s140_s20, %s140_s20 }
  0x3b   :  { %p16444_p6 = scmp.ne.s32.totalorder %s140_s20, %s16443_s23  ;;  %p16449_p8 = scmp.lt.s32.totalorder %s16443_s23, %s16443_s23 }
  0x3d   :  { %p16450_p9 = por %p16449_p8, %p16448_p7 }
  0x3f   :  { %p16451_p10 = pnand %p16450_p9, %p16444_p6 }
  0x41   :  { %16454 = shalt.err (!%p16451_p10)
}
  0x42   :  { %s16684_s6 = smov 384   ;;  %s16685_s24 = smov 24  }
  0x43   :  { %145 = dma.hbm_to_vmem [thread:$0]  %s17345_s11, 12288, %s140_s20, [#allocation18], %s16684_s6, %s16684_s6, %s16685_s24  }
  0x44   :  { %s16463_s9 = scalar_lea.vmem %s163_s22, 96  ;;  %p16468_p12 = scmp.lt.s32.totalorder %s163_s22, %s163_s22 }
  0x45   :  { %p16464_p11 = scmp.ne.s32.totalorder %s163_s22, %s16463_s9  ;;  %p16469_p13 = scmp.lt.s32.totalorder %s16463_s9, %s16463_s9 }
  0x47   :  { %p16470_p0 = por %p16469_p13, %p16468_p12 }
  0x49   :  { %p16471_p1 = pnand %p16470_p0, %p16464_p11 }
  0x4b   :  { %16474 = shalt.err (!%p16471_p1)
}
  0x4c   :  { %165 = dma.hbm_to_vmem [thread:$0]  %s17347_s13, 96, %s163_s22, [#allocation21]  }
  0x4d   :  { %s16686_s0 = smov [#allocation2]   ;;  %s16687_s30 = smov [#allocation7]  }
  0x4e   :  { %s40_s4 = sshll.u32 %s16686_s0, 4  ;;  %s62_s18 = sshll.u32 %s16687_s30, 4  ;;  %s41_s4 = int_to_ptr.vmem [resolvable:$true] %s40_s4  ;;  %s63_s18 = int_to_ptr.vmem [resolvable:$true] %s62_s18 }
  0x4f   :  { %s16483_s19 = scalar_lea.vmem %s41_s4, 64  ;;  %p16488_p3 = scmp.lt.s32.totalorder %s41_s4, %s41_s4 }
  0x50   :  { %p16484_p2 = scmp.ne.s32.totalorder %s41_s4, %s16483_s19  ;;  %p16489_p4 = scmp.lt.s32.totalorder %s16483_s19, %s16483_s19 }
  0x52   :  { %p16490_p5 = por %p16489_p4, %p16488_p3 }
  0x54   :  { %p16491_p6 = pnand %p16490_p5, %p16484_p2 }
  0x56   :  { %16494 = shalt.err (!%p16491_p6)
}
  0x57   :  { %s17354_s20 = sld [smem:[#allocation36_spill]]  ;;  %s16503_s21 = scalar_lea.vmem %s63_s18, 256 }
  0x58   :  { %p16504_p7 = scmp.ne.s32.totalorder %s63_s18, %s16503_s21  ;;  %p16508_p8 = scmp.lt.s32.totalorder %s63_s18, %s63_s18 }
  0x59   :  { %p16509_p9 = scmp.lt.s32.totalorder %s16503_s21, %s16503_s21 }
  0x5b   :  { %p16510_p10 = por %p16509_p9, %p16508_p8 }
  0x5d   :  { %43 = dma.hbm_to_vmem [thread:$0]  %s17354_s20, 64, %s41_s4, [#allocation3]  }
  0x5e   :  { %p16511_p11 = pnand %p16510_p10, %p16504_p7 }
  0x60   :  { %16514 = shalt.err (!%p16511_p11)
}
  0x61   :  { %65 = dma.hbm_to_vmem [thread:$0]  %s17337_s3, 256, %s63_s18, [#allocation6]  }
  0x62   :  { %s16688_s23 = smov [#allocation10]   ;;  %s16689_s26 = smov [#allocation13]  }
  0x63   :  { %s84_s2 = sshll.u32 %s16688_s23, 4  ;;  %s106_s9 = sshll.u32 %s16689_s26, 4  ;;  %s85_s2 = int_to_ptr.vmem [resolvable:$true] %s84_s2  ;;  %s107_s9 = int_to_ptr.vmem [resolvable:$true] %s106_s9 }
  0x64   :  { %s16523_s25 = scalar_lea.vmem %s85_s2, 64  ;;  %p16528_p13 = scmp.lt.s32.totalorder %s85_s2, %s85_s2 }
  0x65   :  { %p16524_p12 = scmp.ne.s32.totalorder %s85_s2, %s16523_s25  ;;  %p16529_p0 = scmp.lt.s32.totalorder %s16523_s25, %s16523_s25 }
  0x67   :  { %p16530_p1 = por %p16529_p0, %p16528_p13 }
  0x69   :  { %p16531_p2 = pnand %p16530_p1, %p16524_p12 }
  0x6b   :  { %16534 = shalt.err (!%p16531_p2)
}
  0x6c   :  { %87 = dma.hbm_to_vmem [thread:$0]  %s17339_s5, 64, %s85_s2, [#allocation9]  }
  0x6d   :  { %s16543_s4 = scalar_lea.vmem %s107_s9, 16  ;;  %s16547_s3 = scalar_lea.vmem %s107_s9, 32 }
  0x6e   :  { %p16544_p3 = scmp.ne.s32.totalorder %s107_s9, %s16543_s4  ;;  %p16548_p4 = scmp.lt.s32.totalorder %s107_s9, %s107_s9 }
  0x6f   :  { %p16549_p5 = scmp.lt.s32.totalorder %s16547_s3, %s16543_s4 }
  0x71   :  { %p16550_p6 = por %p16549_p5, %p16548_p4 }
  0x73   :  { %p16551_p7 = pnand %p16550_p6, %p16544_p3 }
  0x75   :  { %16554 = shalt.err (!%p16551_p7)
}
  0x76   :  { %109 = dma.hbm_to_vmem [thread:$0]  %s17341_s7, 16, %s107_s9, [#allocation12]  }
  0x77   :  { %s16690_s19 = smov [#allocation16]   ;;  %s16691_s1 = smov [#allocation19]  }
  0x78   :  { %s127_s11 = sshll.u32 %s16690_s19, 4  ;;  %s152_s20 = sshll.u32 %s16691_s1, 4  ;;  %s128_s11 = int_to_ptr.vmem [resolvable:$true] %s127_s11  ;;  %s153_s20 = int_to_ptr.vmem [resolvable:$true] %s152_s20 }
  0x79   :  { %s16563_s21 = scalar_lea.vmem %s128_s11, 1536  ;;  %p16568_p9 = scmp.lt.s32.totalorder %s128_s11, %s128_s11 }
  0x7a   :  { %p16564_p8 = scmp.ne.s32.totalorder %s128_s11, %s16563_s21  ;;  %p16569_p10 = scmp.lt.s32.totalorder %s16563_s21, %s16563_s21 }
  0x7c   :  { %p16570_p11 = por %p16569_p10, %p16568_p9 }
  0x7e   :  { %p16571_p12 = pnand %p16570_p11, %p16564_p8 }
  0x80   :  { %16574 = shalt.err (!%p16571_p12)
}
  0x81   :  { %133 = dma.hbm_to_vmem [thread:$0]  %s17344_s10, 1536, %s128_s11, [#allocation15], %s16684_s6, %s16684_s6, %s16685_s24  }
  0x82   :  { %s16583_s7 = scalar_lea.vmem %s153_s20, 96  ;;  %p16588_p0 = scmp.lt.s32.totalorder %s153_s20, %s153_s20 }
  0x83   :  { %p16584_p13 = scmp.ne.s32.totalorder %s153_s20, %s16583_s7  ;;  %p16589_p1 = scmp.lt.s32.totalorder %s16583_s7, %s16583_s7 }
  0x85   :  { %p16590_p2 = por %p16589_p1, %p16588_p0 }
  0x87   :  { %p16591_p3 = pnand %p16590_p2, %p16584_p13 }
  0x89   :  { %16594 = shalt.err (!%p16591_p3)
}
  0x8a   :  { %155 = dma.hbm_to_vmem [thread:$0]  %s17346_s12, 96, %s153_s20, [#allocation18]  }
  0x8b   :  { %s16692_s2 = smov [#allocation22]   ;;  %s16693_s9 = smov [#allocation23]  }
  0x8c   :  { %s171_s26 = sshll.u32 %s16692_s2, 4  ;;  %s184_s25 = sshll.u32 %s16693_s9, 4  ;;  %s172_s26 = int_to_ptr.vmem [resolvable:$true] %s171_s26  ;;  %s185_s25 = int_to_ptr.vmem [resolvable:$true] %s184_s25 }
  0x8d   :  { %s16603_s29 = scalar_lea.vmem %s172_s26, 2048  ;;  %p16608_p5 = scmp.lt.s32.totalorder %s172_s26, %s172_s26 }
  0x8e   :  { %p16604_p4 = scmp.ne.s32.totalorder %s172_s26, %s16603_s29  ;;  %p16609_p6 = scmp.lt.s32.totalorder %s16603_s29, %s16603_s29 }
  0x90   :  { %p16610_p7 = por %p16609_p6, %p16608_p5 }
  0x92   :  { %p16611_p8 = pnand %p16610_p7, %p16604_p4 }
  0x94   :  { %16614 = shalt.err (!%p16611_p8)
}
  0x95   :  { %177 = dma.hbm_to_vmem [thread:$0]  %s17348_s14, 2048, %s172_s26, [#allocation21], %s16675_s28, %s16675_s28, %s16681_s27  }
  0x96   :  { %s16623_s12 = scalar_lea.vmem %s185_s25, 16  ;;  %s16627_s24 = scalar_lea.vmem %s185_s25, 32 }
  0x97   :  { %p16624_p9 = scmp.ne.s32.totalorder %s185_s25, %s16623_s12  ;;  %p16628_p10 = scmp.lt.s32.totalorder %s185_s25, %s185_s25 }
  0x98   :  { %p16629_p11 = scmp.lt.s32.totalorder %s16627_s24, %s16623_s12 }
  0x9a   :  { %p16630_p12 = por %p16629_p11, %p16628_p10 }
  0x9c   :  { %p16631_p13 = pnand %p16630_p12, %p16624_p9 }
  0x9e   :  { %16634 = shalt.err (!%p16631_p13)
}
  0x9f   :  { %187 = dma.hbm_to_vmem [thread:$0]  %s17349_s15, 16, %s185_s25, [#allocation24]  }
  0xa0   :  { %16655 = dma.done.wait [#allocation3], 64  }
  0xa1   :  { %16656 = vsyncadd [#allocation3], 4294967232 }
  0xa2   :  { %16657 = dma.done.wait [#allocation6], 131328  }
  0xa3   :  { %16658 = vsyncadd [#allocation6], 4294835968 }
  0xa4   :  { %16659 = dma.done.wait [#allocation9], 65600  }
  0xa5   :  { %16660 = vsyncadd [#allocation9], 4294901696 }
  0xa6   :  { %16661 = dma.done.wait [#allocation12], 4112  }
  0xa7   :  { %16662 = vsyncadd [#allocation12], 4294963184 }
  0xa8   :  { %16663 = dma.done.wait [#allocation15], 1552  }
  0xa9   :  { %16664 = vsyncadd [#allocation15], 4294965744 }
  0xaa   :  { %16665 = dma.done.wait [#allocation18], 12384  }
  0xab   :  { %16666 = vsyncadd [#allocation18], 4294954912 }
  0xac   :  { %16667 = dma.done.wait [#allocation21], 2144  }
  0xad   :  { %16668 = vsyncadd [#allocation21], 4294965152 }
  0xae   :  { %16669 = dma.done.wait [#allocation24], 16  }
  0xaf   :  { %16670 = vsyncadd [#allocation24], 4294967280  ;;  %v344_v0 = vld [vmem:[#allocation5 + $0x380] sm:$0xff]  ;;  %v1260_v32 = vlaneseq  ;;  %v16694_v33 = vmov 1966171168   ;;  %s17355_s28 = sld [smem:[#allocation35_spill]] }
  0xb0   :  { %v352_v1 = vld [vmem:[#allocation5 + $0x3c0] sm:$0xff]  ;;  %v1343_v34 = vunpack.c.l.s4 %v16694_v33 }
  0xb1   :  { %v600_v2 = vld [vmem:[#allocation5 + $0xb80] sm:$0xff]  ;;  %v13554_v3 = vcombine.high %v344_v0, %v352_v1  ;;  %v13553_v5 = vcombine.low %v344_v0, %v352_v1  ;;  %v16845_v43 = vshrl.u32 %v1260_v32, 7 }
  0xb2   :  { %v608_v4 = vld [vmem:[#allocation5 + $0xbc0] sm:$0xff]  ;;  %v1344_v44 = vunpack.c.0.s8 %v1343_v34 }
  0xb3   :  { %v328_v6 = vld [vmem:[#allocation5 + $0x300] sm:$0xff]  ;;  %v13810_v8 = vcombine.high %v600_v2, %v608_v4  ;;  %v13809_v9 = vcombine.low %v600_v2, %v608_v4  ;;  %6518 = vmatprep.subr.bf16.mxu0 %v13554_v3 }
  0xb4   :  { %v336_v7 = vld [vmem:[#allocation5 + $0x340] sm:$0xff]  ;;  %6519 = vmatpush1.bf16.msra.mxu0 %v13553_v5  ;;  %v16848_v53 = vsub.s32 %v1344_v44, %v16845_v43 }
  0xb5   :  { %v13538_v10 = vcombine.high %v328_v6, %v336_v7  ;;  %v584_v11 = vld [vmem:[#allocation5 + $0xb00] sm:$0xff]  ;;  %6559 = vmatprep.subr.bf16.mxu1 %v13810_v8  ;;  %v13537_v18 = vcombine.low %v328_v6, %v336_v7 }
  0xb6   :  { %v592_v12 = vld [vmem:[#allocation5 + $0xb40] sm:$0xff]  ;;  %6560 = vmatpush1.bf16.msra.mxu1 %v13809_v9 }
  0xb7   :  { %v312_v13 = vld [vmem:[#allocation5 + $0x280] sm:$0xff]  ;;  %v13794_v14 = vcombine.high %v584_v11, %v592_v12  ;;  %6520 = vmatprep.subr.bf16.mxu0 %v13538_v10  ;;  %v13793_v19 = vcombine.low %v584_v11, %v592_v12 }
  0xb8   :  { %v320_v15 = vld [vmem:[#allocation5 + $0x2c0] sm:$0xff]  ;;  %6521 = vmatpush1.bf16.msra.mxu0 %v13537_v18 }
  0xb9   :  { %v568_v16 = vld [vmem:[#allocation5 + $0xa80] sm:$0xff]  ;;  %v13522_v20 = vcombine.high %v312_v13, %v320_v15  ;;  %6561 = vmatprep.subr.bf16.mxu1 %v13794_v14  ;;  %v13521_v26 = vcombine.low %v312_v13, %v320_v15 }
  0xba   :  { %v576_v17 = vld [vmem:[#allocation5 + $0xac0] sm:$0xff]  ;;  %6562 = vmatpush1.bf16.msra.mxu1 %v13793_v19 }
  0xbb   :  { %v13778_v21 = vcombine.high %v568_v16, %v576_v17  ;;  %v296_v22 = vld [vmem:[#allocation5 + $0x200] sm:$0xff]  ;;  %6522 = vmatprep.subr.bf16.mxu0 %v13522_v20  ;;  %v13777_v27 = vcombine.low %v568_v16, %v576_v17 }
  0xbc   :  { %v304_v23 = vld [vmem:[#allocation5 + $0x240] sm:$0xff]  ;;  %6523 = vmatpush1.bf16.msra.mxu0 %v13521_v26 }
  0xbd   :  { %v552_v24 = vld [vmem:[#allocation5 + $0xa00] sm:$0xff]  ;;  %v13506_v28 = vcombine.high %v296_v22, %v304_v23  ;;  %6563 = vmatprep.subr.bf16.mxu1 %v13778_v21  ;;  %v13505_v37 = vcombine.low %v296_v22, %v304_v23 }
  0xbe   :  { %v560_v25 = vld [vmem:[#allocation5 + $0xa40] sm:$0xff]  ;;  %6564 = vmatpush1.bf16.msra.mxu1 %v13777_v27 }
  0xbf   :  { %v13762_v29 = vcombine.high %v552_v24, %v560_v25  ;;  %v280_v30 = vld [vmem:[#allocation5 + $0x180] sm:$0xff]  ;;  %6524 = vmatprep.subr.bf16.mxu0 %v13506_v28  ;;  %v13761_v38 = vcombine.low %v552_v24, %v560_v25 }
  0xc0   :  { %v288_v31 = vld [vmem:[#allocation5 + $0x1c0] sm:$0xff]  ;;  %6525 = vmatpush1.bf16.msra.mxu0 %v13505_v37 }
  0xc1   :  { %v536_v35 = vld [vmem:[#allocation5 + $0x980] sm:$0xff]  ;;  %v13490_v39 = vcombine.high %v280_v30, %v288_v31  ;;  %6565 = vmatprep.subr.bf16.mxu1 %v13762_v29  ;;  %v13489_v47 = vcombine.low %v280_v30, %v288_v31 }
  0xc2   :  { %v544_v36 = vld [vmem:[#allocation5 + $0x9c0] sm:$0xff]  ;;  %6566 = vmatpush1.bf16.msra.mxu1 %v13761_v38 }
  0xc3   :  { %v13746_v40 = vcombine.high %v536_v35, %v544_v36  ;;  %v264_v41 = vld [vmem:[#allocation5 + $0x100] sm:$0xff]  ;;  %6526 = vmatprep.subr.bf16.mxu0 %v13490_v39  ;;  %v13745_v48 = vcombine.low %v536_v35, %v544_v36 }
  0xc4   :  { %v272_v42 = vld [vmem:[#allocation5 + $0x140] sm:$0xff]  ;;  %6527 = vmatpush1.bf16.msra.mxu0 %v13489_v47 }
  0xc5   :  { %v520_v45 = vld [vmem:[#allocation5 + $0x900] sm:$0xff]  ;;  %v13474_v49 = vcombine.high %v264_v41, %v272_v42  ;;  %6567 = vmatprep.subr.bf16.mxu1 %v13746_v40  ;;  %v13473_v56 = vcombine.low %v264_v41, %v272_v42 }
  0xc6   :  { %v528_v46 = vld [vmem:[#allocation5 + $0x940] sm:$0xff]  ;;  %6568 = vmatpush1.bf16.msra.mxu1 %v13745_v48 }
  0xc7   :  { %v13730_v50 = vcombine.high %v520_v45, %v528_v46  ;;  %v248_v51 = vld [vmem:[#allocation5 + $0x80] sm:$0xff]  ;;  %6528 = vmatprep.subr.bf16.mxu0 %v13474_v49  ;;  %v13729_v57 = vcombine.low %v520_v45, %v528_v46 }
  0xc8   :  { %v256_v52 = vld [vmem:[#allocation5 + $0xc0] sm:$0xff]  ;;  %6529 = vmatpush1.bf16.msra.mxu0 %v13473_v56 }
  0xc9   :  { %v504_v54 = vld [vmem:[#allocation5 + $0x880] sm:$0xff]  ;;  %v13458_v58 = vcombine.high %v248_v51, %v256_v52  ;;  %6569 = vmatprep.subr.bf16.mxu1 %v13730_v50  ;;  %v13457_v2 = vcombine.low %v248_v51, %v256_v52 }
  0xca   :  { %v512_v55 = vld [vmem:[#allocation5 + $0x8c0] sm:$0xff]  ;;  %6570 = vmatpush1.bf16.msra.mxu1 %v13729_v57 }
  0xcb   :  { %v231_v59 = vld [vmem:[%s17355_s28] sm:$0xff]  ;;  %v13714_v60 = vcombine.high %v504_v54, %v512_v55  ;;  %6530 = vmatprep.subr.bf16.mxu0 %v13458_v58  ;;  %v13713_v4 = vcombine.low %v504_v54, %v512_v55 }
  0xcc   :  { %v232_v61 = vld [vmem:[#allocation5] sm:$0xff]  ;;  %v16854_v63 = vrot.slane %v231_v59, %v16848_v53  ;;  %6531 = vmatpush1.bf16.msra.mxu0 %v13457_v2  ;;  %v1341_v19 = vcombine.high %v231_v59, %v231_v59 }
  0xcd   :  { %v240_v62 = vld [vmem:[#allocation5 + $0x40] sm:$0xff]  ;;  %6571 = vmatprep.subr.bf16.mxu1 %v13714_v60 }
  0xce   :  { %v488_v0 = vld [vmem:[#allocation5 + $0x800] sm:$0xff]  ;;  %v1356_v3 = vcombine.high %v16854_v63, %v16854_v63  ;;  %v13442_v5 = vcombine.high %v232_v61, %v240_v62  ;;  %v13441_v12 = vcombine.low %v232_v61, %v240_v62  ;;  %6572 = vmatpush1.bf16.msra.mxu1 %v13713_v4  ;;  %v16868_v28 = vrot.slane %v1341_v19, %v16848_v53 }
  0xcf   :  { %v496_v1 = vld [vmem:[#allocation5 + $0x840] sm:$0xff] }
  0xd0   :  { %v13698_v6 = vcombine.high %v488_v0, %v496_v1  ;;  %v472_v7 = vld [vmem:[#allocation5 + $0x780] sm:$0xff]  ;;  %v16859_v9 = vrot.slane %v1356_v3, %v16848_v53  ;;  %6532 = vmatprep.subr.bf16.mxu0 %v13442_v5  ;;  %v13697_v14 = vcombine.low %v488_v0, %v496_v1  ;;  %v16872_v33 = vrot.slane %v16868_v28, %v16848_v53 }
  0xd1   :  { %v480_v8 = vld [vmem:[#allocation5 + $0x7c0] sm:$0xff]  ;;  %6533 = vmatpush1.bf16.msra.mxu0 %v13441_v12 }
  0xd2   :  { %v728_v10 = vld [vmem:[#allocation5 + $0xf80] sm:$0xff]  ;;  %6550 = vmatprep.mubr.bf16.mxu0 %v16859_v9  ;;  %v16864_v13 = vcombine.high %v16859_v9, %v16859_v9  ;;  %v13682_v15 = vcombine.high %v472_v7, %v480_v8  ;;  %6573 = vmatprep.subr.bf16.mxu1 %v13698_v6  ;;  %v13681_v22 = vcombine.low %v472_v7, %v480_v8 }
  0xd3   :  { %v736_v11 = vld [vmem:[#allocation5 + $0xfc0] sm:$0xff]  ;;  %6574 = vmatpush1.bf16.msra.mxu1 %v13697_v14 }
  0xd4   :  { %v13938_v16 = vcombine.high %v728_v10, %v736_v11  ;;  %v456_v17 = vld [vmem:[#allocation5 + $0x700] sm:$0xff]  ;;  %6591 = vmatprep.mubr.bf16.mxu1 %v16864_v13  ;;  %6534 = vmatprep.subr.bf16.mxu0 %v13682_v15  ;;  %v13937_v23 = vcombine.low %v728_v10, %v736_v11 }
  0xd5   :  { %v464_v18 = vld [vmem:[#allocation5 + $0x740] sm:$0xff]  ;;  %6535 = vmatpush2.bf16.msra.mxu0 %v13681_v22  ;;  %v1357_v22 = vcombine.high %v16868_v28, %v16868_v28 }
  0xd6   :  { %v712_v20 = vld [vmem:[#allocation5 + $0xf00] sm:$0xff]  ;;  %v13666_v24 = vcombine.high %v456_v17, %v464_v18  ;;  %6575 = vmatprep.subr.bf16.mxu1 %v13938_v16  ;;  %v13665_v31 = vcombine.low %v456_v17, %v464_v18 }
  0xd7   :  { %v720_v21 = vld [vmem:[#allocation5 + $0xf40] sm:$0xff]  ;;  %6576 = vmatpush2.bf16.msra.mxu1 %v13937_v23 }
  0xd8   :  { %v13922_v25 = vcombine.high %v712_v20, %v720_v21  ;;  %v440_v26 = vld [vmem:[#allocation5 + $0x680] sm:$0xff]  ;;  %6536 = vmatprep.subr.bf16.mxu0 %v13666_v24  ;;  %v13921_v34 = vcombine.low %v712_v20, %v720_v21  ;;  %v16878_v24 = vrot.slane %v16854_v63, %v16848_v53 }
  0xd9   :  { %v448_v27 = vld [vmem:[#allocation5 + $0x6c0] sm:$0xff]  ;;  %6537 = vmatpush2.bf16.msra.mxu0 %v13665_v31 }
  0xda   :  { %v696_v29 = vld [vmem:[#allocation5 + $0xe80] sm:$0xff]  ;;  %v13650_v35 = vcombine.high %v440_v26, %v448_v27  ;;  %6577 = vmatprep.subr.bf16.mxu1 %v13922_v25  ;;  %v13649_v41 = vcombine.low %v440_v26, %v448_v27  ;;  %v16885_v28 = vcombine.high %v16878_v24, %v16878_v24 }
  0xdb   :  { %v704_v30 = vld [vmem:[#allocation5 + $0xec0] sm:$0xff]  ;;  %6578 = vmatpush2.bf16.msra.mxu1 %v13921_v34 }
  0xdc   :  { %v13906_v36 = vcombine.high %v696_v29, %v704_v30  ;;  %v424_v37 = vld [vmem:[#allocation5 + $0x600] sm:$0xff]  ;;  %6538 = vmatprep.subr.bf16.mxu0 %v13650_v35  ;;  %v13905_v42 = vcombine.low %v696_v29, %v704_v30  ;;  %v16881_v35 = vrot.slane %v1357_v22, %v16848_v53 }
  0xdd   :  { %v432_v38 = vld [vmem:[#allocation5 + $0x640] sm:$0xff]  ;;  %6539 = vmatpush2.bf16.msra.mxu0 %v13649_v41 }
  0xde   :  { %v680_v39 = vld [vmem:[#allocation5 + $0xe00] sm:$0xff]  ;;  %v13634_v44 = vcombine.high %v424_v37, %v432_v38  ;;  %6579 = vmatprep.subr.bf16.mxu1 %v13906_v36  ;;  %v13633_v50 = vcombine.low %v424_v37, %v432_v38  ;;  %v16890_v53 = vcombine.high %v16881_v35, %v16881_v35 }
  0xdf   :  { %v688_v40 = vld [vmem:[#allocation5 + $0xe40] sm:$0xff]  ;;  %6580 = vmatpush2.bf16.msra.mxu1 %v13905_v42 }
  0xe0   :  { %v13890_v45 = vcombine.high %v680_v39, %v688_v40  ;;  %v408_v46 = vld [vmem:[#allocation5 + $0x580] sm:$0xff]  ;;  %6540 = vmatprep.subr.bf16.mxu0 %v13634_v44  ;;  %v13889_v51 = vcombine.low %v680_v39, %v688_v40 }
  0xe1   :  { %v416_v47 = vld [vmem:[#allocation5 + $0x5c0] sm:$0xff]  ;;  %6541 = vmatpush2.bf16.msra.mxu0 %v13633_v50 }
  0xe2   :  { %v664_v48 = vld [vmem:[#allocation5 + $0xd80] sm:$0xff]  ;;  %v13618_v52 = vcombine.high %v408_v46, %v416_v47  ;;  %6581 = vmatprep.subr.bf16.mxu1 %v13890_v45  ;;  %v13617_v59 = vcombine.low %v408_v46, %v416_v47 }
  0xe3   :  { %v672_v49 = vld [vmem:[#allocation5 + $0xdc0] sm:$0xff]  ;;  %6582 = vmatpush2.bf16.msra.mxu1 %v13889_v51 }
  0xe4   :  { %v13874_v54 = vcombine.high %v664_v48, %v672_v49  ;;  %v392_v55 = vld [vmem:[#allocation5 + $0x500] sm:$0xff]  ;;  %6542 = vmatprep.subr.bf16.mxu0 %v13618_v52  ;;  %v13873_v60 = vcombine.low %v664_v48, %v672_v49 }
  0xe5   :  { %v400_v56 = vld [vmem:[#allocation5 + $0x540] sm:$0xff]  ;;  %6543 = vmatpush2.bf16.msra.mxu0 %v13617_v59 }
  0xe6   :  { %v648_v57 = vld [vmem:[#allocation5 + $0xd00] sm:$0xff]  ;;  %v13602_v61 = vcombine.high %v392_v55, %v400_v56  ;;  %6583 = vmatprep.subr.bf16.mxu1 %v13874_v54  ;;  %v13601_v4 = vcombine.low %v392_v55, %v400_v56 }
  0xe7   :  { %v656_v58 = vld [vmem:[#allocation5 + $0xd40] sm:$0xff]  ;;  %6584 = vmatpush2.bf16.msra.mxu1 %v13873_v60 }
  0xe8   :  { %v13858_v62 = vcombine.high %v648_v57, %v656_v58  ;;  %v376_v0 = vld [vmem:[#allocation5 + $0x480] sm:$0xff]  ;;  %6544 = vmatprep.subr.bf16.mxu0 %v13602_v61  ;;  %v13857_v5 = vcombine.low %v648_v57, %v656_v58 }
  0xe9   :  { %v384_v1 = vld [vmem:[#allocation5 + $0x4c0] sm:$0xff]  ;;  %6545 = vmatpush2.bf16.msra.mxu0 %v13601_v4 }
  0xea   :  { %v632_v2 = vld [vmem:[#allocation5 + $0xc80] sm:$0xff]  ;;  %v13586_v6 = vcombine.high %v376_v0, %v384_v1  ;;  %6585 = vmatprep.subr.bf16.mxu1 %v13858_v62  ;;  %v13585_v14 = vcombine.low %v376_v0, %v384_v1 }
  0xeb   :  { %v640_v3 = vld [vmem:[#allocation5 + $0xcc0] sm:$0xff]  ;;  %6586 = vmatpush2.bf16.msra.mxu1 %v13857_v5 }
  0xec   :  { %v13842_v7 = vcombine.high %v632_v2, %v640_v3  ;;  %v360_v8 = vld [vmem:[#allocation5 + $0x400] sm:$0xff]  ;;  %6546 = vmatprep.subr.bf16.mxu0 %v13586_v6  ;;  %v13841_v15 = vcombine.low %v632_v2, %v640_v3 }
  0xed   :  { %v368_v10 = vld [vmem:[#allocation5 + $0x440] sm:$0xff]  ;;  %6547 = vmatpush2.bf16.msra.mxu0 %v13585_v14 }
  0xee   :  { %v616_v11 = vld [vmem:[#allocation5 + $0xc00] sm:$0xff]  ;;  %v13570_v16 = vcombine.high %v360_v8, %v368_v10  ;;  %6587 = vmatprep.subr.bf16.mxu1 %v13842_v7  ;;  %v13569_v23 = vcombine.low %v360_v8, %v368_v10 }
  0xef   :  { %v624_v12 = vld [vmem:[#allocation5 + $0xc40] sm:$0xff]  ;;  %6588 = vmatpush2.bf16.msra.mxu1 %v13841_v15 }
  0xf0   :  { %v13826_v17 = vcombine.high %v616_v11, %v624_v12  ;;  %v856_v18 = vld [vmem:[#allocation5 + $0x1380] sm:$0xff]  ;;  %6548 = vmatprep.subr.bf16.mxu0 %v13570_v16  ;;  %v13825_v25 = vcombine.low %v616_v11, %v624_v12 }
  0xf1   :  { %v864_v19 = vld [vmem:[#allocation5 + $0x13c0] sm:$0xff]  ;;  %6549 = vmatpush2.bf16.msra.mxu0 %v13569_v23 }
  0xf2   :  { %v1112_v20 = vld [vmem:[#allocation5 + $0x1b80] sm:$0xff]  ;;  %v14066_v26 = vcombine.high %v856_v18, %v864_v19  ;;  %6589 = vmatprep.subr.bf16.mxu1 %v13826_v17  ;;  %v14065_v63 = vcombine.low %v856_v18, %v864_v19 }
  0xf3   :  { %v1120_v21 = vld [vmem:[#allocation5 + $0x1bc0] sm:$0xff]  ;;  %6590 = vmatpush2.bf16.msra.mxu1 %v13825_v25 }
  0xf4   :  { %v14322_v27 = vcombine.high %v1112_v20, %v1120_v21  ;;  %v840_v29 = vld [vmem:[#allocation5 + $0x1300] sm:$0xff]  ;;  %6600 = vmatprep.subr.bf16.mxu0 %v14066_v26  ;;  %v14321_v36 = vcombine.low %v1112_v20, %v1120_v21  ;;  %6551 = vmatmul.mubr.bf16.vlgmr.msra.gmra.mxu0 %v16878_v24 }
  0xf5   :  { %v848_v30 = vld [vmem:[#allocation5 + $0x1340] sm:$0xff]  ;;  %6601 = vmatpush1.bf16.msra.mxu0 %v14065_v63  ;;  %6632 = vmatprep.mubr.bf16.mxu0 %v16881_v35 }
  0xf6   :  { %v1096_v31 = vld [vmem:[#allocation5 + $0x1b00] sm:$0xff]  ;;  %v14050_v37 = vcombine.high %v840_v29, %v848_v30  ;;  %6641 = vmatprep.subr.bf16.mxu1 %v14322_v27  ;;  %6592 = vmatmul.mubr.bf16.vlgmr.msra.gmra.mxu1 %v16885_v28  ;;  %v14049_v44 = vcombine.low %v840_v29, %v848_v30 }
  0xf7   :  { %v1104_v34 = vld [vmem:[#allocation5 + $0x1b40] sm:$0xff]  ;;  %6642 = vmatpush1.bf16.msra.mxu1 %v14321_v36  ;;  %6673 = vmatprep.mubr.bf16.mxu1 %v16890_v53 }
  0xf8   :  { %v824_v38 = vld [vmem:[#allocation5 + $0x1280] sm:$0xff]  ;;  %v14306_v41 = vcombine.high %v1096_v31, %v1104_v34  ;;  %6602 = vmatprep.subr.bf16.mxu0 %v14050_v37  ;;  %v14305_v45 = vcombine.low %v1096_v31, %v1104_v34 }
  0xf9   :  { %v832_v39 = vld [vmem:[#allocation5 + $0x12c0] sm:$0xff]  ;;  %6603 = vmatpush1.bf16.msra.mxu0 %v14049_v44 }
  0xfa   :  { %v1080_v40 = vld [vmem:[#allocation5 + $0x1a80] sm:$0xff]  ;;  %v14034_v46 = vcombine.high %v824_v38, %v832_v39  ;;  %6643 = vmatprep.subr.bf16.mxu1 %v14306_v41  ;;  %v14033_v52 = vcombine.low %v824_v38, %v832_v39 }
  0xfb   :  { %v1088_v42 = vld [vmem:[#allocation5 + $0x1ac0] sm:$0xff]  ;;  %6644 = vmatpush1.bf16.msra.mxu1 %v14305_v45 }
  0xfc   :  { %v808_v47 = vld [vmem:[#allocation5 + $0x1200] sm:$0xff]  ;;  %v14290_v50 = vcombine.high %v1080_v40, %v1088_v42  ;;  %6604 = vmatprep.subr.bf16.mxu0 %v14034_v46  ;;  %v14289_v54 = vcombine.low %v1080_v40, %v1088_v42 }
  0xfd   :  { %v816_v48 = vld [vmem:[#allocation5 + $0x1240] sm:$0xff]  ;;  %6605 = vmatpush1.bf16.msra.mxu0 %v14033_v52 }
  0xfe   :  { %v1064_v49 = vld [vmem:[#allocation5 + $0x1a00] sm:$0xff]  ;;  %v14018_v55 = vcombine.high %v808_v47, %v816_v48  ;;  %6645 = vmatprep.subr.bf16.mxu1 %v14290_v50  ;;  %v14017_v61 = vcombine.low %v808_v47, %v816_v48 }
  0xff   :  { %v1072_v51 = vld [vmem:[#allocation5 + $0x1a40] sm:$0xff]  ;;  %6646 = vmatpush1.bf16.msra.mxu1 %v14289_v54 }
 0x100   :  { %v792_v56 = vld [vmem:[#allocation5 + $0x1180] sm:$0xff]  ;;  %v14274_v59 = vcombine.high %v1064_v49, %v1072_v51  ;;  %6606 = vmatprep.subr.bf16.mxu0 %v14018_v55  ;;  %v14273_v62 = vcombine.low %v1064_v49, %v1072_v51 }
 0x101   :  { %v800_v57 = vld [vmem:[#allocation5 + $0x11c0] sm:$0xff]  ;;  %6607 = vmatpush1.bf16.msra.mxu0 %v14017_v61 }
 0x102   :  { %v1048_v58 = vld [vmem:[#allocation5 + $0x1980] sm:$0xff]  ;;  %v14002_v0 = vcombine.high %v792_v56, %v800_v57  ;;  %6647 = vmatprep.subr.bf16.mxu1 %v14274_v59  ;;  %v14001_v6 = vcombine.low %v792_v56, %v800_v57 }
 0x103   :  { %v1056_v60 = vld [vmem:[#allocation5 + $0x19c0] sm:$0xff]  ;;  %6648 = vmatpush1.bf16.msra.mxu1 %v14273_v62 }
 0x104   :  { %v776_v1 = vld [vmem:[#allocation5 + $0x1100] sm:$0xff]  ;;  %v14258_v4 = vcombine.high %v1048_v58, %v1056_v60  ;;  %6608 = vmatprep.subr.bf16.mxu0 %v14002_v0  ;;  %v14257_v7 = vcombine.low %v1048_v58, %v1056_v60 }
 0x105   :  { %v784_v2 = vld [vmem:[#allocation5 + $0x1140] sm:$0xff]  ;;  %6609 = vmatpush1.bf16.msra.mxu0 %v14001_v6 }
 0x106   :  { %v1032_v3 = vld [vmem:[#allocation5 + $0x1900] sm:$0xff]  ;;  %v13986_v8 = vcombine.high %v776_v1, %v784_v2  ;;  %6649 = vmatprep.subr.bf16.mxu1 %v14258_v4  ;;  %v13985_v16 = vcombine.low %v776_v1, %v784_v2 }
 0x107   :  { %v1040_v5 = vld [vmem:[#allocation5 + $0x1940] sm:$0xff]  ;;  %6650 = vmatpush1.bf16.msra.mxu1 %v14257_v7 }
 0x108   :  { %v760_v10 = vld [vmem:[#allocation5 + $0x1080] sm:$0xff]  ;;  %v14242_v14 = vcombine.high %v1032_v3, %v1040_v5  ;;  %6610 = vmatprep.subr.bf16.mxu0 %v13986_v8  ;;  %v14241_v17 = vcombine.low %v1032_v3, %v1040_v5 }
 0x109   :  { %v768_v11 = vld [vmem:[#allocation5 + $0x10c0] sm:$0xff]  ;;  %6611 = vmatpush1.bf16.msra.mxu0 %v13985_v16 }
 0x10a   :  { %v1016_v12 = vld [vmem:[#allocation5 + $0x1880] sm:$0xff]  ;;  %v13970_v18 = vcombine.high %v760_v10, %v768_v11  ;;  %6651 = vmatprep.subr.bf16.mxu1 %v14242_v14  ;;  %v13969_v25 = vcombine.low %v760_v10, %v768_v11 }
 0x10b   :  { %v1024_v15 = vld [vmem:[#allocation5 + $0x18c0] sm:$0xff]  ;;  %6652 = vmatpush1.bf16.msra.mxu1 %v14241_v17 }
 0x10c   :  { %v744_v19 = vld [vmem:[#allocation5 + $0x1000] sm:$0xff]  ;;  %v14226_v22 = vcombine.high %v1016_v12, %v1024_v15  ;;  %6612 = vmatprep.subr.bf16.mxu0 %v13970_v18  ;;  %v14225_v26 = vcombine.low %v1016_v12, %v1024_v15 }
 0x10d   :  { %v752_v20 = vld [vmem:[#allocation5 + $0x1040] sm:$0xff]  ;;  %6613 = vmatpush1.bf16.msra.mxu0 %v13969_v25 }
 0x10e   :  { %v1000_v21 = vld [vmem:[#allocation5 + $0x1800] sm:$0xff]  ;;  %v13954_v27 = vcombine.high %v744_v19, %v752_v20  ;;  %6653 = vmatprep.subr.bf16.mxu1 %v14226_v22  ;;  %v13953_v36 = vcombine.low %v744_v19, %v752_v20 }
 0x10f   :  { %v1008_v23 = vld [vmem:[#allocation5 + $0x1840] sm:$0xff]  ;;  %6654 = vmatpush1.bf16.msra.mxu1 %v14225_v26 }
 0x110   :  { %v984_v29 = vld [vmem:[#allocation5 + $0x1780] sm:$0xff]  ;;  %v14210_v34 = vcombine.high %v1000_v21, %v1008_v23  ;;  %6614 = vmatprep.subr.bf16.mxu0 %v13954_v27  ;;  %v14209_v37 = vcombine.low %v1000_v21, %v1008_v23 }
 0x111   :  { %v992_v30 = vld [vmem:[#allocation5 + $0x17c0] sm:$0xff]  ;;  %6615 = vmatpush1.bf16.msra.mxu0 %v13953_v36 }
 0x112   :  { %v1240_v31 = vld [vmem:[#allocation5 + $0x1f80] sm:$0xff]  ;;  %v14194_v38 = vcombine.high %v984_v29, %v992_v30  ;;  %6655 = vmatprep.subr.bf16.mxu1 %v14210_v34  ;;  %v14193_v45 = vcombine.low %v984_v29, %v992_v30 }
 0x113   :  { %v1248_v63 = vld [vmem:[#allocation5 + $0x1fc0] sm:$0xff]  ;;  %6656 = vmatpush1.bf16.msra.mxu1 %v14209_v37 }
 0x114   :  { %v968_v39 = vld [vmem:[#allocation5 + $0x1700] sm:$0xff]  ;;  %v14450_v42 = vcombine.high %v1240_v31, %v1248_v63  ;;  %6616 = vmatprep.subr.bf16.mxu0 %v14194_v38  ;;  %v14449_v46 = vcombine.low %v1240_v31, %v1248_v63 }
 0x115   :  { %v976_v40 = vld [vmem:[#allocation5 + $0x1740] sm:$0xff]  ;;  %6617 = vmatpush2.bf16.msra.mxu0 %v14193_v45  ;;  %v609_v45 = vld [vmem:[#allocation5 + $0xbc8] sm:$0xff] }
 0x116   :  { %v1224_v41 = vld [vmem:[#allocation5 + $0x1f00] sm:$0xff]  ;;  %v14178_v47 = vcombine.high %v968_v39, %v976_v40  ;;  %6657 = vmatprep.subr.bf16.mxu1 %v14450_v42  ;;  %v14177_v54 = vcombine.low %v968_v39, %v976_v40  ;;  %v345_v40 = vld [vmem:[#allocation5 + $0x388] sm:$0xff] }
 0x117   :  { %v1232_v44 = vld [vmem:[#allocation5 + $0x1f40] sm:$0xff]  ;;  %6658 = vmatpush2.bf16.msra.mxu1 %v14449_v46  ;;  %v601_v42 = vld [vmem:[#allocation5 + $0xb88] sm:$0xff] }
 0x118   :  { %v952_v48 = vld [vmem:[#allocation5 + $0x1680] sm:$0xff]  ;;  %v14434_v51 = vcombine.high %v1224_v41, %v1232_v44  ;;  %6618 = vmatprep.subr.bf16.mxu0 %v14178_v47  ;;  %v14433_v55 = vcombine.low %v1224_v41, %v1232_v44  ;;  %v353_v41 = vld [vmem:[#allocation5 + $0x3c8] sm:$0xff] }
 0x119   :  { %v960_v49 = vld [vmem:[#allocation5 + $0x16c0] sm:$0xff]  ;;  %6619 = vmatpush2.bf16.msra.mxu0 %v14177_v54  ;;  %v593_v54 = vld [vmem:[#allocation5 + $0xb48] sm:$0xff] }
 0x11a   :  { %v1208_v50 = vld [vmem:[#allocation5 + $0x1e80] sm:$0xff]  ;;  %v14162_v56 = vcombine.high %v952_v48, %v960_v49  ;;  %6659 = vmatprep.subr.bf16.mxu1 %v14434_v51  ;;  %v14161_v62 = vcombine.low %v952_v48, %v960_v49  ;;  %v13556_v48 = vcombine.high %v345_v40, %v353_v41  ;;  %v329_v49 = vld [vmem:[#allocation5 + $0x308] sm:$0xff] }
 0x11b   :  { %v1216_v52 = vld [vmem:[#allocation5 + $0x1ec0] sm:$0xff]  ;;  %6660 = vmatpush2.bf16.msra.mxu1 %v14433_v55  ;;  %v585_v51 = vld [vmem:[#allocation5 + $0xb08] sm:$0xff]  ;;  %v16897_v55 = vcombine.high %v16872_v33, %v16872_v33 }
 0x11c   :  { %v936_v57 = vld [vmem:[#allocation5 + $0x1600] sm:$0xff]  ;;  %v14418_v60 = vcombine.high %v1208_v50, %v1216_v52  ;;  %6620 = vmatprep.subr.bf16.mxu0 %v14162_v56  ;;  %v14417_v0 = vcombine.low %v1208_v50, %v1216_v52  ;;  %v337_v50 = vld [vmem:[#allocation5 + $0x348] sm:$0xff]  ;;  %v13812_v52 = vcombine.high %v601_v42, %v609_v45  ;;  %v13555_v56 = vcombine.low %v345_v40, %v353_v41 }
 0x11d   :  { %v944_v58 = vld [vmem:[#allocation5 + $0x1640] sm:$0xff]  ;;  %6621 = vmatpush2.bf16.msra.mxu0 %v14161_v62  ;;  %v569_v62 = vld [vmem:[#allocation5 + $0xa88] sm:$0xff] }
 0x11e   :  { %v1192_v59 = vld [vmem:[#allocation5 + $0x1e00] sm:$0xff]  ;;  %v14146_v1 = vcombine.high %v936_v57, %v944_v58  ;;  %6661 = vmatprep.subr.bf16.mxu1 %v14418_v60  ;;  %v14145_v7 = vcombine.low %v936_v57, %v944_v58  ;;  %v13811_v57 = vcombine.low %v601_v42, %v609_v45  ;;  %v13540_v58 = vcombine.high %v329_v49, %v337_v50  ;;  %v321_v60 = vld [vmem:[#allocation5 + $0x2c8] sm:$0xff] }
 0x11f   :  { %v1200_v61 = vld [vmem:[#allocation5 + $0x1e40] sm:$0xff]  ;;  %6662 = vmatpush2.bf16.msra.mxu1 %v14417_v0  ;;  %v577_v0 = vld [vmem:[#allocation5 + $0xac8] sm:$0xff] }
 0x120   :  { %v920_v2 = vld [vmem:[#allocation5 + $0x1580] sm:$0xff]  ;;  %v14402_v5 = vcombine.high %v1192_v59, %v1200_v61  ;;  %6622 = vmatprep.subr.bf16.mxu0 %v14146_v1  ;;  %v14401_v8 = vcombine.low %v1192_v59, %v1200_v61  ;;  %v313_v59 = vld [vmem:[#allocation5 + $0x288] sm:$0xff]  ;;  %v13796_v61 = vcombine.high %v585_v51, %v593_v54  ;;  %v13539_v1 = vcombine.low %v329_v49, %v337_v50 }
 0x121   :  { %v928_v3 = vld [vmem:[#allocation5 + $0x15c0] sm:$0xff]  ;;  %6623 = vmatpush2.bf16.msra.mxu0 %v14145_v7  ;;  %v13780_v7 = vcombine.high %v569_v62, %v577_v0  ;;  %v233_v42 = vld [vmem:[#allocation5 + $0x8] sm:$0xff] }
 0x122   :  { %v1176_v4 = vld [vmem:[#allocation5 + $0x1d80] sm:$0xff]  ;;  %v14130_v10 = vcombine.high %v920_v2, %v928_v3  ;;  %6663 = vmatprep.subr.bf16.mxu1 %v14402_v5  ;;  %v14129_v17 = vcombine.low %v920_v2, %v928_v3  ;;  %v13795_v2 = vcombine.low %v585_v51, %v593_v54  ;;  %v13524_v3 = vcombine.high %v313_v59, %v321_v60  ;;  %v305_v5 = vld [vmem:[#allocation5 + $0x248] sm:$0xff] }
 0x123   :  { %v1184_v6 = vld [vmem:[#allocation5 + $0x1dc0] sm:$0xff]  ;;  %6664 = vmatpush2.bf16.msra.mxu1 %v14401_v8  ;;  %v561_v8 = vld [vmem:[#allocation5 + $0xa48] sm:$0xff] }
 0x124   :  { %v904_v11 = vld [vmem:[#allocation5 + $0x1500] sm:$0xff]  ;;  %v14386_v15 = vcombine.high %v1176_v4, %v1184_v6  ;;  %6624 = vmatprep.subr.bf16.mxu0 %v14130_v10  ;;  %v14385_v18 = vcombine.low %v1176_v4, %v1184_v6  ;;  %v297_v4 = vld [vmem:[#allocation5 + $0x208] sm:$0xff]  ;;  %v13523_v10 = vcombine.low %v313_v59, %v321_v60 }
 0x125   :  { %v912_v12 = vld [vmem:[#allocation5 + $0x1540] sm:$0xff]  ;;  %6625 = vmatpush2.bf16.msra.mxu0 %v14129_v17  ;;  %v553_v6 = vld [vmem:[#allocation5 + $0xa08] sm:$0xff] }
 0x126   :  { %v1160_v14 = vld [vmem:[#allocation5 + $0x1d00] sm:$0xff]  ;;  %v14114_v19 = vcombine.high %v904_v11, %v912_v12  ;;  %6665 = vmatprep.subr.bf16.mxu1 %v14386_v15  ;;  %v14113_v26 = vcombine.low %v904_v11, %v912_v12  ;;  %v13779_v11 = vcombine.low %v569_v62, %v577_v0  ;;  %v13508_v12 = vcombine.high %v297_v4, %v305_v5  ;;  %v289_v15 = vld [vmem:[#allocation5 + $0x1c8] sm:$0xff] }
 0x127   :  { %v1168_v16 = vld [vmem:[#allocation5 + $0x1d40] sm:$0xff]  ;;  %6666 = vmatpush2.bf16.msra.mxu1 %v14385_v18  ;;  %v13764_v17 = vcombine.high %v553_v6, %v561_v8  ;;  %v545_v18 = vld [vmem:[#allocation5 + $0x9c8] sm:$0xff] }
 0x128   :  { %v888_v20 = vld [vmem:[#allocation5 + $0x1480] sm:$0xff]  ;;  %v14370_v23 = vcombine.high %v1160_v14, %v1168_v16  ;;  %6626 = vmatprep.subr.bf16.mxu0 %v14114_v19  ;;  %v14369_v27 = vcombine.low %v1160_v14, %v1168_v16  ;;  %v281_v14 = vld [vmem:[#allocation5 + $0x188] sm:$0xff]  ;;  %v13507_v19 = vcombine.low %v297_v4, %v305_v5 }
 0x129   :  { %v896_v21 = vld [vmem:[#allocation5 + $0x14c0] sm:$0xff]  ;;  %6627 = vmatpush2.bf16.msra.mxu0 %v14113_v26  ;;  %v537_v16 = vld [vmem:[#allocation5 + $0x988] sm:$0xff] }
 0x12a   :  { %v1144_v22 = vld [vmem:[#allocation5 + $0x1c80] sm:$0xff]  ;;  %v14098_v29 = vcombine.high %v888_v20, %v896_v21  ;;  %6667 = vmatprep.subr.bf16.mxu1 %v14370_v23  ;;  %v14097_v37 = vcombine.low %v888_v20, %v896_v21  ;;  %v13763_v20 = vcombine.low %v553_v6, %v561_v8  ;;  %v13492_v21 = vcombine.high %v281_v14, %v289_v15  ;;  %v273_v23 = vld [vmem:[#allocation5 + $0x148] sm:$0xff] }
 0x12b   :  { %v1152_v25 = vld [vmem:[#allocation5 + $0x1cc0] sm:$0xff]  ;;  %6668 = vmatpush2.bf16.msra.mxu1 %v14369_v27  ;;  %v13748_v26 = vcombine.high %v537_v16, %v545_v18  ;;  %v529_v27 = vld [vmem:[#allocation5 + $0x948] sm:$0xff] }
 0x12c   :  { %v872_v30 = vld [vmem:[#allocation5 + $0x1400] sm:$0xff]  ;;  %v14354_v63 = vcombine.high %v1144_v22, %v1152_v25  ;;  %6628 = vmatprep.subr.bf16.mxu0 %v14098_v29  ;;  %v14353_v38 = vcombine.low %v1144_v22, %v1152_v25  ;;  %v265_v22 = vld [vmem:[#allocation5 + $0x108] sm:$0xff]  ;;  %v13491_v29 = vcombine.low %v281_v14, %v289_v15 }
 0x12d   :  { %v880_v31 = vld [vmem:[#allocation5 + $0x1440] sm:$0xff]  ;;  %6629 = vmatpush2.bf16.msra.mxu0 %v14097_v37  ;;  %v521_v25 = vld [vmem:[#allocation5 + $0x908] sm:$0xff] }
 0x12e   :  { %v1128_v34 = vld [vmem:[#allocation5 + $0x1c00] sm:$0xff]  ;;  %v14082_v39 = vcombine.high %v872_v30, %v880_v31  ;;  %6669 = vmatprep.subr.bf16.mxu1 %v14354_v63  ;;  %v14081_v46 = vcombine.low %v872_v30, %v880_v31  ;;  %v13747_v30 = vcombine.low %v537_v16, %v545_v18  ;;  %v13476_v31 = vcombine.high %v265_v22, %v273_v23  ;;  %v257_v63 = vld [vmem:[#allocation5 + $0xc8] sm:$0xff] }
 0x12f   :  { %v1136_v36 = vld [vmem:[#allocation5 + $0x1c40] sm:$0xff]  ;;  %6670 = vmatpush2.bf16.msra.mxu1 %v14353_v38  ;;  %v13732_v37 = vcombine.high %v521_v25, %v529_v27  ;;  %v513_v38 = vld [vmem:[#allocation5 + $0x8c8] sm:$0xff]  ;;  %v13731_v40 = vcombine.low %v521_v25, %v529_v27 }
 0x130   :  { %v14338_v44 = vcombine.high %v1128_v34, %v1136_v36  ;;  %6630 = vmatprep.subr.bf16.mxu0 %v14082_v39  ;;  %v14337_v47 = vcombine.low %v1128_v34, %v1136_v36  ;;  %v249_v34 = vld [vmem:[#allocation5 + $0x88] sm:$0xff]  ;;  %v13475_v39 = vcombine.low %v265_v22, %v273_v23 }
 0x131   :  { %6631 = vmatpush2.bf16.msra.mxu0 %v14081_v46  ;;  %v505_v36 = vld [vmem:[#allocation5 + $0x888] sm:$0xff]  ;;  %v13460_v41 = vcombine.high %v249_v34, %v257_v63 }
 0x132   :  { %6671 = vmatprep.subr.bf16.mxu1 %v14338_v44  ;;  %6682 = vmatprep.subr.bf16.mxu0 %v13556_v48  ;;  %v241_v44 = vld [vmem:[#allocation5 + $0x48] sm:$0xff]  ;;  %v13716_v46 = vcombine.high %v505_v36, %v513_v38  ;;  %v13459_v48 = vcombine.low %v249_v34, %v257_v63  ;;  %v13715_v49 = vcombine.low %v505_v36, %v513_v38 }
 0x133   :  { %6672 = vmatpush2.bf16.msra.mxu1 %v14337_v47  ;;  %v489_v45 = vld [vmem:[#allocation5 + $0x808] sm:$0xff]  ;;  %v13444_v50 = vcombine.high %v233_v42, %v241_v44 }
 0x134   :  { %6723 = vmatprep.subr.bf16.mxu1 %v13812_v52  ;;  %6633 = vmatmul.mubr.bf16.vlgmr.msra.gmra.mxu0 %v16872_v33  ;;  %v497_v47 = vld [vmem:[#allocation5 + $0x848] sm:$0xff] }
 0x135   :  { %6683 = vmatpush1.bf16.msra.mxu0 %v13555_v56  ;;  %6714 = vmatprep.mubr.bf16.mxu0 %v16859_v9  ;;  %v473_v51 = vld [vmem:[#allocation5 + $0x788] sm:$0xff]  ;;  %v13700_v56 = vcombine.high %v489_v45, %v497_v47  ;;  %v13699_v59 = vcombine.low %v489_v45, %v497_v47 }
 0x136   :  { %6674 = vmatmul.mubr.bf16.vlgmr.msra.gmra.mxu1 %v16897_v55  ;;  %6684 = vmatprep.subr.bf16.mxu0 %v13540_v58  ;;  %v481_v52 = vld [vmem:[#allocation5 + $0x7c8] sm:$0xff]  ;;  %v13443_v58 = vcombine.low %v233_v42, %v241_v44 }
 0x137   :  { %6724 = vmatpush1.bf16.msra.mxu1 %v13811_v57  ;;  %6755 = vmatprep.mubr.bf16.mxu1 %v16864_v13  ;;  %v729_v54 = vld [vmem:[#allocation5 + $0xf88] sm:$0xff]  ;;  %v13684_v60 = vcombine.high %v473_v51, %v481_v52 }
 0x138   :  { %6725 = vmatprep.subr.bf16.mxu1 %v13796_v61  ;;  %v737_v57 = vld [vmem:[#allocation5 + $0xfc8] sm:$0xff] }
 0x139   :  { %6685 = vmatpush1.bf16.msra.mxu0 %v13539_v1  ;;  %v457_v61 = vld [vmem:[#allocation5 + $0x708] sm:$0xff]  ;;  %v13940_v1 = vcombine.high %v729_v54, %v737_v57  ;;  %v13939_v4 = vcombine.low %v729_v54, %v737_v57 }
 0x13a   :  { %6686 = vmatprep.subr.bf16.mxu0 %v13524_v3  ;;  %v465_v62 = vld [vmem:[#allocation5 + $0x748] sm:$0xff]  ;;  %v13683_v3 = vcombine.low %v473_v51, %v481_v52 }
 0x13b   :  { %6726 = vmatpush1.bf16.msra.mxu1 %v13795_v2  ;;  %v713_v0 = vld [vmem:[#allocation5 + $0xf08] sm:$0xff]  ;;  %v13668_v5 = vcombine.high %v457_v61, %v465_v62 }
 0x13c   :  { %6727 = vmatprep.subr.bf16.mxu1 %v13780_v7  ;;  %v721_v2 = vld [vmem:[#allocation5 + $0xf48] sm:$0xff] }
 0x13d   :  { %6687 = vmatpush1.bf16.msra.mxu0 %v13523_v10  ;;  %v441_v6 = vld [vmem:[#allocation5 + $0x688] sm:$0xff]  ;;  %v13924_v10 = vcombine.high %v713_v0, %v721_v2  ;;  %v13923_v14 = vcombine.low %v713_v0, %v721_v2 }
 0x13e   :  { %6688 = vmatprep.subr.bf16.mxu0 %v13508_v12  ;;  %v449_v7 = vld [vmem:[#allocation5 + $0x6c8] sm:$0xff]  ;;  %v13667_v12 = vcombine.low %v457_v61, %v465_v62 }
 0x13f   :  { %6728 = vmatpush1.bf16.msra.mxu1 %v13779_v11  ;;  %v697_v8 = vld [vmem:[#allocation5 + $0xe88] sm:$0xff]  ;;  %v13652_v15 = vcombine.high %v441_v6, %v449_v7 }
 0x140   :  { %6729 = vmatprep.subr.bf16.mxu1 %v13764_v17  ;;  %v705_v11 = vld [vmem:[#allocation5 + $0xec8] sm:$0xff] }
 0x141   :  { %6689 = vmatpush1.bf16.msra.mxu0 %v13507_v19  ;;  %v425_v16 = vld [vmem:[#allocation5 + $0x608] sm:$0xff]  ;;  %v13908_v19 = vcombine.high %v697_v8, %v705_v11  ;;  %v13907_v22 = vcombine.low %v697_v8, %v705_v11 }
 0x142   :  { %6690 = vmatprep.subr.bf16.mxu0 %v13492_v21  ;;  %v433_v17 = vld [vmem:[#allocation5 + $0x648] sm:$0xff]  ;;  %v13651_v21 = vcombine.low %v441_v6, %v449_v7 }
 0x143   :  { %6730 = vmatpush1.bf16.msra.mxu1 %v13763_v20  ;;  %v681_v18 = vld [vmem:[#allocation5 + $0xe08] sm:$0xff]  ;;  %v13636_v23 = vcombine.high %v425_v16, %v433_v17 }
 0x144   :  { %6731 = vmatprep.subr.bf16.mxu1 %v13748_v26  ;;  %v689_v20 = vld [vmem:[#allocation5 + $0xe48] sm:$0xff] }
 0x145   :  { %6691 = vmatpush1.bf16.msra.mxu0 %v13491_v29  ;;  %v409_v25 = vld [vmem:[#allocation5 + $0x588] sm:$0xff]  ;;  %v13892_v29 = vcombine.high %v681_v18, %v689_v20  ;;  %v13891_v34 = vcombine.low %v681_v18, %v689_v20 }
 0x146   :  { %6692 = vmatprep.subr.bf16.mxu0 %v13476_v31  ;;  %v417_v26 = vld [vmem:[#allocation5 + $0x5c8] sm:$0xff]  ;;  %v13635_v31 = vcombine.low %v425_v16, %v433_v17 }
 0x147   :  { %6732 = vmatpush1.bf16.msra.mxu1 %v13747_v30  ;;  %v665_v27 = vld [vmem:[#allocation5 + $0xd88] sm:$0xff]  ;;  %v13620_v63 = vcombine.high %v409_v25, %v417_v26 }
 0x148   :  { %6733 = vmatprep.subr.bf16.mxu1 %v13732_v37  ;;  %v673_v30 = vld [vmem:[#allocation5 + $0xdc8] sm:$0xff] }
 0x149   :  { %6693 = vmatpush1.bf16.msra.mxu0 %v13475_v39  ;;  %v393_v36 = vld [vmem:[#allocation5 + $0x508] sm:$0xff]  ;;  %v13876_v39 = vcombine.high %v665_v27, %v673_v30  ;;  %v13875_v42 = vcombine.low %v665_v27, %v673_v30 }
 0x14a   :  { %6694 = vmatprep.subr.bf16.mxu0 %v13460_v41  ;;  %v401_v37 = vld [vmem:[#allocation5 + $0x548] sm:$0xff]  ;;  %v13619_v41 = vcombine.low %v409_v25, %v417_v26 }
 0x14b   :  { %6734 = vmatpush1.bf16.msra.mxu1 %v13731_v40  ;;  %v649_v38 = vld [vmem:[#allocation5 + $0xd08] sm:$0xff]  ;;  %v13604_v44 = vcombine.high %v393_v36, %v401_v37 }
 0x14c   :  { %6735 = vmatprep.subr.bf16.mxu1 %v13716_v46  ;;  %v657_v40 = vld [vmem:[#allocation5 + $0xd48] sm:$0xff] }
 0x14d   :  { %6695 = vmatpush1.bf16.msra.mxu0 %v13459_v48  ;;  %v377_v45 = vld [vmem:[#allocation5 + $0x488] sm:$0xff]  ;;  %v13860_v48 = vcombine.high %v649_v38, %v657_v40  ;;  %v13859_v51 = vcombine.low %v649_v38, %v657_v40 }
 0x14e   :  { %6696 = vmatprep.subr.bf16.mxu0 %v13444_v50  ;;  %v385_v46 = vld [vmem:[#allocation5 + $0x4c8] sm:$0xff]  ;;  %v13603_v50 = vcombine.low %v393_v36, %v401_v37 }
 0x14f   :  { %6736 = vmatpush1.bf16.msra.mxu1 %v13715_v49  ;;  %v633_v47 = vld [vmem:[#allocation5 + $0xc88] sm:$0xff]  ;;  %v13588_v52 = vcombine.high %v377_v45, %v385_v46 }
 0x150   :  { %6737 = vmatprep.subr.bf16.mxu1 %v13700_v56  ;;  %v641_v49 = vld [vmem:[#allocation5 + $0xcc8] sm:$0xff] }
 0x151   :  { %6697 = vmatpush1.bf16.msra.mxu0 %v13443_v58  ;;  %v361_v54 = vld [vmem:[#allocation5 + $0x408] sm:$0xff]  ;;  %v13844_v58 = vcombine.high %v633_v47, %v641_v49  ;;  %v13843_v61 = vcombine.low %v633_v47, %v641_v49 }
 0x152   :  { %6698 = vmatprep.subr.bf16.mxu0 %v13684_v60  ;;  %v369_v56 = vld [vmem:[#allocation5 + $0x448] sm:$0xff]  ;;  %v13587_v60 = vcombine.low %v377_v45, %v385_v46 }
 0x153   :  { %6738 = vmatpush1.bf16.msra.mxu1 %v13699_v59  ;;  %v617_v57 = vld [vmem:[#allocation5 + $0xc08] sm:$0xff]  ;;  %v13572_v62 = vcombine.high %v361_v54, %v369_v56 }
 0x154   :  { %6739 = vmatprep.subr.bf16.mxu1 %v13940_v1  ;;  %v625_v59 = vld [vmem:[#allocation5 + $0xc48] sm:$0xff] }
 0x155   :  { %6699 = vmatpush2.bf16.msra.mxu0 %v13683_v3  ;;  %v857_v0 = vld [vmem:[#allocation5 + $0x1388] sm:$0xff]  ;;  %v13828_v3 = vcombine.high %v617_v57, %v625_v59  ;;  %v13827_v6 = vcombine.low %v617_v57, %v625_v59 }
 0x156   :  { %6700 = vmatprep.subr.bf16.mxu0 %v13668_v5  ;;  %v865_v1 = vld [vmem:[#allocation5 + $0x13c8] sm:$0xff]  ;;  %v13571_v5 = vcombine.low %v361_v54, %v369_v56 }
 0x157   :  { %6740 = vmatpush2.bf16.msra.mxu1 %v13939_v4  ;;  %v1113_v2 = vld [vmem:[#allocation5 + $0x1b88] sm:$0xff]  ;;  %v14068_v7 = vcombine.high %v857_v0, %v865_v1 }
 0x158   :  { %6741 = vmatprep.subr.bf16.mxu1 %v13924_v10  ;;  %v1121_v4 = vld [vmem:[#allocation5 + $0x1bc8] sm:$0xff] }
 0x159   :  { %6701 = vmatpush2.bf16.msra.mxu0 %v13667_v12  ;;  %v841_v8 = vld [vmem:[#allocation5 + $0x1308] sm:$0xff]  ;;  %v14324_v12 = vcombine.high %v1113_v2, %v1121_v4  ;;  %v14323_v16 = vcombine.low %v1113_v2, %v1121_v4 }
 0x15a   :  { %6702 = vmatprep.subr.bf16.mxu0 %v13652_v15  ;;  %v849_v10 = vld [vmem:[#allocation5 + $0x1348] sm:$0xff]  ;;  %v14067_v15 = vcombine.low %v857_v0, %v865_v1 }
 0x15b   :  { %6742 = vmatpush2.bf16.msra.mxu1 %v13923_v14  ;;  %v1097_v11 = vld [vmem:[#allocation5 + $0x1b08] sm:$0xff]  ;;  %v14052_v17 = vcombine.high %v841_v8, %v849_v10 }
 0x15c   :  { %6743 = vmatprep.subr.bf16.mxu1 %v13908_v19  ;;  %v1105_v14 = vld [vmem:[#allocation5 + $0x1b48] sm:$0xff] }
 0x15d   :  { %6703 = vmatpush2.bf16.msra.mxu0 %v13651_v21  ;;  %v825_v18 = vld [vmem:[#allocation5 + $0x1288] sm:$0xff]  ;;  %v14308_v21 = vcombine.high %v1097_v11, %v1105_v14  ;;  %v14307_v25 = vcombine.low %v1097_v11, %v1105_v14 }
 0x15e   :  { %6704 = vmatprep.subr.bf16.mxu0 %v13636_v23  ;;  %v833_v19 = vld [vmem:[#allocation5 + $0x12c8] sm:$0xff]  ;;  %v14051_v23 = vcombine.low %v841_v8, %v849_v10 }
 0x15f   :  { %6744 = vmatpush2.bf16.msra.mxu1 %v13907_v22  ;;  %v1081_v20 = vld [vmem:[#allocation5 + $0x1a88] sm:$0xff]  ;;  %v14036_v26 = vcombine.high %v825_v18, %v833_v19 }
 0x160   :  { %6745 = vmatprep.subr.bf16.mxu1 %v13892_v29  ;;  %v1089_v22 = vld [vmem:[#allocation5 + $0x1ac8] sm:$0xff] }
 0x161   :  { %6705 = vmatpush2.bf16.msra.mxu0 %v13635_v31  ;;  %v809_v27 = vld [vmem:[#allocation5 + $0x1208] sm:$0xff]  ;;  %v14292_v31 = vcombine.high %v1081_v20, %v1089_v22  ;;  %v14291_v36 = vcombine.low %v1081_v20, %v1089_v22 }
 0x162   :  { %6706 = vmatprep.subr.bf16.mxu0 %v13620_v63  ;;  %v817_v29 = vld [vmem:[#allocation5 + $0x1248] sm:$0xff]  ;;  %v14035_v63 = vcombine.low %v825_v18, %v833_v19 }
 0x163   :  { %6746 = vmatpush2.bf16.msra.mxu1 %v13891_v34  ;;  %v1065_v30 = vld [vmem:[#allocation5 + $0x1a08] sm:$0xff]  ;;  %v14020_v37 = vcombine.high %v809_v27, %v817_v29 }
 0x164   :  { %6747 = vmatprep.subr.bf16.mxu1 %v13876_v39  ;;  %v1073_v34 = vld [vmem:[#allocation5 + $0x1a48] sm:$0xff] }
 0x165   :  { %6707 = vmatpush2.bf16.msra.mxu0 %v13619_v41  ;;  %v793_v38 = vld [vmem:[#allocation5 + $0x1188] sm:$0xff]  ;;  %v14276_v41 = vcombine.high %v1065_v30, %v1073_v34  ;;  %v14275_v45 = vcombine.low %v1065_v30, %v1073_v34 }
 0x166   :  { %6708 = vmatprep.subr.bf16.mxu0 %v13604_v44  ;;  %v801_v39 = vld [vmem:[#allocation5 + $0x11c8] sm:$0xff]  ;;  %v14019_v44 = vcombine.low %v809_v27, %v817_v29 }
 0x167   :  { %6748 = vmatpush2.bf16.msra.mxu1 %v13875_v42  ;;  %v1049_v40 = vld [vmem:[#allocation5 + $0x1988] sm:$0xff]  ;;  %v14004_v46 = vcombine.high %v793_v38, %v801_v39 }
 0x168   :  { %6749 = vmatprep.subr.bf16.mxu1 %v13860_v48  ;;  %v1057_v42 = vld [vmem:[#allocation5 + $0x19c8] sm:$0xff] }
 0x169   :  { %6709 = vmatpush2.bf16.msra.mxu0 %v13603_v50  ;;  %v777_v47 = vld [vmem:[#allocation5 + $0x1108] sm:$0xff]  ;;  %v14260_v50 = vcombine.high %v1049_v40, %v1057_v42  ;;  %v14259_v54 = vcombine.low %v1049_v40, %v1057_v42 }
 0x16a   :  { %6710 = vmatprep.subr.bf16.mxu0 %v13588_v52  ;;  %v785_v48 = vld [vmem:[#allocation5 + $0x1148] sm:$0xff]  ;;  %v14003_v52 = vcombine.low %v793_v38, %v801_v39 }
 0x16b   :  { %6750 = vmatpush2.bf16.msra.mxu1 %v13859_v51  ;;  %v1033_v49 = vld [vmem:[#allocation5 + $0x1908] sm:$0xff]  ;;  %v13988_v56 = vcombine.high %v777_v47, %v785_v48 }
 0x16c   :  { %6751 = vmatprep.subr.bf16.mxu1 %v13844_v58  ;;  %v1041_v51 = vld [vmem:[#allocation5 + $0x1948] sm:$0xff] }
 0x16d   :  { %6711 = vmatpush2.bf16.msra.mxu0 %v13587_v60  ;;  %v761_v57 = vld [vmem:[#allocation5 + $0x1088] sm:$0xff]  ;;  %v14244_v60 = vcombine.high %v1033_v49, %v1041_v51  ;;  %v14243_v0 = vcombine.low %v1033_v49, %v1041_v51 }
 0x16e   :  { %6712 = vmatprep.subr.bf16.mxu0 %v13572_v62  ;;  %v769_v58 = vld [vmem:[#allocation5 + $0x10c8] sm:$0xff]  ;;  %v13987_v62 = vcombine.low %v777_v47, %v785_v48 }
 0x16f   :  { %6752 = vmatpush2.bf16.msra.mxu1 %v13843_v61  ;;  %v1017_v59 = vld [vmem:[#allocation5 + $0x1888] sm:$0xff]  ;;  %v13972_v1 = vcombine.high %v761_v57, %v769_v58 }
 0x170   :  { %6753 = vmatprep.subr.bf16.mxu1 %v13828_v3  ;;  %v1025_v61 = vld [vmem:[#allocation5 + $0x18c8] sm:$0xff] }
 0x171   :  { %6713 = vmatpush2.bf16.msra.mxu0 %v13571_v5  ;;  %v745_v2 = vld [vmem:[#allocation5 + $0x1008] sm:$0xff]  ;;  %v14228_v5 = vcombine.high %v1017_v59, %v1025_v61  ;;  %v14227_v8 = vcombine.low %v1017_v59, %v1025_v61 }
 0x172   :  { %6764 = vmatprep.subr.bf16.mxu0 %v14068_v7  ;;  %v753_v3 = vld [vmem:[#allocation5 + $0x1048] sm:$0xff]  ;;  %v13971_v7 = vcombine.low %v761_v57, %v769_v58 }
 0x173   :  { %6754 = vmatpush2.bf16.msra.mxu1 %v13827_v6  ;;  %v1001_v4 = vld [vmem:[#allocation5 + $0x1808] sm:$0xff]  ;;  %v13956_v10 = vcombine.high %v745_v2, %v753_v3 }
 0x174   :  { %6805 = vmatprep.subr.bf16.mxu1 %v14324_v12  ;;  %6715 = vmatmul.mubr.bf16.vlgmr.msra.gmra.mxu0 %v16878_v24  ;;  %v1009_v6 = vld [vmem:[#allocation5 + $0x1848] sm:$0xff] }
 0x175   :  { %6765 = vmatpush1.bf16.msra.mxu0 %v14067_v15  ;;  %6796 = vmatprep.mubr.bf16.mxu0 %v16881_v35  ;;  %v985_v11 = vld [vmem:[#allocation5 + $0x1788] sm:$0xff]  ;;  %v14212_v15 = vcombine.high %v1001_v4, %v1009_v6  ;;  %v14211_v18 = vcombine.low %v1001_v4, %v1009_v6 }
 0x176   :  { %6756 = vmatmul.mubr.bf16.vlgmr.msra.gmra.mxu1 %v16885_v28  ;;  %6766 = vmatprep.subr.bf16.mxu0 %v14052_v17  ;;  %v993_v12 = vld [vmem:[#allocation5 + $0x17c8] sm:$0xff]  ;;  %v13955_v17 = vcombine.low %v745_v2, %v753_v3 }
 0x177   :  { %6806 = vmatpush1.bf16.msra.mxu1 %v14323_v16  ;;  %6837 = vmatprep.mubr.bf16.mxu1 %v16890_v53  ;;  %v1241_v14 = vld [vmem:[#allocation5 + $0x1f88] sm:$0xff]  ;;  %v14196_v19 = vcombine.high %v985_v11, %v993_v12 }
 0x178   :  { %6807 = vmatprep.subr.bf16.mxu1 %v14308_v21  ;;  %v1249_v16 = vld [vmem:[#allocation5 + $0x1fc8] sm:$0xff] }
 0x179   :  { %6767 = vmatpush1.bf16.msra.mxu0 %v14051_v23  ;;  %v969_v20 = vld [vmem:[#allocation5 + $0x1708] sm:$0xff]  ;;  %v14452_v23 = vcombine.high %v1241_v14, %v1249_v16  ;;  %v14451_v27 = vcombine.low %v1241_v14, %v1249_v16 }
 0x17a   :  { %6768 = vmatprep.subr.bf16.mxu0 %v14036_v26  ;;  %v977_v21 = vld [vmem:[#allocation5 + $0x1748] sm:$0xff]  ;;  %v14195_v26 = vcombine.low %v985_v11, %v993_v12 }
 0x17b   :  { %6808 = vmatpush1.bf16.msra.mxu1 %v14307_v25  ;;  %v1225_v22 = vld [vmem:[#allocation5 + $0x1f08] sm:$0xff]  ;;  %v14180_v29 = vcombine.high %v969_v20, %v977_v21 }
 0x17c   :  { %6809 = vmatprep.subr.bf16.mxu1 %v14292_v31  ;;  %v1233_v25 = vld [vmem:[#allocation5 + $0x1f48] sm:$0xff] }
 0x17d   :  { %6769 = vmatpush1.bf16.msra.mxu0 %v14035_v63  ;;  %v953_v30 = vld [vmem:[#allocation5 + $0x1688] sm:$0xff]  ;;  %v14436_v63 = vcombine.high %v1225_v22, %v1233_v25  ;;  %v14435_v38 = vcombine.low %v1225_v22, %v1233_v25  ;;  %v346_v22 = vld [vmem:[#allocation5 + $0x390] sm:$0xff] }
 0x17e   :  { %6770 = vmatprep.subr.bf16.mxu0 %v14020_v37  ;;  %v961_v31 = vld [vmem:[#allocation5 + $0x16c8] sm:$0xff]  ;;  %v14179_v37 = vcombine.low %v969_v20, %v977_v21  ;;  %v602_v25 = vld [vmem:[#allocation5 + $0xb90] sm:$0xff] }
 0x17f   :  { %6810 = vmatpush1.bf16.msra.mxu1 %v14291_v36  ;;  %v1209_v34 = vld [vmem:[#allocation5 + $0x1e88] sm:$0xff]  ;;  %v14164_v39 = vcombine.high %v953_v30, %v961_v31 }
 0x180   :  { %6811 = vmatprep.subr.bf16.mxu1 %v14276_v41  ;;  %v1217_v36 = vld [vmem:[#allocation5 + $0x1ec8] sm:$0xff] }
 0x181   :  { %6771 = vmatpush1.bf16.msra.mxu0 %v14019_v44  ;;  %v937_v40 = vld [vmem:[#allocation5 + $0x1608] sm:$0xff]  ;;  %v14420_v44 = vcombine.high %v1209_v34, %v1217_v36  ;;  %v14419_v47 = vcombine.low %v1209_v34, %v1217_v36  ;;  %v330_v36 = vld [vmem:[#allocation5 + $0x310] sm:$0xff] }
 0x182   :  { %6772 = vmatprep.subr.bf16.mxu0 %v14004_v46  ;;  %v945_v41 = vld [vmem:[#allocation5 + $0x1648] sm:$0xff]  ;;  %v14163_v46 = vcombine.low %v953_v30, %v961_v31  ;;  %v16908_v31 = vsub.s32 0, %v16845_v43 }
 0x183   :  { %6812 = vmatpush1.bf16.msra.mxu1 %v14275_v45  ;;  %v1193_v42 = vld [vmem:[#allocation5 + $0x1e08] sm:$0xff]  ;;  %v14148_v48 = vcombine.high %v937_v40, %v945_v41 }
 0x184   :  { %6813 = vmatprep.subr.bf16.mxu1 %v14260_v50  ;;  %v1201_v45 = vld [vmem:[#allocation5 + $0x1e48] sm:$0xff] }
 0x185   :  { %6773 = vmatpush1.bf16.msra.mxu0 %v14003_v52  ;;  %v921_v49 = vld [vmem:[#allocation5 + $0x1588] sm:$0xff]  ;;  %v14404_v52 = vcombine.high %v1193_v42, %v1201_v45  ;;  %v14403_v57 = vcombine.low %v1193_v42, %v1201_v45 }
 0x186   :  { %6774 = vmatprep.subr.bf16.mxu0 %v13988_v56  ;;  %v929_v50 = vld [vmem:[#allocation5 + $0x15c8] sm:$0xff]  ;;  %v14147_v56 = vcombine.low %v937_v40, %v945_v41  ;;  %v16911_v40 = vsub.s32 1, %v16845_v43  ;;  %v594_v41 = vld [vmem:[#allocation5 + $0xb50] sm:$0xff] }
 0x187   :  { %6814 = vmatpush1.bf16.msra.mxu1 %v14259_v54  ;;  %v1177_v51 = vld [vmem:[#allocation5 + $0x1d88] sm:$0xff]  ;;  %v14132_v58 = vcombine.high %v921_v49, %v929_v50 }
 0x188   :  { %6815 = vmatprep.subr.bf16.mxu1 %v14244_v60  ;;  %v1185_v54 = vld [vmem:[#allocation5 + $0x1dc8] sm:$0xff] }
 0x189   :  { %6775 = vmatpush1.bf16.msra.mxu0 %v13987_v62  ;;  %v905_v59 = vld [vmem:[#allocation5 + $0x1508] sm:$0xff]  ;;  %v14388_v62 = vcombine.high %v1177_v51, %v1185_v54  ;;  %v14387_v2 = vcombine.low %v1177_v51, %v1185_v54 }
 0x18a   :  { %6776 = vmatprep.subr.bf16.mxu0 %v13972_v1  ;;  %v913_v60 = vld [vmem:[#allocation5 + $0x1548] sm:$0xff]  ;;  %v14131_v1 = vcombine.low %v921_v49, %v929_v50  ;;  %v570_v49 = vld [vmem:[#allocation5 + $0xa90] sm:$0xff] }
 0x18b   :  { %6816 = vmatpush1.bf16.msra.mxu1 %v14243_v0  ;;  %v1161_v61 = vld [vmem:[#allocation5 + $0x1d08] sm:$0xff]  ;;  %v14116_v3 = vcombine.high %v905_v59, %v913_v60 }
 0x18c   :  { %6817 = vmatprep.subr.bf16.mxu1 %v14228_v5  ;;  %v1169_v0 = vld [vmem:[#allocation5 + $0x1d48] sm:$0xff] }
 0x18d   :  { %6777 = vmatpush1.bf16.msra.mxu0 %v13971_v7  ;;  %v889_v4 = vld [vmem:[#allocation5 + $0x1488] sm:$0xff]  ;;  %v14372_v7 = vcombine.high %v1161_v61, %v1169_v0  ;;  %v14371_v11 = vcombine.low %v1161_v61, %v1169_v0  ;;  %v306_v0 = vld [vmem:[#allocation5 + $0x250] sm:$0xff] }
 0x18e   :  { %6778 = vmatprep.subr.bf16.mxu0 %v13956_v10  ;;  %v897_v5 = vld [vmem:[#allocation5 + $0x14c8] sm:$0xff]  ;;  %v14115_v10 = vcombine.low %v905_v59, %v913_v60 }
 0x18f   :  { %6818 = vmatpush1.bf16.msra.mxu1 %v14227_v8  ;;  %v1145_v6 = vld [vmem:[#allocation5 + $0x1c88] sm:$0xff]  ;;  %v14100_v12 = vcombine.high %v889_v4, %v897_v5 }
 0x190   :  { %6819 = vmatprep.subr.bf16.mxu1 %v14212_v15  ;;  %v1153_v8 = vld [vmem:[#allocation5 + $0x1cc8] sm:$0xff] }
 0x191   :  { %6779 = vmatpush1.bf16.msra.mxu0 %v13955_v17  ;;  %v873_v14 = vld [vmem:[#allocation5 + $0x1408] sm:$0xff]  ;;  %v14356_v17 = vcombine.high %v1145_v6, %v1153_v8  ;;  %v14355_v20 = vcombine.low %v1145_v6, %v1153_v8  ;;  %v562_v6 = vld [vmem:[#allocation5 + $0xa50] sm:$0xff] }
 0x192   :  { %6780 = vmatprep.subr.bf16.mxu0 %v14196_v19  ;;  %v881_v15 = vld [vmem:[#allocation5 + $0x1448] sm:$0xff]  ;;  %v14099_v19 = vcombine.low %v889_v4, %v897_v5 }
 0x193   :  { %6820 = vmatpush1.bf16.msra.mxu1 %v14211_v18  ;;  %v1129_v16 = vld [vmem:[#allocation5 + $0x1c08] sm:$0xff]  ;;  %v14084_v21 = vcombine.high %v873_v14, %v881_v15  ;;  %v14083_v30 = vcombine.low %v873_v14, %v881_v15 }
 0x194   :  { %6821 = vmatprep.subr.bf16.mxu1 %v14452_v23  ;;  %v1137_v18 = vld [vmem:[#allocation5 + $0x1c48] sm:$0xff]  ;;  %v354_v23 = vld [vmem:[#allocation5 + $0x3d0] sm:$0xff] }
 0x195   :  { %6781 = vmatpush2.bf16.msra.mxu0 %v14195_v26  ;;  %v14340_v26 = vcombine.high %v1129_v16, %v1137_v18  ;;  %v14339_v34 = vcombine.low %v1129_v16, %v1137_v18  ;;  %v282_v16 = vld [vmem:[#allocation5 + $0x190] sm:$0xff] }
 0x196   :  { %6782 = vmatprep.subr.bf16.mxu0 %v14180_v29  ;;  %v1256_v29 = vld [vmem:[#allocation7] sm:$0xff]  ;;  %v538_v18 = vld [vmem:[#allocation5 + $0x990] sm:$0xff] }
 0x197   :  { %6822 = vmatpush2.bf16.msra.mxu1 %v14451_v27  ;;  %v610_v27 = vld [vmem:[#allocation5 + $0xbd0] sm:$0xff]  ;;  %v1263_v42 = vrot.slane %v1256_v29, %v16908_v31  ;;  %v1267_v50 = vrot.slane %v1256_v29, %v16911_v40 }
 0x198   :  { %6823 = vmatprep.subr.bf16.mxu1 %v14436_v63  ;;  %v13558_v63 = vcombine.high %v346_v22, %v354_v23  ;;  %v13813_v45 = vcombine.low %v602_v25, %v610_v27  ;;  %v522_v29 = vld [vmem:[#allocation5 + $0x910] sm:$0xff] }
 0x199   :  { %6783 = vmatpush2.bf16.msra.mxu0 %v14179_v37  ;;  %v338_v37 = vld [vmem:[#allocation5 + $0x350] sm:$0xff] }
 0x19a   :  { %6784 = vmatprep.subr.bf16.mxu0 %v14164_v39  ;;  %v13814_v39 = vcombine.high %v602_v25, %v610_v27  ;;  %v274_v27 = vld [vmem:[#allocation5 + $0x150] sm:$0xff] }
 0x19b   :  { %6824 = vmatpush2.bf16.msra.mxu1 %v14435_v38  ;;  %v586_v38 = vld [vmem:[#allocation5 + $0xb10] sm:$0xff] }
 0x19c   :  { %6825 = vmatprep.subr.bf16.mxu1 %v14420_v44  ;;  %v13557_v44 = vcombine.low %v346_v22, %v354_v23  ;;  %v13798_v51 = vcombine.high %v586_v38, %v594_v41  ;;  %v13797_v60 = vcombine.low %v586_v38, %v594_v41  ;;  %v250_v38 = vld [vmem:[#allocation5 + $0x90] sm:$0xff] }
 0x19d   :  { %6785 = vmatpush2.bf16.msra.mxu0 %v14163_v46  ;;  %v13542_v46 = vcombine.high %v330_v36, %v338_v37  ;;  %v506_v41 = vld [vmem:[#allocation5 + $0x890] sm:$0xff] }
 0x19e   :  { %6786 = vmatprep.subr.bf16.mxu0 %v14148_v48  ;;  %v322_v48 = vld [vmem:[#allocation5 + $0x2d0] sm:$0xff] }
 0x19f   :  { %6826 = vmatpush2.bf16.msra.mxu1 %v14419_v47  ;;  %v314_v47 = vld [vmem:[#allocation5 + $0x290] sm:$0xff] }
 0x1a0   :  { %6827 = vmatprep.subr.bf16.mxu1 %v14404_v52  ;;  %v578_v52 = vld [vmem:[#allocation5 + $0xad0] sm:$0xff]  ;;  %v13526_v61 = vcombine.high %v314_v47, %v322_v48 }
 0x1a1   :  { %6787 = vmatpush2.bf16.msra.mxu0 %v14147_v56  ;;  %v13782_v5 = vcombine.high %v570_v49, %v578_v52  ;;  %v13781_v14 = vcombine.low %v570_v49, %v578_v52  ;;  %v242_v49 = vld [vmem:[#allocation5 + $0x50] sm:$0xff] }
 0x1a2   :  { %6788 = vmatprep.subr.bf16.mxu0 %v14132_v58  ;;  %v13541_v58 = vcombine.low %v330_v36, %v338_v37  ;;  %v498_v52 = vld [vmem:[#allocation5 + $0x850] sm:$0xff] }
 0x1a3   :  { %6828 = vmatpush2.bf16.msra.mxu1 %v14403_v57 }
 0x1a4   :  { %6829 = vmatprep.subr.bf16.mxu1 %v14388_v62  ;;  %v298_v62 = vld [vmem:[#allocation5 + $0x210] sm:$0xff] }
 0x1a5   :  { %6789 = vmatpush2.bf16.msra.mxu0 %v14131_v1  ;;  %v554_v1 = vld [vmem:[#allocation5 + $0xa10] sm:$0xff]  ;;  %v13510_v15 = vcombine.high %v298_v62, %v306_v0  ;;  %v13509_v22 = vcombine.low %v298_v62, %v306_v0 }
 0x1a6   :  { %6790 = vmatprep.subr.bf16.mxu0 %v14116_v3  ;;  %v13765_v23 = vcombine.low %v554_v1, %v562_v6  ;;  %v738_v62 = vld [vmem:[#allocation5 + $0xfd0] sm:$0xff] }
 0x1a7   :  { %6830 = vmatpush2.bf16.msra.mxu1 %v14387_v2 }
 0x1a8   :  { %6831 = vmatprep.subr.bf16.mxu1 %v14372_v7 }
 0x1a9   :  { %6791 = vmatpush2.bf16.msra.mxu0 %v14115_v10 }
 0x1aa   :  { %6792 = vmatprep.subr.bf16.mxu0 %v14100_v12 }
 0x1ab   :  { %6832 = vmatpush2.bf16.msra.mxu1 %v14371_v11  ;;  %v13525_v11 = vcombine.low %v314_v47, %v322_v48  ;;  %v234_v48 = vld [vmem:[#allocation5 + $0x10] sm:$0xff] }
 0x1ac   :  { %6833 = vmatprep.subr.bf16.mxu1 %v14356_v17  ;;  %v290_v17 = vld [vmem:[#allocation5 + $0x1d0] sm:$0xff]  ;;  %v13445_v0 = vcombine.low %v234_v48, %v242_v49 }
 0x1ad   :  { %6793 = vmatpush2.bf16.msra.mxu0 %v14099_v19  ;;  %v13494_v25 = vcombine.high %v282_v16, %v290_v17 }
 0x1ae   :  { %6794 = vmatprep.subr.bf16.mxu0 %v14084_v21  ;;  %v546_v21 = vld [vmem:[#allocation5 + $0x9d0] sm:$0xff] }
 0x1af   :  { %6834 = vmatpush2.bf16.msra.mxu1 %v14355_v20  ;;  %v13766_v20 = vcombine.high %v554_v1, %v562_v6  ;;  %v13749_v36 = vcombine.low %v538_v18, %v546_v21  ;;  %v714_v6 = vld [vmem:[#allocation5 + $0xf10] sm:$0xff] }
 0x1b0   :  { %6835 = vmatprep.subr.bf16.mxu1 %v14340_v26  ;;  %v266_v26 = vld [vmem:[#allocation5 + $0x110] sm:$0xff] }
 0x1b1   :  { %6795 = vmatpush2.bf16.msra.mxu0 %v14083_v30  ;;  %v13750_v30 = vcombine.high %v538_v18, %v546_v21  ;;  %v13478_v37 = vcombine.high %v266_v26, %v274_v27 }
 0x1b2   :  { %6846 = vmatprep.subr.bf16.mxu0 %v13558_v63  ;;  %v13493_v63 = vcombine.low %v282_v16, %v290_v17  ;;  %v450_v16 = vld [vmem:[#allocation5 + $0x6d0] sm:$0xff] }
 0x1b3   :  { %6836 = vmatpush2.bf16.msra.mxu1 %v14339_v34  ;;  %v530_v34 = vld [vmem:[#allocation5 + $0x950] sm:$0xff] }
 0x1b4   :  { %6887 = vmatprep.subr.bf16.mxu1 %v13814_v39  ;;  %v6552_v54 = vpop.f32.mrf.mxu0  ;;  %6797 = vmatmul.mubr.bf16.vlgmr.msra.gmra.mxu0 %v16872_v33  ;;  %v258_v39 = vld [vmem:[#allocation5 + $0xd0] sm:$0xff] }
 0x1b5   :  { %v6553_v56 = vadd.f32 %v6552_v54, %v1263_v42  ;;  %6847 = vmatpush1.bf16.msra.mxu0 %v13557_v44  ;;  %6878 = vmatprep.mubr.bf16.mxu0 %v16859_v9  ;;  %v13734_v42 = vcombine.high %v522_v29, %v530_v34  ;;  %v514_v44 = vld [vmem:[#allocation5 + $0x8d0] sm:$0xff]  ;;  %v13462_v47 = vcombine.high %v250_v38, %v258_v39 }
 0x1b6   :  { %v6593_v57 = vpop.f32.mrf.mxu1  ;;  %6838 = vmatmul.mubr.bf16.vlgmr.msra.gmra.mxu1 %v16897_v55  ;;  %v6554_v59 = vpop.f32.mrf.mxu0  ;;  %6848 = vmatprep.subr.bf16.mxu0 %v13542_v46  ;;  %v13733_v46 = vcombine.low %v522_v29, %v530_v34  ;;  %v13461_v54 = vcombine.low %v250_v38, %v258_v39  ;;  %v698_v17 = vld [vmem:[#allocation5 + $0xe90] sm:$0xff] }
 0x1b7   :  { %6888 = vmatpush1.bf16.msra.mxu1 %v13813_v45  ;;  %v16917_v2 = vadd.f32 %v6593_v57, %v6553_v56  ;;  %v6555_v3 = vadd.f32 %v6554_v59, %v1267_v50  ;;  %6919 = vmatprep.mubr.bf16.mxu1 %v16864_v13  ;;  %v13477_v45 = vcombine.low %v266_v26, %v274_v27  ;;  %v490_v50 = vld [vmem:[#allocation5 + $0x810] sm:$0xff] }
 0x1b8   :  { %v6595_v4 = vpop.f32.mrf.mxu1  ;;  %6889 = vmatprep.subr.bf16.mxu1 %v13798_v51  ;;  %v6556_v7 = vpop.f32.mrf.mxu0  ;;  %v13718_v51 = vcombine.high %v506_v41, %v514_v44  ;;  %v13717_v56 = vcombine.low %v506_v41, %v514_v44  ;;  %v13446_v57 = vcombine.high %v234_v48, %v242_v49  ;;  %v482_v59 = vld [vmem:[#allocation5 + $0x7d0] sm:$0xff]  ;;  %v13701_v1 = vcombine.low %v490_v50, %v498_v52 }
 0x1b9   :  { %v16921_v8 = vadd.f32 %v6595_v4, %v6555_v3  ;;  %6849 = vmatpush1.bf16.msra.mxu0 %v13541_v58  ;;  %v474_v58 = vld [vmem:[#allocation5 + $0x790] sm:$0xff] }
 0x1ba   :  { %v6597_v10 = vpop.f32.mrf.mxu1  ;;  %v6557_v12 = vpop.f32.mrf.mxu0  ;;  %6850 = vmatprep.subr.bf16.mxu0 %v13526_v61  ;;  %v13702_v61 = vcombine.high %v490_v50, %v498_v52  ;;  %v13686_v3 = vcombine.high %v474_v58, %v482_v59  ;;  %v458_v4 = vld [vmem:[#allocation5 + $0x710] sm:$0xff] }
 0x1bb   :  { %6890 = vmatpush1.bf16.msra.mxu1 %v13797_v60  ;;  %v730_v60 = vld [vmem:[#allocation5 + $0xf90] sm:$0xff] }
 0x1bc   :  { %v6598_v19 = vpop.f32.mrf.mxu1  ;;  %6891 = vmatprep.subr.bf16.mxu1 %v13782_v5  ;;  %v466_v5 = vld [vmem:[#allocation5 + $0x750] sm:$0xff]  ;;  %v13942_v7 = vcombine.high %v730_v60, %v738_v62  ;;  %v13941_v12 = vcombine.low %v730_v60, %v738_v62 }
 0x1bd   :  { %6851 = vmatpush1.bf16.msra.mxu0 %v13525_v11  ;;  %v722_v10 = vld [vmem:[#allocation5 + $0xf50] sm:$0xff]  ;;  %v13685_v11 = vcombine.low %v474_v58, %v482_v59 }
 0x1be   :  { %6852 = vmatprep.subr.bf16.mxu0 %v13510_v15  ;;  %v442_v15 = vld [vmem:[#allocation5 + $0x690] sm:$0xff]  ;;  %v13926_v18 = vcombine.high %v714_v6, %v722_v10  ;;  %v13925_v21 = vcombine.low %v714_v6, %v722_v10 }
 0x1bf   :  { %6892 = vmatpush1.bf16.msra.mxu1 %v13781_v14  ;;  %v13670_v14 = vcombine.high %v458_v4, %v466_v5  ;;  %v706_v19 = vld [vmem:[#allocation5 + $0xed0] sm:$0xff] }
 0x1c0   :  { %6893 = vmatprep.subr.bf16.mxu1 %v13766_v20  ;;  %v13669_v20 = vcombine.low %v458_v4, %v466_v5  ;;  %v682_v26 = vld [vmem:[#allocation5 + $0xe10] sm:$0xff]  ;;  %v13910_v27 = vcombine.high %v698_v17, %v706_v19  ;;  %v13909_v34 = vcombine.low %v698_v17, %v706_v19 }
 0x1c1   :  { %6853 = vmatpush1.bf16.msra.mxu0 %v13509_v22  ;;  %v13654_v22 = vcombine.high %v442_v15, %v450_v16  ;;  %v690_v29 = vld [vmem:[#allocation5 + $0xe50] sm:$0xff] }
 0x1c2   :  { %6854 = vmatprep.subr.bf16.mxu0 %v13494_v25  ;;  %v434_v25 = vld [vmem:[#allocation5 + $0x650] sm:$0xff]  ;;  %v13894_v39 = vcombine.high %v682_v26, %v690_v29  ;;  %v13893_v44 = vcombine.low %v682_v26, %v690_v29 }
 0x1c3   :  { %6894 = vmatpush1.bf16.msra.mxu1 %v13765_v23  ;;  %v426_v23 = vld [vmem:[#allocation5 + $0x610] sm:$0xff] }
 0x1c4   :  { %6895 = vmatprep.subr.bf16.mxu1 %v13750_v30  ;;  %v13653_v30 = vcombine.low %v442_v15, %v450_v16  ;;  %v666_v38 = vld [vmem:[#allocation5 + $0xd90] sm:$0xff] }
 0x1c5   :  { %6855 = vmatpush1.bf16.msra.mxu0 %v13493_v63  ;;  %v13638_v63 = vcombine.high %v426_v23, %v434_v25  ;;  %v674_v41 = vld [vmem:[#allocation5 + $0xdd0] sm:$0xff] }
 0x1c6   :  { %6856 = vmatprep.subr.bf16.mxu0 %v13478_v37  ;;  %v418_v37 = vld [vmem:[#allocation5 + $0x5d0] sm:$0xff]  ;;  %v13878_v49 = vcombine.high %v666_v38, %v674_v41  ;;  %v13877_v52 = vcombine.low %v666_v38, %v674_v41 }
 0x1c7   :  { %6896 = vmatpush1.bf16.msra.mxu1 %v13749_v36  ;;  %v410_v36 = vld [vmem:[#allocation5 + $0x590] sm:$0xff] }
 0x1c8   :  { %6897 = vmatprep.subr.bf16.mxu1 %v13734_v42  ;;  %v13637_v42 = vcombine.low %v426_v23, %v434_v25  ;;  %v650_v48 = vld [vmem:[#allocation5 + $0xd10] sm:$0xff] }
 0x1c9   :  { %6857 = vmatpush1.bf16.msra.mxu0 %v13477_v45  ;;  %v13622_v45 = vcombine.high %v410_v36, %v418_v37  ;;  %v658_v50 = vld [vmem:[#allocation5 + $0xd50] sm:$0xff] }
 0x1ca   :  { %6858 = vmatprep.subr.bf16.mxu0 %v13462_v47  ;;  %v402_v47 = vld [vmem:[#allocation5 + $0x550] sm:$0xff]  ;;  %v13862_v59 = vcombine.high %v650_v48, %v658_v50  ;;  %v13861_v62 = vcombine.low %v650_v48, %v658_v50 }
 0x1cb   :  { %6898 = vmatpush1.bf16.msra.mxu1 %v13733_v46  ;;  %v394_v46 = vld [vmem:[#allocation5 + $0x510] sm:$0xff] }
 0x1cc   :  { %6899 = vmatprep.subr.bf16.mxu1 %v13718_v51  ;;  %v13621_v51 = vcombine.low %v410_v36, %v418_v37  ;;  %v634_v58 = vld [vmem:[#allocation5 + $0xc90] sm:$0xff] }
 0x1cd   :  { %6859 = vmatpush1.bf16.msra.mxu0 %v13461_v54  ;;  %v13606_v54 = vcombine.high %v394_v46, %v402_v47  ;;  %v642_v60 = vld [vmem:[#allocation5 + $0xcd0] sm:$0xff] }
 0x1ce   :  { %6860 = vmatprep.subr.bf16.mxu0 %v13446_v57  ;;  %v386_v57 = vld [vmem:[#allocation5 + $0x4d0] sm:$0xff]  ;;  %v13846_v5 = vcombine.high %v634_v58, %v642_v60  ;;  %v13845_v10 = vcombine.low %v634_v58, %v642_v60 }
 0x1cf   :  { %6900 = vmatpush1.bf16.msra.mxu1 %v13717_v56  ;;  %v378_v56 = vld [vmem:[#allocation5 + $0x490] sm:$0xff] }
 0x1d0   :  { %6901 = vmatprep.subr.bf16.mxu1 %v13702_v61  ;;  %v13605_v61 = vcombine.low %v394_v46, %v402_v47  ;;  %v618_v4 = vld [vmem:[#allocation5 + $0xc10] sm:$0xff] }
 0x1d1   :  { %6861 = vmatpush1.bf16.msra.mxu0 %v13445_v0  ;;  %v13590_v0 = vcombine.high %v378_v56, %v386_v57  ;;  %v626_v6 = vld [vmem:[#allocation5 + $0xc50] sm:$0xff] }
 0x1d2   :  { %6862 = vmatprep.subr.bf16.mxu0 %v13686_v3  ;;  %v370_v3 = vld [vmem:[#allocation5 + $0x450] sm:$0xff]  ;;  %v13830_v16 = vcombine.high %v618_v4, %v626_v6  ;;  %v13829_v19 = vcombine.low %v618_v4, %v626_v6 }
 0x1d3   :  { %6902 = vmatpush1.bf16.msra.mxu1 %v13701_v1  ;;  %v362_v1 = vld [vmem:[#allocation5 + $0x410] sm:$0xff] }
 0x1d4   :  { %6903 = vmatprep.subr.bf16.mxu1 %v13942_v7  ;;  %v13589_v7 = vcombine.low %v378_v56, %v386_v57  ;;  %v1114_v15 = vld [vmem:[#allocation5 + $0x1b90] sm:$0xff] }
 0x1d5   :  { %6863 = vmatpush2.bf16.msra.mxu0 %v13685_v11  ;;  %v13574_v11 = vcombine.high %v362_v1, %v370_v3  ;;  %v1122_v17 = vld [vmem:[#allocation5 + $0x1bd0] sm:$0xff] }
 0x1d6   :  { %6864 = vmatprep.subr.bf16.mxu0 %v13670_v14  ;;  %v866_v14 = vld [vmem:[#allocation5 + $0x13d0] sm:$0xff]  ;;  %v14326_v25 = vcombine.high %v1114_v15, %v1122_v17  ;;  %v14325_v29 = vcombine.low %v1114_v15, %v1122_v17 }
 0x1d7   :  { %6904 = vmatpush2.bf16.msra.mxu1 %v13941_v12  ;;  %v858_v12 = vld [vmem:[#allocation5 + $0x1390] sm:$0xff] }
 0x1d8   :  { %6905 = vmatprep.subr.bf16.mxu1 %v13926_v18  ;;  %v13573_v18 = vcombine.low %v362_v1, %v370_v3  ;;  %v1098_v23 = vld [vmem:[#allocation5 + $0x1b10] sm:$0xff] }
 0x1d9   :  { %6865 = vmatpush2.bf16.msra.mxu0 %v13669_v20  ;;  %v14070_v20 = vcombine.high %v858_v12, %v866_v14  ;;  %v1106_v26 = vld [vmem:[#allocation5 + $0x1b50] sm:$0xff] }
 0x1da   :  { %6866 = vmatprep.subr.bf16.mxu0 %v13654_v22  ;;  %v850_v22 = vld [vmem:[#allocation5 + $0x1350] sm:$0xff]  ;;  %v14310_v37 = vcombine.high %v1098_v23, %v1106_v26  ;;  %v14309_v46 = vcombine.low %v1098_v23, %v1106_v26 }
 0x1db   :  { %6906 = vmatpush2.bf16.msra.mxu1 %v13925_v21  ;;  %v842_v21 = vld [vmem:[#allocation5 + $0x1310] sm:$0xff] }
 0x1dc   :  { %6907 = vmatprep.subr.bf16.mxu1 %v13910_v27  ;;  %v14069_v27 = vcombine.low %v858_v12, %v866_v14  ;;  %v1082_v36 = vld [vmem:[#allocation5 + $0x1a90] sm:$0xff] }
 0x1dd   :  { %6867 = vmatpush2.bf16.msra.mxu0 %v13653_v30  ;;  %v14054_v30 = vcombine.high %v842_v21, %v850_v22  ;;  %v1090_v38 = vld [vmem:[#allocation5 + $0x1ad0] sm:$0xff] }
 0x1de   :  { %6868 = vmatprep.subr.bf16.mxu0 %v13638_v63  ;;  %v834_v63 = vld [vmem:[#allocation5 + $0x12d0] sm:$0xff] }
 0x1df   :  { %6908 = vmatpush2.bf16.msra.mxu1 %v13909_v34  ;;  %v826_v34 = vld [vmem:[#allocation5 + $0x1290] sm:$0xff] }
 0x1e0   :  { %6909 = vmatprep.subr.bf16.mxu1 %v13894_v39  ;;  %v14038_v47 = vcombine.high %v826_v34, %v834_v63  ;;  %v810_v48 = vld [vmem:[#allocation5 + $0x1210] sm:$0xff]  ;;  %v14037_v60 = vcombine.low %v826_v34, %v834_v63 }
 0x1e1   :  { %6869 = vmatpush2.bf16.msra.mxu0 %v13637_v42  ;;  %v1066_v50 = vld [vmem:[#allocation5 + $0x1a10] sm:$0xff] }
 0x1e2   :  { %6870 = vmatprep.subr.bf16.mxu0 %v13622_v45  ;;  %v1074_v56 = vld [vmem:[#allocation5 + $0x1a50] sm:$0xff] }
 0x1e3   :  { %6910 = vmatpush2.bf16.msra.mxu1 %v13893_v44  ;;  %v14053_v44 = vcombine.low %v842_v21, %v850_v22  ;;  %v802_v1 = vld [vmem:[#allocation5 + $0x11d0] sm:$0xff]  ;;  %v14278_v4 = vcombine.high %v1066_v50, %v1074_v56 }
 0x1e4   :  { %6911 = vmatprep.subr.bf16.mxu1 %v13878_v49  ;;  %v818_v49 = vld [vmem:[#allocation5 + $0x1250] sm:$0xff] }
 0x1e5   :  { %6871 = vmatpush2.bf16.msra.mxu0 %v13621_v51  ;;  %v1058_v6 = vld [vmem:[#allocation5 + $0x19d0] sm:$0xff] }
 0x1e6   :  { %6872 = vmatprep.subr.bf16.mxu0 %v13606_v54  ;;  %v778_v12 = vld [vmem:[#allocation5 + $0x1110] sm:$0xff] }
 0x1e7   :  { %6912 = vmatpush2.bf16.msra.mxu1 %v13877_v52  ;;  %v786_v14 = vld [vmem:[#allocation5 + $0x1150] sm:$0xff] }
 0x1e8   :  { %6913 = vmatprep.subr.bf16.mxu1 %v13862_v59  ;;  %v1034_v15 = vld [vmem:[#allocation5 + $0x1910] sm:$0xff] }
 0x1e9   :  { %6873 = vmatpush2.bf16.msra.mxu0 %v13605_v61  ;;  %v1042_v17 = vld [vmem:[#allocation5 + $0x1950] sm:$0xff] }
 0x1ea   :  { %6874 = vmatprep.subr.bf16.mxu0 %v13590_v0  ;;  %v14022_v0 = vcombine.high %v810_v48, %v818_v49  ;;  %v762_v21 = vld [vmem:[#allocation5 + $0x1090] sm:$0xff] }
 0x1eb   :  { %6914 = vmatpush2.bf16.msra.mxu1 %v13861_v62  ;;  %v14293_v62 = vcombine.low %v1082_v36, %v1090_v38  ;;  %v770_v22 = vld [vmem:[#allocation5 + $0x10d0] sm:$0xff] }
 0x1ec   :  { %6915 = vmatprep.subr.bf16.mxu1 %v13846_v5  ;;  %v1050_v5 = vld [vmem:[#allocation5 + $0x1990] sm:$0xff] }
 0x1ed   :  { %6875 = vmatpush2.bf16.msra.mxu0 %v13589_v7  ;;  %v14021_v7 = vcombine.low %v810_v48, %v818_v49  ;;  %v1018_v23 = vld [vmem:[#allocation5 + $0x1890] sm:$0xff] }
 0x1ee   :  { %6876 = vmatprep.subr.bf16.mxu0 %v13574_v11  ;;  %v1026_v26 = vld [vmem:[#allocation5 + $0x18d0] sm:$0xff] }
 0x1ef   :  { %6916 = vmatpush2.bf16.msra.mxu1 %v13845_v10  ;;  %v14277_v10 = vcombine.low %v1066_v50, %v1074_v56  ;;  %v746_v34 = vld [vmem:[#allocation5 + $0x1010] sm:$0xff] }
 0x1f0   :  { %6917 = vmatprep.subr.bf16.mxu1 %v13830_v16  ;;  %v14262_v16 = vcombine.high %v1050_v5, %v1058_v6  ;;  %v754_v63 = vld [vmem:[#allocation5 + $0x1050] sm:$0xff] }
 0x1f1   :  { %6877 = vmatpush2.bf16.msra.mxu0 %v13573_v18  ;;  %v1250_v48 = vld [vmem:[#allocation5 + $0x1fd0] sm:$0xff]  ;;  %v13957_v49 = vcombine.low %v746_v34, %v754_v63 }
 0x1f2   :  { %6928 = vmatprep.subr.bf16.mxu0 %v14070_v20  ;;  %v13990_v20 = vcombine.high %v778_v12, %v786_v14  ;;  %v1226_v56 = vld [vmem:[#allocation5 + $0x1f10] sm:$0xff] }
 0x1f3   :  { %6918 = vmatpush2.bf16.msra.mxu1 %v13829_v19  ;;  %v14261_v19 = vcombine.low %v1050_v5, %v1058_v6 }
 0x1f4   :  { %6969 = vmatprep.subr.bf16.mxu1 %v14326_v25  ;;  %v6634_v39 = vpop.f32.mrf.mxu0  ;;  %6879 = vmatmul.mubr.bf16.vlgmr.msra.gmra.mxu0 %v16878_v24  ;;  %v14246_v25 = vcombine.high %v1034_v15, %v1042_v17 }
 0x1f5   :  { %v6635_v41 = vadd.f32 %v6634_v39, %v16917_v2  ;;  %6929 = vmatpush1.bf16.msra.mxu0 %v14069_v27  ;;  %v14294_v2 = vcombine.high %v1082_v36, %v1090_v38  ;;  %6960 = vmatprep.mubr.bf16.mxu0 %v16881_v35  ;;  %v13989_v27 = vcombine.low %v778_v12, %v786_v14  ;;  %v1002_v36 = vld [vmem:[#allocation5 + $0x1810] sm:$0xff] }
 0x1f6   :  { %v6675_v42 = vpop.f32.mrf.mxu1  ;;  %6920 = vmatmul.mubr.bf16.vlgmr.msra.gmra.mxu1 %v16885_v28  ;;  %v6636_v45 = vpop.f32.mrf.mxu0  ;;  %6930 = vmatprep.subr.bf16.mxu0 %v14054_v30  ;;  %v13974_v30 = vcombine.high %v762_v21, %v770_v22  ;;  %v1010_v38 = vld [vmem:[#allocation5 + $0x1850] sm:$0xff]  ;;  %v13973_v39 = vcombine.low %v762_v21, %v770_v22 }
 0x1f7   :  { %6970 = vmatpush1.bf16.msra.mxu1 %v14325_v29  ;;  %v16926_v51 = vadd.f32 %v6675_v42, %v6635_v41  ;;  %v6637_v52 = vadd.f32 %v6636_v45, %v16921_v8  ;;  %7001 = vmatprep.mubr.bf16.mxu1 %v16890_v53  ;;  %v794_v8 = vld [vmem:[#allocation5 + $0x1190] sm:$0xff]  ;;  %v14245_v29 = vcombine.low %v1034_v15, %v1042_v17 }
 0x1f8   :  { %v6677_v54 = vpop.f32.mrf.mxu1  ;;  %6971 = vmatprep.subr.bf16.mxu1 %v14310_v37  ;;  %v6638_v57 = vpop.f32.mrf.mxu0  ;;  %v14006_v11 = vcombine.high %v794_v8, %v802_v1  ;;  %v14005_v18 = vcombine.low %v794_v8, %v802_v1  ;;  %v14230_v37 = vcombine.high %v1018_v23, %v1026_v26  ;;  %v14229_v41 = vcombine.low %v1018_v23, %v1026_v26  ;;  %v994_v45 = vld [vmem:[#allocation5 + $0x17d0] sm:$0xff] }
 0x1f9   :  { %v16931_v58 = vadd.f32 %v6677_v54, %v6637_v52  ;;  %6931 = vmatpush1.bf16.msra.mxu0 %v14053_v44  ;;  %v13958_v42 = vcombine.high %v746_v34, %v754_v63  ;;  %v986_v44 = vld [vmem:[#allocation5 + $0x1790] sm:$0xff]  ;;  %v14213_v50 = vcombine.low %v1002_v36, %v1010_v38  ;;  %vm7846_vm2 = vcmp.gt.f32.partialorder %v16926_v51, 0.0 }
 0x1fa   :  { %v6679_v59 = vpop.f32.mrf.mxu1  ;;  %v6639_v61 = vpop.f32.mrf.mxu0  ;;  %6932 = vmatprep.subr.bf16.mxu0 %v14038_v47  ;;  %v14214_v47 = vcombine.high %v1002_v36, %v1010_v38  ;;  %v14198_v52 = vcombine.high %v986_v44, %v994_v45  ;;  %v970_v54 = vld [vmem:[#allocation5 + $0x1710] sm:$0xff] }
 0x1fb   :  { %6972 = vmatpush1.bf16.msra.mxu1 %v14309_v46  ;;  %v1242_v46 = vld [vmem:[#allocation5 + $0x1f90] sm:$0xff]  ;;  %vm7847_vm0 = vcmp.gt.f32.partialorder %v16931_v58, 0.0 }
 0x1fc   :  { %v6680_v3 = vpop.f32.mrf.mxu1  ;;  %6973 = vmatprep.subr.bf16.mxu1 %v14294_v2  ;;  %v978_v2 = vld [vmem:[#allocation5 + $0x1750] sm:$0xff]  ;;  %v14454_v57 = vcombine.high %v1242_v46, %v1250_v48  ;;  %v14453_v61 = vcombine.low %v1242_v46, %v1250_v48 }
 0x1fd   :  { %6933 = vmatpush1.bf16.msra.mxu0 %v14037_v60  ;;  %v1234_v59 = vld [vmem:[#allocation5 + $0x1f50] sm:$0xff]  ;;  %v14197_v60 = vcombine.low %v986_v44, %v994_v45  ;;  %v14181_v5 = vcombine.low %v970_v54, %v978_v2 }
 0x1fe   :  { %6934 = vmatprep.subr.bf16.mxu0 %v14022_v0  ;;  %v954_v0 = vld [vmem:[#allocation5 + $0x1690] sm:$0xff]  ;;  %v14438_v3 = vcombine.high %v1226_v56, %v1234_v59  ;;  %v14437_v6 = vcombine.low %v1226_v56, %v1234_v59 }
 0x1ff   :  { %6974 = vmatpush1.bf16.msra.mxu1 %v14293_v62  ;;  %v14182_v62 = vcombine.high %v970_v54, %v978_v2  ;;  %v962_v8 = vld [vmem:[#allocation5 + $0x16d0] sm:$0xff] }
 0x200   :  { %6975 = vmatprep.subr.bf16.mxu1 %v14278_v4  ;;  %v1210_v1 = vld [vmem:[#allocation5 + $0x1e90] sm:$0xff] }
 0x201   :  { %6935 = vmatpush1.bf16.msra.mxu0 %v14021_v7  ;;  %v1218_v4 = vld [vmem:[#allocation5 + $0x1ed0] sm:$0xff]  ;;  %v14166_v7 = vcombine.high %v954_v0, %v962_v8 }
 0x202   :  { %6936 = vmatprep.subr.bf16.mxu0 %v14006_v11  ;;  %v946_v11 = vld [vmem:[#allocation5 + $0x1650] sm:$0xff]  ;;  %v14422_v14 = vcombine.high %v1210_v1, %v1218_v4  ;;  %v14421_v17 = vcombine.low %v1210_v1, %v1218_v4  ;;  %v611_v1 = vld [vmem:[#allocation5 + $0xbd8] sm:$0xff]  ;;  %v16934_v4 = vsub.s32 2, %v16845_v43 }
 0x203   :  { %6976 = vmatpush1.bf16.msra.mxu1 %v14277_v10  ;;  %v938_v10 = vld [vmem:[#allocation5 + $0x1610] sm:$0xff] }
 0x204   :  { %6977 = vmatprep.subr.bf16.mxu1 %v14262_v16  ;;  %v1194_v12 = vld [vmem:[#allocation5 + $0x1e10] sm:$0xff]  ;;  %v14165_v16 = vcombine.low %v954_v0, %v962_v8  ;;  %v603_v0 = vld [vmem:[#allocation5 + $0xb98] sm:$0xff] }
 0x205   :  { %6937 = vmatpush1.bf16.msra.mxu0 %v14005_v18  ;;  %v1202_v15 = vld [vmem:[#allocation5 + $0x1e50] sm:$0xff]  ;;  %v14150_v18 = vcombine.high %v938_v10, %v946_v11 }
 0x206   :  { %6938 = vmatprep.subr.bf16.mxu0 %v13990_v20  ;;  %v930_v20 = vld [vmem:[#allocation5 + $0x15d0] sm:$0xff]  ;;  %v14406_v22 = vcombine.high %v1194_v12, %v1202_v15  ;;  %v14405_v26 = vcombine.low %v1194_v12, %v1202_v15  ;;  %v13816_v12 = vcombine.high %v603_v0, %v611_v1  ;;  %v595_v15 = vld [vmem:[#allocation5 + $0xb58] sm:$0xff] }
 0x207   :  { %6978 = vmatpush1.bf16.msra.mxu1 %v14261_v19  ;;  %v922_v19 = vld [vmem:[#allocation5 + $0x1590] sm:$0xff] }
 0x208   :  { %6979 = vmatprep.subr.bf16.mxu1 %v14246_v25  ;;  %v1178_v21 = vld [vmem:[#allocation5 + $0x1d90] sm:$0xff]  ;;  %v14149_v25 = vcombine.low %v938_v10, %v946_v11  ;;  %v339_v10 = vld [vmem:[#allocation5 + $0x358] sm:$0xff] }
 0x209   :  { %6939 = vmatpush1.bf16.msra.mxu0 %v13989_v27  ;;  %v1186_v23 = vld [vmem:[#allocation5 + $0x1dd0] sm:$0xff]  ;;  %v14134_v27 = vcombine.high %v922_v19, %v930_v20  ;;  %v587_v11 = vld [vmem:[#allocation5 + $0xb18] sm:$0xff] }
 0x20a   :  { %6940 = vmatprep.subr.bf16.mxu0 %v13974_v30  ;;  %v914_v30 = vld [vmem:[#allocation5 + $0x1550] sm:$0xff]  ;;  %v14390_v63 = vcombine.high %v1178_v21, %v1186_v23  ;;  %v14389_v38 = vcombine.low %v1178_v21, %v1186_v23  ;;  %v315_v21 = vld [vmem:[#allocation5 + $0x298] sm:$0xff] }
 0x20b   :  { %6980 = vmatpush1.bf16.msra.mxu1 %v14245_v29  ;;  %v906_v29 = vld [vmem:[#allocation5 + $0x1510] sm:$0xff]  ;;  %v571_v23 = vld [vmem:[#allocation5 + $0xa98] sm:$0xff] }
 0x20c   :  { %6981 = vmatprep.subr.bf16.mxu1 %v14230_v37  ;;  %v1162_v34 = vld [vmem:[#allocation5 + $0x1d10] sm:$0xff]  ;;  %v14133_v37 = vcombine.low %v922_v19, %v930_v20  ;;  %v13815_v19 = vcombine.low %v603_v0, %v611_v1 }
 0x20d   :  { %6941 = vmatpush1.bf16.msra.mxu0 %v13973_v39  ;;  %v1170_v36 = vld [vmem:[#allocation5 + $0x1d50] sm:$0xff]  ;;  %v14118_v39 = vcombine.high %v906_v29, %v914_v30 }
 0x20e   :  { %6942 = vmatprep.subr.bf16.mxu0 %v13958_v42  ;;  %v898_v42 = vld [vmem:[#allocation5 + $0x14d0] sm:$0xff]  ;;  %v14374_v45 = vcombine.high %v1162_v34, %v1170_v36  ;;  %v14373_v48 = vcombine.low %v1162_v34, %v1170_v36 }
 0x20f   :  { %6982 = vmatpush1.bf16.msra.mxu1 %v14229_v41  ;;  %v890_v41 = vld [vmem:[#allocation5 + $0x1490] sm:$0xff] }
 0x210   :  { %6983 = vmatprep.subr.bf16.mxu1 %v14214_v47  ;;  %v1146_v44 = vld [vmem:[#allocation5 + $0x1c90] sm:$0xff]  ;;  %v14117_v47 = vcombine.low %v906_v29, %v914_v30 }
 0x211   :  { %6943 = vmatpush1.bf16.msra.mxu0 %v13957_v49  ;;  %v1154_v46 = vld [vmem:[#allocation5 + $0x1cd0] sm:$0xff]  ;;  %v14102_v49 = vcombine.high %v890_v41, %v898_v42 }
 0x212   :  { %6944 = vmatprep.subr.bf16.mxu0 %v14198_v52  ;;  %v882_v52 = vld [vmem:[#allocation5 + $0x1450] sm:$0xff]  ;;  %v14358_v2 = vcombine.high %v1146_v44, %v1154_v46  ;;  %v14357_v59 = vcombine.low %v1146_v44, %v1154_v46 }
 0x213   :  { %6984 = vmatpush1.bf16.msra.mxu1 %v14213_v50  ;;  %v874_v50 = vld [vmem:[#allocation5 + $0x1410] sm:$0xff] }
 0x214   :  { %6985 = vmatprep.subr.bf16.mxu1 %v14454_v57  ;;  %v1130_v54 = vld [vmem:[#allocation5 + $0x1c10] sm:$0xff]  ;;  %v14101_v57 = vcombine.low %v890_v41, %v898_v42  ;;  %v307_v41 = vld [vmem:[#allocation5 + $0x258] sm:$0xff] }
 0x215   :  { %6945 = vmatpush2.bf16.msra.mxu0 %v14197_v60  ;;  %v1138_v56 = vld [vmem:[#allocation5 + $0x1c50] sm:$0xff]  ;;  %v14086_v60 = vcombine.high %v874_v50, %v882_v52  ;;  %v555_v42 = vld [vmem:[#allocation5 + $0xa18] sm:$0xff] }
 0x216   :  { %6946 = vmatprep.subr.bf16.mxu0 %v14182_v62  ;;  %v355_v62 = vld [vmem:[#allocation5 + $0x3d8] sm:$0xff]  ;;  %v14342_v8 = vcombine.high %v1130_v54, %v1138_v56 }
 0x217   :  { %6986 = vmatpush2.bf16.msra.mxu1 %v14453_v61  ;;  %v347_v61 = vld [vmem:[#allocation5 + $0x398] sm:$0xff] }
 0x218   :  { %6987 = vmatprep.subr.bf16.mxu1 %v14438_v3  ;;  %v14085_v3 = vcombine.low %v874_v50, %v882_v52 }
 0x219   :  { %6947 = vmatpush2.bf16.msra.mxu0 %v14181_v5  ;;  %v14341_v5 = vcombine.low %v1130_v54, %v1138_v56 }
 0x21a   :  { %6948 = vmatprep.subr.bf16.mxu0 %v14166_v7  ;;  %v331_v7 = vld [vmem:[#allocation5 + $0x318] sm:$0xff] }
 0x21b   :  { %6988 = vmatpush2.bf16.msra.mxu1 %v14437_v6  ;;  %v13560_v6 = vcombine.high %v347_v61, %v355_v62  ;;  %v13544_v20 = vcombine.high %v331_v7, %v339_v10 }
 0x21c   :  { %6989 = vmatprep.subr.bf16.mxu1 %v14422_v14  ;;  %v16937_v14 = vsub.s32 3, %v16845_v43 }
 0x21d   :  { %6949 = vmatpush2.bf16.msra.mxu0 %v14165_v16  ;;  %v16351_v16 = vld [vmem:[#allocation7] sm:$0xff] }
 0x21e   :  { %6950 = vmatprep.subr.bf16.mxu0 %v14150_v18  ;;  %v13559_v18 = vcombine.low %v347_v61, %v355_v62  ;;  %v539_v61 = vld [vmem:[#allocation5 + $0x998] sm:$0xff] }
 0x21f   :  { %6990 = vmatpush2.bf16.msra.mxu1 %v14421_v17  ;;  %v1271_v17 = vrot.slane %v16351_v16, %v16934_v4 }
 0x220   :  { %6991 = vmatprep.subr.bf16.mxu1 %v14406_v22  ;;  %v323_v22 = vld [vmem:[#allocation5 + $0x2d8] sm:$0xff] }
 0x221   :  { %6951 = vmatpush2.bf16.msra.mxu0 %v14149_v25  ;;  %v1275_v25 = vrot.slane %v16351_v16, %v16937_v14  ;;  %v13527_v54 = vcombine.low %v315_v21, %v323_v22 }
 0x222   :  { %6952 = vmatprep.subr.bf16.mxu0 %v14134_v27  ;;  %v579_v27 = vld [vmem:[#allocation5 + $0xad8] sm:$0xff] }
 0x223   :  { %6992 = vmatpush2.bf16.msra.mxu1 %v14405_v26  ;;  %v13800_v26 = vcombine.high %v587_v11, %v595_v15  ;;  %v13783_v56 = vcombine.low %v571_v23, %v579_v27 }
 0x224   :  { %6993 = vmatprep.subr.bf16.mxu1 %v14390_v63  ;;  %v13543_v63 = vcombine.low %v331_v7, %v339_v10  ;;  %v275_v7 = vld [vmem:[#allocation5 + $0x158] sm:$0xff] }
 0x225   :  { %6953 = vmatpush2.bf16.msra.mxu0 %v14133_v37  ;;  %v13799_v37 = vcombine.low %v587_v11, %v595_v15  ;;  %v523_v10 = vld [vmem:[#allocation5 + $0x918] sm:$0xff] }
 0x226   :  { %6954 = vmatprep.subr.bf16.mxu0 %v14118_v39  ;;  %v299_v39 = vld [vmem:[#allocation5 + $0x218] sm:$0xff] }
 0x227   :  { %6994 = vmatpush2.bf16.msra.mxu1 %v14389_v38  ;;  %v13528_v38 = vcombine.high %v315_v21, %v323_v22  ;;  %v13511_v1 = vcombine.low %v299_v39, %v307_v41  ;;  %v515_v22 = vld [vmem:[#allocation5 + $0x8d8] sm:$0xff] }
 0x228   :  { %6995 = vmatprep.subr.bf16.mxu1 %v14374_v45 }
 0x229   :  { %6955 = vmatpush2.bf16.msra.mxu0 %v14117_v47  ;;  %v13784_v47 = vcombine.high %v571_v23, %v579_v27  ;;  %v235_v27 = vld [vmem:[#allocation5 + $0x18] sm:$0xff] }
 0x22a   :  { %6956 = vmatprep.subr.bf16.mxu0 %v14102_v49 }
 0x22b   :  { %6996 = vmatpush2.bf16.msra.mxu1 %v14373_v48  ;;  %v563_v48 = vld [vmem:[#allocation5 + $0xa58] sm:$0xff] }
 0x22c   :  { %6997 = vmatprep.subr.bf16.mxu1 %v14358_v2  ;;  %v13768_v0 = vcombine.high %v555_v42, %v563_v48 }
 0x22d   :  { %6957 = vmatpush2.bf16.msra.mxu0 %v14101_v57  ;;  %v13512_v57 = vcombine.high %v299_v39, %v307_v41  ;;  %v475_v39 = vld [vmem:[#allocation5 + $0x798] sm:$0xff] }
 0x22e   :  { %6958 = vmatprep.subr.bf16.mxu0 %v14086_v60  ;;  %v291_v60 = vld [vmem:[#allocation5 + $0x1d8] sm:$0xff] }
 0x22f   :  { %6998 = vmatpush2.bf16.msra.mxu1 %v14357_v59  ;;  %v283_v59 = vld [vmem:[#allocation5 + $0x198] sm:$0xff] }
 0x230   :  { %6999 = vmatprep.subr.bf16.mxu1 %v14342_v8  ;;  %v547_v8 = vld [vmem:[#allocation5 + $0x9d8] sm:$0xff]  ;;  %v13495_v15 = vcombine.low %v283_v59, %v291_v60 }
 0x231   :  { %6959 = vmatpush2.bf16.msra.mxu0 %v14085_v3  ;;  %v13767_v3 = vcombine.low %v555_v42, %v563_v48  ;;  %v13752_v11 = vcombine.high %v539_v61, %v547_v8  ;;  %v13751_v16 = vcombine.low %v539_v61, %v547_v8  ;;  %v483_v41 = vld [vmem:[#allocation5 + $0x7d8] sm:$0xff] }
 0x232   :  { %7010 = vmatprep.subr.bf16.mxu0 %v13560_v6  ;;  %v267_v6 = vld [vmem:[#allocation5 + $0x118] sm:$0xff] }
 0x233   :  { %7000 = vmatpush2.bf16.msra.mxu1 %v14341_v5  ;;  %v13496_v5 = vcombine.high %v283_v59, %v291_v60  ;;  %v13479_v23 = vcombine.low %v267_v6, %v275_v7  ;;  %v731_v42 = vld [vmem:[#allocation5 + $0xf98] sm:$0xff]  ;;  %v13687_v59 = vcombine.low %v475_v39, %v483_v41 }
 0x234   :  { %7051 = vmatprep.subr.bf16.mxu1 %v13816_v12  ;;  %v6716_v29 = vpop.f32.mrf.mxu0  ;;  %6961 = vmatmul.mubr.bf16.vlgmr.msra.gmra.mxu0 %v16872_v33  ;;  %v531_v12 = vld [vmem:[#allocation5 + $0x958] sm:$0xff] }
 0x235   :  { %v6717_v30 = vadd.f32 %v6716_v29, %v1271_v17  ;;  %7011 = vmatpush1.bf16.msra.mxu0 %v13559_v18  ;;  %7042 = vmatprep.mubr.bf16.mxu0 %v16859_v9  ;;  %v13480_v17 = vcombine.high %v267_v6, %v275_v7  ;;  %v251_v18 = vld [vmem:[#allocation5 + $0x98] sm:$0xff]  ;;  %v13736_v21 = vcombine.high %v523_v10, %v531_v12 }
 0x236   :  { %v6757_v34 = vpop.f32.mrf.mxu1  ;;  %7002 = vmatmul.mubr.bf16.vlgmr.msra.gmra.mxu1 %v16897_v55  ;;  %v6718_v36 = vpop.f32.mrf.mxu0  ;;  %7012 = vmatprep.subr.bf16.mxu0 %v13544_v20  ;;  %v507_v20 = vld [vmem:[#allocation5 + $0x898] sm:$0xff] }
 0x237   :  { %7052 = vmatpush1.bf16.msra.mxu1 %v13815_v19  ;;  %v16943_v44 = vadd.f32 %v6757_v34, %v6717_v30  ;;  %v6719_v45 = vadd.f32 %v6718_v36, %v1275_v25  ;;  %7083 = vmatprep.mubr.bf16.mxu1 %v16864_v13  ;;  %v259_v19 = vld [vmem:[#allocation5 + $0xd8] sm:$0xff]  ;;  %v13735_v25 = vcombine.low %v523_v10, %v531_v12 }
 0x238   :  { %v6759_v46 = vpop.f32.mrf.mxu1  ;;  %7053 = vmatprep.subr.bf16.mxu1 %v13800_v26  ;;  %v6720_v49 = vpop.f32.mrf.mxu0  ;;  %v13464_v26 = vcombine.high %v251_v18, %v259_v19  ;;  %v243_v29 = vld [vmem:[#allocation5 + $0x58] sm:$0xff]  ;;  %v13720_v34 = vcombine.high %v507_v20, %v515_v22  ;;  %v13463_v36 = vcombine.low %v251_v18, %v259_v19 }
 0x239   :  { %v16947_v50 = vadd.f32 %v6759_v46, %v6719_v45  ;;  %7013 = vmatpush1.bf16.msra.mxu0 %v13543_v63  ;;  %v491_v30 = vld [vmem:[#allocation5 + $0x818] sm:$0xff]  ;;  %v13688_v49 = vcombine.high %v475_v39, %v483_v41 }
 0x23a   :  { %v6761_v52 = vpop.f32.mrf.mxu1  ;;  %v6721_v2 = vpop.f32.mrf.mxu0  ;;  %7014 = vmatprep.subr.bf16.mxu0 %v13528_v38  ;;  %v499_v63 = vld [vmem:[#allocation5 + $0x858] sm:$0xff]  ;;  %v13448_v38 = vcombine.high %v235_v27, %v243_v29 }
 0x23b   :  { %7054 = vmatpush1.bf16.msra.mxu1 %v13799_v37  ;;  %v13719_v37 = vcombine.low %v507_v20, %v515_v22  ;;  %v13704_v45 = vcombine.high %v491_v30, %v499_v63  ;;  %v739_v46 = vld [vmem:[#allocation5 + $0xfd8] sm:$0xff]  ;;  %v13703_v48 = vcombine.low %v491_v30, %v499_v63 }
 0x23c   :  { %v6762_v62 = vpop.f32.mrf.mxu1  ;;  %7055 = vmatprep.subr.bf16.mxu1 %v13784_v47  ;;  %v13447_v47 = vcombine.low %v235_v27, %v243_v29  ;;  %v459_v52 = vld [vmem:[#allocation5 + $0x718] sm:$0xff]  ;;  %v13943_v60 = vcombine.low %v731_v42, %v739_v46 }
 0x23d   :  { %7015 = vmatpush1.bf16.msra.mxu0 %v13527_v54  ;;  %v467_v54 = vld [vmem:[#allocation5 + $0x758] sm:$0xff] }
 0x23e   :  { %7016 = vmatprep.subr.bf16.mxu0 %v13512_v57  ;;  %v715_v2 = vld [vmem:[#allocation5 + $0xf18] sm:$0xff]  ;;  %v13672_v61 = vcombine.high %v459_v52, %v467_v54 }
 0x23f   :  { %7056 = vmatpush1.bf16.msra.mxu1 %v13783_v56  ;;  %v13944_v56 = vcombine.high %v731_v42, %v739_v46  ;;  %v723_v57 = vld [vmem:[#allocation5 + $0xf58] sm:$0xff] }
 0x240   :  { %7057 = vmatprep.subr.bf16.mxu1 %v13768_v0  ;;  %v443_v62 = vld [vmem:[#allocation5 + $0x698] sm:$0xff]  ;;  %v13927_v6 = vcombine.low %v715_v2, %v723_v57 }
 0x241   :  { %7017 = vmatpush1.bf16.msra.mxu0 %v13511_v1  ;;  %v451_v0 = vld [vmem:[#allocation5 + $0x6d8] sm:$0xff]  ;;  %v13928_v1 = vcombine.high %v715_v2, %v723_v57 }
 0x242   :  { %7018 = vmatprep.subr.bf16.mxu0 %v13496_v5  ;;  %v699_v8 = vld [vmem:[#allocation5 + $0xe98] sm:$0xff]  ;;  %v13671_v5 = vcombine.low %v459_v52, %v467_v54  ;;  %v13656_v7 = vcombine.high %v443_v62, %v451_v0 }
 0x243   :  { %7058 = vmatpush1.bf16.msra.mxu1 %v13767_v3  ;;  %v707_v3 = vld [vmem:[#allocation5 + $0xed8] sm:$0xff] }
 0x244   :  { %7059 = vmatprep.subr.bf16.mxu1 %v13752_v11  ;;  %v427_v10 = vld [vmem:[#allocation5 + $0x618] sm:$0xff]  ;;  %v13911_v18 = vcombine.low %v699_v8, %v707_v3 }
 0x245   :  { %7019 = vmatpush1.bf16.msra.mxu0 %v13495_v15  ;;  %v435_v11 = vld [vmem:[#allocation5 + $0x658] sm:$0xff]  ;;  %v13912_v15 = vcombine.high %v699_v8, %v707_v3 }
 0x246   :  { %7020 = vmatprep.subr.bf16.mxu0 %v13480_v17  ;;  %v683_v12 = vld [vmem:[#allocation5 + $0xe18] sm:$0xff]  ;;  %v13655_v17 = vcombine.low %v443_v62, %v451_v0  ;;  %v13640_v19 = vcombine.high %v427_v10, %v435_v11 }
 0x247   :  { %7060 = vmatpush1.bf16.msra.mxu1 %v13751_v16  ;;  %v691_v16 = vld [vmem:[#allocation5 + $0xe58] sm:$0xff] }
 0x248   :  { %7061 = vmatprep.subr.bf16.mxu1 %v13736_v21  ;;  %v411_v20 = vld [vmem:[#allocation5 + $0x598] sm:$0xff]  ;;  %v13895_v27 = vcombine.low %v683_v12, %v691_v16 }
 0x249   :  { %7021 = vmatpush1.bf16.msra.mxu0 %v13479_v23  ;;  %v419_v21 = vld [vmem:[#allocation5 + $0x5d8] sm:$0xff]  ;;  %v13896_v23 = vcombine.high %v683_v12, %v691_v16 }
 0x24a   :  { %7022 = vmatprep.subr.bf16.mxu0 %v13464_v26  ;;  %v667_v22 = vld [vmem:[#allocation5 + $0xd98] sm:$0xff]  ;;  %v13639_v26 = vcombine.low %v427_v10, %v435_v11  ;;  %v13624_v29 = vcombine.high %v411_v20, %v419_v21 }
 0x24b   :  { %7062 = vmatpush1.bf16.msra.mxu1 %v13735_v25  ;;  %v675_v25 = vld [vmem:[#allocation5 + $0xdd8] sm:$0xff] }
 0x24c   :  { %7063 = vmatprep.subr.bf16.mxu1 %v13720_v34  ;;  %v395_v30 = vld [vmem:[#allocation5 + $0x518] sm:$0xff]  ;;  %v13879_v39 = vcombine.low %v667_v22, %v675_v25 }
 0x24d   :  { %7023 = vmatpush1.bf16.msra.mxu0 %v13463_v36  ;;  %v403_v34 = vld [vmem:[#allocation5 + $0x558] sm:$0xff]  ;;  %v13880_v36 = vcombine.high %v667_v22, %v675_v25 }
 0x24e   :  { %7024 = vmatprep.subr.bf16.mxu0 %v13448_v38  ;;  %v651_v63 = vld [vmem:[#allocation5 + $0xd18] sm:$0xff]  ;;  %v13623_v38 = vcombine.low %v411_v20, %v419_v21  ;;  %v13608_v41 = vcombine.high %v395_v30, %v403_v34 }
 0x24f   :  { %7064 = vmatpush1.bf16.msra.mxu1 %v13719_v37  ;;  %v659_v37 = vld [vmem:[#allocation5 + $0xd58] sm:$0xff] }
 0x250   :  { %7065 = vmatprep.subr.bf16.mxu1 %v13704_v45  ;;  %v13864_v42 = vcombine.high %v651_v63, %v659_v37  ;;  %v379_v45 = vld [vmem:[#allocation5 + $0x498] sm:$0xff]  ;;  %v13863_v52 = vcombine.low %v651_v63, %v659_v37 }
 0x251   :  { %7025 = vmatpush1.bf16.msra.mxu0 %v13447_v47  ;;  %v387_v46 = vld [vmem:[#allocation5 + $0x4d8] sm:$0xff] }
 0x252   :  { %7026 = vmatprep.subr.bf16.mxu0 %v13688_v49  ;;  %v635_v47 = vld [vmem:[#allocation5 + $0xc98] sm:$0xff]  ;;  %v13607_v49 = vcombine.low %v395_v30, %v403_v34  ;;  %v13592_v54 = vcombine.high %v379_v45, %v387_v46 }
 0x253   :  { %7066 = vmatpush1.bf16.msra.mxu1 %v13703_v48  ;;  %v643_v48 = vld [vmem:[#allocation5 + $0xcd8] sm:$0xff] }
 0x254   :  { %7067 = vmatprep.subr.bf16.mxu1 %v13944_v56  ;;  %v13848_v2 = vcombine.high %v635_v47, %v643_v48  ;;  %v363_v56 = vld [vmem:[#allocation5 + $0x418] sm:$0xff]  ;;  %v13847_v62 = vcombine.low %v635_v47, %v643_v48 }
 0x255   :  { %7027 = vmatpush2.bf16.msra.mxu0 %v13687_v59  ;;  %v371_v57 = vld [vmem:[#allocation5 + $0x458] sm:$0xff] }
 0x256   :  { %7028 = vmatprep.subr.bf16.mxu0 %v13672_v61  ;;  %v619_v59 = vld [vmem:[#allocation5 + $0xc18] sm:$0xff]  ;;  %v13591_v61 = vcombine.low %v379_v45, %v387_v46  ;;  %v13576_v0 = vcombine.high %v363_v56, %v371_v57 }
 0x257   :  { %7068 = vmatpush2.bf16.msra.mxu1 %v13943_v60  ;;  %v627_v60 = vld [vmem:[#allocation5 + $0xc58] sm:$0xff] }
 0x258   :  { %7069 = vmatprep.subr.bf16.mxu1 %v13928_v1  ;;  %v13832_v8 = vcombine.high %v619_v59, %v627_v60  ;;  %v859_v1 = vld [vmem:[#allocation5 + $0x1398] sm:$0xff]  ;;  %v13831_v10 = vcombine.low %v619_v59, %v627_v60 }
 0x259   :  { %7029 = vmatpush2.bf16.msra.mxu0 %v13671_v5  ;;  %v867_v3 = vld [vmem:[#allocation5 + $0x13d8] sm:$0xff] }
 0x25a   :  { %7030 = vmatprep.subr.bf16.mxu0 %v13656_v7  ;;  %v1115_v5 = vld [vmem:[#allocation5 + $0x1b98] sm:$0xff]  ;;  %v13575_v7 = vcombine.low %v363_v56, %v371_v57  ;;  %v14072_v11 = vcombine.high %v859_v1, %v867_v3 }
 0x25b   :  { %7070 = vmatpush2.bf16.msra.mxu1 %v13927_v6  ;;  %v1123_v6 = vld [vmem:[#allocation5 + $0x1bd8] sm:$0xff] }
 0x25c   :  { %7071 = vmatprep.subr.bf16.mxu1 %v13912_v15  ;;  %v14328_v12 = vcombine.high %v1115_v5, %v1123_v6  ;;  %v843_v15 = vld [vmem:[#allocation5 + $0x1318] sm:$0xff]  ;;  %v14327_v20 = vcombine.low %v1115_v5, %v1123_v6 }
 0x25d   :  { %7031 = vmatpush2.bf16.msra.mxu0 %v13655_v17  ;;  %v851_v16 = vld [vmem:[#allocation5 + $0x1358] sm:$0xff] }
 0x25e   :  { %7032 = vmatprep.subr.bf16.mxu0 %v13640_v19  ;;  %v1099_v17 = vld [vmem:[#allocation5 + $0x1b18] sm:$0xff]  ;;  %v14071_v19 = vcombine.low %v859_v1, %v867_v3  ;;  %v14056_v21 = vcombine.high %v843_v15, %v851_v16  ;;  %v14055_v63 = vcombine.low %v843_v15, %v851_v16 }
 0x25f   :  { %7072 = vmatpush2.bf16.msra.mxu1 %v13911_v18  ;;  %v1107_v18 = vld [vmem:[#allocation5 + $0x1b58] sm:$0xff] }
 0x260   :  { %7073 = vmatprep.subr.bf16.mxu1 %v13896_v23  ;;  %v14312_v22 = vcombine.high %v1099_v17, %v1107_v18  ;;  %v827_v23 = vld [vmem:[#allocation5 + $0x1298] sm:$0xff]  ;;  %v14311_v37 = vcombine.low %v1099_v17, %v1107_v18 }
 0x261   :  { %7033 = vmatpush2.bf16.msra.mxu0 %v13639_v26  ;;  %v835_v25 = vld [vmem:[#allocation5 + $0x12d8] sm:$0xff] }
 0x262   :  { %7034 = vmatprep.subr.bf16.mxu0 %v13624_v29  ;;  %v1091_v29 = vld [vmem:[#allocation5 + $0x1ad8] sm:$0xff] }
 0x263   :  { %7074 = vmatpush2.bf16.msra.mxu1 %v13895_v27  ;;  %v1083_v27 = vld [vmem:[#allocation5 + $0x1a98] sm:$0xff] }
 0x264   :  { %7075 = vmatprep.subr.bf16.mxu1 %v13880_v36  ;;  %v14296_v45 = vcombine.high %v1083_v27, %v1091_v29  ;;  %v811_v46 = vld [vmem:[#allocation5 + $0x1218] sm:$0xff] }
 0x265   :  { %7035 = vmatpush2.bf16.msra.mxu0 %v13623_v38  ;;  %v14040_v38 = vcombine.high %v827_v23, %v835_v25  ;;  %v819_v47 = vld [vmem:[#allocation5 + $0x1258] sm:$0xff] }
 0x266   :  { %7036 = vmatprep.subr.bf16.mxu0 %v13608_v41  ;;  %v1067_v48 = vld [vmem:[#allocation5 + $0x1a18] sm:$0xff]  ;;  %v14024_v57 = vcombine.high %v811_v46, %v819_v47  ;;  %v14023_v1 = vcombine.low %v811_v46, %v819_v47 }
 0x267   :  { %7076 = vmatpush2.bf16.msra.mxu1 %v13879_v39  ;;  %v1243_v46 = vld [vmem:[#allocation5 + $0x1f98] sm:$0xff] }
 0x268   :  { %7077 = vmatprep.subr.bf16.mxu1 %v13864_v42  ;;  %v1251_v47 = vld [vmem:[#allocation5 + $0x1fd8] sm:$0xff] }
 0x269   :  { %7037 = vmatpush2.bf16.msra.mxu0 %v13607_v49  ;;  %v1075_v49 = vld [vmem:[#allocation5 + $0x1a58] sm:$0xff] }
 0x26a   :  { %7038 = vmatprep.subr.bf16.mxu0 %v13592_v54  ;;  %v14280_v60 = vcombine.high %v1067_v48, %v1075_v49  ;;  %v14279_v3 = vcombine.low %v1067_v48, %v1075_v49 }
 0x26b   :  { %7078 = vmatpush2.bf16.msra.mxu1 %v13863_v52 }
 0x26c   :  { %7079 = vmatprep.subr.bf16.mxu1 %v13848_v2  ;;  %v14039_v2 = vcombine.low %v827_v23, %v835_v25 }
 0x26d   :  { %7039 = vmatpush2.bf16.msra.mxu0 %v13591_v61  ;;  %v795_v61 = vld [vmem:[#allocation5 + $0x1198] sm:$0xff] }
 0x26e   :  { %7040 = vmatprep.subr.bf16.mxu0 %v13576_v0  ;;  %v1051_v0 = vld [vmem:[#allocation5 + $0x1998] sm:$0xff] }
 0x26f   :  { %7080 = vmatpush2.bf16.msra.mxu1 %v13847_v62  ;;  %v803_v62 = vld [vmem:[#allocation5 + $0x11d8] sm:$0xff] }
 0x270   :  { %7081 = vmatprep.subr.bf16.mxu1 %v13832_v8  ;;  %v1059_v8 = vld [vmem:[#allocation5 + $0x19d8] sm:$0xff]  ;;  %v14008_v5 = vcombine.high %v795_v61, %v803_v62  ;;  %v14007_v15 = vcombine.low %v795_v61, %v803_v62 }
 0x271   :  { %7041 = vmatpush2.bf16.msra.mxu0 %v13575_v7  ;;  %v14264_v6 = vcombine.high %v1051_v0, %v1059_v8  ;;  %v779_v7 = vld [vmem:[#allocation5 + $0x1118] sm:$0xff]  ;;  %v14263_v16 = vcombine.low %v1051_v0, %v1059_v8 }
 0x272   :  { %7092 = vmatprep.subr.bf16.mxu0 %v14072_v11  ;;  %v1035_v11 = vld [vmem:[#allocation5 + $0x1918] sm:$0xff] }
 0x273   :  { %7082 = vmatpush2.bf16.msra.mxu1 %v13831_v10  ;;  %v787_v10 = vld [vmem:[#allocation5 + $0x1158] sm:$0xff] }
 0x274   :  { %7133 = vmatprep.subr.bf16.mxu1 %v14328_v12  ;;  %v6798_v26 = vpop.f32.mrf.mxu0  ;;  %7043 = vmatmul.mubr.bf16.vlgmr.msra.gmra.mxu0 %v16878_v24  ;;  %v1043_v12 = vld [vmem:[#allocation5 + $0x1958] sm:$0xff]  ;;  %v13992_v17 = vcombine.high %v779_v7, %v787_v10  ;;  %v13991_v23 = vcombine.low %v779_v7, %v787_v10 }
 0x275   :  { %v6799_v30 = vadd.f32 %v6798_v26, %v16943_v44  ;;  %7093 = vmatpush1.bf16.msra.mxu0 %v14071_v19  ;;  %7124 = vmatprep.mubr.bf16.mxu0 %v16881_v35  ;;  %v14248_v18 = vcombine.high %v1035_v11, %v1043_v12  ;;  %v763_v19 = vld [vmem:[#allocation5 + $0x1098] sm:$0xff]  ;;  %v14247_v25 = vcombine.low %v1035_v11, %v1043_v12 }
 0x276   :  { %v6839_v34 = vpop.f32.mrf.mxu1  ;;  %7084 = vmatmul.mubr.bf16.vlgmr.msra.gmra.mxu1 %v16885_v28  ;;  %v6800_v36 = vpop.f32.mrf.mxu0  ;;  %7094 = vmatprep.subr.bf16.mxu0 %v14056_v21  ;;  %v1019_v21 = vld [vmem:[#allocation5 + $0x1898] sm:$0xff] }
 0x277   :  { %7134 = vmatpush1.bf16.msra.mxu1 %v14327_v20  ;;  %v16952_v39 = vadd.f32 %v6839_v34, %v6799_v30  ;;  %v6801_v41 = vadd.f32 %v6800_v36, %v16947_v50  ;;  %7165 = vmatprep.mubr.bf16.mxu1 %v16890_v53  ;;  %v14295_v50 = vcombine.low %v1083_v27, %v1091_v29  ;;  %v771_v20 = vld [vmem:[#allocation5 + $0x10d8] sm:$0xff] }
 0x278   :  { %v6841_v42 = vpop.f32.mrf.mxu1  ;;  %7135 = vmatprep.subr.bf16.mxu1 %v14312_v22  ;;  %v6802_v44 = vpop.f32.mrf.mxu0  ;;  %v1027_v22 = vld [vmem:[#allocation5 + $0x18d8] sm:$0xff]  ;;  %v13976_v26 = vcombine.high %v763_v19, %v771_v20  ;;  %v13975_v36 = vcombine.low %v763_v19, %v771_v20 }
 0x279   :  { %v16957_v52 = vadd.f32 %v6841_v42, %v6801_v41  ;;  %7095 = vmatpush1.bf16.msra.mxu0 %v14055_v63  ;;  %v14232_v27 = vcombine.high %v1019_v21, %v1027_v22  ;;  %v747_v29 = vld [vmem:[#allocation5 + $0x1018] sm:$0xff]  ;;  %vm7848_vm3 = vcmp.gt.f32.partialorder %v16952_v39, 0.0 }
 0x27a   :  { %v6843_v54 = vpop.f32.mrf.mxu1  ;;  %v6803_v56 = vpop.f32.mrf.mxu0  ;;  %7096 = vmatprep.subr.bf16.mxu0 %v14040_v38  ;;  %v755_v30 = vld [vmem:[#allocation5 + $0x1058] sm:$0xff] }
 0x27b   :  { %7136 = vmatpush1.bf16.msra.mxu1 %v14311_v37  ;;  %v1003_v34 = vld [vmem:[#allocation5 + $0x1818] sm:$0xff]  ;;  %v14231_v37 = vcombine.low %v1019_v21, %v1027_v22  ;;  %v13960_v38 = vcombine.high %v747_v29, %v755_v30  ;;  %v13959_v44 = vcombine.low %v747_v29, %v755_v30  ;;  %v14456_v54 = vcombine.high %v1243_v46, %v1251_v47 }
 0x27c   :  { %v6844_v59 = vpop.f32.mrf.mxu1  ;;  %7137 = vmatprep.subr.bf16.mxu1 %v14296_v45  ;;  %v1011_v63 = vld [vmem:[#allocation5 + $0x1858] sm:$0xff]  ;;  %vm7849_vm1 = vcmp.gt.f32.partialorder %v16957_v52, 0.0 }
 0x27d   :  { %7097 = vmatpush1.bf16.msra.mxu0 %v14039_v2  ;;  %v14216_v41 = vcombine.high %v1003_v34, %v1011_v63  ;;  %v987_v42 = vld [vmem:[#allocation5 + $0x1798] sm:$0xff]  ;;  %v14215_v48 = vcombine.low %v1003_v34, %v1011_v63 }
 0x27e   :  { %7098 = vmatprep.subr.bf16.mxu0 %v14024_v57  ;;  %v995_v45 = vld [vmem:[#allocation5 + $0x17d8] sm:$0xff] }
 0x27f   :  { %7138 = vmatpush1.bf16.msra.mxu1 %v14295_v50  ;;  %v14200_v49 = vcombine.high %v987_v42, %v995_v45  ;;  %v971_v2 = vld [vmem:[#allocation5 + $0x1718] sm:$0xff]  ;;  %v14199_v59 = vcombine.low %v987_v42, %v995_v45 }
 0x280   :  { %7139 = vmatprep.subr.bf16.mxu1 %v14280_v60  ;;  %v979_v56 = vld [vmem:[#allocation5 + $0x1758] sm:$0xff]  ;;  %v14455_v60 = vcombine.low %v1243_v46, %v1251_v47 }
 0x281   :  { %7099 = vmatpush1.bf16.msra.mxu0 %v14023_v1  ;;  %v1227_v50 = vld [vmem:[#allocation5 + $0x1f18] sm:$0xff]  ;;  %v14184_v61 = vcombine.high %v971_v2, %v979_v56 }
 0x282   :  { %7100 = vmatprep.subr.bf16.mxu0 %v14008_v5  ;;  %v1235_v57 = vld [vmem:[#allocation5 + $0x1f58] sm:$0xff]  ;;  %v14183_v5 = vcombine.low %v971_v2, %v979_v56 }
 0x283   :  { %7140 = vmatpush1.bf16.msra.mxu1 %v14279_v3  ;;  %v14440_v62 = vcombine.high %v1227_v50, %v1235_v57  ;;  %v955_v0 = vld [vmem:[#allocation5 + $0x1698] sm:$0xff] }
 0x284   :  { %7141 = vmatprep.subr.bf16.mxu1 %v14264_v6  ;;  %v963_v8 = vld [vmem:[#allocation5 + $0x16d8] sm:$0xff]  ;;  %v14439_v6 = vcombine.low %v1227_v50, %v1235_v57 }
 0x285   :  { %7101 = vmatpush1.bf16.msra.mxu0 %v14007_v15  ;;  %v1211_v1 = vld [vmem:[#allocation5 + $0x1e98] sm:$0xff]  ;;  %v14168_v7 = vcombine.high %v955_v0, %v963_v8 }
 0x286   :  { %7102 = vmatprep.subr.bf16.mxu0 %v13992_v17  ;;  %v1219_v3 = vld [vmem:[#allocation5 + $0x1ed8] sm:$0xff]  ;;  %v14167_v17 = vcombine.low %v955_v0, %v963_v8 }
 0x287   :  { %7142 = vmatpush1.bf16.msra.mxu1 %v14263_v16  ;;  %v14424_v10 = vcombine.high %v1211_v1, %v1219_v3  ;;  %v939_v11 = vld [vmem:[#allocation5 + $0x1618] sm:$0xff] }
 0x288   :  { %7143 = vmatprep.subr.bf16.mxu1 %v14248_v18  ;;  %v947_v12 = vld [vmem:[#allocation5 + $0x1658] sm:$0xff]  ;;  %v14423_v18 = vcombine.low %v1211_v1, %v1219_v3  ;;  %v348_v1 = vld [vmem:[#allocation5 + $0x3a0] sm:$0xff] }
 0x289   :  { %7103 = vmatpush1.bf16.msra.mxu0 %v13991_v23  ;;  %v1195_v15 = vld [vmem:[#allocation5 + $0x1e18] sm:$0xff]  ;;  %v14152_v19 = vcombine.high %v939_v11, %v947_v12  ;;  %v356_v3 = vld [vmem:[#allocation5 + $0x3e0] sm:$0xff] }
 0x28a   :  { %7104 = vmatprep.subr.bf16.mxu0 %v13976_v26  ;;  %v1203_v16 = vld [vmem:[#allocation5 + $0x1e58] sm:$0xff]  ;;  %v14151_v26 = vcombine.low %v939_v11, %v947_v12  ;;  %v13562_v12 = vcombine.high %v348_v1, %v356_v3 }
 0x28b   :  { %7144 = vmatpush1.bf16.msra.mxu1 %v14247_v25  ;;  %v14408_v20 = vcombine.high %v1195_v15, %v1203_v16  ;;  %v923_v21 = vld [vmem:[#allocation5 + $0x1598] sm:$0xff] }
 0x28c   :  { %7145 = vmatprep.subr.bf16.mxu1 %v14232_v27  ;;  %v931_v22 = vld [vmem:[#allocation5 + $0x15d8] sm:$0xff]  ;;  %v14407_v27 = vcombine.low %v1195_v15, %v1203_v16  ;;  %v16963_v16 = vsub.s32 5, %v16845_v43 }
 0x28d   :  { %7105 = vmatpush1.bf16.msra.mxu0 %v13975_v36  ;;  %v1179_v23 = vld [vmem:[#allocation5 + $0x1d98] sm:$0xff]  ;;  %v14136_v29 = vcombine.high %v923_v21, %v931_v22 }
 0x28e   :  { %7106 = vmatprep.subr.bf16.mxu0 %v13960_v38  ;;  %v1187_v25 = vld [vmem:[#allocation5 + $0x1dd8] sm:$0xff]  ;;  %v14135_v38 = vcombine.low %v923_v21, %v931_v22  ;;  %v16965_v21 = vld [vmem:[#allocation7] sm:$0xff] }
 0x28f   :  { %7146 = vmatpush1.bf16.msra.mxu1 %v14231_v37  ;;  %v14392_v30 = vcombine.high %v1179_v23, %v1187_v25  ;;  %v907_v34 = vld [vmem:[#allocation5 + $0x1518] sm:$0xff] }
 0x290   :  { %7147 = vmatprep.subr.bf16.mxu1 %v14216_v41  ;;  %v915_v63 = vld [vmem:[#allocation5 + $0x1558] sm:$0xff]  ;;  %v14391_v41 = vcombine.low %v1179_v23, %v1187_v25  ;;  %v13561_v23 = vcombine.low %v348_v1, %v356_v3 }
 0x291   :  { %7107 = vmatpush1.bf16.msra.mxu0 %v13959_v44  ;;  %v1163_v36 = vld [vmem:[#allocation5 + $0x1d18] sm:$0xff]  ;;  %v14120_v42 = vcombine.high %v907_v34, %v915_v63 }
 0x292   :  { %7108 = vmatprep.subr.bf16.mxu0 %v14200_v49  ;;  %v1171_v37 = vld [vmem:[#allocation5 + $0x1d58] sm:$0xff]  ;;  %v14119_v49 = vcombine.low %v907_v34, %v915_v63  ;;  %v324_v34 = vld [vmem:[#allocation5 + $0x2e0] sm:$0xff] }
 0x293   :  { %7148 = vmatpush1.bf16.msra.mxu1 %v14215_v48  ;;  %v14376_v45 = vcombine.high %v1163_v36, %v1171_v37  ;;  %v891_v46 = vld [vmem:[#allocation5 + $0x1498] sm:$0xff] }
 0x294   :  { %7149 = vmatprep.subr.bf16.mxu1 %v14456_v54  ;;  %v899_v47 = vld [vmem:[#allocation5 + $0x14d8] sm:$0xff]  ;;  %v14375_v54 = vcombine.low %v1163_v36, %v1171_v37  ;;  %v572_v36 = vld [vmem:[#allocation5 + $0xaa0] sm:$0xff] }
 0x295   :  { %7109 = vmatpush2.bf16.msra.mxu0 %v14199_v59  ;;  %v1147_v44 = vld [vmem:[#allocation5 + $0x1c98] sm:$0xff]  ;;  %v14104_v2 = vcombine.high %v891_v46, %v899_v47  ;;  %v580_v37 = vld [vmem:[#allocation5 + $0xae0] sm:$0xff] }
 0x296   :  { %7110 = vmatprep.subr.bf16.mxu0 %v14184_v61  ;;  %v1155_v48 = vld [vmem:[#allocation5 + $0x1cd8] sm:$0xff]  ;;  %v14103_v61 = vcombine.low %v891_v46, %v899_v47 }
 0x297   :  { %7150 = vmatpush2.bf16.msra.mxu1 %v14455_v60  ;;  %v14360_v56 = vcombine.high %v1147_v44, %v1155_v48  ;;  %v875_v50 = vld [vmem:[#allocation5 + $0x1418] sm:$0xff] }
 0x298   :  { %7151 = vmatprep.subr.bf16.mxu1 %v14440_v62  ;;  %v883_v57 = vld [vmem:[#allocation5 + $0x1458] sm:$0xff]  ;;  %v14359_v62 = vcombine.low %v1147_v44, %v1155_v48 }
 0x299   :  { %7111 = vmatpush2.bf16.msra.mxu0 %v14183_v5  ;;  %v1131_v59 = vld [vmem:[#allocation5 + $0x1c18] sm:$0xff]  ;;  %v14088_v0 = vcombine.high %v875_v50, %v883_v57  ;;  %v604_v5 = vld [vmem:[#allocation5 + $0xba0] sm:$0xff] }
 0x29a   :  { %7112 = vmatprep.subr.bf16.mxu0 %v14168_v7  ;;  %v1139_v60 = vld [vmem:[#allocation5 + $0x1c58] sm:$0xff]  ;;  %v14087_v7 = vcombine.low %v875_v50, %v883_v57  ;;  %v556_v57 = vld [vmem:[#allocation5 + $0xa20] sm:$0xff] }
 0x29b   :  { %7152 = vmatpush2.bf16.msra.mxu1 %v14439_v6  ;;  %v14344_v8 = vcombine.high %v1131_v59, %v1139_v60  ;;  %v612_v6 = vld [vmem:[#allocation5 + $0xbe0] sm:$0xff]  ;;  %v14343_v11 = vcombine.low %v1131_v59, %v1139_v60 }
 0x29c   :  { %7153 = vmatprep.subr.bf16.mxu1 %v14424_v10  ;;  %v16960_v10 = vsub.s32 4, %v16845_v43  ;;  %v13818_v15 = vcombine.high %v604_v5, %v612_v6  ;;  %v13817_v25 = vcombine.low %v604_v5, %v612_v6  ;;  %v564_v59 = vld [vmem:[#allocation5 + $0xa60] sm:$0xff] }
 0x29d   :  { %7113 = vmatpush2.bf16.msra.mxu0 %v14167_v17  ;;  %v332_v17 = vld [vmem:[#allocation5 + $0x320] sm:$0xff]  ;;  %v13770_v5 = vcombine.high %v556_v57, %v564_v59 }
 0x29e   :  { %7114 = vmatprep.subr.bf16.mxu0 %v14152_v19  ;;  %v588_v19 = vld [vmem:[#allocation5 + $0xb20] sm:$0xff]  ;;  %v1279_v22 = vrot.slane %v16965_v21, %v16960_v10 }
 0x29f   :  { %7154 = vmatpush2.bf16.msra.mxu1 %v14423_v18  ;;  %v340_v18 = vld [vmem:[#allocation5 + $0x360] sm:$0xff] }
 0x2a0   :  { %7155 = vmatprep.subr.bf16.mxu1 %v14408_v20  ;;  %v596_v20 = vld [vmem:[#allocation5 + $0xb60] sm:$0xff] }
 0x2a1   :  { %7115 = vmatpush2.bf16.msra.mxu0 %v14151_v26  ;;  %v13546_v26 = vcombine.high %v332_v17, %v340_v18  ;;  %v13801_v46 = vcombine.low %v588_v19, %v596_v20  ;;  %v284_v6 = vld [vmem:[#allocation5 + $0x1a0] sm:$0xff] }
 0x2a2   :  { %7116 = vmatprep.subr.bf16.mxu0 %v14136_v29  ;;  %v13802_v29 = vcombine.high %v588_v19, %v596_v20  ;;  %v268_v20 = vld [vmem:[#allocation5 + $0x120] sm:$0xff] }
 0x2a3   :  { %7156 = vmatpush2.bf16.msra.mxu1 %v14407_v27  ;;  %v1283_v27 = vrot.slane %v16965_v21, %v16963_v16 }
 0x2a4   :  { %7157 = vmatprep.subr.bf16.mxu1 %v14392_v30  ;;  %v316_v30 = vld [vmem:[#allocation5 + $0x2a0] sm:$0xff] }
 0x2a5   :  { %7117 = vmatpush2.bf16.msra.mxu0 %v14135_v38  ;;  %v13530_v47 = vcombine.high %v316_v30, %v324_v34 }
 0x2a6   :  { %7118 = vmatprep.subr.bf16.mxu0 %v14120_v42  ;;  %v13545_v42 = vcombine.low %v332_v17, %v340_v18  ;;  %v13769_v17 = vcombine.low %v556_v57, %v564_v59  ;;  %v476_v57 = vld [vmem:[#allocation5 + $0x7a0] sm:$0xff] }
 0x2a7   :  { %7158 = vmatpush2.bf16.msra.mxu1 %v14391_v41  ;;  %v484_v59 = vld [vmem:[#allocation5 + $0x7e0] sm:$0xff] }
 0x2a8   :  { %7159 = vmatprep.subr.bf16.mxu1 %v14376_v45 }
 0x2a9   :  { %7119 = vmatpush2.bf16.msra.mxu0 %v14119_v49 }
 0x2aa   :  { %7120 = vmatprep.subr.bf16.mxu0 %v14104_v2  ;;  %v300_v2 = vld [vmem:[#allocation5 + $0x220] sm:$0xff] }
 0x2ab   :  { %7160 = vmatpush2.bf16.msra.mxu1 %v14375_v54  ;;  %v13786_v54 = vcombine.high %v572_v36, %v580_v37 }
 0x2ac   :  { %7161 = vmatprep.subr.bf16.mxu1 %v14360_v56  ;;  %v308_v56 = vld [vmem:[#allocation5 + $0x260] sm:$0xff] }
 0x2ad   :  { %7121 = vmatpush2.bf16.msra.mxu0 %v14103_v61  ;;  %v13514_v1 = vcombine.high %v300_v2, %v308_v56 }
 0x2ae   :  { %7122 = vmatprep.subr.bf16.mxu0 %v14088_v0 }
 0x2af   :  { %7162 = vmatpush2.bf16.msra.mxu1 %v14359_v62  ;;  %v13529_v62 = vcombine.low %v316_v30, %v324_v34  ;;  %v252_v34 = vld [vmem:[#allocation5 + $0xa0] sm:$0xff] }
 0x2b0   :  { %7163 = vmatprep.subr.bf16.mxu1 %v14344_v8  ;;  %v13785_v8 = vcombine.low %v572_v36, %v580_v37  ;;  %v508_v36 = vld [vmem:[#allocation5 + $0x8a0] sm:$0xff] }
 0x2b1   :  { %7123 = vmatpush2.bf16.msra.mxu0 %v14087_v7  ;;  %v292_v7 = vld [vmem:[#allocation5 + $0x1e0] sm:$0xff] }
 0x2b2   :  { %7174 = vmatprep.subr.bf16.mxu0 %v13562_v12  ;;  %v548_v12 = vld [vmem:[#allocation5 + $0x9e0] sm:$0xff]  ;;  %v13498_v18 = vcombine.high %v284_v6, %v292_v7 }
 0x2b3   :  { %7164 = vmatpush2.bf16.msra.mxu1 %v14343_v11  ;;  %v540_v11 = vld [vmem:[#allocation5 + $0x9a0] sm:$0xff] }
 0x2b4   :  { %7215 = vmatprep.subr.bf16.mxu1 %v13818_v15  ;;  %v6880_v63 = vpop.f32.mrf.mxu0  ;;  %7125 = vmatmul.mubr.bf16.vlgmr.msra.gmra.mxu0 %v16872_v33  ;;  %v13513_v15 = vcombine.low %v300_v2, %v308_v56  ;;  %v13754_v19 = vcombine.high %v540_v11, %v548_v12  ;;  %v516_v37 = vld [vmem:[#allocation5 + $0x8e0] sm:$0xff] }
 0x2b5   :  { %v6881_v38 = vadd.f32 %v6880_v63, %v1279_v22  ;;  %7175 = vmatpush1.bf16.msra.mxu0 %v13561_v23  ;;  %7206 = vmatprep.mubr.bf16.mxu0 %v16859_v9  ;;  %v276_v22 = vld [vmem:[#allocation5 + $0x160] sm:$0xff]  ;;  %v13721_v2 = vcombine.low %v508_v36, %v516_v37 }
 0x2b6   :  { %v6921_v41 = vpop.f32.mrf.mxu1  ;;  %7166 = vmatmul.mubr.bf16.vlgmr.msra.gmra.mxu1 %v16897_v55  ;;  %v6882_v45 = vpop.f32.mrf.mxu0  ;;  %7176 = vmatprep.subr.bf16.mxu0 %v13546_v26  ;;  %v524_v23 = vld [vmem:[#allocation5 + $0x920] sm:$0xff]  ;;  %v13497_v26 = vcombine.low %v284_v6, %v292_v7 }
 0x2b7   :  { %7216 = vmatpush1.bf16.msra.mxu1 %v13817_v25  ;;  %v16973_v44 = vadd.f32 %v6921_v41, %v6881_v38  ;;  %v6883_v48 = vadd.f32 %v6882_v45, %v1283_v27  ;;  %7247 = vmatprep.mubr.bf16.mxu1 %v16864_v13  ;;  %v532_v25 = vld [vmem:[#allocation5 + $0x960] sm:$0xff]  ;;  %v13753_v27 = vcombine.low %v540_v11, %v548_v12 }
 0x2b8   :  { %v6923_v49 = vpop.f32.mrf.mxu1  ;;  %7217 = vmatprep.subr.bf16.mxu1 %v13802_v29  ;;  %v6884_v50 = vpop.f32.mrf.mxu0  ;;  %v13482_v29 = vcombine.high %v268_v20, %v276_v22  ;;  %v13738_v30 = vcombine.high %v524_v23, %v532_v25  ;;  %v260_v63 = vld [vmem:[#allocation5 + $0xe0] sm:$0xff]  ;;  %v13481_v38 = vcombine.low %v268_v20, %v276_v22  ;;  %v13737_v41 = vcombine.low %v524_v23, %v532_v25 }
 0x2b9   :  { %v16977_v60 = vadd.f32 %v6923_v49, %v6883_v48  ;;  %7177 = vmatpush1.bf16.msra.mxu0 %v13545_v42  ;;  %v13466_v42 = vcombine.high %v252_v34, %v260_v63  ;;  %v13722_v45 = vcombine.high %v508_v36, %v516_v37  ;;  %v492_v48 = vld [vmem:[#allocation5 + $0x820] sm:$0xff]  ;;  %v13689_v12 = vcombine.low %v476_v57, %v484_v59 }
 0x2ba   :  { %v6925_v61 = vpop.f32.mrf.mxu1  ;;  %v6885_v0 = vpop.f32.mrf.mxu0  ;;  %7178 = vmatprep.subr.bf16.mxu0 %v13530_v47  ;;  %v244_v47 = vld [vmem:[#allocation5 + $0x60] sm:$0xff] }
 0x2bb   :  { %7218 = vmatpush1.bf16.msra.mxu1 %v13801_v46  ;;  %v236_v46 = vld [vmem:[#allocation5 + $0x20] sm:$0xff] }
 0x2bc   :  { %v6926_v3 = vpop.f32.mrf.mxu1  ;;  %7219 = vmatprep.subr.bf16.mxu1 %v13786_v54  ;;  %v500_v49 = vld [vmem:[#allocation5 + $0x860] sm:$0xff]  ;;  %v13465_v54 = vcombine.low %v252_v34, %v260_v63  ;;  %v13450_v56 = vcombine.high %v236_v46, %v244_v47  ;;  %v13449_v0 = vcombine.low %v236_v46, %v244_v47 }
 0x2bd   :  { %7179 = vmatpush1.bf16.msra.mxu0 %v13529_v62  ;;  %v13706_v50 = vcombine.high %v492_v48, %v500_v49  ;;  %v732_v61 = vld [vmem:[#allocation5 + $0xfa0] sm:$0xff] }
 0x2be   :  { %7180 = vmatprep.subr.bf16.mxu0 %v13514_v1  ;;  %v740_v62 = vld [vmem:[#allocation5 + $0xfe0] sm:$0xff]  ;;  %v13690_v1 = vcombine.high %v476_v57, %v484_v59 }
 0x2bf   :  { %7220 = vmatpush1.bf16.msra.mxu1 %v13785_v8  ;;  %v13705_v8 = vcombine.low %v492_v48, %v500_v49  ;;  %v13946_v3 = vcombine.high %v732_v61, %v740_v62  ;;  %v468_v6 = vld [vmem:[#allocation5 + $0x760] sm:$0xff] }
 0x2c0   :  { %7221 = vmatprep.subr.bf16.mxu1 %v13770_v5  ;;  %v460_v5 = vld [vmem:[#allocation5 + $0x720] sm:$0xff] }
 0x2c1   :  { %7181 = vmatpush1.bf16.msra.mxu0 %v13513_v15  ;;  %v716_v7 = vld [vmem:[#allocation5 + $0xf20] sm:$0xff]  ;;  %v13945_v15 = vcombine.low %v732_v61, %v740_v62  ;;  %v13673_v25 = vcombine.low %v460_v5, %v468_v6 }
 0x2c2   :  { %7182 = vmatprep.subr.bf16.mxu0 %v13498_v18  ;;  %v724_v11 = vld [vmem:[#allocation5 + $0xf60] sm:$0xff] }
 0x2c3   :  { %7222 = vmatpush1.bf16.msra.mxu1 %v13769_v17  ;;  %v13674_v17 = vcombine.high %v460_v5, %v468_v6  ;;  %v13930_v18 = vcombine.high %v716_v7, %v724_v11  ;;  %v452_v20 = vld [vmem:[#allocation5 + $0x6e0] sm:$0xff] }
 0x2c4   :  { %7223 = vmatprep.subr.bf16.mxu1 %v13754_v19  ;;  %v444_v19 = vld [vmem:[#allocation5 + $0x6a0] sm:$0xff] }
 0x2c5   :  { %7183 = vmatpush1.bf16.msra.mxu0 %v13497_v26  ;;  %v700_v22 = vld [vmem:[#allocation5 + $0xea0] sm:$0xff]  ;;  %v13929_v26 = vcombine.low %v716_v7, %v724_v11  ;;  %v13657_v37 = vcombine.low %v444_v19, %v452_v20 }
 0x2c6   :  { %7184 = vmatprep.subr.bf16.mxu0 %v13482_v29  ;;  %v708_v23 = vld [vmem:[#allocation5 + $0xee0] sm:$0xff] }
 0x2c7   :  { %7224 = vmatpush1.bf16.msra.mxu1 %v13753_v27  ;;  %v13658_v27 = vcombine.high %v444_v19, %v452_v20  ;;  %v13914_v29 = vcombine.high %v700_v22, %v708_v23  ;;  %v436_v34 = vld [vmem:[#allocation5 + $0x660] sm:$0xff] }
 0x2c8   :  { %7225 = vmatprep.subr.bf16.mxu1 %v13738_v30  ;;  %v428_v30 = vld [vmem:[#allocation5 + $0x620] sm:$0xff] }
 0x2c9   :  { %7185 = vmatpush1.bf16.msra.mxu0 %v13481_v38  ;;  %v684_v63 = vld [vmem:[#allocation5 + $0xe20] sm:$0xff]  ;;  %v13913_v38 = vcombine.low %v700_v22, %v708_v23  ;;  %v13641_v49 = vcombine.low %v428_v30, %v436_v34 }
 0x2ca   :  { %7186 = vmatprep.subr.bf16.mxu0 %v13466_v42  ;;  %v692_v36 = vld [vmem:[#allocation5 + $0xe60] sm:$0xff] }
 0x2cb   :  { %7226 = vmatpush1.bf16.msra.mxu1 %v13737_v41  ;;  %v13642_v41 = vcombine.high %v428_v30, %v436_v34  ;;  %v13898_v42 = vcombine.high %v684_v63, %v692_v36  ;;  %v420_v46 = vld [vmem:[#allocation5 + $0x5e0] sm:$0xff] }
 0x2cc   :  { %7227 = vmatprep.subr.bf16.mxu1 %v13722_v45  ;;  %v412_v45 = vld [vmem:[#allocation5 + $0x5a0] sm:$0xff] }
 0x2cd   :  { %7187 = vmatpush1.bf16.msra.mxu0 %v13465_v54  ;;  %v668_v47 = vld [vmem:[#allocation5 + $0xda0] sm:$0xff]  ;;  %v13897_v54 = vcombine.low %v684_v63, %v692_v36  ;;  %v13625_v62 = vcombine.low %v412_v45, %v420_v46 }
 0x2ce   :  { %7188 = vmatprep.subr.bf16.mxu0 %v13450_v56  ;;  %v676_v48 = vld [vmem:[#allocation5 + $0xde0] sm:$0xff] }
 0x2cf   :  { %7228 = vmatpush1.bf16.msra.mxu1 %v13721_v2  ;;  %v13626_v2 = vcombine.high %v412_v45, %v420_v46  ;;  %v13882_v56 = vcombine.high %v668_v47, %v676_v48  ;;  %v404_v57 = vld [vmem:[#allocation5 + $0x560] sm:$0xff] }
 0x2d0   :  { %7229 = vmatprep.subr.bf16.mxu1 %v13706_v50  ;;  %v396_v50 = vld [vmem:[#allocation5 + $0x520] sm:$0xff] }
 0x2d1   :  { %7189 = vmatpush1.bf16.msra.mxu0 %v13449_v0  ;;  %v652_v59 = vld [vmem:[#allocation5 + $0xd20] sm:$0xff]  ;;  %v13881_v0 = vcombine.low %v668_v47, %v676_v48  ;;  %v13609_v11 = vcombine.low %v396_v50, %v404_v57 }
 0x2d2   :  { %7190 = vmatprep.subr.bf16.mxu0 %v13690_v1  ;;  %v660_v61 = vld [vmem:[#allocation5 + $0xd60] sm:$0xff] }
 0x2d3   :  { %7230 = vmatpush1.bf16.msra.mxu1 %v13705_v8  ;;  %v13610_v8 = vcombine.high %v396_v50, %v404_v57  ;;  %v13866_v1 = vcombine.high %v652_v59, %v660_v61  ;;  %v388_v5 = vld [vmem:[#allocation5 + $0x4e0] sm:$0xff] }
 0x2d4   :  { %7231 = vmatprep.subr.bf16.mxu1 %v13946_v3  ;;  %v380_v3 = vld [vmem:[#allocation5 + $0x4a0] sm:$0xff] }
 0x2d5   :  { %7191 = vmatpush2.bf16.msra.mxu0 %v13689_v12  ;;  %v636_v6 = vld [vmem:[#allocation5 + $0xca0] sm:$0xff]  ;;  %v13865_v12 = vcombine.low %v652_v59, %v660_v61  ;;  %v13593_v23 = vcombine.low %v380_v3, %v388_v5 }
 0x2d6   :  { %7192 = vmatprep.subr.bf16.mxu0 %v13674_v17  ;;  %v644_v7 = vld [vmem:[#allocation5 + $0xce0] sm:$0xff] }
 0x2d7   :  { %7232 = vmatpush2.bf16.msra.mxu1 %v13945_v15  ;;  %v13594_v15 = vcombine.high %v380_v3, %v388_v5  ;;  %v13850_v17 = vcombine.high %v636_v6, %v644_v7  ;;  %v372_v19 = vld [vmem:[#allocation5 + $0x460] sm:$0xff] }
 0x2d8   :  { %7233 = vmatprep.subr.bf16.mxu1 %v13930_v18  ;;  %v364_v18 = vld [vmem:[#allocation5 + $0x420] sm:$0xff] }
 0x2d9   :  { %7193 = vmatpush2.bf16.msra.mxu0 %v13673_v25  ;;  %v620_v20 = vld [vmem:[#allocation5 + $0xc20] sm:$0xff]  ;;  %v13849_v25 = vcombine.low %v636_v6, %v644_v7  ;;  %v13577_v36 = vcombine.low %v364_v18, %v372_v19 }
 0x2da   :  { %7194 = vmatprep.subr.bf16.mxu0 %v13658_v27  ;;  %v628_v22 = vld [vmem:[#allocation5 + $0xc60] sm:$0xff] }
 0x2db   :  { %7234 = vmatpush2.bf16.msra.mxu1 %v13929_v26  ;;  %v13578_v26 = vcombine.high %v364_v18, %v372_v19  ;;  %v13834_v27 = vcombine.high %v620_v20, %v628_v22  ;;  %v868_v30 = vld [vmem:[#allocation5 + $0x13e0] sm:$0xff] }
 0x2dc   :  { %7235 = vmatprep.subr.bf16.mxu1 %v13914_v29  ;;  %v860_v29 = vld [vmem:[#allocation5 + $0x13a0] sm:$0xff] }
 0x2dd   :  { %7195 = vmatpush2.bf16.msra.mxu0 %v13657_v37  ;;  %v1116_v34 = vld [vmem:[#allocation5 + $0x1ba0] sm:$0xff]  ;;  %v13833_v37 = vcombine.low %v620_v20, %v628_v22  ;;  %v14073_v48 = vcombine.low %v860_v29, %v868_v30 }
 0x2de   :  { %7196 = vmatprep.subr.bf16.mxu0 %v13642_v41  ;;  %v1124_v63 = vld [vmem:[#allocation5 + $0x1be0] sm:$0xff] }
 0x2df   :  { %7236 = vmatpush2.bf16.msra.mxu1 %v13913_v38  ;;  %v14074_v38 = vcombine.high %v860_v29, %v868_v30  ;;  %v14330_v41 = vcombine.high %v1116_v34, %v1124_v63  ;;  %v852_v45 = vld [vmem:[#allocation5 + $0x1360] sm:$0xff] }
 0x2e0   :  { %7237 = vmatprep.subr.bf16.mxu1 %v13898_v42  ;;  %v844_v42 = vld [vmem:[#allocation5 + $0x1320] sm:$0xff] }
 0x2e1   :  { %7197 = vmatpush2.bf16.msra.mxu0 %v13641_v49  ;;  %v1100_v46 = vld [vmem:[#allocation5 + $0x1b20] sm:$0xff]  ;;  %v14329_v49 = vcombine.low %v1116_v34, %v1124_v63 }
 0x2e2   :  { %7198 = vmatprep.subr.bf16.mxu0 %v13626_v2  ;;  %v1108_v47 = vld [vmem:[#allocation5 + $0x1b60] sm:$0xff] }
 0x2e3   :  { %7238 = vmatpush2.bf16.msra.mxu1 %v13897_v54  ;;  %v14058_v54 = vcombine.high %v844_v42, %v852_v45  ;;  %v14314_v2 = vcombine.high %v1100_v46, %v1108_v47  ;;  %v836_v50 = vld [vmem:[#allocation5 + $0x12e0] sm:$0xff]  ;;  %v14313_v3 = vcombine.low %v1100_v46, %v1108_v47 }
 0x2e4   :  { %7239 = vmatprep.subr.bf16.mxu1 %v13882_v56  ;;  %v828_v56 = vld [vmem:[#allocation5 + $0x12a0] sm:$0xff] }
 0x2e5   :  { %7199 = vmatpush2.bf16.msra.mxu0 %v13625_v62  ;;  %v1084_v59 = vld [vmem:[#allocation5 + $0x1aa0] sm:$0xff]  ;;  %v14042_v5 = vcombine.high %v828_v56, %v836_v50 }
 0x2e6   :  { %7200 = vmatprep.subr.bf16.mxu0 %v13610_v8  ;;  %v1092_v61 = vld [vmem:[#allocation5 + $0x1ae0] sm:$0xff]  ;;  %v14057_v8 = vcombine.low %v844_v42, %v852_v45 }
 0x2e7   :  { %7240 = vmatpush2.bf16.msra.mxu1 %v13881_v0  ;;  %v1068_v18 = vld [vmem:[#allocation5 + $0x1a20] sm:$0xff] }
 0x2e8   :  { %7241 = vmatprep.subr.bf16.mxu1 %v13866_v1  ;;  %v1076_v19 = vld [vmem:[#allocation5 + $0x1a60] sm:$0xff] }
 0x2e9   :  { %7201 = vmatpush2.bf16.msra.mxu0 %v13609_v11  ;;  %v14282_v29 = vcombine.high %v1068_v18, %v1076_v19  ;;  %v796_v30 = vld [vmem:[#allocation5 + $0x11a0] sm:$0xff] }
 0x2ea   :  { %7202 = vmatprep.subr.bf16.mxu0 %v13594_v15  ;;  %v812_v15 = vld [vmem:[#allocation5 + $0x1220] sm:$0xff] }
 0x2eb   :  { %7242 = vmatpush2.bf16.msra.mxu1 %v13865_v12  ;;  %v14298_v12 = vcombine.high %v1084_v59, %v1092_v61  ;;  %v804_v34 = vld [vmem:[#allocation5 + $0x11e0] sm:$0xff] }
 0x2ec   :  { %7243 = vmatprep.subr.bf16.mxu1 %v13850_v17  ;;  %v820_v17 = vld [vmem:[#allocation5 + $0x1260] sm:$0xff] }
 0x2ed   :  { %7203 = vmatpush2.bf16.msra.mxu0 %v13593_v23  ;;  %v14041_v23 = vcombine.low %v828_v56, %v836_v50  ;;  %v1052_v63 = vld [vmem:[#allocation5 + $0x19a0] sm:$0xff] }
 0x2ee   :  { %7204 = vmatprep.subr.bf16.mxu0 %v13578_v26  ;;  %v14026_v26 = vcombine.high %v812_v15, %v820_v17  ;;  %v780_v45 = vld [vmem:[#allocation5 + $0x1120] sm:$0xff] }
 0x2ef   :  { %7244 = vmatpush2.bf16.msra.mxu1 %v13849_v25  ;;  %v788_v46 = vld [vmem:[#allocation5 + $0x1160] sm:$0xff] }
 0x2f0   :  { %7245 = vmatprep.subr.bf16.mxu1 %v13834_v27  ;;  %v1036_v47 = vld [vmem:[#allocation5 + $0x1920] sm:$0xff] }
 0x2f1   :  { %7205 = vmatpush2.bf16.msra.mxu0 %v13577_v36  ;;  %v1060_v36 = vld [vmem:[#allocation5 + $0x19e0] sm:$0xff] }
 0x2f2   :  { %7256 = vmatprep.subr.bf16.mxu0 %v14074_v38  ;;  %v14281_v38 = vcombine.low %v1068_v18, %v1076_v19  ;;  %v14266_v42 = vcombine.high %v1052_v63, %v1060_v36  ;;  %v764_v50 = vld [vmem:[#allocation5 + $0x10a0] sm:$0xff] }
 0x2f3   :  { %7246 = vmatpush2.bf16.msra.mxu1 %v13833_v37  ;;  %v14025_v37 = vcombine.low %v812_v15, %v820_v17  ;;  %v988_v18 = vld [vmem:[#allocation5 + $0x17a0] sm:$0xff] }
 0x2f4   :  { %7297 = vmatprep.subr.bf16.mxu1 %v14330_v41  ;;  %v6962_v57 = vpop.f32.mrf.mxu0  ;;  %7207 = vmatmul.mubr.bf16.vlgmr.msra.gmra.mxu0 %v16878_v24  ;;  %v14010_v41 = vcombine.high %v796_v30, %v804_v34  ;;  %v996_v19 = vld [vmem:[#allocation5 + $0x17e0] sm:$0xff] }
 0x2f5   :  { %v6963_v62 = vadd.f32 %v6962_v57, %v16973_v44  ;;  %7257 = vmatpush1.bf16.msra.mxu0 %v14073_v48  ;;  %7288 = vmatprep.mubr.bf16.mxu0 %v16881_v35  ;;  %v1044_v48 = vld [vmem:[#allocation5 + $0x1960] sm:$0xff] }
 0x2f6   :  { %v7003_v0 = vpop.f32.mrf.mxu1  ;;  %7248 = vmatmul.mubr.bf16.vlgmr.msra.gmra.mxu1 %v16885_v28  ;;  %v6964_v1 = vpop.f32.mrf.mxu0  ;;  %7258 = vmatprep.subr.bf16.mxu0 %v14058_v54  ;;  %v14265_v54 = vcombine.low %v1052_v63, %v1060_v36  ;;  %v14250_v56 = vcombine.high %v1036_v47, %v1044_v48  ;;  %v772_v57 = vld [vmem:[#allocation5 + $0x10e0] sm:$0xff]  ;;  %v14201_v36 = vcombine.low %v988_v18, %v996_v19 }
 0x2f7   :  { %7298 = vmatpush1.bf16.msra.mxu1 %v14329_v49  ;;  %v16982_v6 = vadd.f32 %v7003_v0, %v6963_v62  ;;  %v6965_v7 = vadd.f32 %v6964_v1, %v16977_v60  ;;  %7329 = vmatprep.mubr.bf16.mxu1 %v16890_v53  ;;  %v14297_v60 = vcombine.low %v1084_v59, %v1092_v61  ;;  %v1020_v59 = vld [vmem:[#allocation5 + $0x18a0] sm:$0xff] }
 0x2f8   :  { %v7005_v11 = vpop.f32.mrf.mxu1  ;;  %7299 = vmatprep.subr.bf16.mxu1 %v14314_v2  ;;  %v6966_v44 = vpop.f32.mrf.mxu0  ;;  %v14009_v49 = vcombine.low %v796_v30, %v804_v34  ;;  %v13994_v2 = vcombine.high %v780_v45, %v788_v46  ;;  %v1028_v61 = vld [vmem:[#allocation5 + $0x18e0] sm:$0xff]  ;;  %v13993_v62 = vcombine.low %v780_v45, %v788_v46  ;;  %v14249_v0 = vcombine.low %v1036_v47, %v1044_v48 }
 0x2f9   :  { %v16987_v20 = vadd.f32 %v7005_v11, %v6965_v7  ;;  %7259 = vmatpush1.bf16.msra.mxu0 %v14057_v8  ;;  %v13978_v8 = vcombine.high %v764_v50, %v772_v57  ;;  %v14234_v1 = vcombine.high %v1020_v59, %v1028_v61  ;;  %v1004_v7 = vld [vmem:[#allocation5 + $0x1820] sm:$0xff]  ;;  %v14233_v15 = vcombine.low %v1020_v59, %v1028_v61 }
 0x2fa   :  { %v7007_v22 = vpop.f32.mrf.mxu1  ;;  %v6967_v25 = vpop.f32.mrf.mxu0  ;;  %7260 = vmatprep.subr.bf16.mxu0 %v14042_v5  ;;  %v756_v5 = vld [vmem:[#allocation5 + $0x1060] sm:$0xff]  ;;  %vm7850_vm6 = vcmp.gt.f32.partialorder %v16982_v6, 0.0 }
 0x2fb   :  { %7300 = vmatpush1.bf16.msra.mxu1 %v14313_v3  ;;  %v748_v3 = vld [vmem:[#allocation5 + $0x1020] sm:$0xff]  ;;  %vm7851_vm4 = vcmp.gt.f32.partialorder %v16987_v20, 0.0 }
 0x2fc   :  { %v7008_v27 = vpop.f32.mrf.mxu1  ;;  %7301 = vmatprep.subr.bf16.mxu1 %v14298_v12  ;;  %v1012_v11 = vld [vmem:[#allocation5 + $0x1860] sm:$0xff]  ;;  %v13977_v12 = vcombine.low %v764_v50, %v772_v57  ;;  %v13962_v17 = vcombine.high %v748_v3, %v756_v5  ;;  %v13961_v25 = vcombine.low %v748_v3, %v756_v5 }
 0x2fd   :  { %7261 = vmatpush1.bf16.msra.mxu0 %v14041_v23  ;;  %v14218_v44 = vcombine.high %v1004_v7, %v1012_v11  ;;  %v1244_v22 = vld [vmem:[#allocation5 + $0x1fa0] sm:$0xff] }
 0x2fe   :  { %7262 = vmatprep.subr.bf16.mxu0 %v14026_v26  ;;  %v1252_v23 = vld [vmem:[#allocation5 + $0x1fe0] sm:$0xff]  ;;  %v14202_v26 = vcombine.high %v988_v18, %v996_v19 }
 0x2ff   :  { %7302 = vmatpush1.bf16.msra.mxu1 %v14297_v60  ;;  %v14217_v60 = vcombine.low %v1004_v7, %v1012_v11  ;;  %v14458_v27 = vcombine.high %v1244_v22, %v1252_v23  ;;  %v980_v30 = vld [vmem:[#allocation5 + $0x1760] sm:$0xff] }
 0x300   :  { %7303 = vmatprep.subr.bf16.mxu1 %v14282_v29  ;;  %v972_v29 = vld [vmem:[#allocation5 + $0x1720] sm:$0xff] }
 0x301   :  { %7263 = vmatpush1.bf16.msra.mxu0 %v14025_v37  ;;  %v1228_v34 = vld [vmem:[#allocation5 + $0x1f20] sm:$0xff]  ;;  %v14457_v37 = vcombine.low %v1244_v22, %v1252_v23  ;;  %v14185_v48 = vcombine.low %v972_v29, %v980_v30 }
 0x302   :  { %7264 = vmatprep.subr.bf16.mxu0 %v14010_v41  ;;  %v1236_v63 = vld [vmem:[#allocation5 + $0x1f60] sm:$0xff] }
 0x303   :  { %7304 = vmatpush1.bf16.msra.mxu1 %v14281_v38  ;;  %v14186_v38 = vcombine.high %v972_v29, %v980_v30  ;;  %v14442_v41 = vcombine.high %v1228_v34, %v1236_v63  ;;  %v964_v45 = vld [vmem:[#allocation5 + $0x16e0] sm:$0xff] }
 0x304   :  { %7305 = vmatprep.subr.bf16.mxu1 %v14266_v42  ;;  %v956_v42 = vld [vmem:[#allocation5 + $0x16a0] sm:$0xff] }
 0x305   :  { %7265 = vmatpush1.bf16.msra.mxu0 %v14009_v49  ;;  %v1212_v46 = vld [vmem:[#allocation5 + $0x1ea0] sm:$0xff]  ;;  %v14441_v49 = vcombine.low %v1228_v34, %v1236_v63  ;;  %v14169_v61 = vcombine.low %v956_v42, %v964_v45 }
 0x306   :  { %7266 = vmatprep.subr.bf16.mxu0 %v13994_v2  ;;  %v1220_v47 = vld [vmem:[#allocation5 + $0x1ee0] sm:$0xff] }
 0x307   :  { %7306 = vmatpush1.bf16.msra.mxu1 %v14265_v54  ;;  %v14170_v54 = vcombine.high %v956_v42, %v964_v45  ;;  %v14426_v2 = vcombine.high %v1212_v46, %v1220_v47  ;;  %v948_v50 = vld [vmem:[#allocation5 + $0x1660] sm:$0xff] }
 0x308   :  { %7307 = vmatprep.subr.bf16.mxu1 %v14250_v56  ;;  %v940_v56 = vld [vmem:[#allocation5 + $0x1620] sm:$0xff] }
 0x309   :  { %7267 = vmatpush1.bf16.msra.mxu0 %v13993_v62  ;;  %v1196_v57 = vld [vmem:[#allocation5 + $0x1e20] sm:$0xff]  ;;  %v14425_v62 = vcombine.low %v1212_v46, %v1220_v47  ;;  %v14153_v11 = vcombine.low %v940_v56, %v948_v50 }
 0x30a   :  { %7268 = vmatprep.subr.bf16.mxu0 %v13978_v8  ;;  %v1204_v59 = vld [vmem:[#allocation5 + $0x1e60] sm:$0xff] }
 0x30b   :  { %7308 = vmatpush1.bf16.msra.mxu1 %v14249_v0  ;;  %v14154_v0 = vcombine.high %v940_v56, %v948_v50  ;;  %v14410_v8 = vcombine.high %v1196_v57, %v1204_v59  ;;  %v932_v3 = vld [vmem:[#allocation5 + $0x15e0] sm:$0xff]  ;;  %v357_v56 = vld [vmem:[#allocation5 + $0x3e8] sm:$0xff] }
 0x30c   :  { %7309 = vmatprep.subr.bf16.mxu1 %v14234_v1  ;;  %v924_v1 = vld [vmem:[#allocation5 + $0x15a0] sm:$0xff]  ;;  %v605_v50 = vld [vmem:[#allocation5 + $0xba8] sm:$0xff] }
 0x30d   :  { %7269 = vmatpush1.bf16.msra.mxu0 %v13977_v12  ;;  %v1180_v5 = vld [vmem:[#allocation5 + $0x1da0] sm:$0xff]  ;;  %v14409_v12 = vcombine.low %v1196_v57, %v1204_v59  ;;  %v14137_v23 = vcombine.low %v924_v1, %v932_v3  ;;  %v613_v57 = vld [vmem:[#allocation5 + $0xbe8] sm:$0xff] }
 0x30e   :  { %7270 = vmatprep.subr.bf16.mxu0 %v13962_v17  ;;  %v1188_v7 = vld [vmem:[#allocation5 + $0x1de0] sm:$0xff] }
 0x30f   :  { %7310 = vmatpush1.bf16.msra.mxu1 %v14233_v15  ;;  %v14138_v15 = vcombine.high %v924_v1, %v932_v3  ;;  %v14394_v17 = vcombine.high %v1180_v5, %v1188_v7  ;;  %v916_v18 = vld [vmem:[#allocation5 + $0x1560] sm:$0xff]  ;;  %v1290_v1 = vsub.s32 7, %v16845_v43  ;;  %v333_v3 = vld [vmem:[#allocation5 + $0x328] sm:$0xff] }
 0x310   :  { %7311 = vmatprep.subr.bf16.mxu1 %v14218_v44  ;;  %v908_v44 = vld [vmem:[#allocation5 + $0x1520] sm:$0xff] }
 0x311   :  { %7271 = vmatpush1.bf16.msra.mxu0 %v13961_v25  ;;  %v1164_v19 = vld [vmem:[#allocation5 + $0x1d20] sm:$0xff]  ;;  %v14393_v25 = vcombine.low %v1180_v5, %v1188_v7  ;;  %v14121_v63 = vcombine.low %v908_v44, %v916_v18  ;;  %v341_v5 = vld [vmem:[#allocation5 + $0x368] sm:$0xff] }
 0x312   :  { %7272 = vmatprep.subr.bf16.mxu0 %v14202_v26  ;;  %v1172_v22 = vld [vmem:[#allocation5 + $0x1d60] sm:$0xff]  ;;  %v589_v7 = vld [vmem:[#allocation5 + $0xb28] sm:$0xff] }
 0x313   :  { %7312 = vmatpush1.bf16.msra.mxu1 %v14217_v60  ;;  %v14122_v60 = vcombine.high %v908_v44, %v916_v18  ;;  %v14378_v26 = vcombine.high %v1164_v19, %v1172_v22  ;;  %v900_v29 = vld [vmem:[#allocation5 + $0x14e0] sm:$0xff]  ;;  %v13548_v44 = vcombine.high %v333_v3, %v341_v5  ;;  %v1291_v18 = vrot.slane %v16965_v21, %v1290_v1 }
 0x314   :  { %7313 = vmatprep.subr.bf16.mxu1 %v14458_v27  ;;  %v892_v27 = vld [vmem:[#allocation5 + $0x14a0] sm:$0xff] }
 0x315   :  { %7273 = vmatpush2.bf16.msra.mxu0 %v14201_v36  ;;  %v1148_v30 = vld [vmem:[#allocation5 + $0x1ca0] sm:$0xff]  ;;  %v14377_v36 = vcombine.low %v1164_v19, %v1172_v22  ;;  %v14105_v47 = vcombine.low %v892_v27, %v900_v29  ;;  %v317_v22 = vld [vmem:[#allocation5 + $0x2a8] sm:$0xff] }
 0x316   :  { %7274 = vmatprep.subr.bf16.mxu0 %v14186_v38  ;;  %v1156_v34 = vld [vmem:[#allocation5 + $0x1ce0] sm:$0xff] }
 0x317   :  { %7314 = vmatpush2.bf16.msra.mxu1 %v14457_v37  ;;  %v14106_v37 = vcombine.high %v892_v27, %v900_v29  ;;  %v14362_v38 = vcombine.high %v1148_v30, %v1156_v34  ;;  %v884_v42 = vld [vmem:[#allocation5 + $0x1460] sm:$0xff] }
 0x318   :  { %7315 = vmatprep.subr.bf16.mxu1 %v14442_v41  ;;  %v876_v41 = vld [vmem:[#allocation5 + $0x1420] sm:$0xff] }
 0x319   :  { %7275 = vmatpush2.bf16.msra.mxu0 %v14185_v48  ;;  %v1132_v45 = vld [vmem:[#allocation5 + $0x1c20] sm:$0xff]  ;;  %v14361_v48 = vcombine.low %v1148_v30, %v1156_v34  ;;  %v14089_v59 = vcombine.low %v876_v41, %v884_v42  ;;  %v13547_v30 = vcombine.low %v333_v3, %v341_v5  ;;  %v541_v3 = vld [vmem:[#allocation5 + $0x9a8] sm:$0xff] }
 0x31a   :  { %7276 = vmatprep.subr.bf16.mxu0 %v14170_v54  ;;  %v1140_v46 = vld [vmem:[#allocation5 + $0x1c60] sm:$0xff]  ;;  %v549_v5 = vld [vmem:[#allocation5 + $0x9e8] sm:$0xff] }
 0x31b   :  { %7316 = vmatpush2.bf16.msra.mxu1 %v14441_v49  ;;  %v14090_v49 = vcombine.high %v876_v41, %v884_v42  ;;  %v14346_v54 = vcombine.high %v1132_v45, %v1140_v46  ;;  %v301_v42 = vld [vmem:[#allocation5 + $0x228] sm:$0xff] }
 0x31c   :  { %7317 = vmatprep.subr.bf16.mxu1 %v14426_v2  ;;  %v349_v2 = vld [vmem:[#allocation5 + $0x3a8] sm:$0xff] }
 0x31d   :  { %7277 = vmatpush2.bf16.msra.mxu0 %v14169_v61  ;;  %v1286_v61 = vsub.s32 6, %v16845_v43 }
 0x31e   :  { %7278 = vmatprep.subr.bf16.mxu0 %v14154_v0  ;;  %v13564_v0 = vcombine.high %v349_v2, %v357_v56 }
 0x31f   :  { %7318 = vmatpush2.bf16.msra.mxu1 %v14425_v62  ;;  %v14345_v62 = vcombine.low %v1132_v45, %v1140_v46  ;;  %v309_v45 = vld [vmem:[#allocation5 + $0x268] sm:$0xff] }
 0x320   :  { %7319 = vmatprep.subr.bf16.mxu1 %v14410_v8  ;;  %v13820_v8 = vcombine.high %v605_v50, %v613_v57 }
 0x321   :  { %7279 = vmatpush2.bf16.msra.mxu0 %v14153_v11  ;;  %v597_v11 = vld [vmem:[#allocation5 + $0xb68] sm:$0xff] }
 0x322   :  { %7280 = vmatprep.subr.bf16.mxu0 %v14138_v15  ;;  %v13563_v15 = vcombine.low %v349_v2, %v357_v56  ;;  %v13804_v19 = vcombine.high %v589_v7, %v597_v11 }
 0x323   :  { %7320 = vmatpush2.bf16.msra.mxu1 %v14409_v12  ;;  %v1287_v12 = vrot.slane %v16965_v21, %v1286_v61 }
 0x324   :  { %7321 = vmatprep.subr.bf16.mxu1 %v14394_v17  ;;  %v13819_v17 = vcombine.low %v605_v50, %v613_v57  ;;  %v13516_v57 = vcombine.high %v301_v42, %v309_v45 }
 0x325   :  { %7281 = vmatpush2.bf16.msra.mxu0 %v14137_v23  ;;  %v325_v23 = vld [vmem:[#allocation5 + $0x2e8] sm:$0xff] }
 0x326   :  { %7282 = vmatprep.subr.bf16.mxu0 %v14122_v60  ;;  %v573_v60 = vld [vmem:[#allocation5 + $0xaa8] sm:$0xff]  ;;  %v13531_v2 = vcombine.low %v317_v22, %v325_v23 }
 0x327   :  { %7322 = vmatpush2.bf16.msra.mxu1 %v14393_v25 }
 0x328   :  { %7323 = vmatprep.subr.bf16.mxu1 %v14378_v26  ;;  %v581_v26 = vld [vmem:[#allocation5 + $0xae8] sm:$0xff] }
 0x329   :  { %7283 = vmatpush2.bf16.msra.mxu0 %v14121_v63  ;;  %v13803_v63 = vcombine.low %v589_v7, %v597_v11  ;;  %v13788_v41 = vcombine.high %v573_v60, %v581_v26  ;;  %v13787_v50 = vcombine.low %v573_v60, %v581_v26  ;;  %v13515_v7 = vcombine.low %v301_v42, %v309_v45  ;;  %v253_v26 = vld [vmem:[#allocation5 + $0xa8] sm:$0xff] }
 0x32a   :  { %7284 = vmatprep.subr.bf16.mxu0 %v14106_v37  ;;  %v493_v42 = vld [vmem:[#allocation5 + $0x828] sm:$0xff] }
 0x32b   :  { %7324 = vmatpush2.bf16.msra.mxu1 %v14377_v36  ;;  %v13532_v36 = vcombine.high %v317_v22, %v325_v23  ;;  %v13755_v23 = vcombine.low %v541_v3, %v549_v5  ;;  %v501_v45 = vld [vmem:[#allocation5 + $0x868] sm:$0xff] }
 0x32c   :  { %7325 = vmatprep.subr.bf16.mxu1 %v14362_v38 }
 0x32d   :  { %7285 = vmatpush2.bf16.msra.mxu0 %v14105_v47  ;;  %v557_v47 = vld [vmem:[#allocation5 + $0xa28] sm:$0xff] }
 0x32e   :  { %7286 = vmatprep.subr.bf16.mxu0 %v14090_v49 }
 0x32f   :  { %7326 = vmatpush2.bf16.msra.mxu1 %v14361_v48  ;;  %v565_v48 = vld [vmem:[#allocation5 + $0xa68] sm:$0xff] }
 0x330   :  { %7327 = vmatprep.subr.bf16.mxu1 %v14346_v54  ;;  %v13771_v11 = vcombine.low %v557_v47, %v565_v48 }
 0x331   :  { %7287 = vmatpush2.bf16.msra.mxu0 %v14089_v59 }
 0x332   :  { %7338 = vmatprep.subr.bf16.mxu0 %v13564_v0  ;;  %v285_v0 = vld [vmem:[#allocation5 + $0x1a8] sm:$0xff] }
 0x333   :  { %7328 = vmatpush2.bf16.msra.mxu1 %v14345_v62  ;;  %v13772_v62 = vcombine.high %v557_v47, %v565_v48 }
 0x334   :  { %7379 = vmatprep.subr.bf16.mxu1 %v13820_v8  ;;  %v7044_v25 = vpop.f32.mrf.mxu0  ;;  %7289 = vmatmul.mubr.bf16.vlgmr.msra.gmra.mxu0 %v16872_v33  ;;  %v293_v8 = vld [vmem:[#allocation5 + $0x1e8] sm:$0xff] }
 0x335   :  { %v7045_v27 = vadd.f32 %v7044_v25, %v1287_v12  ;;  %7339 = vmatpush1.bf16.msra.mxu0 %v13563_v15  ;;  %7370 = vmatprep.mubr.bf16.mxu0 %v16859_v9  ;;  %v13500_v12 = vcombine.high %v285_v0, %v293_v8  ;;  %v13756_v15 = vcombine.high %v541_v3, %v549_v5  ;;  %v461_v3 = vld [vmem:[#allocation5 + $0x728] sm:$0xff] }
 0x336   :  { %v7085_v29 = vpop.f32.mrf.mxu1  ;;  %7330 = vmatmul.mubr.bf16.vlgmr.msra.gmra.mxu1 %v16897_v55  ;;  %v7046_v34 = vpop.f32.mrf.mxu0  ;;  %7340 = vmatprep.subr.bf16.mxu0 %v13548_v44  ;;  %v277_v44 = vld [vmem:[#allocation5 + $0x168] sm:$0xff]  ;;  %v13499_v22 = vcombine.low %v285_v0, %v293_v8 }
 0x337   :  { %7380 = vmatpush1.bf16.msra.mxu1 %v13819_v17  ;;  %v16999_v21 = vadd.f32 %v7085_v29, %v7045_v27  ;;  %v7047_v37 = vadd.f32 %v7046_v34, %v1291_v18  ;;  %7411 = vmatprep.mubr.bf16.mxu1 %v16864_v13  ;;  %v269_v17 = vld [vmem:[#allocation5 + $0x128] sm:$0xff] }
 0x338   :  { %v7087_v38 = vpop.f32.mrf.mxu1  ;;  %7381 = vmatprep.subr.bf16.mxu1 %v13804_v19  ;;  %v7048_v46 = vpop.f32.mrf.mxu0  ;;  %v525_v18 = vld [vmem:[#allocation5 + $0x928] sm:$0xff]  ;;  %v13484_v25 = vcombine.high %v269_v17, %v277_v44  ;;  %v13483_v34 = vcombine.low %v269_v17, %v277_v44 }
 0x339   :  { %v17003_v49 = vadd.f32 %v7087_v38, %v7047_v37  ;;  %7341 = vmatpush1.bf16.msra.mxu0 %v13547_v30  ;;  %v533_v19 = vld [vmem:[#allocation5 + $0x968] sm:$0xff] }
 0x33a   :  { %v7089_v54 = vpop.f32.mrf.mxu1  ;;  %v7049_v56 = vpop.f32.mrf.mxu0  ;;  %7342 = vmatprep.subr.bf16.mxu0 %v13532_v36  ;;  %v13740_v60 = vcombine.high %v525_v18, %v533_v19  ;;  %v261_v27 = vld [vmem:[#allocation5 + $0xe8] sm:$0xff] }
 0x33b   :  { %7382 = vmatpush1.bf16.msra.mxu1 %v13803_v63  ;;  %v509_v29 = vld [vmem:[#allocation5 + $0x8a8] sm:$0xff]  ;;  %v13739_v63 = vcombine.low %v525_v18, %v533_v19  ;;  %v13468_v36 = vcombine.high %v253_v26, %v261_v27  ;;  %v13467_v46 = vcombine.low %v253_v26, %v261_v27  ;;  %v13708_v54 = vcombine.high %v493_v42, %v501_v45 }
 0x33c   :  { %v7090_v59 = vpop.f32.mrf.mxu1  ;;  %7383 = vmatprep.subr.bf16.mxu1 %v13788_v41  ;;  %v517_v30 = vld [vmem:[#allocation5 + $0x8e8] sm:$0xff] }
 0x33d   :  { %7343 = vmatpush1.bf16.msra.mxu0 %v13531_v2  ;;  %v13724_v37 = vcombine.high %v509_v29, %v517_v30  ;;  %v237_v38 = vld [vmem:[#allocation5 + $0x28] sm:$0xff]  ;;  %v13723_v47 = vcombine.low %v509_v29, %v517_v30 }
 0x33e   :  { %7344 = vmatprep.subr.bf16.mxu0 %v13516_v57  ;;  %v245_v41 = vld [vmem:[#allocation5 + $0x68] sm:$0xff] }
 0x33f   :  { %7384 = vmatpush1.bf16.msra.mxu1 %v13787_v50  ;;  %v13452_v48 = vcombine.high %v237_v38, %v245_v41  ;;  %v477_v2 = vld [vmem:[#allocation5 + $0x7a8] sm:$0xff]  ;;  %v13451_v59 = vcombine.low %v237_v38, %v245_v41 }
 0x340   :  { %7385 = vmatprep.subr.bf16.mxu1 %v13772_v62  ;;  %v485_v56 = vld [vmem:[#allocation5 + $0x7e8] sm:$0xff]  ;;  %v13707_v62 = vcombine.low %v493_v42, %v501_v45 }
 0x341   :  { %7345 = vmatpush1.bf16.msra.mxu0 %v13515_v7  ;;  %v733_v50 = vld [vmem:[#allocation5 + $0xfa8] sm:$0xff]  ;;  %v13692_v0 = vcombine.high %v477_v2, %v485_v56 }
 0x342   :  { %7346 = vmatprep.subr.bf16.mxu0 %v13500_v12  ;;  %v741_v57 = vld [vmem:[#allocation5 + $0xfe8] sm:$0xff]  ;;  %v13691_v12 = vcombine.low %v477_v2, %v485_v56 }
 0x343   :  { %7386 = vmatpush1.bf16.msra.mxu1 %v13771_v11  ;;  %v13948_v8 = vcombine.high %v733_v50, %v741_v57  ;;  %v469_v5 = vld [vmem:[#allocation5 + $0x768] sm:$0xff] }
 0x344   :  { %7387 = vmatprep.subr.bf16.mxu1 %v13756_v15  ;;  %v717_v7 = vld [vmem:[#allocation5 + $0xf28] sm:$0xff]  ;;  %v13947_v15 = vcombine.low %v733_v50, %v741_v57  ;;  %v13676_v17 = vcombine.high %v461_v3, %v469_v5 }
 0x345   :  { %7347 = vmatpush1.bf16.msra.mxu0 %v13499_v22  ;;  %v725_v11 = vld [vmem:[#allocation5 + $0xf68] sm:$0xff] }
 0x346   :  { %7348 = vmatprep.subr.bf16.mxu0 %v13484_v25  ;;  %v13932_v44 = vcombine.high %v717_v7, %v725_v11  ;;  %v445_v18 = vld [vmem:[#allocation5 + $0x6a8] sm:$0xff]  ;;  %v13675_v25 = vcombine.low %v461_v3, %v469_v5 }
 0x347   :  { %7388 = vmatpush1.bf16.msra.mxu1 %v13755_v23  ;;  %v453_v19 = vld [vmem:[#allocation5 + $0x6e8] sm:$0xff] }
 0x348   :  { %7389 = vmatprep.subr.bf16.mxu1 %v13740_v60  ;;  %v701_v22 = vld [vmem:[#allocation5 + $0xea8] sm:$0xff]  ;;  %v13931_v60 = vcombine.low %v717_v7, %v725_v11  ;;  %v13660_v26 = vcombine.high %v445_v18, %v453_v19 }
 0x349   :  { %7349 = vmatpush1.bf16.msra.mxu0 %v13483_v34  ;;  %v709_v23 = vld [vmem:[#allocation5 + $0xee8] sm:$0xff] }
 0x34a   :  { %7350 = vmatprep.subr.bf16.mxu0 %v13468_v36  ;;  %v13916_v27 = vcombine.high %v701_v22, %v709_v23  ;;  %v429_v29 = vld [vmem:[#allocation5 + $0x628] sm:$0xff]  ;;  %v13659_v36 = vcombine.low %v445_v18, %v453_v19 }
 0x34b   :  { %7390 = vmatpush1.bf16.msra.mxu1 %v13739_v63  ;;  %v437_v30 = vld [vmem:[#allocation5 + $0x668] sm:$0xff] }
 0x34c   :  { %7391 = vmatprep.subr.bf16.mxu1 %v13724_v37  ;;  %v685_v34 = vld [vmem:[#allocation5 + $0xe28] sm:$0xff]  ;;  %v13915_v37 = vcombine.low %v701_v22, %v709_v23  ;;  %v13644_v38 = vcombine.high %v429_v29, %v437_v30 }
 0x34d   :  { %7351 = vmatpush1.bf16.msra.mxu0 %v13467_v46  ;;  %v693_v63 = vld [vmem:[#allocation5 + $0xe68] sm:$0xff] }
 0x34e   :  { %7352 = vmatprep.subr.bf16.mxu0 %v13452_v48  ;;  %v13900_v41 = vcombine.high %v685_v34, %v693_v63  ;;  %v413_v42 = vld [vmem:[#allocation5 + $0x5a8] sm:$0xff]  ;;  %v13643_v48 = vcombine.low %v429_v29, %v437_v30 }
 0x34f   :  { %7392 = vmatpush1.bf16.msra.mxu1 %v13723_v47  ;;  %v421_v45 = vld [vmem:[#allocation5 + $0x5e8] sm:$0xff] }
 0x350   :  { %7393 = vmatprep.subr.bf16.mxu1 %v13708_v54  ;;  %v669_v46 = vld [vmem:[#allocation5 + $0xda8] sm:$0xff]  ;;  %v13899_v54 = vcombine.low %v685_v34, %v693_v63  ;;  %v13628_v2 = vcombine.high %v413_v42, %v421_v45 }
 0x351   :  { %7353 = vmatpush1.bf16.msra.mxu0 %v13451_v59  ;;  %v677_v47 = vld [vmem:[#allocation5 + $0xde8] sm:$0xff] }
 0x352   :  { %7354 = vmatprep.subr.bf16.mxu0 %v13692_v0  ;;  %v13884_v56 = vcombine.high %v669_v46, %v677_v47  ;;  %v397_v50 = vld [vmem:[#allocation5 + $0x528] sm:$0xff]  ;;  %v13627_v0 = vcombine.low %v413_v42, %v421_v45 }
 0x353   :  { %7394 = vmatpush1.bf16.msra.mxu1 %v13707_v62  ;;  %v405_v57 = vld [vmem:[#allocation5 + $0x568] sm:$0xff] }
 0x354   :  { %7395 = vmatprep.subr.bf16.mxu1 %v13948_v8  ;;  %v653_v59 = vld [vmem:[#allocation5 + $0xd28] sm:$0xff]  ;;  %v13883_v8 = vcombine.low %v669_v46, %v677_v47  ;;  %v13612_v3 = vcombine.high %v397_v50, %v405_v57 }
 0x355   :  { %7355 = vmatpush2.bf16.msra.mxu0 %v13691_v12  ;;  %v661_v62 = vld [vmem:[#allocation5 + $0xd68] sm:$0xff] }
 0x356   :  { %7356 = vmatprep.subr.bf16.mxu0 %v13676_v17  ;;  %v13868_v5 = vcombine.high %v653_v59, %v661_v62  ;;  %v381_v7 = vld [vmem:[#allocation5 + $0x4a8] sm:$0xff]  ;;  %v13611_v17 = vcombine.low %v397_v50, %v405_v57 }
 0x357   :  { %7396 = vmatpush2.bf16.msra.mxu1 %v13947_v15  ;;  %v389_v11 = vld [vmem:[#allocation5 + $0x4e8] sm:$0xff] }
 0x358   :  { %7397 = vmatprep.subr.bf16.mxu1 %v13932_v44  ;;  %v637_v12 = vld [vmem:[#allocation5 + $0xca8] sm:$0xff]  ;;  %v13867_v44 = vcombine.low %v653_v59, %v661_v62  ;;  %v13596_v18 = vcombine.high %v381_v7, %v389_v11 }
 0x359   :  { %7357 = vmatpush2.bf16.msra.mxu0 %v13675_v25  ;;  %v645_v15 = vld [vmem:[#allocation5 + $0xce8] sm:$0xff] }
 0x35a   :  { %7358 = vmatprep.subr.bf16.mxu0 %v13660_v26  ;;  %v13852_v19 = vcombine.high %v637_v12, %v645_v15  ;;  %v365_v22 = vld [vmem:[#allocation5 + $0x428] sm:$0xff]  ;;  %v13595_v26 = vcombine.low %v381_v7, %v389_v11 }
 0x35b   :  { %7398 = vmatpush2.bf16.msra.mxu1 %v13931_v60  ;;  %v373_v23 = vld [vmem:[#allocation5 + $0x468] sm:$0xff] }
 0x35c   :  { %7399 = vmatprep.subr.bf16.mxu1 %v13916_v27  ;;  %v621_v25 = vld [vmem:[#allocation5 + $0xc28] sm:$0xff]  ;;  %v13851_v27 = vcombine.low %v637_v12, %v645_v15  ;;  %v13580_v29 = vcombine.high %v365_v22, %v373_v23 }
 0x35d   :  { %7359 = vmatpush2.bf16.msra.mxu0 %v13659_v36  ;;  %v629_v60 = vld [vmem:[#allocation5 + $0xc68] sm:$0xff] }
 0x35e   :  { %7360 = vmatprep.subr.bf16.mxu0 %v13644_v38  ;;  %v13836_v30 = vcombine.high %v621_v25, %v629_v60  ;;  %v861_v34 = vld [vmem:[#allocation5 + $0x13a8] sm:$0xff]  ;;  %v13579_v38 = vcombine.low %v365_v22, %v373_v23 }
 0x35f   :  { %7400 = vmatpush2.bf16.msra.mxu1 %v13915_v37  ;;  %v869_v63 = vld [vmem:[#allocation5 + $0x13e8] sm:$0xff] }
 0x360   :  { %7401 = vmatprep.subr.bf16.mxu1 %v13900_v41  ;;  %v1117_v36 = vld [vmem:[#allocation5 + $0x1ba8] sm:$0xff]  ;;  %v13835_v41 = vcombine.low %v621_v25, %v629_v60  ;;  %v14076_v42 = vcombine.high %v861_v34, %v869_v63 }
 0x361   :  { %7361 = vmatpush2.bf16.msra.mxu0 %v13643_v48  ;;  %v1125_v37 = vld [vmem:[#allocation5 + $0x1be8] sm:$0xff] }
 0x362   :  { %7362 = vmatprep.subr.bf16.mxu0 %v13628_v2  ;;  %v14332_v45 = vcombine.high %v1117_v36, %v1125_v37  ;;  %v845_v46 = vld [vmem:[#allocation5 + $0x1328] sm:$0xff]  ;;  %v14075_v2 = vcombine.low %v861_v34, %v869_v63 }
 0x363   :  { %7402 = vmatpush2.bf16.msra.mxu1 %v13899_v54  ;;  %v853_v47 = vld [vmem:[#allocation5 + $0x1368] sm:$0xff] }
 0x364   :  { %7403 = vmatprep.subr.bf16.mxu1 %v13884_v56  ;;  %v1101_v48 = vld [vmem:[#allocation5 + $0x1b28] sm:$0xff]  ;;  %v14331_v56 = vcombine.low %v1117_v36, %v1125_v37  ;;  %v14060_v50 = vcombine.high %v845_v46, %v853_v47  ;;  %v14059_v11 = vcombine.low %v845_v46, %v853_v47 }
 0x365   :  { %7363 = vmatpush2.bf16.msra.mxu0 %v13627_v0  ;;  %v1109_v54 = vld [vmem:[#allocation5 + $0x1b68] sm:$0xff] }
 0x366   :  { %7364 = vmatprep.subr.bf16.mxu0 %v13612_v3  ;;  %v14316_v57 = vcombine.high %v1101_v48, %v1109_v54  ;;  %v829_v59 = vld [vmem:[#allocation5 + $0x12a8] sm:$0xff]  ;;  %v14315_v15 = vcombine.low %v1101_v48, %v1109_v54 }
 0x367   :  { %7404 = vmatpush2.bf16.msra.mxu1 %v13883_v8  ;;  %v837_v62 = vld [vmem:[#allocation5 + $0x12e8] sm:$0xff] }
 0x368   :  { %7405 = vmatprep.subr.bf16.mxu1 %v13868_v5  ;;  %v1085_v8 = vld [vmem:[#allocation5 + $0x1aa8] sm:$0xff] }
 0x369   :  { %7365 = vmatpush2.bf16.msra.mxu0 %v13611_v17  ;;  %v1093_v3 = vld [vmem:[#allocation5 + $0x1ae8] sm:$0xff]  ;;  %v14044_v17 = vcombine.high %v829_v59, %v837_v62 }
 0x36a   :  { %7366 = vmatprep.subr.bf16.mxu0 %v13596_v18  ;;  %v14300_v22 = vcombine.high %v1085_v8, %v1093_v3  ;;  %v813_v23 = vld [vmem:[#allocation5 + $0x1228] sm:$0xff] }
 0x36b   :  { %7406 = vmatpush2.bf16.msra.mxu1 %v13867_v44  ;;  %v821_v25 = vld [vmem:[#allocation5 + $0x1268] sm:$0xff] }
 0x36c   :  { %7407 = vmatprep.subr.bf16.mxu1 %v13852_v19  ;;  %v1069_v60 = vld [vmem:[#allocation5 + $0x1a28] sm:$0xff]  ;;  %v14028_v63 = vcombine.high %v813_v23, %v821_v25  ;;  %v14027_v46 = vcombine.low %v813_v23, %v821_v25 }
 0x36d   :  { %7367 = vmatpush2.bf16.msra.mxu0 %v13595_v26  ;;  %v1077_v26 = vld [vmem:[#allocation5 + $0x1a68] sm:$0xff] }
 0x36e   :  { %7368 = vmatprep.subr.bf16.mxu0 %v13580_v29  ;;  %v14284_v37 = vcombine.high %v1069_v60, %v1077_v26  ;;  %v14283_v47 = vcombine.low %v1069_v60, %v1077_v26  ;;  %v1005_v23 = vld [vmem:[#allocation5 + $0x1828] sm:$0xff] }
 0x36f   :  { %7408 = vmatpush2.bf16.msra.mxu1 %v13851_v27  ;;  %v1013_v25 = vld [vmem:[#allocation5 + $0x1868] sm:$0xff] }
 0x370   :  { %7409 = vmatprep.subr.bf16.mxu1 %v13836_v30  ;;  %v14043_v30 = vcombine.low %v829_v59, %v837_v62 }
 0x371   :  { %7369 = vmatpush2.bf16.msra.mxu0 %v13579_v38  ;;  %v797_v38 = vld [vmem:[#allocation5 + $0x11a8] sm:$0xff] }
 0x372   :  { %7420 = vmatprep.subr.bf16.mxu0 %v14076_v42  ;;  %v1053_v42 = vld [vmem:[#allocation5 + $0x19a8] sm:$0xff] }
 0x373   :  { %7410 = vmatpush2.bf16.msra.mxu1 %v13835_v41  ;;  %v805_v41 = vld [vmem:[#allocation5 + $0x11e8] sm:$0xff] }
 0x374   :  { %7461 = vmatprep.subr.bf16.mxu1 %v14332_v45  ;;  %v7126_v0 = vpop.f32.mrf.mxu0  ;;  %7371 = vmatmul.mubr.bf16.vlgmr.msra.gmra.mxu0 %v16878_v24  ;;  %v1061_v45 = vld [vmem:[#allocation5 + $0x19e8] sm:$0xff]  ;;  %v14012_v48 = vcombine.high %v797_v38, %v805_v41  ;;  %v14011_v59 = vcombine.low %v797_v38, %v805_v41 }
 0x375   :  { %v7127_v5 = vadd.f32 %v7126_v0, %v16999_v21  ;;  %7421 = vmatpush1.bf16.msra.mxu0 %v14075_v2  ;;  %7452 = vmatprep.mubr.bf16.mxu0 %v16881_v35  ;;  %v14268_v54 = vcombine.high %v1053_v42, %v1061_v45  ;;  %v781_v2 = vld [vmem:[#allocation5 + $0x1128] sm:$0xff]  ;;  %v14267_v62 = vcombine.low %v1053_v42, %v1061_v45 }
 0x376   :  { %v7167_v7 = vpop.f32.mrf.mxu1  ;;  %7412 = vmatmul.mubr.bf16.vlgmr.msra.gmra.mxu1 %v16885_v28  ;;  %v7128_v12 = vpop.f32.mrf.mxu0  ;;  %7422 = vmatprep.subr.bf16.mxu0 %v14060_v50  ;;  %v1037_v50 = vld [vmem:[#allocation5 + $0x1928] sm:$0xff] }
 0x377   :  { %7462 = vmatpush1.bf16.msra.mxu1 %v14331_v56  ;;  %v17008_v44 = vadd.f32 %v7167_v7, %v7127_v5  ;;  %v7129_v18 = vadd.f32 %v7128_v12, %v17003_v49  ;;  %7493 = vmatprep.mubr.bf16.mxu1 %v16890_v53  ;;  %v14299_v49 = vcombine.low %v1085_v8, %v1093_v3  ;;  %v789_v56 = vld [vmem:[#allocation5 + $0x1168] sm:$0xff] }
 0x378   :  { %v7169_v19 = vpop.f32.mrf.mxu1  ;;  %7463 = vmatprep.subr.bf16.mxu1 %v14316_v57  ;;  %v7130_v21 = vpop.f32.mrf.mxu0  ;;  %v1045_v57 = vld [vmem:[#allocation5 + $0x1968] sm:$0xff]  ;;  %v13996_v0 = vcombine.high %v781_v2, %v789_v56  ;;  %v13995_v12 = vcombine.low %v781_v2, %v789_v56 }
 0x379   :  { %v17013_v27 = vadd.f32 %v7169_v19, %v7129_v18  ;;  %7423 = vmatpush1.bf16.msra.mxu0 %v14059_v11  ;;  %v14252_v8 = vcombine.high %v1037_v50, %v1045_v57  ;;  %v765_v3 = vld [vmem:[#allocation5 + $0x10a8] sm:$0xff]  ;;  %vm7852_vm7 = vcmp.gt.f32.partialorder %v17008_v44, 0.0 }
 0x37a   :  { %v7171_v29 = vpop.f32.mrf.mxu1  ;;  %v7131_v34 = vpop.f32.mrf.mxu0  ;;  %7424 = vmatprep.subr.bf16.mxu0 %v14044_v17  ;;  %v773_v5 = vld [vmem:[#allocation5 + $0x10e8] sm:$0xff] }
 0x37b   :  { %7464 = vmatpush1.bf16.msra.mxu1 %v14315_v15  ;;  %v1021_v7 = vld [vmem:[#allocation5 + $0x18a8] sm:$0xff]  ;;  %v14251_v15 = vcombine.low %v1037_v50, %v1045_v57  ;;  %v13980_v17 = vcombine.high %v765_v3, %v773_v5  ;;  %v13979_v21 = vcombine.low %v765_v3, %v773_v5  ;;  %v14220_v29 = vcombine.high %v1005_v23, %v1013_v25 }
 0x37c   :  { %v7172_v36 = vpop.f32.mrf.mxu1  ;;  %7465 = vmatprep.subr.bf16.mxu1 %v14300_v22  ;;  %v1029_v11 = vld [vmem:[#allocation5 + $0x18e8] sm:$0xff]  ;;  %vm7853_vm5 = vcmp.gt.f32.partialorder %v17013_v27, 0.0 }
 0x37d   :  { %7425 = vmatpush1.bf16.msra.mxu0 %v14043_v30  ;;  %v14236_v18 = vcombine.high %v1021_v7, %v1029_v11  ;;  %v749_v19 = vld [vmem:[#allocation5 + $0x1028] sm:$0xff]  ;;  %v14235_v60 = vcombine.low %v1021_v7, %v1029_v11 }
 0x37e   :  { %7426 = vmatprep.subr.bf16.mxu0 %v14028_v63  ;;  %v757_v22 = vld [vmem:[#allocation5 + $0x1068] sm:$0xff] }
 0x37f   :  { %7466 = vmatpush1.bf16.msra.mxu1 %v14299_v49  ;;  %v13964_v26 = vcombine.high %v749_v19, %v757_v22  ;;  %v989_v30 = vld [vmem:[#allocation5 + $0x17a8] sm:$0xff]  ;;  %v13963_v36 = vcombine.low %v749_v19, %v757_v22 }
 0x380   :  { %7467 = vmatprep.subr.bf16.mxu1 %v14284_v37  ;;  %v997_v34 = vld [vmem:[#allocation5 + $0x17e8] sm:$0xff]  ;;  %v14219_v37 = vcombine.low %v1005_v23, %v1013_v25 }
 0x381   :  { %7427 = vmatpush1.bf16.msra.mxu0 %v14027_v46  ;;  %v1245_v49 = vld [vmem:[#allocation5 + $0x1fa8] sm:$0xff]  ;;  %v14204_v38 = vcombine.high %v989_v30, %v997_v34 }
 0x382   :  { %7428 = vmatprep.subr.bf16.mxu0 %v14012_v48  ;;  %v1253_v63 = vld [vmem:[#allocation5 + $0x1fe8] sm:$0xff]  ;;  %v14203_v48 = vcombine.low %v989_v30, %v997_v34 }
 0x383   :  { %7468 = vmatpush1.bf16.msra.mxu1 %v14283_v47  ;;  %v14460_v41 = vcombine.high %v1245_v49, %v1253_v63  ;;  %v973_v42 = vld [vmem:[#allocation5 + $0x1728] sm:$0xff] }
 0x384   :  { %7469 = vmatprep.subr.bf16.mxu1 %v14268_v54  ;;  %v981_v45 = vld [vmem:[#allocation5 + $0x1768] sm:$0xff]  ;;  %v14459_v54 = vcombine.low %v1245_v49, %v1253_v63 }
 0x385   :  { %7429 = vmatpush1.bf16.msra.mxu0 %v14011_v59  ;;  %v1229_v46 = vld [vmem:[#allocation5 + $0x1f28] sm:$0xff]  ;;  %v14188_v2 = vcombine.high %v973_v42, %v981_v45 }
 0x386   :  { %7430 = vmatprep.subr.bf16.mxu0 %v13996_v0  ;;  %v1237_v47 = vld [vmem:[#allocation5 + $0x1f68] sm:$0xff]  ;;  %v14187_v0 = vcombine.low %v973_v42, %v981_v45 }
 0x387   :  { %7470 = vmatpush1.bf16.msra.mxu1 %v14267_v62  ;;  %v14444_v56 = vcombine.high %v1229_v46, %v1237_v47  ;;  %v957_v50 = vld [vmem:[#allocation5 + $0x16a8] sm:$0xff] }
 0x388   :  { %7471 = vmatprep.subr.bf16.mxu1 %v14252_v8  ;;  %v965_v57 = vld [vmem:[#allocation5 + $0x16e8] sm:$0xff]  ;;  %v14443_v8 = vcombine.low %v1229_v46, %v1237_v47 }
 0x389   :  { %7431 = vmatpush1.bf16.msra.mxu0 %v13995_v12  ;;  %v1213_v59 = vld [vmem:[#allocation5 + $0x1ea8] sm:$0xff]  ;;  %v14172_v3 = vcombine.high %v957_v50, %v965_v57 }
 0x38a   :  { %7432 = vmatprep.subr.bf16.mxu0 %v13980_v17  ;;  %v1221_v62 = vld [vmem:[#allocation5 + $0x1ee8] sm:$0xff]  ;;  %v14171_v17 = vcombine.low %v957_v50, %v965_v57 }
 0x38b   :  { %7472 = vmatpush1.bf16.msra.mxu1 %v14251_v15  ;;  %v14428_v5 = vcombine.high %v1213_v59, %v1221_v62  ;;  %v941_v7 = vld [vmem:[#allocation5 + $0x1628] sm:$0xff] }
 0x38c   :  { %7473 = vmatprep.subr.bf16.mxu1 %v14236_v18  ;;  %v949_v11 = vld [vmem:[#allocation5 + $0x1668] sm:$0xff]  ;;  %v14427_v18 = vcombine.low %v1213_v59, %v1221_v62 }
 0x38d   :  { %7433 = vmatpush1.bf16.msra.mxu0 %v13979_v21  ;;  %v1197_v12 = vld [vmem:[#allocation5 + $0x1e28] sm:$0xff]  ;;  %v14156_v19 = vcombine.high %v941_v7, %v949_v11 }
 0x38e   :  { %7434 = vmatprep.subr.bf16.mxu0 %v13964_v26  ;;  %v1205_v15 = vld [vmem:[#allocation5 + $0x1e68] sm:$0xff]  ;;  %v14155_v26 = vcombine.low %v941_v7, %v949_v11 }
 0x38f   :  { %7474 = vmatpush1.bf16.msra.mxu1 %v14235_v60  ;;  %v14412_v22 = vcombine.high %v1197_v12, %v1205_v15  ;;  %v925_v23 = vld [vmem:[#allocation5 + $0x15a8] sm:$0xff] }
 0x390   :  { %7475 = vmatprep.subr.bf16.mxu1 %v14220_v29  ;;  %v933_v25 = vld [vmem:[#allocation5 + $0x15e8] sm:$0xff]  ;;  %v14411_v29 = vcombine.low %v1197_v12, %v1205_v15  ;;  %v350_v12 = vld [vmem:[#allocation5 + $0x3b0] sm:$0xff] }
 0x391   :  { %7435 = vmatpush1.bf16.msra.mxu0 %v13963_v36  ;;  %v1181_v21 = vld [vmem:[#allocation5 + $0x1da8] sm:$0xff]  ;;  %v14140_v30 = vcombine.high %v925_v23, %v933_v25  ;;  %v358_v15 = vld [vmem:[#allocation5 + $0x3f0] sm:$0xff] }
 0x392   :  { %7436 = vmatprep.subr.bf16.mxu0 %v14204_v38  ;;  %v1189_v60 = vld [vmem:[#allocation5 + $0x1de8] sm:$0xff]  ;;  %v14139_v38 = vcombine.low %v925_v23, %v933_v25  ;;  %v13566_v25 = vcombine.high %v350_v12, %v358_v15 }
 0x393   :  { %7476 = vmatpush1.bf16.msra.mxu1 %v14219_v37  ;;  %v14396_v34 = vcombine.high %v1181_v21, %v1189_v60  ;;  %v909_v49 = vld [vmem:[#allocation5 + $0x1528] sm:$0xff] }
 0x394   :  { %7477 = vmatprep.subr.bf16.mxu1 %v14460_v41  ;;  %v917_v63 = vld [vmem:[#allocation5 + $0x1568] sm:$0xff]  ;;  %v14395_v41 = vcombine.low %v1181_v21, %v1189_v60  ;;  %v334_v60 = vld [vmem:[#allocation5 + $0x330] sm:$0xff] }
 0x395   :  { %7437 = vmatpush2.bf16.msra.mxu0 %v14203_v48  ;;  %v1165_v36 = vld [vmem:[#allocation5 + $0x1d28] sm:$0xff]  ;;  %v14124_v42 = vcombine.high %v909_v49, %v917_v63 }
 0x396   :  { %7438 = vmatprep.subr.bf16.mxu0 %v14188_v2  ;;  %v1173_v37 = vld [vmem:[#allocation5 + $0x1d68] sm:$0xff]  ;;  %v14123_v2 = vcombine.low %v909_v49, %v917_v63  ;;  %v13565_v49 = vcombine.low %v350_v12, %v358_v15  ;;  %v566_v12 = vld [vmem:[#allocation5 + $0xa70] sm:$0xff] }
 0x397   :  { %7478 = vmatpush2.bf16.msra.mxu1 %v14459_v54  ;;  %v14380_v45 = vcombine.high %v1165_v36, %v1173_v37  ;;  %v893_v46 = vld [vmem:[#allocation5 + $0x14a8] sm:$0xff] }
 0x398   :  { %7479 = vmatprep.subr.bf16.mxu1 %v14444_v56  ;;  %v901_v47 = vld [vmem:[#allocation5 + $0x14e8] sm:$0xff]  ;;  %v14379_v56 = vcombine.low %v1165_v36, %v1173_v37 }
 0x399   :  { %7439 = vmatpush2.bf16.msra.mxu0 %v14187_v0  ;;  %v1149_v48 = vld [vmem:[#allocation5 + $0x1ca8] sm:$0xff]  ;;  %v14108_v50 = vcombine.high %v893_v46, %v901_v47 }
 0x39a   :  { %7440 = vmatprep.subr.bf16.mxu0 %v14172_v3  ;;  %v1157_v54 = vld [vmem:[#allocation5 + $0x1ce8] sm:$0xff]  ;;  %v14107_v3 = vcombine.low %v893_v46, %v901_v47  ;;  %v574_v46 = vld [vmem:[#allocation5 + $0xab0] sm:$0xff] }
 0x39b   :  { %7480 = vmatpush2.bf16.msra.mxu1 %v14443_v8  ;;  %v14364_v57 = vcombine.high %v1149_v48, %v1157_v54  ;;  %v877_v59 = vld [vmem:[#allocation5 + $0x1428] sm:$0xff]  ;;  %v582_v47 = vld [vmem:[#allocation5 + $0xaf0] sm:$0xff] }
 0x39c   :  { %7481 = vmatprep.subr.bf16.mxu1 %v14428_v5  ;;  %v885_v62 = vld [vmem:[#allocation5 + $0x1468] sm:$0xff]  ;;  %v14363_v5 = vcombine.low %v1149_v48, %v1157_v54 }
 0x39d   :  { %7441 = vmatpush2.bf16.msra.mxu0 %v14171_v17  ;;  %v1133_v0 = vld [vmem:[#allocation5 + $0x1c28] sm:$0xff]  ;;  %v14092_v7 = vcombine.high %v877_v59, %v885_v62  ;;  %v606_v17 = vld [vmem:[#allocation5 + $0xbb0] sm:$0xff] }
 0x39e   :  { %7442 = vmatprep.subr.bf16.mxu0 %v14156_v19  ;;  %v1141_v8 = vld [vmem:[#allocation5 + $0x1c68] sm:$0xff]  ;;  %v14091_v19 = vcombine.low %v877_v59, %v885_v62 }
 0x39f   :  { %7482 = vmatpush2.bf16.msra.mxu1 %v14427_v18  ;;  %v14348_v11 = vcombine.high %v1133_v0, %v1141_v8  ;;  %v614_v18 = vld [vmem:[#allocation5 + $0xbf0] sm:$0xff]  ;;  %v17015_v23 = vld [vmem:[#allocation7 + $0x8] sm:$0xff] }
 0x3a0   :  { %7483 = vmatprep.subr.bf16.mxu1 %v14412_v22  ;;  %v14347_v22 = vcombine.low %v1133_v0, %v1141_v8  ;;  %v13822_v21 = vcombine.high %v606_v17, %v614_v18  ;;  %v13821_v63 = vcombine.low %v606_v17, %v614_v18  ;;  %v1299_v37 = vrot.slane %v17015_v23, %v16911_v40 }
 0x3a1   :  { %7443 = vmatpush2.bf16.msra.mxu0 %v14155_v26  ;;  %v342_v26 = vld [vmem:[#allocation5 + $0x370] sm:$0xff]  ;;  %v13790_v8 = vcombine.high %v574_v46, %v582_v47 }
 0x3a2   :  { %7444 = vmatprep.subr.bf16.mxu0 %v14140_v30  ;;  %v598_v30 = vld [vmem:[#allocation5 + $0xb70] sm:$0xff]  ;;  %v13550_v36 = vcombine.high %v334_v60, %v342_v26 }
 0x3a3   :  { %7484 = vmatpush2.bf16.msra.mxu1 %v14411_v29  ;;  %v590_v29 = vld [vmem:[#allocation5 + $0xb30] sm:$0xff] }
 0x3a4   :  { %7485 = vmatprep.subr.bf16.mxu1 %v14396_v34  ;;  %v1295_v34 = vrot.slane %v17015_v23, %v16908_v31 }
 0x3a5   :  { %7445 = vmatpush2.bf16.msra.mxu0 %v14139_v38  ;;  %v13806_v38 = vcombine.high %v590_v29, %v598_v30 }
 0x3a6   :  { %7446 = vmatprep.subr.bf16.mxu0 %v14124_v42  ;;  %v326_v42 = vld [vmem:[#allocation5 + $0x2f0] sm:$0xff] }
 0x3a7   :  { %7486 = vmatpush2.bf16.msra.mxu1 %v14395_v41  ;;  %v318_v41 = vld [vmem:[#allocation5 + $0x2b0] sm:$0xff] }
 0x3a8   :  { %7487 = vmatprep.subr.bf16.mxu1 %v14380_v45  ;;  %v13533_v18 = vcombine.low %v318_v41, %v326_v42 }
 0x3a9   :  { %7447 = vmatpush2.bf16.msra.mxu0 %v14123_v2  ;;  %v13549_v2 = vcombine.low %v334_v60, %v342_v26  ;;  %v286_v26 = vld [vmem:[#allocation5 + $0x1b0] sm:$0xff] }
 0x3aa   :  { %7448 = vmatprep.subr.bf16.mxu0 %v14108_v50  ;;  %v13805_v50 = vcombine.low %v590_v29, %v598_v30  ;;  %v294_v29 = vld [vmem:[#allocation5 + $0x1f0] sm:$0xff] }
 0x3ab   :  { %7488 = vmatpush2.bf16.msra.mxu1 %v14379_v56  ;;  %v542_v30 = vld [vmem:[#allocation5 + $0x9b0] sm:$0xff] }
 0x3ac   :  { %7489 = vmatprep.subr.bf16.mxu1 %v14364_v57  ;;  %v13534_v57 = vcombine.high %v318_v41, %v326_v42  ;;  %v278_v41 = vld [vmem:[#allocation5 + $0x170] sm:$0xff] }
 0x3ad   :  { %7449 = vmatpush2.bf16.msra.mxu0 %v14107_v3  ;;  %v302_v3 = vld [vmem:[#allocation5 + $0x230] sm:$0xff] }
 0x3ae   :  { %7450 = vmatprep.subr.bf16.mxu0 %v14092_v7  ;;  %v526_v42 = vld [vmem:[#allocation5 + $0x930] sm:$0xff] }
 0x3af   :  { %7490 = vmatpush2.bf16.msra.mxu1 %v14363_v5  ;;  %v310_v5 = vld [vmem:[#allocation5 + $0x270] sm:$0xff] }
 0x3b0   :  { %7491 = vmatprep.subr.bf16.mxu1 %v14348_v11  ;;  %v558_v11 = vld [vmem:[#allocation5 + $0xa30] sm:$0xff] }
 0x3b1   :  { %7451 = vmatpush2.bf16.msra.mxu0 %v14091_v19  ;;  %v13774_v60 = vcombine.high %v558_v11, %v566_v12 }
 0x3b2   :  { %7502 = vmatprep.subr.bf16.mxu0 %v13566_v25  ;;  %v13518_v25 = vcombine.high %v302_v3, %v310_v5 }
 0x3b3   :  { %7492 = vmatpush2.bf16.msra.mxu1 %v14347_v22  ;;  %v13789_v22 = vcombine.low %v574_v46, %v582_v47  ;;  %v13501_v46 = vcombine.low %v286_v26, %v294_v29 }
 0x3b4   :  { %7543 = vmatprep.subr.bf16.mxu1 %v13822_v21  ;;  %v7208_v45 = vpop.f32.mrf.mxu0  ;;  %7453 = vmatmul.mubr.bf16.vlgmr.msra.gmra.mxu0 %v16872_v33 }
 0x3b5   :  { %v7209_v48 = vadd.f32 %v7208_v45, %v1295_v34  ;;  %7503 = vmatpush1.bf16.msra.mxu0 %v13565_v49  ;;  %7534 = vmatprep.mubr.bf16.mxu0 %v16859_v9  ;;  %v550_v34 = vld [vmem:[#allocation5 + $0x9f0] sm:$0xff]  ;;  %v13517_v49 = vcombine.low %v302_v3, %v310_v5 }
 0x3b6   :  { %v7249_v54 = vpop.f32.mrf.mxu1  ;;  %7494 = vmatmul.mubr.bf16.vlgmr.msra.gmra.mxu1 %v16897_v55  ;;  %v7210_v56 = vpop.f32.mrf.mxu0  ;;  %7504 = vmatprep.subr.bf16.mxu0 %v13550_v36  ;;  %v13502_v36 = vcombine.high %v286_v26, %v294_v29  ;;  %v534_v45 = vld [vmem:[#allocation5 + $0x970] sm:$0xff]  ;;  %v13757_v47 = vcombine.low %v542_v30, %v550_v34 }
 0x3b7   :  { %7544 = vmatpush1.bf16.msra.mxu1 %v13821_v63  ;;  %v17023_v59 = vadd.f32 %v7249_v54, %v7209_v48  ;;  %v7211_v62 = vadd.f32 %v7210_v56, %v1299_v37  ;;  %7575 = vmatprep.mubr.bf16.mxu1 %v16864_v13  ;;  %v13773_v63 = vcombine.low %v558_v11, %v566_v12  ;;  %v262_v56 = vld [vmem:[#allocation5 + $0xf0] sm:$0xff] }
 0x3b8   :  { %v7251_v0 = vpop.f32.mrf.mxu1  ;;  %7545 = vmatprep.subr.bf16.mxu1 %v13806_v38  ;;  %v7212_v7 = vpop.f32.mrf.mxu0  ;;  %v13758_v37 = vcombine.high %v542_v30, %v550_v34  ;;  %v270_v38 = vld [vmem:[#allocation5 + $0x130] sm:$0xff]  ;;  %v13742_v54 = vcombine.high %v526_v42, %v534_v45 }
 0x3b9   :  { %v17027_v15 = vadd.f32 %v7251_v0, %v7211_v62  ;;  %7505 = vmatpush1.bf16.msra.mxu0 %v13549_v2  ;;  %v13486_v48 = vcombine.high %v270_v38, %v278_v41  ;;  %v254_v2 = vld [vmem:[#allocation5 + $0xb0] sm:$0xff]  ;;  %v13485_v62 = vcombine.low %v270_v38, %v278_v41  ;;  %v13741_v0 = vcombine.low %v526_v42, %v534_v45 }
 0x3ba   :  { %v7253_v17 = vpop.f32.mrf.mxu1  ;;  %v7213_v19 = vpop.f32.mrf.mxu0  ;;  %7506 = vmatprep.subr.bf16.mxu0 %v13534_v57  ;;  %v518_v57 = vld [vmem:[#allocation5 + $0x8f0] sm:$0xff] }
 0x3bb   :  { %7546 = vmatpush1.bf16.msra.mxu1 %v13805_v50  ;;  %v510_v50 = vld [vmem:[#allocation5 + $0x8b0] sm:$0xff]  ;;  %v13469_v17 = vcombine.low %v254_v2, %v262_v56 }
 0x3bc   :  { %v7254_v21 = vpop.f32.mrf.mxu1  ;;  %7547 = vmatprep.subr.bf16.mxu1 %v13790_v8  ;;  %v13470_v8 = vcombine.high %v254_v2, %v262_v56  ;;  %v13726_v3 = vcombine.high %v510_v50, %v518_v57  ;;  %v238_v5 = vld [vmem:[#allocation5 + $0x30] sm:$0xff] }
 0x3bd   :  { %7507 = vmatpush1.bf16.msra.mxu0 %v13533_v18  ;;  %v246_v7 = vld [vmem:[#allocation5 + $0x70] sm:$0xff]  ;;  %v13725_v18 = vcombine.low %v510_v50, %v518_v57 }
 0x3be   :  { %7508 = vmatprep.subr.bf16.mxu0 %v13518_v25  ;;  %v494_v11 = vld [vmem:[#allocation5 + $0x830] sm:$0xff]  ;;  %v13454_v19 = vcombine.high %v238_v5, %v246_v7  ;;  %v13453_v29 = vcombine.low %v238_v5, %v246_v7 }
 0x3bf   :  { %7548 = vmatpush1.bf16.msra.mxu1 %v13789_v22  ;;  %v502_v12 = vld [vmem:[#allocation5 + $0x870] sm:$0xff] }
 0x3c0   :  { %7549 = vmatprep.subr.bf16.mxu1 %v13774_v60  ;;  %v13710_v22 = vcombine.high %v494_v11, %v502_v12  ;;  %v478_v25 = vld [vmem:[#allocation5 + $0x7b0] sm:$0xff]  ;;  %v13709_v30 = vcombine.low %v494_v11, %v502_v12 }
 0x3c1   :  { %7509 = vmatpush1.bf16.msra.mxu0 %v13517_v49  ;;  %v486_v21 = vld [vmem:[#allocation5 + $0x7f0] sm:$0xff] }
 0x3c2   :  { %7510 = vmatprep.subr.bf16.mxu0 %v13502_v36  ;;  %v734_v60 = vld [vmem:[#allocation5 + $0xfb0] sm:$0xff]  ;;  %v13694_v34 = vcombine.high %v478_v25, %v486_v21  ;;  %v13693_v41 = vcombine.low %v478_v25, %v486_v21 }
 0x3c3   :  { %7550 = vmatpush1.bf16.msra.mxu1 %v13773_v63  ;;  %v742_v26 = vld [vmem:[#allocation5 + $0xff0] sm:$0xff] }
 0x3c4   :  { %7551 = vmatprep.subr.bf16.mxu1 %v13758_v37  ;;  %v13950_v49 = vcombine.high %v734_v60, %v742_v26  ;;  %v462_v63 = vld [vmem:[#allocation5 + $0x730] sm:$0xff]  ;;  %v13949_v42 = vcombine.low %v734_v60, %v742_v26 }
 0x3c5   :  { %7511 = vmatpush1.bf16.msra.mxu0 %v13501_v46  ;;  %v470_v36 = vld [vmem:[#allocation5 + $0x770] sm:$0xff] }
 0x3c6   :  { %7512 = vmatprep.subr.bf16.mxu0 %v13486_v48  ;;  %v718_v37 = vld [vmem:[#allocation5 + $0xf30] sm:$0xff]  ;;  %v13678_v45 = vcombine.high %v462_v63, %v470_v36  ;;  %v13677_v56 = vcombine.low %v462_v63, %v470_v36 }
 0x3c7   :  { %7552 = vmatpush1.bf16.msra.mxu1 %v13757_v47  ;;  %v726_v38 = vld [vmem:[#allocation5 + $0xf70] sm:$0xff] }
 0x3c8   :  { %7553 = vmatprep.subr.bf16.mxu1 %v13742_v54  ;;  %v13934_v46 = vcombine.high %v718_v37, %v726_v38  ;;  %v446_v47 = vld [vmem:[#allocation5 + $0x6b0] sm:$0xff]  ;;  %v13933_v50 = vcombine.low %v718_v37, %v726_v38 }
 0x3c9   :  { %7513 = vmatpush1.bf16.msra.mxu0 %v13485_v62  ;;  %v454_v48 = vld [vmem:[#allocation5 + $0x6f0] sm:$0xff] }
 0x3ca   :  { %7514 = vmatprep.subr.bf16.mxu0 %v13470_v8  ;;  %v702_v54 = vld [vmem:[#allocation5 + $0xeb0] sm:$0xff]  ;;  %v13662_v57 = vcombine.high %v446_v47, %v454_v48  ;;  %v13661_v7 = vcombine.low %v446_v47, %v454_v48 }
 0x3cb   :  { %7554 = vmatpush1.bf16.msra.mxu1 %v13741_v0  ;;  %v710_v2 = vld [vmem:[#allocation5 + $0xef0] sm:$0xff] }
 0x3cc   :  { %7555 = vmatprep.subr.bf16.mxu1 %v13726_v3  ;;  %v13918_v62 = vcombine.high %v702_v54, %v710_v2  ;;  %v430_v0 = vld [vmem:[#allocation5 + $0x630] sm:$0xff]  ;;  %v13917_v11 = vcombine.low %v702_v54, %v710_v2 }
 0x3cd   :  { %7515 = vmatpush1.bf16.msra.mxu0 %v13469_v17  ;;  %v438_v8 = vld [vmem:[#allocation5 + $0x670] sm:$0xff] }
 0x3ce   :  { %7516 = vmatprep.subr.bf16.mxu0 %v13454_v19  ;;  %v686_v3 = vld [vmem:[#allocation5 + $0xe30] sm:$0xff]  ;;  %v13646_v12 = vcombine.high %v430_v0, %v438_v8  ;;  %v13645_v21 = vcombine.low %v430_v0, %v438_v8 }
 0x3cf   :  { %7556 = vmatpush1.bf16.msra.mxu1 %v13725_v18  ;;  %v694_v5 = vld [vmem:[#allocation5 + $0xe70] sm:$0xff] }
 0x3d0   :  { %7557 = vmatprep.subr.bf16.mxu1 %v13710_v22  ;;  %v13902_v17 = vcombine.high %v686_v3, %v694_v5  ;;  %v414_v18 = vld [vmem:[#allocation5 + $0x5b0] sm:$0xff]  ;;  %v13901_v60 = vcombine.low %v686_v3, %v694_v5 }
 0x3d1   :  { %7517 = vmatpush1.bf16.msra.mxu0 %v13453_v29  ;;  %v422_v19 = vld [vmem:[#allocation5 + $0x5f0] sm:$0xff] }
 0x3d2   :  { %7518 = vmatprep.subr.bf16.mxu0 %v13694_v34  ;;  %v670_v22 = vld [vmem:[#allocation5 + $0xdb0] sm:$0xff]  ;;  %v13630_v26 = vcombine.high %v414_v18, %v422_v19  ;;  %v13629_v36 = vcombine.low %v414_v18, %v422_v19 }
 0x3d3   :  { %7558 = vmatpush1.bf16.msra.mxu1 %v13709_v30  ;;  %v678_v25 = vld [vmem:[#allocation5 + $0xdf0] sm:$0xff] }
 0x3d4   :  { %7559 = vmatprep.subr.bf16.mxu1 %v13950_v49  ;;  %v13886_v29 = vcombine.high %v670_v22, %v678_v25  ;;  %v398_v30 = vld [vmem:[#allocation5 + $0x530] sm:$0xff]  ;;  %v13885_v37 = vcombine.low %v670_v22, %v678_v25 }
 0x3d5   :  { %7519 = vmatpush2.bf16.msra.mxu0 %v13693_v41  ;;  %v406_v34 = vld [vmem:[#allocation5 + $0x570] sm:$0xff] }
 0x3d6   :  { %7520 = vmatprep.subr.bf16.mxu0 %v13678_v45  ;;  %v654_v49 = vld [vmem:[#allocation5 + $0xd30] sm:$0xff]  ;;  %v13614_v38 = vcombine.high %v398_v30, %v406_v34  ;;  %v13613_v48 = vcombine.low %v398_v30, %v406_v34 }
 0x3d7   :  { %7560 = vmatpush2.bf16.msra.mxu1 %v13949_v42  ;;  %v662_v63 = vld [vmem:[#allocation5 + $0xd70] sm:$0xff] }
 0x3d8   :  { %7561 = vmatprep.subr.bf16.mxu1 %v13934_v46  ;;  %v13870_v41 = vcombine.high %v654_v49, %v662_v63  ;;  %v382_v42 = vld [vmem:[#allocation5 + $0x4b0] sm:$0xff]  ;;  %v13869_v54 = vcombine.low %v654_v49, %v662_v63 }
 0x3d9   :  { %7521 = vmatpush2.bf16.msra.mxu0 %v13677_v56  ;;  %v390_v45 = vld [vmem:[#allocation5 + $0x4f0] sm:$0xff] }
 0x3da   :  { %7522 = vmatprep.subr.bf16.mxu0 %v13662_v57  ;;  %v638_v46 = vld [vmem:[#allocation5 + $0xcb0] sm:$0xff]  ;;  %v13598_v2 = vcombine.high %v382_v42, %v390_v45  ;;  %v13597_v8 = vcombine.low %v382_v42, %v390_v45 }
 0x3db   :  { %7562 = vmatpush2.bf16.msra.mxu1 %v13933_v50  ;;  %v646_v47 = vld [vmem:[#allocation5 + $0xcf0] sm:$0xff] }
 0x3dc   :  { %7563 = vmatprep.subr.bf16.mxu1 %v13918_v62  ;;  %v13854_v56 = vcombine.high %v638_v46, %v646_v47  ;;  %v366_v50 = vld [vmem:[#allocation5 + $0x430] sm:$0xff]  ;;  %v13853_v3 = vcombine.low %v638_v46, %v646_v47 }
 0x3dd   :  { %7523 = vmatpush2.bf16.msra.mxu0 %v13661_v7  ;;  %v374_v57 = vld [vmem:[#allocation5 + $0x470] sm:$0xff] }
 0x3de   :  { %7524 = vmatprep.subr.bf16.mxu0 %v13646_v12  ;;  %v622_v62 = vld [vmem:[#allocation5 + $0xc30] sm:$0xff]  ;;  %v13582_v5 = vcombine.high %v366_v50, %v374_v57  ;;  %v13581_v19 = vcombine.low %v366_v50, %v374_v57 }
 0x3df   :  { %7564 = vmatpush2.bf16.msra.mxu1 %v13917_v11  ;;  %v630_v0 = vld [vmem:[#allocation5 + $0xc70] sm:$0xff] }
 0x3e0   :  { %7565 = vmatprep.subr.bf16.mxu1 %v13902_v17  ;;  %v13838_v7 = vcombine.high %v622_v62, %v630_v0  ;;  %v862_v11 = vld [vmem:[#allocation5 + $0x13b0] sm:$0xff]  ;;  %v13837_v22 = vcombine.low %v622_v62, %v630_v0 }
 0x3e1   :  { %7525 = vmatpush2.bf16.msra.mxu0 %v13645_v21  ;;  %v870_v12 = vld [vmem:[#allocation5 + $0x13f0] sm:$0xff] }
 0x3e2   :  { %7526 = vmatprep.subr.bf16.mxu0 %v13630_v26  ;;  %v1118_v17 = vld [vmem:[#allocation5 + $0x1bb0] sm:$0xff]  ;;  %v14078_v25 = vcombine.high %v862_v11, %v870_v12  ;;  %v14077_v34 = vcombine.low %v862_v11, %v870_v12 }
 0x3e3   :  { %7566 = vmatpush2.bf16.msra.mxu1 %v13901_v60  ;;  %v1126_v18 = vld [vmem:[#allocation5 + $0x1bf0] sm:$0xff] }
 0x3e4   :  { %7567 = vmatprep.subr.bf16.mxu1 %v13886_v29  ;;  %v14334_v21 = vcombine.high %v1118_v17, %v1126_v18  ;;  %v846_v60 = vld [vmem:[#allocation5 + $0x1330] sm:$0xff]  ;;  %v14333_v49 = vcombine.low %v1118_v17, %v1126_v18 }
 0x3e5   :  { %7527 = vmatpush2.bf16.msra.mxu0 %v13629_v36  ;;  %v854_v26 = vld [vmem:[#allocation5 + $0x1370] sm:$0xff] }
 0x3e6   :  { %7528 = vmatprep.subr.bf16.mxu0 %v13614_v38  ;;  %v1102_v29 = vld [vmem:[#allocation5 + $0x1b30] sm:$0xff]  ;;  %v14062_v63 = vcombine.high %v846_v60, %v854_v26 }
 0x3e7   :  { %7568 = vmatpush2.bf16.msra.mxu1 %v13885_v37  ;;  %v1110_v30 = vld [vmem:[#allocation5 + $0x1b70] sm:$0xff] }
 0x3e8   :  { %7569 = vmatprep.subr.bf16.mxu1 %v13870_v41  ;;  %v14318_v36 = vcombine.high %v1102_v29, %v1110_v30  ;;  %v830_v37 = vld [vmem:[#allocation5 + $0x12b0] sm:$0xff] }
 0x3e9   :  { %7529 = vmatpush2.bf16.msra.mxu0 %v13613_v48  ;;  %v838_v38 = vld [vmem:[#allocation5 + $0x12f0] sm:$0xff]  ;;  %v14061_v48 = vcombine.low %v846_v60, %v854_v26 }
 0x3ea   :  { %7530 = vmatprep.subr.bf16.mxu0 %v13598_v2  ;;  %v1086_v42 = vld [vmem:[#allocation5 + $0x1ab0] sm:$0xff]  ;;  %v14317_v2 = vcombine.low %v1102_v29, %v1110_v30  ;;  %v14045_v17 = vcombine.low %v830_v37, %v838_v38 }
 0x3eb   :  { %7570 = vmatpush2.bf16.msra.mxu1 %v13869_v54  ;;  %v1094_v45 = vld [vmem:[#allocation5 + $0x1af0] sm:$0xff] }
 0x3ec   :  { %7571 = vmatprep.subr.bf16.mxu1 %v13854_v56  ;;  %v14046_v56 = vcombine.high %v830_v37, %v838_v38  ;;  %v14302_v0 = vcombine.high %v1086_v42, %v1094_v45  ;;  %v806_v60 = vld [vmem:[#allocation5 + $0x11f0] sm:$0xff] }
 0x3ed   :  { %7531 = vmatpush2.bf16.msra.mxu0 %v13597_v8  ;;  %v814_v8 = vld [vmem:[#allocation5 + $0x1230] sm:$0xff] }
 0x3ee   :  { %7532 = vmatprep.subr.bf16.mxu0 %v13582_v5  ;;  %v1070_v5 = vld [vmem:[#allocation5 + $0x1a30] sm:$0xff] }
 0x3ef   :  { %7572 = vmatpush2.bf16.msra.mxu1 %v13853_v3  ;;  %v822_v3 = vld [vmem:[#allocation5 + $0x1270] sm:$0xff] }
 0x3f0   :  { %7573 = vmatprep.subr.bf16.mxu1 %v13838_v7  ;;  %v1078_v7 = vld [vmem:[#allocation5 + $0x1a70] sm:$0xff]  ;;  %v14029_v30 = vcombine.low %v814_v8, %v822_v3 }
 0x3f1   :  { %7533 = vmatpush2.bf16.msra.mxu0 %v13581_v19  ;;  %v14030_v19 = vcombine.high %v814_v8, %v822_v3  ;;  %v1054_v26 = vld [vmem:[#allocation5 + $0x19b0] sm:$0xff] }
 0x3f2   :  { %7584 = vmatprep.subr.bf16.mxu0 %v14078_v25  ;;  %v14286_v25 = vcombine.high %v1070_v5, %v1078_v7  ;;  %v1062_v29 = vld [vmem:[#allocation5 + $0x19f0] sm:$0xff] }
 0x3f3   :  { %7574 = vmatpush2.bf16.msra.mxu1 %v13837_v22  ;;  %v790_v37 = vld [vmem:[#allocation5 + $0x1170] sm:$0xff] }
 0x3f4   :  { %7625 = vmatprep.subr.bf16.mxu1 %v14334_v21  ;;  %v7290_v41 = vpop.f32.mrf.mxu0  ;;  %7535 = vmatmul.mubr.bf16.vlgmr.msra.gmra.mxu0 %v16878_v24  ;;  %v798_v21 = vld [vmem:[#allocation5 + $0x11b0] sm:$0xff] }
 0x3f5   :  { %v7291_v46 = vadd.f32 %v7290_v41, %v17023_v59  ;;  %7585 = vmatpush1.bf16.msra.mxu0 %v14077_v34  ;;  %7616 = vmatprep.mubr.bf16.mxu0 %v16881_v35  ;;  %v14285_v34 = vcombine.low %v1070_v5, %v1078_v7  ;;  %v1038_v38 = vld [vmem:[#allocation5 + $0x1930] sm:$0xff] }
 0x3f6   :  { %v7331_v47 = vpop.f32.mrf.mxu1  ;;  %7576 = vmatmul.mubr.bf16.vlgmr.msra.gmra.mxu1 %v16885_v28  ;;  %v7292_v54 = vpop.f32.mrf.mxu0  ;;  %7586 = vmatprep.subr.bf16.mxu0 %v14062_v63  ;;  %v14270_v63 = vcombine.high %v1054_v26, %v1062_v29  ;;  %v1046_v41 = vld [vmem:[#allocation5 + $0x1970] sm:$0xff] }
 0x3f7   :  { %7626 = vmatpush1.bf16.msra.mxu1 %v14333_v49  ;;  %v17032_v50 = vadd.f32 %v7331_v47, %v7291_v46  ;;  %v7293_v57 = vadd.f32 %v7292_v54, %v17027_v15  ;;  %7657 = vmatprep.mubr.bf16.mxu1 %v16890_v53  ;;  %v14301_v15 = vcombine.low %v1086_v42, %v1094_v45  ;;  %v774_v54 = vld [vmem:[#allocation5 + $0x10f0] sm:$0xff] }
 0x3f8   :  { %v7333_v62 = vpop.f32.mrf.mxu1  ;;  %7627 = vmatprep.subr.bf16.mxu1 %v14318_v36  ;;  %v7294_v59 = vpop.f32.mrf.mxu0  ;;  %v14014_v49 = vcombine.high %v798_v21, %v806_v60  ;;  %v782_v36 = vld [vmem:[#allocation5 + $0x1130] sm:$0xff]  ;;  %v14013_v42 = vcombine.low %v798_v21, %v806_v60  ;;  %v14269_v45 = vcombine.low %v1054_v26, %v1062_v29  ;;  %v14254_v47 = vcombine.high %v1038_v38, %v1046_v41 }
 0x3f9   :  { %v17037_v11 = vadd.f32 %v7333_v62, %v7293_v57  ;;  %7587 = vmatpush1.bf16.msra.mxu0 %v14061_v48  ;;  %v13998_v46 = vcombine.high %v782_v36, %v790_v37  ;;  %v766_v48 = vld [vmem:[#allocation5 + $0x10b0] sm:$0xff]  ;;  %v13997_v57 = vcombine.low %v782_v36, %v790_v37  ;;  %v14253_v62 = vcombine.low %v1038_v38, %v1046_v41 }
 0x3fa   :  { %v7335_v12 = vpop.f32.mrf.mxu1  ;;  %v7295_v18 = vpop.f32.mrf.mxu0  ;;  %7588 = vmatprep.subr.bf16.mxu0 %v14046_v56  ;;  %v1030_v56 = vld [vmem:[#allocation5 + $0x18f0] sm:$0xff]  ;;  %vm7854_vm10 = vcmp.gt.f32.partialorder %v17032_v50, 0.0 }
 0x3fb   :  { %7628 = vmatpush1.bf16.msra.mxu1 %v14317_v2  ;;  %v1022_v2 = vld [vmem:[#allocation5 + $0x18b0] sm:$0xff]  ;;  %v13981_v12 = vcombine.low %v766_v48, %v774_v54  ;;  %vm7855_vm8 = vcmp.gt.f32.partialorder %v17037_v11, 0.0 }
 0x3fc   :  { %v7336_v22 = vpop.f32.mrf.mxu1  ;;  %7629 = vmatprep.subr.bf16.mxu1 %v14302_v0  ;;  %v13982_v0 = vcombine.high %v766_v48, %v774_v54  ;;  %v14238_v8 = vcombine.high %v1022_v2, %v1030_v56  ;;  %v750_v3 = vld [vmem:[#allocation5 + $0x1030] sm:$0xff] }
 0x3fd   :  { %7589 = vmatpush1.bf16.msra.mxu0 %v14045_v17  ;;  %v758_v59 = vld [vmem:[#allocation5 + $0x1070] sm:$0xff]  ;;  %v14237_v17 = vcombine.low %v1022_v2, %v1030_v56 }
 0x3fe   :  { %7590 = vmatprep.subr.bf16.mxu0 %v14030_v19  ;;  %v1006_v5 = vld [vmem:[#allocation5 + $0x1830] sm:$0xff]  ;;  %v13966_v18 = vcombine.high %v750_v3, %v758_v59  ;;  %v13965_v60 = vcombine.low %v750_v3, %v758_v59 }
 0x3ff   :  { %7630 = vmatpush1.bf16.msra.mxu1 %v14301_v15  ;;  %v1014_v7 = vld [vmem:[#allocation5 + $0x1870] sm:$0xff] }
 0x400   :  { %7631 = vmatprep.subr.bf16.mxu1 %v14286_v25  ;;  %v14222_v15 = vcombine.high %v1006_v5, %v1014_v7  ;;  %v990_v19 = vld [vmem:[#allocation5 + $0x17b0] sm:$0xff]  ;;  %v14221_v26 = vcombine.low %v1006_v5, %v1014_v7 }
 0x401   :  { %7591 = vmatpush1.bf16.msra.mxu0 %v14029_v30  ;;  %v998_v22 = vld [vmem:[#allocation5 + $0x17f0] sm:$0xff] }
 0x402   :  { %7592 = vmatprep.subr.bf16.mxu0 %v14014_v49  ;;  %v1246_v25 = vld [vmem:[#allocation5 + $0x1fb0] sm:$0xff]  ;;  %v14206_v29 = vcombine.high %v990_v19, %v998_v22  ;;  %v14205_v37 = vcombine.low %v990_v19, %v998_v22 }
 0x403   :  { %7632 = vmatpush1.bf16.msra.mxu1 %v14285_v34  ;;  %v1254_v21 = vld [vmem:[#allocation5 + $0x1ff0] sm:$0xff] }
 0x404   :  { %7633 = vmatprep.subr.bf16.mxu1 %v14270_v63  ;;  %v14462_v30 = vcombine.high %v1246_v25, %v1254_v21  ;;  %v974_v34 = vld [vmem:[#allocation5 + $0x1730] sm:$0xff]  ;;  %v14461_v38 = vcombine.low %v1246_v25, %v1254_v21 }
 0x405   :  { %7593 = vmatpush1.bf16.msra.mxu0 %v14013_v42  ;;  %v982_v49 = vld [vmem:[#allocation5 + $0x1770] sm:$0xff] }
 0x406   :  { %7594 = vmatprep.subr.bf16.mxu0 %v13998_v46  ;;  %v1230_v63 = vld [vmem:[#allocation5 + $0x1f30] sm:$0xff]  ;;  %v14190_v41 = vcombine.high %v974_v34, %v982_v49  ;;  %v14189_v54 = vcombine.low %v974_v34, %v982_v49 }
 0x407   :  { %7634 = vmatpush1.bf16.msra.mxu1 %v14269_v45  ;;  %v1238_v36 = vld [vmem:[#allocation5 + $0x1f70] sm:$0xff] }
 0x408   :  { %7635 = vmatprep.subr.bf16.mxu1 %v14254_v47  ;;  %v14446_v42 = vcombine.high %v1230_v63, %v1238_v36  ;;  %v958_v45 = vld [vmem:[#allocation5 + $0x16b0] sm:$0xff]  ;;  %v14445_v2 = vcombine.low %v1230_v63, %v1238_v36 }
 0x409   :  { %7595 = vmatpush1.bf16.msra.mxu0 %v13997_v57  ;;  %v966_v46 = vld [vmem:[#allocation5 + $0x16f0] sm:$0xff] }
 0x40a   :  { %7596 = vmatprep.subr.bf16.mxu0 %v13982_v0  ;;  %v1214_v47 = vld [vmem:[#allocation5 + $0x1eb0] sm:$0xff]  ;;  %v14174_v56 = vcombine.high %v958_v45, %v966_v46  ;;  %v14173_v59 = vcombine.low %v958_v45, %v966_v46 }
 0x40b   :  { %7636 = vmatpush1.bf16.msra.mxu1 %v14253_v62  ;;  %v1222_v48 = vld [vmem:[#allocation5 + $0x1ef0] sm:$0xff] }
 0x40c   :  { %7637 = vmatprep.subr.bf16.mxu1 %v14238_v8  ;;  %v14430_v57 = vcombine.high %v1214_v47, %v1222_v48  ;;  %v942_v62 = vld [vmem:[#allocation5 + $0x1630] sm:$0xff]  ;;  %v14429_v5 = vcombine.low %v1214_v47, %v1222_v48 }
 0x40d   :  { %7597 = vmatpush1.bf16.msra.mxu0 %v13981_v12  ;;  %v950_v0 = vld [vmem:[#allocation5 + $0x1670] sm:$0xff] }
 0x40e   :  { %7598 = vmatprep.subr.bf16.mxu0 %v13966_v18  ;;  %v1198_v8 = vld [vmem:[#allocation5 + $0x1e30] sm:$0xff]  ;;  %v14158_v7 = vcombine.high %v942_v62, %v950_v0  ;;  %v14157_v22 = vcombine.low %v942_v62, %v950_v0 }
 0x40f   :  { %7638 = vmatpush1.bf16.msra.mxu1 %v14237_v17  ;;  %v1206_v3 = vld [vmem:[#allocation5 + $0x1e70] sm:$0xff] }
 0x410   :  { %7639 = vmatprep.subr.bf16.mxu1 %v14222_v15  ;;  %v14414_v12 = vcombine.high %v1198_v8, %v1206_v3  ;;  %v926_v17 = vld [vmem:[#allocation5 + $0x15b0] sm:$0xff]  ;;  %v14413_v25 = vcombine.low %v1198_v8, %v1206_v3 }
 0x411   :  { %7599 = vmatpush1.bf16.msra.mxu0 %v13965_v60  ;;  %v934_v18 = vld [vmem:[#allocation5 + $0x15f0] sm:$0xff] }
 0x412   :  { %7600 = vmatprep.subr.bf16.mxu0 %v14206_v29  ;;  %v1182_v15 = vld [vmem:[#allocation5 + $0x1db0] sm:$0xff]  ;;  %v14142_v21 = vcombine.high %v926_v17, %v934_v18  ;;  %v14141_v49 = vcombine.low %v926_v17, %v934_v18  ;;  %v615_v17 = vld [vmem:[#allocation5 + $0xbf8] sm:$0xff] }
 0x413   :  { %7640 = vmatpush1.bf16.msra.mxu1 %v14221_v26  ;;  %v1190_v19 = vld [vmem:[#allocation5 + $0x1df0] sm:$0xff] }
 0x414   :  { %7641 = vmatprep.subr.bf16.mxu1 %v14462_v30  ;;  %v14398_v60 = vcombine.high %v1182_v15, %v1190_v19  ;;  %v910_v26 = vld [vmem:[#allocation5 + $0x1530] sm:$0xff]  ;;  %v14397_v63 = vcombine.low %v1182_v15, %v1190_v19 }
 0x415   :  { %7601 = vmatpush2.bf16.msra.mxu0 %v14205_v37  ;;  %v918_v29 = vld [vmem:[#allocation5 + $0x1570] sm:$0xff] }
 0x416   :  { %7602 = vmatprep.subr.bf16.mxu0 %v14190_v41  ;;  %v1166_v30 = vld [vmem:[#allocation5 + $0x1d30] sm:$0xff]  ;;  %v14126_v36 = vcombine.high %v910_v26, %v918_v29  ;;  %v14125_v46 = vcombine.low %v910_v26, %v918_v29  ;;  %v599_v26 = vld [vmem:[#allocation5 + $0xb78] sm:$0xff]  ;;  %v1303_v29 = vrot.slane %v17015_v23, %v16934_v4 }
 0x417   :  { %7642 = vmatpush2.bf16.msra.mxu1 %v14461_v38  ;;  %v1174_v34 = vld [vmem:[#allocation5 + $0x1d70] sm:$0xff] }
 0x418   :  { %7643 = vmatprep.subr.bf16.mxu1 %v14446_v42  ;;  %v14382_v37 = vcombine.high %v1166_v30, %v1174_v34  ;;  %v894_v38 = vld [vmem:[#allocation5 + $0x14b0] sm:$0xff]  ;;  %v14381_v47 = vcombine.low %v1166_v30, %v1174_v34 }
 0x419   :  { %7603 = vmatpush2.bf16.msra.mxu0 %v14189_v54  ;;  %v902_v41 = vld [vmem:[#allocation5 + $0x14f0] sm:$0xff] }
 0x41a   :  { %7604 = vmatprep.subr.bf16.mxu0 %v14174_v56  ;;  %v1150_v42 = vld [vmem:[#allocation5 + $0x1cb0] sm:$0xff]  ;;  %v14110_v48 = vcombine.high %v894_v38, %v902_v41  ;;  %v14109_v0 = vcombine.low %v894_v38, %v902_v41  ;;  %v327_v38 = vld [vmem:[#allocation5 + $0x2f8] sm:$0xff] }
 0x41b   :  { %7644 = vmatpush2.bf16.msra.mxu1 %v14445_v2  ;;  %v1158_v45 = vld [vmem:[#allocation5 + $0x1cf0] sm:$0xff] }
 0x41c   :  { %7645 = vmatprep.subr.bf16.mxu1 %v14430_v57  ;;  %v14366_v54 = vcombine.high %v1150_v42, %v1158_v45  ;;  %v878_v2 = vld [vmem:[#allocation5 + $0x1430] sm:$0xff]  ;;  %v14365_v8 = vcombine.low %v1150_v42, %v1158_v45  ;;  %v575_v42 = vld [vmem:[#allocation5 + $0xab8] sm:$0xff] }
 0x41d   :  { %7605 = vmatpush2.bf16.msra.mxu0 %v14173_v59  ;;  %v886_v56 = vld [vmem:[#allocation5 + $0x1470] sm:$0xff]  ;;  %v583_v45 = vld [vmem:[#allocation5 + $0xaf8] sm:$0xff] }
 0x41e   :  { %7606 = vmatprep.subr.bf16.mxu0 %v14158_v7  ;;  %v1134_v57 = vld [vmem:[#allocation5 + $0x1c30] sm:$0xff]  ;;  %v14094_v3 = vcombine.high %v878_v2, %v886_v56  ;;  %v359_v7 = vld [vmem:[#allocation5 + $0x3f8] sm:$0xff]  ;;  %v14093_v18 = vcombine.low %v878_v2, %v886_v56 }
 0x41f   :  { %7646 = vmatpush2.bf16.msra.mxu1 %v14429_v5  ;;  %v1142_v62 = vld [vmem:[#allocation5 + $0x1c70] sm:$0xff]  ;;  %v351_v5 = vld [vmem:[#allocation5 + $0x3b8] sm:$0xff] }
 0x420   :  { %7647 = vmatprep.subr.bf16.mxu1 %v14414_v12  ;;  %v14350_v59 = vcombine.high %v1134_v57, %v1142_v62  ;;  %v607_v12 = vld [vmem:[#allocation5 + $0xbb8] sm:$0xff]  ;;  %v14349_v15 = vcombine.low %v1134_v57, %v1142_v62  ;;  %v13568_v19 = vcombine.high %v351_v5, %v359_v7  ;;  %v13567_v30 = vcombine.low %v351_v5, %v359_v7 }
 0x421   :  { %7607 = vmatpush2.bf16.msra.mxu0 %v14157_v22  ;;  %v13824_v22 = vcombine.high %v607_v12, %v615_v17  ;;  %v13823_v34 = vcombine.low %v607_v12, %v615_v17  ;;  %v559_v5 = vld [vmem:[#allocation5 + $0xa38] sm:$0xff] }
 0x422   :  { %7608 = vmatprep.subr.bf16.mxu0 %v14142_v21  ;;  %v343_v21 = vld [vmem:[#allocation5 + $0x378] sm:$0xff] }
 0x423   :  { %7648 = vmatpush2.bf16.msra.mxu1 %v14413_v25  ;;  %v335_v25 = vld [vmem:[#allocation5 + $0x338] sm:$0xff] }
 0x424   :  { %7649 = vmatprep.subr.bf16.mxu1 %v14398_v60  ;;  %v591_v60 = vld [vmem:[#allocation5 + $0xb38] sm:$0xff] }
 0x425   :  { %7609 = vmatpush2.bf16.msra.mxu0 %v14141_v49  ;;  %v13552_v49 = vcombine.high %v335_v25, %v343_v21  ;;  %v13807_v2 = vcombine.low %v591_v60, %v599_v26  ;;  %v567_v7 = vld [vmem:[#allocation5 + $0xa78] sm:$0xff] }
 0x426   :  { %7610 = vmatprep.subr.bf16.mxu0 %v14126_v36  ;;  %v13808_v36 = vcombine.high %v591_v60, %v599_v26  ;;  %v287_v60 = vld [vmem:[#allocation5 + $0x1b8] sm:$0xff] }
 0x427   :  { %7650 = vmatpush2.bf16.msra.mxu1 %v14397_v63  ;;  %v1307_v63 = vrot.slane %v17015_v23, %v16937_v14  ;;  %v543_v26 = vld [vmem:[#allocation5 + $0x9b8] sm:$0xff] }
 0x428   :  { %7651 = vmatprep.subr.bf16.mxu1 %v14382_v37  ;;  %v319_v37 = vld [vmem:[#allocation5 + $0x2b8] sm:$0xff] }
 0x429   :  { %7611 = vmatpush2.bf16.msra.mxu0 %v14125_v46  ;;  %v13536_v56 = vcombine.high %v319_v37, %v327_v38 }
 0x42a   :  { %7612 = vmatprep.subr.bf16.mxu0 %v14110_v48  ;;  %v13551_v48 = vcombine.low %v335_v25, %v343_v21  ;;  %v13776_v21 = vcombine.high %v559_v5, %v567_v7 }
 0x42b   :  { %7652 = vmatpush2.bf16.msra.mxu1 %v14381_v47 }
 0x42c   :  { %7653 = vmatprep.subr.bf16.mxu1 %v14366_v54 }
 0x42d   :  { %7613 = vmatpush2.bf16.msra.mxu0 %v14109_v0  ;;  %v13792_v0 = vcombine.high %v575_v42, %v583_v45 }
 0x42e   :  { %7614 = vmatprep.subr.bf16.mxu0 %v14094_v3  ;;  %v311_v3 = vld [vmem:[#allocation5 + $0x278] sm:$0xff] }
 0x42f   :  { %7654 = vmatpush2.bf16.msra.mxu1 %v14365_v8  ;;  %v303_v8 = vld [vmem:[#allocation5 + $0x238] sm:$0xff] }
 0x430   :  { %7655 = vmatprep.subr.bf16.mxu1 %v14350_v59 }
 0x431   :  { %7615 = vmatpush2.bf16.msra.mxu0 %v14093_v18  ;;  %v13535_v18 = vcombine.low %v319_v37, %v327_v38  ;;  %v527_v37 = vld [vmem:[#allocation5 + $0x938] sm:$0xff] }
 0x432   :  { %7666 = vmatprep.subr.bf16.mxu0 %v13568_v19  ;;  %v13791_v19 = vcombine.low %v575_v42, %v583_v45  ;;  %v535_v38 = vld [vmem:[#allocation5 + $0x978] sm:$0xff] }
 0x433   :  { %7656 = vmatpush2.bf16.msra.mxu1 %v14349_v15 }
 0x434   :  { %7707 = vmatprep.subr.bf16.mxu1 %v13824_v22  ;;  %v7372_v41 = vpop.f32.mrf.mxu0  ;;  %7617 = vmatmul.mubr.bf16.vlgmr.msra.gmra.mxu0 %v16872_v33  ;;  %v13520_v22 = vcombine.high %v303_v8, %v311_v3 }
 0x435   :  { %v7373_v46 = vadd.f32 %v7372_v41, %v1303_v29  ;;  %7667 = vmatpush1.bf16.msra.mxu0 %v13567_v30  ;;  %7698 = vmatprep.mubr.bf16.mxu0 %v16859_v9  ;;  %v295_v9 = vld [vmem:[#allocation5 + $0x1f8] sm:$0xff]  ;;  %v13519_v30 = vcombine.low %v303_v8, %v311_v3 }
 0x436   :  { %v7413_v47 = vpop.f32.mrf.mxu1  ;;  %7658 = vmatmul.mubr.bf16.vlgmr.msra.gmra.mxu1 %v16897_v55  ;;  %v7374_v54 = vpop.f32.mrf.mxu0  ;;  %7668 = vmatprep.subr.bf16.mxu0 %v13552_v49  ;;  %v551_v29 = vld [vmem:[#allocation5 + $0x9f8] sm:$0xff]  ;;  %v13503_v41 = vcombine.low %v287_v60, %v295_v9 }
 0x437   :  { %7708 = vmatpush1.bf16.msra.mxu1 %v13823_v34  ;;  %v17045_v23 = vadd.f32 %v7413_v47, %v7373_v46  ;;  %v7375_v57 = vadd.f32 %v7374_v54, %v1307_v63  ;;  %7739 = vmatprep.mubr.bf16.mxu1 %v16864_v13  ;;  %v13775_v13 = vcombine.low %v559_v5, %v567_v7  ;;  %v271_v63 = vld [vmem:[#allocation5 + $0x138] sm:$0xff] }
 0x438   :  { %v7415_v62 = vpop.f32.mrf.mxu1  ;;  %7709 = vmatprep.subr.bf16.mxu1 %v13808_v36  ;;  %v7376_v59 = vpop.f32.mrf.mxu0  ;;  %v13504_v34 = vcombine.high %v287_v60, %v295_v9  ;;  %v13760_v49 = vcombine.high %v543_v26, %v551_v29  ;;  %v279_v36 = vld [vmem:[#allocation5 + $0x178] sm:$0xff]  ;;  %v13759_v42 = vcombine.low %v543_v26, %v551_v29  ;;  %v13744_v46 = vcombine.high %v527_v37, %v535_v38 }
 0x439   :  { %v17049_v12 = vadd.f32 %v7415_v62, %v7375_v57  ;;  %7669 = vmatpush1.bf16.msra.mxu0 %v13551_v48  ;;  %v13488_v45 = vcombine.high %v271_v63, %v279_v36  ;;  %v255_v47 = vld [vmem:[#allocation5 + $0xb8] sm:$0xff]  ;;  %v13743_v57 = vcombine.low %v527_v37, %v535_v38 }
 0x43a   :  { %v7417_v17 = vpop.f32.mrf.mxu1  ;;  %v7377_v15 = vpop.f32.mrf.mxu0  ;;  %7670 = vmatprep.subr.bf16.mxu0 %v13536_v56  ;;  %v263_v48 = vld [vmem:[#allocation5 + $0xf8] sm:$0xff]  ;;  %v13487_v56 = vcombine.low %v271_v63, %v279_v36 }
 0x43b   :  { %7710 = vmatpush1.bf16.msra.mxu1 %v13807_v2  ;;  %v511_v54 = vld [vmem:[#allocation5 + $0x8b8] sm:$0xff]  ;;  %v13472_v62 = vcombine.high %v255_v47, %v263_v48  ;;  %v13471_v7 = vcombine.low %v255_v47, %v263_v48 }
 0x43c   :  { %v7418_v25 = vpop.f32.mrf.mxu1  ;;  %7711 = vmatprep.subr.bf16.mxu1 %v13792_v0  ;;  %v519_v2 = vld [vmem:[#allocation5 + $0x8f8] sm:$0xff] }
 0x43d   :  { %7671 = vmatpush1.bf16.msra.mxu0 %v13535_v18  ;;  %v13728_v0 = vcombine.high %v511_v54, %v519_v2  ;;  %v239_v8 = vld [vmem:[#allocation5 + $0x38] sm:$0xff]  ;;  %v13727_v17 = vcombine.low %v511_v54, %v519_v2 }
 0x43e   :  { %7672 = vmatprep.subr.bf16.mxu0 %v13520_v22  ;;  %v247_v3 = vld [vmem:[#allocation5 + $0x78] sm:$0xff] }
 0x43f   :  { %7712 = vmatpush1.bf16.msra.mxu1 %v13791_v19  ;;  %v495_v59 = vld [vmem:[#allocation5 + $0x838] sm:$0xff]  ;;  %v13456_v18 = vcombine.high %v239_v8, %v247_v3  ;;  %v13455_v60 = vcombine.low %v239_v8, %v247_v3 }
 0x440   :  { %7713 = vmatprep.subr.bf16.mxu1 %v13776_v21  ;;  %v503_v5 = vld [vmem:[#allocation5 + $0x878] sm:$0xff] }
 0x441   :  { %7673 = vmatpush1.bf16.msra.mxu0 %v13519_v30  ;;  %v13712_v15 = vcombine.high %v495_v59, %v503_v5  ;;  %v479_v19 = vld [vmem:[#allocation5 + $0x7b8] sm:$0xff]  ;;  %v13711_v9 = vcombine.low %v495_v59, %v503_v5 }
 0x442   :  { %7674 = vmatprep.subr.bf16.mxu0 %v13504_v34  ;;  %v487_v22 = vld [vmem:[#allocation5 + $0x7f8] sm:$0xff] }
 0x443   :  { %7714 = vmatpush1.bf16.msra.mxu1 %v13775_v13  ;;  %v735_v25 = vld [vmem:[#allocation5 + $0xfb8] sm:$0xff]  ;;  %v13696_v26 = vcombine.high %v479_v19, %v487_v22  ;;  %v13695_v63 = vcombine.low %v479_v19, %v487_v22 }
 0x444   :  { %7715 = vmatprep.subr.bf16.mxu1 %v13760_v49  ;;  %v743_v21 = vld [vmem:[#allocation5 + $0xff8] sm:$0xff] }
 0x445   :  { %7675 = vmatpush1.bf16.msra.mxu0 %v13503_v41  ;;  %v13952_v29 = vcombine.high %v735_v25, %v743_v21  ;;  %v463_v30 = vld [vmem:[#allocation5 + $0x738] sm:$0xff]  ;;  %v13951_v36 = vcombine.low %v735_v25, %v743_v21 }
 0x446   :  { %7676 = vmatprep.subr.bf16.mxu0 %v13488_v45  ;;  %v471_v13 = vld [vmem:[#allocation5 + $0x778] sm:$0xff] }
 0x447   :  { %7716 = vmatpush1.bf16.msra.mxu1 %v13759_v42  ;;  %v719_v34 = vld [vmem:[#allocation5 + $0xf38] sm:$0xff]  ;;  %v13680_v37 = vcombine.high %v463_v30, %v471_v13  ;;  %v13679_v47 = vcombine.low %v463_v30, %v471_v13 }
 0x448   :  { %7717 = vmatprep.subr.bf16.mxu1 %v13744_v46  ;;  %v727_v49 = vld [vmem:[#allocation5 + $0xf78] sm:$0xff] }
 0x449   :  { %7677 = vmatpush1.bf16.msra.mxu0 %v13487_v56  ;;  %v13936_v38 = vcombine.high %v719_v34, %v727_v49  ;;  %v447_v41 = vld [vmem:[#allocation5 + $0x6b8] sm:$0xff]  ;;  %v13935_v48 = vcombine.low %v719_v34, %v727_v49 }
 0x44a   :  { %7678 = vmatprep.subr.bf16.mxu0 %v13472_v62  ;;  %v455_v42 = vld [vmem:[#allocation5 + $0x6f8] sm:$0xff] }
 0x44b   :  { %7718 = vmatpush1.bf16.msra.mxu1 %v13743_v57  ;;  %v703_v45 = vld [vmem:[#allocation5 + $0xeb8] sm:$0xff]  ;;  %v13664_v54 = vcombine.high %v447_v41, %v455_v42  ;;  %v13663_v8 = vcombine.low %v447_v41, %v455_v42 }
 0x44c   :  { %7719 = vmatprep.subr.bf16.mxu1 %v13728_v0  ;;  %v711_v46 = vld [vmem:[#allocation5 + $0xef8] sm:$0xff] }
 0x44d   :  { %7679 = vmatpush1.bf16.msra.mxu0 %v13471_v7  ;;  %v13920_v2 = vcombine.high %v703_v45, %v711_v46  ;;  %v431_v56 = vld [vmem:[#allocation5 + $0x638] sm:$0xff]  ;;  %v13919_v3 = vcombine.low %v703_v45, %v711_v46 }
 0x44e   :  { %7680 = vmatprep.subr.bf16.mxu0 %v13456_v18  ;;  %v439_v57 = vld [vmem:[#allocation5 + $0x678] sm:$0xff] }
 0x44f   :  { %7720 = vmatpush1.bf16.msra.mxu1 %v13727_v17  ;;  %v687_v62 = vld [vmem:[#allocation5 + $0xe38] sm:$0xff]  ;;  %v13648_v59 = vcombine.high %v431_v56, %v439_v57  ;;  %v13647_v19 = vcombine.low %v431_v56, %v439_v57 }
 0x450   :  { %7721 = vmatprep.subr.bf16.mxu1 %v13712_v15  ;;  %v695_v0 = vld [vmem:[#allocation5 + $0xe78] sm:$0xff] }
 0x451   :  { %7681 = vmatpush1.bf16.msra.mxu0 %v13455_v60  ;;  %v13904_v5 = vcombine.high %v687_v62, %v695_v0  ;;  %v415_v7 = vld [vmem:[#allocation5 + $0x5b8] sm:$0xff]  ;;  %v13903_v22 = vcombine.low %v687_v62, %v695_v0 }
 0x452   :  { %7682 = vmatprep.subr.bf16.mxu0 %v13696_v26  ;;  %v423_v17 = vld [vmem:[#allocation5 + $0x5f8] sm:$0xff] }
 0x453   :  { %7722 = vmatpush1.bf16.msra.mxu1 %v13711_v9  ;;  %v671_v18 = vld [vmem:[#allocation5 + $0xdb8] sm:$0xff]  ;;  %v13632_v25 = vcombine.high %v415_v7, %v423_v17  ;;  %v13631_v30 = vcombine.low %v415_v7, %v423_v17 }
 0x454   :  { %7723 = vmatprep.subr.bf16.mxu1 %v13952_v29  ;;  %v679_v15 = vld [vmem:[#allocation5 + $0xdf8] sm:$0xff] }
 0x455   :  { %7683 = vmatpush2.bf16.msra.mxu0 %v13695_v63  ;;  %v13888_v21 = vcombine.high %v671_v18, %v679_v15  ;;  %v399_v60 = vld [vmem:[#allocation5 + $0x538] sm:$0xff]  ;;  %v13887_v13 = vcombine.low %v671_v18, %v679_v15 }
 0x456   :  { %7684 = vmatprep.subr.bf16.mxu0 %v13680_v37  ;;  %v407_v9 = vld [vmem:[#allocation5 + $0x578] sm:$0xff] }
 0x457   :  { %7724 = vmatpush2.bf16.msra.mxu1 %v13951_v36  ;;  %v655_v26 = vld [vmem:[#allocation5 + $0xd38] sm:$0xff]  ;;  %v13616_v34 = vcombine.high %v399_v60, %v407_v9  ;;  %v13615_v41 = vcombine.low %v399_v60, %v407_v9 }
 0x458   :  { %7725 = vmatprep.subr.bf16.mxu1 %v13936_v38  ;;  %v663_v29 = vld [vmem:[#allocation5 + $0xd78] sm:$0xff] }
 0x459   :  { %7685 = vmatpush2.bf16.msra.mxu0 %v13679_v47  ;;  %v13872_v49 = vcombine.high %v655_v26, %v663_v29  ;;  %v383_v63 = vld [vmem:[#allocation5 + $0x4b8] sm:$0xff]  ;;  %v13871_v42 = vcombine.low %v655_v26, %v663_v29 }
 0x45a   :  { %7686 = vmatprep.subr.bf16.mxu0 %v13664_v54  ;;  %v391_v36 = vld [vmem:[#allocation5 + $0x4f8] sm:$0xff] }
 0x45b   :  { %7726 = vmatpush2.bf16.msra.mxu1 %v13935_v48  ;;  %v639_v37 = vld [vmem:[#allocation5 + $0xcb8] sm:$0xff]  ;;  %v13600_v45 = vcombine.high %v383_v63, %v391_v36  ;;  %v13599_v56 = vcombine.low %v383_v63, %v391_v36 }
 0x45c   :  { %7727 = vmatprep.subr.bf16.mxu1 %v13920_v2  ;;  %v647_v38 = vld [vmem:[#allocation5 + $0xcf8] sm:$0xff] }
 0x45d   :  { %7687 = vmatpush2.bf16.msra.mxu0 %v13663_v8  ;;  %v13856_v46 = vcombine.high %v639_v37, %v647_v38  ;;  %v367_v47 = vld [vmem:[#allocation5 + $0x438] sm:$0xff]  ;;  %v13855_v57 = vcombine.low %v639_v37, %v647_v38 }
 0x45e   :  { %7688 = vmatprep.subr.bf16.mxu0 %v13648_v59  ;;  %v375_v48 = vld [vmem:[#allocation5 + $0x478] sm:$0xff] }
 0x45f   :  { %7728 = vmatpush2.bf16.msra.mxu1 %v13919_v3  ;;  %v623_v54 = vld [vmem:[#allocation5 + $0xc38] sm:$0xff]  ;;  %v13584_v62 = vcombine.high %v367_v47, %v375_v48  ;;  %v13583_v7 = vcombine.low %v367_v47, %v375_v48 }
 0x460   :  { %7729 = vmatprep.subr.bf16.mxu1 %v13904_v5  ;;  %v631_v2 = vld [vmem:[#allocation5 + $0xc78] sm:$0xff] }
 0x461   :  { %7689 = vmatpush2.bf16.msra.mxu0 %v13647_v19  ;;  %v13840_v0 = vcombine.high %v623_v54, %v631_v2  ;;  %v863_v8 = vld [vmem:[#allocation5 + $0x13b8] sm:$0xff]  ;;  %v13839_v17 = vcombine.low %v623_v54, %v631_v2 }
 0x462   :  { %7690 = vmatprep.subr.bf16.mxu0 %v13632_v25  ;;  %v871_v3 = vld [vmem:[#allocation5 + $0x13f8] sm:$0xff] }
 0x463   :  { %7730 = vmatpush2.bf16.msra.mxu1 %v13903_v22  ;;  %v1119_v59 = vld [vmem:[#allocation5 + $0x1bb8] sm:$0xff]  ;;  %v14080_v18 = vcombine.high %v863_v8, %v871_v3  ;;  %v14079_v60 = vcombine.low %v863_v8, %v871_v3 }
 0x464   :  { %7731 = vmatprep.subr.bf16.mxu1 %v13888_v21  ;;  %v1127_v5 = vld [vmem:[#allocation5 + $0x1bf8] sm:$0xff] }
 0x465   :  { %7691 = vmatpush2.bf16.msra.mxu0 %v13631_v30  ;;  %v14336_v15 = vcombine.high %v1119_v59, %v1127_v5  ;;  %v847_v19 = vld [vmem:[#allocation5 + $0x1338] sm:$0xff]  ;;  %v14335_v9 = vcombine.low %v1119_v59, %v1127_v5 }
 0x466   :  { %7692 = vmatprep.subr.bf16.mxu0 %v13616_v34  ;;  %v855_v22 = vld [vmem:[#allocation5 + $0x1378] sm:$0xff] }
 0x467   :  { %7732 = vmatpush2.bf16.msra.mxu1 %v13887_v13  ;;  %v1103_v25 = vld [vmem:[#allocation5 + $0x1b38] sm:$0xff]  ;;  %v14064_v26 = vcombine.high %v847_v19, %v855_v22  ;;  %v14063_v38 = vcombine.low %v847_v19, %v855_v22 }
 0x468   :  { %7733 = vmatprep.subr.bf16.mxu1 %v13872_v49  ;;  %v1111_v21 = vld [vmem:[#allocation5 + $0x1b78] sm:$0xff] }
 0x469   :  { %7693 = vmatpush2.bf16.msra.mxu0 %v13615_v41  ;;  %v14320_v29 = vcombine.high %v1103_v25, %v1111_v21  ;;  %v831_v30 = vld [vmem:[#allocation5 + $0x12b8] sm:$0xff] }
 0x46a   :  { %7694 = vmatprep.subr.bf16.mxu0 %v13600_v45  ;;  %v839_v13 = vld [vmem:[#allocation5 + $0x12f8] sm:$0xff] }
 0x46b   :  { %7734 = vmatpush2.bf16.msra.mxu1 %v13871_v42  ;;  %v1087_v49 = vld [vmem:[#allocation5 + $0x1ab8] sm:$0xff]  ;;  %v14319_v42 = vcombine.low %v1103_v25, %v1111_v21  ;;  %v14048_v45 = vcombine.high %v831_v30, %v839_v13 }
 0x46c   :  { %7735 = vmatprep.subr.bf16.mxu1 %v13856_v46  ;;  %v1095_v63 = vld [vmem:[#allocation5 + $0x1af8] sm:$0xff] }
 0x46d   :  { %7695 = vmatpush2.bf16.msra.mxu0 %v13599_v56  ;;  %v815_v54 = vld [vmem:[#allocation5 + $0x1238] sm:$0xff] }
 0x46e   :  { %7696 = vmatprep.subr.bf16.mxu0 %v13584_v62  ;;  %v823_v2 = vld [vmem:[#allocation5 + $0x1278] sm:$0xff] }
 0x46f   :  { %7736 = vmatpush2.bf16.msra.mxu1 %v13855_v57  ;;  %v1079_v56 = vld [vmem:[#allocation5 + $0x1a78] sm:$0xff]  ;;  %v14032_v3 = vcombine.high %v815_v54, %v823_v2 }
 0x470   :  { %7737 = vmatprep.subr.bf16.mxu1 %v13840_v0  ;;  %v14047_v0 = vcombine.low %v831_v30, %v839_v13  ;;  %v783_v25 = vld [vmem:[#allocation5 + $0x1138] sm:$0xff] }
 0x471   :  { %7697 = vmatpush2.bf16.msra.mxu0 %v13583_v7  ;;  %v799_v7 = vld [vmem:[#allocation5 + $0x11b8] sm:$0xff] }
 0x472   :  { %7748 = vmatprep.subr.bf16.mxu0 %v14080_v18  ;;  %v1063_v18 = vld [vmem:[#allocation5 + $0x19f8] sm:$0xff] }
 0x473   :  { %7738 = vmatpush2.bf16.msra.mxu1 %v13839_v17  ;;  %v1055_v17 = vld [vmem:[#allocation5 + $0x19b8] sm:$0xff] }
 0x474   :  { %7789 = vmatprep.subr.bf16.mxu1 %v14336_v15  ;;  %v7454_v34 = vpop.f32.mrf.mxu0  ;;  %7699 = vmatmul.mubr.bf16.vlgmr.msra.gmra.mxu0 %v16878_v24  ;;  %v14304_v24 = vcombine.high %v1087_v49, %v1095_v63  ;;  %v14031_v15 = vcombine.low %v815_v54, %v823_v2  ;;  %v14272_v22 = vcombine.high %v1055_v17, %v1063_v18  ;;  %v791_v21 = vld [vmem:[#allocation5 + $0x1178] sm:$0xff] }
 0x475   :  { %v7455_v36 = vadd.f32 %v7454_v34, %v17045_v23  ;;  %7749 = vmatpush1.bf16.msra.mxu0 %v14079_v60  ;;  %7780 = vmatprep.mubr.bf16.mxu0 %v16881_v35  ;;  %v807_v35 = vld [vmem:[#allocation5 + $0x11f8] sm:$0xff]  ;;  %v14000_v30 = vcombine.high %v783_v25, %v791_v21 }
 0x476   :  { %v7495_v37 = vpop.f32.mrf.mxu1  ;;  %7740 = vmatmul.mubr.bf16.vlgmr.msra.gmra.mxu1 %v16885_v28  ;;  %v7456_v41 = vpop.f32.mrf.mxu0  ;;  %7750 = vmatprep.subr.bf16.mxu0 %v14064_v26  ;;  %v1071_v28 = vld [vmem:[#allocation5 + $0x1a38] sm:$0xff]  ;;  %v14016_v19 = vcombine.high %v799_v7, %v807_v35  ;;  %v14015_v26 = vcombine.low %v799_v7, %v807_v35 }
 0x477   :  { %7790 = vmatpush1.bf16.msra.mxu1 %v14335_v9  ;;  %v17054_v46 = vadd.f32 %v7495_v37, %v7455_v36  ;;  %v7457_v47 = vadd.f32 %v7456_v41, %v17049_v12  ;;  %7821 = vmatprep.mubr.bf16.mxu1 %v16890_v53  ;;  %v14303_v12 = vcombine.low %v1087_v49, %v1095_v63  ;;  %v1039_v60 = vld [vmem:[#allocation5 + $0x1938] sm:$0xff] }
 0x478   :  { %v7497_v48 = vpop.f32.mrf.mxu1  ;;  %7791 = vmatprep.subr.bf16.mxu1 %v14320_v29  ;;  %v7458_v23 = vpop.f32.mrf.mxu0  ;;  %v14288_v5 = vcombine.high %v1071_v28, %v1079_v56  ;;  %v14287_v53 = vcombine.low %v1071_v28, %v1079_v56  ;;  %v1047_v9 = vld [vmem:[#allocation5 + $0x1978] sm:$0xff]  ;;  %v14271_v29 = vcombine.low %v1055_v17, %v1063_v18  ;;  %v13999_v37 = vcombine.low %v783_v25, %v791_v21 }
 0x479   :  { %v17059_v57 = vadd.f32 %v7497_v48, %v7457_v47  ;;  %7751 = vmatpush1.bf16.msra.mxu0 %v14063_v38  ;;  %v14256_v13 = vcombine.high %v1039_v60, %v1047_v9  ;;  %v767_v34 = vld [vmem:[#allocation5 + $0x10b8] sm:$0xff]  ;;  %v14255_v38 = vcombine.low %v1039_v60, %v1047_v9  ;;  %vm7856_vm11 = vcmp.gt.f32.partialorder %v17054_v46, 0.0 }
 0x47a   :  { %v7499_v62 = vpop.f32.mrf.mxu1  ;;  %v7459_v8 = vpop.f32.mrf.mxu0  ;;  %7752 = vmatprep.subr.bf16.mxu0 %v14048_v45  ;;  %v775_v49 = vld [vmem:[#allocation5 + $0x10f8] sm:$0xff] }
 0x47b   :  { %7792 = vmatpush1.bf16.msra.mxu1 %v14319_v42  ;;  %v1023_v63 = vld [vmem:[#allocation5 + $0x18b8] sm:$0xff]  ;;  %v13984_v41 = vcombine.high %v767_v34, %v775_v49  ;;  %v13983_v54 = vcombine.low %v767_v34, %v775_v49  ;;  %vm7857_vm9 = vcmp.gt.f32.partialorder %v17059_v57, 0.0 }
 0x47c   :  { %v7500_v59 = vpop.f32.mrf.mxu1  ;;  %7793 = vmatprep.subr.bf16.mxu1 %v14304_v24  ;;  %v1031_v36 = vld [vmem:[#allocation5 + $0x18f8] sm:$0xff] }
 0x47d   :  { %7753 = vmatpush1.bf16.msra.mxu0 %v14047_v0  ;;  %v14240_v42 = vcombine.high %v1023_v63, %v1031_v36  ;;  %v751_v45 = vld [vmem:[#allocation5 + $0x1038] sm:$0xff]  ;;  %v14239_v2 = vcombine.low %v1023_v63, %v1031_v36 }
 0x47e   :  { %7754 = vmatprep.subr.bf16.mxu0 %v14032_v3  ;;  %v759_v47 = vld [vmem:[#allocation5 + $0x1078] sm:$0xff] }
 0x47f   :  { %7794 = vmatpush1.bf16.msra.mxu1 %v14303_v12  ;;  %v1007_v48 = vld [vmem:[#allocation5 + $0x1838] sm:$0xff]  ;;  %v13968_v23 = vcombine.high %v751_v45, %v759_v47  ;;  %v13967_v12 = vcombine.low %v751_v45, %v759_v47 }
 0x480   :  { %7795 = vmatprep.subr.bf16.mxu1 %v14288_v5  ;;  %v1015_v24 = vld [vmem:[#allocation5 + $0x1878] sm:$0xff] }
 0x481   :  { %7755 = vmatpush1.bf16.msra.mxu0 %v14031_v15  ;;  %v14224_v28 = vcombine.high %v1007_v48, %v1015_v24  ;;  %v991_v56 = vld [vmem:[#allocation5 + $0x17b8] sm:$0xff]  ;;  %v14223_v3 = vcombine.low %v1007_v48, %v1015_v24 }
 0x482   :  { %7756 = vmatprep.subr.bf16.mxu0 %v14016_v19  ;;  %v999_v62 = vld [vmem:[#allocation5 + $0x17f8] sm:$0xff] }
 0x483   :  { %7796 = vmatpush1.bf16.msra.mxu1 %v14287_v53  ;;  %v1247_v0 = vld [vmem:[#allocation5 + $0x1fb8] sm:$0xff]  ;;  %v14208_v59 = vcombine.high %v991_v56, %v999_v62  ;;  %v14207_v15 = vcombine.low %v991_v56, %v999_v62 }
 0x484   :  { %7797 = vmatprep.subr.bf16.mxu1 %v14272_v22  ;;  %v1255_v8 = vld [vmem:[#allocation5 + $0x1ff8] sm:$0xff] }
 0x485   :  { %7757 = vmatpush1.bf16.msra.mxu0 %v14015_v26  ;;  %v14464_v5 = vcombine.high %v1247_v0, %v1255_v8  ;;  %v975_v7 = vld [vmem:[#allocation5 + $0x1738] sm:$0xff]  ;;  %v14463_v53 = vcombine.low %v1247_v0, %v1255_v8  ;;  %v7831_v26 = vmin.f32 %v16931_v58, 0.0 }
 0x486   :  { %7758 = vmatprep.subr.bf16.mxu0 %v14000_v30  ;;  %v983_v35 = vld [vmem:[#allocation5 + $0x1778] sm:$0xff]  ;;  %v7833_v30 = vmin.f32 %v16957_v52, 0.0 }
 0x487   :  { %7798 = vmatpush1.bf16.msra.mxu1 %v14271_v29  ;;  %v1231_v17 = vld [vmem:[#allocation5 + $0x1f38] sm:$0xff]  ;;  %v14192_v19 = vcombine.high %v975_v7, %v983_v35  ;;  %v14191_v29 = vcombine.low %v975_v7, %v983_v35 }
 0x488   :  { %7799 = vmatprep.subr.bf16.mxu1 %v14256_v13  ;;  %v1239_v18 = vld [vmem:[#allocation5 + $0x1f78] sm:$0xff]  ;;  %v7868_v45 = vmul.f32 1.442695, %v7833_v30 }
 0x489   :  { %7759 = vmatpush1.bf16.msra.mxu0 %v13999_v37  ;;  %v14448_v22 = vcombine.high %v1231_v17, %v1239_v18  ;;  %v959_v25 = vld [vmem:[#allocation5 + $0x16b8] sm:$0xff]  ;;  %v14447_v13 = vcombine.low %v1231_v17, %v1239_v18 }
 0x48a   :  { %7760 = vmatprep.subr.bf16.mxu0 %v13984_v41  ;;  %v967_v21 = vld [vmem:[#allocation5 + $0x16f8] sm:$0xff]  ;;  %v7864_v41 = vmul.f32 1.442695, %v7831_v26 }
 0x48b   :  { %7800 = vmatpush1.bf16.msra.mxu1 %v14255_v38  ;;  %v1215_v60 = vld [vmem:[#allocation5 + $0x1eb8] sm:$0xff]  ;;  %v14176_v34 = vcombine.high %v959_v25, %v967_v21 }
 0x48c   :  { %7801 = vmatprep.subr.bf16.mxu1 %v14240_v42  ;;  %v1223_v9 = vld [vmem:[#allocation5 + $0x1ef8] sm:$0xff]  ;;  %v14175_v42 = vcombine.low %v959_v25, %v967_v21  ;;  %16283 = vpow2.f32 %v7864_v41 }
 0x48d   :  { %7761 = vmatpush1.bf16.msra.mxu0 %v13983_v54  ;;  %v14432_v49 = vcombine.high %v1215_v60, %v1223_v9  ;;  %v943_v63 = vld [vmem:[#allocation5 + $0x1638] sm:$0xff]  ;;  %v14431_v47 = vcombine.low %v1215_v60, %v1223_v9  ;;  %16285 = vpow2.f32 %v7868_v45 }
 0x48e   :  { %7762 = vmatprep.subr.bf16.mxu0 %v13968_v23  ;;  %v951_v36 = vld [vmem:[#allocation5 + $0x1678] sm:$0xff] }
 0x48f   :  { %7802 = vmatpush1.bf16.msra.mxu1 %v14239_v2  ;;  %v1199_v37 = vld [vmem:[#allocation5 + $0x1e38] sm:$0xff]  ;;  %v14160_v48 = vcombine.high %v943_v63, %v951_v36  ;;  %v14159_v56 = vcombine.low %v943_v63, %v951_v36 }
 0x490   :  { %7803 = vmatprep.subr.bf16.mxu1 %v14224_v28  ;;  %v1207_v38 = vld [vmem:[#allocation5 + $0x1e78] sm:$0xff] }
 0x491   :  { %7763 = vmatpush1.bf16.msra.mxu0 %v13967_v12  ;;  %v14416_v24 = vcombine.high %v1199_v37, %v1207_v38  ;;  %v927_v54 = vld [vmem:[#allocation5 + $0x15b8] sm:$0xff]  ;;  %v14415_v62 = vcombine.low %v1199_v37, %v1207_v38 }
 0x492   :  { %7764 = vmatprep.subr.bf16.mxu0 %v14208_v59  ;;  %v935_v2 = vld [vmem:[#allocation5 + $0x15f8] sm:$0xff] }
 0x493   :  { %7804 = vmatpush1.bf16.msra.mxu1 %v14223_v3  ;;  %v1183_v23 = vld [vmem:[#allocation5 + $0x1db8] sm:$0xff]  ;;  %v14144_v0 = vcombine.high %v927_v54, %v935_v2  ;;  %v14143_v7 = vcombine.low %v927_v54, %v935_v2  ;;  %v17065_v54 = vld [vmem:[#allocation7 + $0x8] sm:$0xff] }
 0x494   :  { %7805 = vmatprep.subr.bf16.mxu1 %v14464_v5  ;;  %v1191_v28 = vld [vmem:[#allocation5 + $0x1df8] sm:$0xff]  ;;  %v1311_v2 = vrot.slane %v17065_v54, %v16960_v10 }
 0x495   :  { %7765 = vmatpush2.bf16.msra.mxu0 %v14207_v15  ;;  %v14400_v8 = vcombine.high %v1183_v23, %v1191_v28  ;;  %v911_v12 = vld [vmem:[#allocation5 + $0x1538] sm:$0xff]  ;;  %v14399_v35 = vcombine.low %v1183_v23, %v1191_v28  ;;  %v15297_v23 = vld [vmem:[#allocation8 + $0xe0] ss:$16 sps:$4 sm:$0xff]  }
 0x496   :  { %7766 = vmatprep.subr.bf16.mxu0 %v14192_v19  ;;  %v919_v3 = vld [vmem:[#allocation5 + $0x1578] sm:$0xff] }
 0x497   :  { %7806 = vmatpush2.bf16.msra.mxu1 %v14463_v53  ;;  %v1167_v59 = vld [vmem:[#allocation5 + $0x1d38] sm:$0xff]  ;;  %v14128_v17 = vcombine.high %v911_v12, %v919_v3  ;;  %v14127_v25 = vcombine.low %v911_v12, %v919_v3 }
 0x498   :  { %7807 = vmatprep.subr.bf16.mxu1 %v14448_v22  ;;  %v1175_v5 = vld [vmem:[#allocation5 + $0x1d78] sm:$0xff] }
 0x499   :  { %7767 = vmatpush2.bf16.msra.mxu0 %v14191_v29  ;;  %v14384_v18 = vcombine.high %v1167_v59, %v1175_v5  ;;  %v895_v15 = vld [vmem:[#allocation5 + $0x14b8] sm:$0xff]  ;;  %v14383_v21 = vcombine.low %v1167_v59, %v1175_v5  ;;  %v15308_v59 = vld [vmem:[#allocation8 + $0x2c4] ss:$16 sps:$4 sm:$0xff]  }
 0x49a   :  { %7768 = vmatprep.subr.bf16.mxu0 %v14176_v34  ;;  %v903_v53 = vld [vmem:[#allocation5 + $0x14f8] sm:$0xff] }
 0x49b   :  { %7808 = vmatpush2.bf16.msra.mxu1 %v14447_v13  ;;  %v1151_v19 = vld [vmem:[#allocation5 + $0x1cb8] sm:$0xff]  ;;  %v14112_v60 = vcombine.high %v895_v15, %v903_v53  ;;  %v14111_v34 = vcombine.low %v895_v15, %v903_v53 }
 0x49c   :  { %7809 = vmatprep.subr.bf16.mxu1 %v14432_v49  ;;  %v1159_v22 = vld [vmem:[#allocation5 + $0x1cf8] sm:$0xff]  ;;  %v16284_v49 = vpop.eup %16283 }
 0x49d   :  { %7769 = vmatpush2.bf16.msra.mxu0 %v14175_v42  ;;  %v14368_v9 = vcombine.high %v1151_v19, %v1159_v22  ;;  %v879_v26 = vld [vmem:[#allocation5 + $0x1438] sm:$0xff]  ;;  %v14367_v63 = vcombine.low %v1151_v19, %v1159_v22  ;;  %v16286_v37 = vpop.eup %16285  ;;  %v14466_v42 = vadd.f32 -1.0, %v16284_v49  ;;  %v15314_v19 = vld [vmem:[#allocation8 + $0x2a4] ss:$16 sps:$4 sm:$0xff]  }
 0x49e   :  { %7770 = vmatprep.subr.bf16.mxu0 %v14160_v48  ;;  %v887_v29 = vld [vmem:[#allocation5 + $0x1478] sm:$0xff]  ;;  %v14468_v48 = vadd.f32 -1.0, %v16286_v37  ;;  %v15323_v49 = vld [vmem:[#allocation8 + $0x64] ss:$16 sps:$4 sm:$0xff]   ;;  %v15324_v37 = vld [vmem:[#allocation8 + $0x260] ss:$16 sps:$4 sm:$0xff]  }
 0x49f   :  { %7810 = vmatpush2.bf16.msra.mxu1 %v14431_v47  ;;  %v1135_v30 = vld [vmem:[#allocation5 + $0x1c38] sm:$0xff]  ;;  %v14096_v36 = vcombine.high %v879_v26, %v887_v29  ;;  %v14095_v41 = vcombine.low %v879_v26, %v887_v29  ;;  %v15299_v47 = vld [vmem:[#allocation8 + $0xe4] ss:$16 sps:$4 sm:$0xff]   ;;  %v7911_v28 = vsel %vm7847_vm0, %v16931_v58, %v14466_v42  ;;  %v15327_v42 = vld [vmem:[#allocation8 + $0x40] ss:$16 sps:$4 sm:$0xff]  }
 0x4a0   :  { %7811 = vmatprep.subr.bf16.mxu1 %v14416_v24  ;;  %v1143_v13 = vld [vmem:[#allocation5 + $0x1c78] sm:$0xff]  ;;  %v15302_v24 = vld [vmem:[#allocation8 + $0x2e4] ss:$16 sps:$4 sm:$0xff]   ;;  %v17074_v3 = vpack.c.bf16 %v7911_v28, %v7911_v28 }
 0x4a1   :  { %7771 = vmatpush2.bf16.msra.mxu0 %v14159_v56  ;;  %v14352_v38 = vcombine.high %v1135_v30, %v1143_v13  ;;  %v14351_v45 = vcombine.low %v1135_v30, %v1143_v13  ;;  %v15300_v56 = vld [vmem:[#allocation8 + $0x2e0] ss:$16 sps:$4 sm:$0xff]   ;;  %v15317_v26 = vld [vmem:[#allocation8 + $0x84] ss:$16 sps:$4 sm:$0xff]  }
 0x4a2   :  { %7772 = vmatprep.subr.bf16.mxu0 %v14144_v0  ;;  %v1315_v0 = vrot.slane %v17065_v54, %v16963_v16  ;;  %v15320_v30 = vld [vmem:[#allocation8 + $0x284] ss:$16 sps:$4 sm:$0xff]   ;;  %v15315_v13 = vld [vmem:[#allocation8 + $0x80] ss:$16 sps:$4 sm:$0xff]  }
 0x4a3   :  { %7812 = vmatpush2.bf16.msra.mxu1 %v14415_v62  ;;  %v7913_v62 = vsel %vm7849_vm1, %v16957_v52, %v14468_v48  ;;  %v15338_v48 = vld [vmem:[#allocation8 + $0x224] ss:$16 sps:$4 sm:$0xff]  }
 0x4a4   :  { %7813 = vmatprep.subr.bf16.mxu1 %v14400_v8  ;;  %v15305_v8 = vld [vmem:[#allocation8 + $0xc4] ss:$16 sps:$4 sm:$0xff]   ;;  %v17077_v58 = vpack.c.bf16 %v7913_v62, %v7913_v62  ;;  %v15342_v62 = vld [vmem:[#allocation8 + $0x200] ss:$16 sps:$4 sm:$0xff]  }
 0x4a5   :  { %7773 = vmatpush2.bf16.msra.mxu0 %v14143_v7  ;;  %v15344_v28 = vld [vmem:[#allocation8 + $0x204] ss:$16 sps:$4 sm:$0xff]  }
 0x4a6   :  { %7774 = vmatprep.subr.bf16.mxu0 %v14128_v17  ;;  %v15306_v17 = vld [vmem:[#allocation8 + $0x2c0] ss:$16 sps:$4 sm:$0xff]  }
 0x4a7   :  { %7814 = vmatpush2.bf16.msra.mxu1 %v14399_v35  ;;  %v15303_v35 = vld [vmem:[#allocation8 + $0xc0] ss:$16 sps:$4 sm:$0xff]  }
 0x4a8   :  { %7815 = vmatprep.subr.bf16.mxu1 %v14384_v18  ;;  %v15311_v18 = vld [vmem:[#allocation8 + $0xa4] ss:$16 sps:$4 sm:$0xff]  }
 0x4a9   :  { %7775 = vmatpush2.bf16.msra.mxu0 %v14127_v25 }
 0x4aa   :  { %7776 = vmatprep.subr.bf16.mxu0 %v14112_v60 }
 0x4ab   :  { %7816 = vmatpush2.bf16.msra.mxu1 %v14383_v21  ;;  %v15309_v21 = vld [vmem:[#allocation8 + $0xa0] ss:$16 sps:$4 sm:$0xff]  }
 0x4ac   :  { %7817 = vmatprep.subr.bf16.mxu1 %v14368_v9  ;;  %v15312_v9 = vld [vmem:[#allocation8 + $0x2a0] ss:$16 sps:$4 sm:$0xff]  }
 0x4ad   :  { %7777 = vmatpush2.bf16.msra.mxu0 %v14111_v34  ;;  %v15318_v34 = vld [vmem:[#allocation8 + $0x280] ss:$16 sps:$4 sm:$0xff]  }
 0x4ae   :  { %7778 = vmatprep.subr.bf16.mxu0 %v14096_v36  ;;  %v15321_v36 = vld [vmem:[#allocation8 + $0x60] ss:$16 sps:$4 sm:$0xff]  }
 0x4af   :  { %7818 = vmatpush2.bf16.msra.mxu1 %v14367_v63  ;;  %v15326_v63 = vld [vmem:[#allocation8 + $0x264] ss:$16 sps:$4 sm:$0xff]  }
 0x4b0   :  { %7819 = vmatprep.subr.bf16.mxu1 %v14352_v38  ;;  %v15329_v38 = vld [vmem:[#allocation8 + $0x44] ss:$16 sps:$4 sm:$0xff]  }
 0x4b1   :  { %7779 = vmatpush2.bf16.msra.mxu0 %v14095_v41  ;;  %v15332_v41 = vld [vmem:[#allocation8 + $0x244] ss:$16 sps:$4 sm:$0xff]  }
 0x4b2   :  { %11036 = vmatprep.subr.bf16.mxu0 %v15299_v47  ;;  %v15335_v47 = vld [vmem:[#allocation8 + $0x24] ss:$16 sps:$4 sm:$0xff]  }
 0x4b3   :  { %7820 = vmatpush2.bf16.msra.mxu1 %v14351_v45  ;;  %v15330_v45 = vld [vmem:[#allocation8 + $0x240] ss:$16 sps:$4 sm:$0xff]  }
 0x4b4   :  { %11077 = vmatprep.subr.bf16.mxu1 %v15302_v24  ;;  %v7536_v12 = vpop.f32.mrf.mxu0  ;;  %7781 = vmatmul.mubr.bf16.vlgmr.msra.gmra.mxu0 %v16872_v33  ;;  %v15333_v24 = vld [vmem:[#allocation8 + $0x20] ss:$16 sps:$4 sm:$0xff]  }
 0x4b5   :  { %v7537_v5 = vadd.f32 %v7536_v12, %v1311_v2  ;;  %11037 = vmatpush1.bf16.msra.mxu0 %v15297_v23  ;;  %11068 = vmatprep.mubr.bf16.mxu0 %v17074_v3  ;;  %v15336_v2 = vld [vmem:[#allocation8 + $0x220] ss:$16 sps:$4 sm:$0xff]   ;;  %v15341_v23 = vld [vmem:[#allocation8 + $0x4] ss:$16 sps:$4 sm:$0xff]  }
 0x4b6   :  { %v7577_v7 = vpop.f32.mrf.mxu1  ;;  %7822 = vmatmul.mubr.bf16.vlgmr.msra.gmra.mxu1 %v16897_v55  ;;  %v7538_v52 = vpop.f32.mrf.mxu0  ;;  %11038 = vmatprep.subr.bf16.mxu0 %v15305_v8  ;;  %v15350_v8 = vld [vmem:[#allocation8 + $0x3e4] ss:$16 sps:$4 sm:$0xff]   ;;  %v15345_v12 = vld [vmem:[#allocation8 + $0x1e0] ss:$16 sps:$4 sm:$0xff]  }
 0x4b7   :  { %11078 = vmatpush1.bf16.msra.mxu1 %v15300_v56  ;;  %v17080_v15 = vadd.f32 %v7577_v7, %v7537_v5  ;;  %11109 = vmatprep.mubr.bf16.mxu1 %v17077_v58  ;;  %v7539_v33 = vadd.f32 %v7538_v52, %v1315_v0  ;;  %v15339_v56 = vld [vmem:[#allocation8] ss:$16 sps:$4 sm:$0xff]   ;;  %v15347_v0 = vld [vmem:[#allocation8 + $0x1e4] ss:$16 sps:$4 sm:$0xff]   ;;  %v7830_v7 = vmin.f32 %v16926_v51, 0.0  ;;  %v7832_v52 = vmin.f32 %v16952_v39, 0.0 }
 0x4b8   :  { %v7579_v53 = vpop.f32.mrf.mxu1  ;;  %v7540_v22 = vpop.f32.mrf.mxu0  ;;  %11079 = vmatprep.subr.bf16.mxu1 %v15308_v59  ;;  %v15348_v59 = vld [vmem:[#allocation8 + $0x3e0] ss:$16 sps:$4 sm:$0xff]   ;;  %v15353_v5 = vld [vmem:[#allocation8 + $0x1c4] ss:$16 sps:$4 sm:$0xff]  }
 0x4b9   :  { %v17083_v55 = vadd.f32 %v7579_v53, %v7539_v33  ;;  %11039 = vmatpush1.bf16.msra.mxu0 %v15303_v35  ;;  %v15356_v35 = vld [vmem:[#allocation8 + $0x3c4] ss:$16 sps:$4 sm:$0xff]   ;;  %v7837_v33 = vmin.f32 %v17013_v27, 0.0  ;;  %v15354_v53 = vld [vmem:[#allocation8 + $0x3c0] ss:$16 sps:$4 sm:$0xff]  }
 0x4ba   :  { %v7581_v25 = vpop.f32.mrf.mxu1  ;;  %v7541_v60 = vpop.f32.mrf.mxu0  ;;  %11040 = vmatprep.subr.bf16.mxu0 %v15311_v18  ;;  %v15351_v18 = vld [vmem:[#allocation8 + $0x1c0] ss:$16 sps:$4 sm:$0xff]   ;;  %v7862_v22 = vmul.f32 1.442695, %v7830_v7 }
 0x4bb   :  { %11080 = vmatpush1.bf16.msra.mxu1 %v15306_v17  ;;  %v7835_v17 = vmin.f32 %v16987_v20, 0.0  ;;  %v15362_v25 = vld [vmem:[#allocation8 + $0x3a4] ss:$16 sps:$4 sm:$0xff]   ;;  %v15387_v7 = vld [vmem:[#allocation8 + $0x100] ss:$16 sps:$4 sm:$0xff]  }
 0x4bc   :  { %v7582_v29 = vpop.f32.mrf.mxu1  ;;  %11081 = vmatprep.subr.bf16.mxu1 %v15314_v19  ;;  %v15359_v19 = vld [vmem:[#allocation8 + $0x1a4] ss:$16 sps:$4 sm:$0xff]   ;;  %16287 = vpow2.f32 %v7862_v22  ;;  %v15393_v22 = vld [vmem:[#allocation8 + $0x4e0] ss:$16 sps:$4 sm:$0xff]  }
 0x4bd   :  { %11041 = vmatpush1.bf16.msra.mxu0 %v15309_v21  ;;  %v7866_v21 = vmul.f32 1.442695, %v7832_v52  ;;  %v7872_v60 = vmul.f32 1.442695, %v7835_v17  ;;  %v15360_v29 = vld [vmem:[#allocation8 + $0x3a0] ss:$16 sps:$4 sm:$0xff]  }
 0x4be   :  { %11042 = vmatprep.subr.bf16.mxu0 %v15317_v26  ;;  %v7876_v26 = vmul.f32 1.442695, %v7837_v33  ;;  %v15390_v52 = vld [vmem:[#allocation8 + $0x300] ss:$16 sps:$4 sm:$0xff]   ;;  %v15395_v17 = vld [vmem:[#allocation8 + $0x4e4] ss:$16 sps:$4 sm:$0xff]  }
 0x4bf   :  { %11082 = vmatpush1.bf16.msra.mxu1 %v15312_v9  ;;  %v15357_v9 = vld [vmem:[#allocation8 + $0x1a0] ss:$16 sps:$4 sm:$0xff]   ;;  %16289 = vpow2.f32 %v7866_v21 }
 0x4c0   :  { %11083 = vmatprep.subr.bf16.mxu1 %v15320_v30  ;;  %v15365_v30 = vld [vmem:[#allocation8 + $0x184] ss:$16 sps:$4 sm:$0xff]   ;;  %16291 = vpow2.f32 %v7872_v60  ;;  %v15396_v60 = vld [vmem:[#allocation8 + $0x6e0] ss:$16 sps:$4 sm:$0xff]  }
 0x4c1   :  { %11043 = vmatpush1.bf16.msra.mxu0 %v15315_v13  ;;  %v15368_v13 = vld [vmem:[#allocation8 + $0x384] ss:$16 sps:$4 sm:$0xff]   ;;  %16293 = vpow2.f32 %v7876_v26 }
 0x4c2   :  { %11044 = vmatprep.subr.bf16.mxu0 %v15323_v49  ;;  %v15366_v49 = vld [vmem:[#allocation8 + $0x380] ss:$16 sps:$4 sm:$0xff]   ;;  %v15401_v26 = vld [vmem:[#allocation8 + $0x4c4] ss:$16 sps:$4 sm:$0xff]  }
 0x4c3   :  { %11084 = vmatpush1.bf16.msra.mxu1 %v15318_v34  ;;  %v15363_v34 = vld [vmem:[#allocation8 + $0x180] ss:$16 sps:$4 sm:$0xff]  }
 0x4c4   :  { %11085 = vmatprep.subr.bf16.mxu1 %v15326_v63  ;;  %v15371_v63 = vld [vmem:[#allocation8 + $0x164] ss:$16 sps:$4 sm:$0xff]  }
 0x4c5   :  { %11045 = vmatpush1.bf16.msra.mxu0 %v15321_v36  ;;  %v15374_v36 = vld [vmem:[#allocation8 + $0x364] ss:$16 sps:$4 sm:$0xff]  }
 0x4c6   :  { %11046 = vmatprep.subr.bf16.mxu0 %v15329_v38  ;;  %v15372_v38 = vld [vmem:[#allocation8 + $0x360] ss:$16 sps:$4 sm:$0xff]  }
 0x4c7   :  { %11086 = vmatpush1.bf16.msra.mxu1 %v15324_v37  ;;  %v15369_v37 = vld [vmem:[#allocation8 + $0x160] ss:$16 sps:$4 sm:$0xff]  }
 0x4c8   :  { %11087 = vmatprep.subr.bf16.mxu1 %v15332_v41  ;;  %v15377_v41 = vld [vmem:[#allocation8 + $0x144] ss:$16 sps:$4 sm:$0xff]  }
 0x4c9   :  { %11047 = vmatpush1.bf16.msra.mxu0 %v15327_v42  ;;  %v15380_v42 = vld [vmem:[#allocation8 + $0x344] ss:$16 sps:$4 sm:$0xff]  }
 0x4ca   :  { %11048 = vmatprep.subr.bf16.mxu0 %v15335_v47  ;;  %v15378_v47 = vld [vmem:[#allocation8 + $0x340] ss:$16 sps:$4 sm:$0xff]  }
 0x4cb   :  { %11088 = vmatpush1.bf16.msra.mxu1 %v15330_v45  ;;  %v15375_v45 = vld [vmem:[#allocation8 + $0x140] ss:$16 sps:$4 sm:$0xff]  }
 0x4cc   :  { %11089 = vmatprep.subr.bf16.mxu1 %v15338_v48  ;;  %v15383_v48 = vld [vmem:[#allocation8 + $0x124] ss:$16 sps:$4 sm:$0xff]  }
 0x4cd   :  { %11049 = vmatpush1.bf16.msra.mxu0 %v15333_v24  ;;  %v15386_v24 = vld [vmem:[#allocation8 + $0x324] ss:$16 sps:$4 sm:$0xff]  }
 0x4ce   :  { %11050 = vmatprep.subr.bf16.mxu0 %v15341_v23 }
 0x4cf   :  { %11090 = vmatpush1.bf16.msra.mxu1 %v15336_v2  ;;  %v16288_v2 = vpop.eup %16287 }
 0x4d0   :  { %11091 = vmatprep.subr.bf16.mxu1 %v15344_v28  ;;  %v16290_v23 = vpop.eup %16289  ;;  %v15381_v28 = vld [vmem:[#allocation8 + $0x120] ss:$16 sps:$4 sm:$0xff]  }
 0x4d1   :  { %11051 = vmatpush1.bf16.msra.mxu0 %v15339_v56  ;;  %v16292_v56 = vpop.eup %16291 }
 0x4d2   :  { %11052 = vmatprep.subr.bf16.mxu0 %v15347_v0  ;;  %v15389_v0 = vld [vmem:[#allocation8 + $0x104] ss:$16 sps:$4 sm:$0xff]  }
 0x4d3   :  { %11092 = vmatpush1.bf16.msra.mxu1 %v15342_v62  ;;  %v15384_v62 = vld [vmem:[#allocation8 + $0x320] ss:$16 sps:$4 sm:$0xff]  }
 0x4d4   :  { %11093 = vmatprep.subr.bf16.mxu1 %v15350_v8  ;;  %v16294_v8 = vpop.eup %16293 }
 0x4d5   :  { %11053 = vmatpush2.bf16.msra.mxu0 %v15345_v12  ;;  %v14465_v12 = vadd.f32 -1.0, %v16288_v2  ;;  %v15408_v2 = vld [vmem:[#allocation8 + $0x6a0] ss:$16 sps:$4 sm:$0xff]  }
 0x4d6   :  { %11054 = vmatprep.subr.bf16.mxu0 %v15353_v5  ;;  %v14467_v5 = vadd.f32 -1.0, %v16290_v23  ;;  %v15413_v23 = vld [vmem:[#allocation8 + $0x484] ss:$16 sps:$4 sm:$0xff]  }
 0x4d7   :  { %11094 = vmatpush2.bf16.msra.mxu1 %v15348_v59  ;;  %v15392_v59 = vld [vmem:[#allocation8 + $0x304] ss:$16 sps:$4 sm:$0xff]   ;;  %v7910_v33 = vsel %vm7846_vm2, %v16926_v51, %v14465_v12  ;;  %v15417_v12 = vld [vmem:[#allocation8 + $0x460] ss:$16 sps:$4 sm:$0xff]  }
 0x4d8   :  { %11095 = vmatprep.subr.bf16.mxu1 %v15356_v35  ;;  %v14470_v35 = vadd.f32 -1.0, %v16292_v56  ;;  %v17096_v21 = vpack.c.bf16 %v7910_v33, %v7910_v33  ;;  %v15416_v56 = vld [vmem:[#allocation8 + $0x684] ss:$16 sps:$4 sm:$0xff]   ;;  %v15429_v33 = vld [vmem:[#allocation8 + $0x420] ss:$16 sps:$4 sm:$0xff]  }
 0x4d9   :  { %11055 = vmatpush2.bf16.msra.mxu0 %v15351_v18  ;;  %v14472_v18 = vadd.f32 -1.0, %v16294_v8  ;;  %v15422_v8 = vld [vmem:[#allocation8 + $0x664] ss:$16 sps:$4 sm:$0xff]  }
 0x4da   :  { %11056 = vmatprep.subr.bf16.mxu0 %v15359_v19  ;;  %v7912_v19 = vsel %vm7848_vm3, %v16952_v39, %v14467_v5  ;;  %v15425_v5 = vld [vmem:[#allocation8 + $0x444] ss:$16 sps:$4 sm:$0xff]  }
 0x4db   :  { %11096 = vmatpush2.bf16.msra.mxu1 %v15354_v53  ;;  %v15398_v53 = vld [vmem:[#allocation8 + $0x6e4] ss:$16 sps:$4 sm:$0xff]   ;;  %v7917_v51 = vsel %vm7853_vm5, %v17013_v27, %v14472_v18 }
 0x4dc   :  { %11097 = vmatprep.subr.bf16.mxu1 %v15362_v25  ;;  %v7915_v25 = vsel %vm7851_vm4, %v16987_v20, %v14470_v35  ;;  %v15423_v35 = vld [vmem:[#allocation8 + $0x440] ss:$16 sps:$4 sm:$0xff]   ;;  %v15434_v18 = vld [vmem:[#allocation8 + $0x624] ss:$16 sps:$4 sm:$0xff]   ;;  %vm16696_vm4 = vmmov 0  }
 0x4dd   :  { %11057 = vmatpush2.bf16.msra.mxu0 %v15357_v9  ;;  %v17099_v9 = vpack.c.bf16 %v7912_v19, %v7912_v19  ;;  %v15437_v19 = vld [vmem:[#allocation8 + $0x404] ss:$16 sps:$4 sm:$0xff]  }
 0x4de   :  { %11058 = vmatprep.subr.bf16.mxu0 %v15365_v30  ;;  %v15404_v30 = vld [vmem:[#allocation8 + $0x6c4] ss:$16 sps:$4 sm:$0xff]  }
 0x4df   :  { %11098 = vmatpush2.bf16.msra.mxu1 %v15360_v29  ;;  %v17102_v29 = vpack.c.bf16 %v7915_v25, %v7915_v25  ;;  %v15435_v25 = vld [vmem:[#allocation8 + $0x400] ss:$16 sps:$4 sm:$0xff]  }
 0x4e0   :  { %11099 = vmatprep.subr.bf16.mxu1 %v15368_v13 }
 0x4e1   :  { %11059 = vmatpush2.bf16.msra.mxu0 %v15363_v34  ;;  %v17106_v34 = vpack.c.bf16 %v7917_v51, %v7917_v51  ;;  %v15443_v51 = vld [vmem:[#allocation8 + $0x5e4] ss:$16 sps:$4 sm:$0xff]  }
 0x4e2   :  { %11060 = vmatprep.subr.bf16.mxu0 %v15371_v63  ;;  %v15402_v63 = vld [vmem:[#allocation8 + $0x6c0] ss:$16 sps:$4 sm:$0xff]  }
 0x4e3   :  { %11100 = vmatpush2.bf16.msra.mxu1 %v15366_v49  ;;  %v15399_v49 = vld [vmem:[#allocation8 + $0x4c0] ss:$16 sps:$4 sm:$0xff]  }
 0x4e4   :  { %11101 = vmatprep.subr.bf16.mxu1 %v15374_v36  ;;  %v15407_v36 = vld [vmem:[#allocation8 + $0x4a4] ss:$16 sps:$4 sm:$0xff]  }
 0x4e5   :  { %11061 = vmatpush2.bf16.msra.mxu0 %v15369_v37 }
 0x4e6   :  { %11062 = vmatprep.subr.bf16.mxu0 %v15377_v41  ;;  %v15410_v41 = vld [vmem:[#allocation8 + $0x6a4] ss:$16 sps:$4 sm:$0xff]  }
 0x4e7   :  { %11102 = vmatpush2.bf16.msra.mxu1 %v15372_v38 }
 0x4e8   :  { %11103 = vmatprep.subr.bf16.mxu1 %v15380_v42 }
 0x4e9   :  { %11063 = vmatpush2.bf16.msra.mxu0 %v15375_v45 }
 0x4ea   :  { %11064 = vmatprep.subr.bf16.mxu0 %v15383_v48  ;;  %v15405_v48 = vld [vmem:[#allocation8 + $0x4a0] ss:$16 sps:$4 sm:$0xff]  }
 0x4eb   :  { %11104 = vmatpush2.bf16.msra.mxu1 %v15378_v47 }
 0x4ec   :  { %11105 = vmatprep.subr.bf16.mxu1 %v15386_v24 }
 0x4ed   :  { %11065 = vmatpush2.bf16.msra.mxu0 %v15381_v28 }
 0x4ee   :  { %11066 = vmatprep.subr.bf16.mxu0 %v15389_v0  ;;  %v15419_v0 = vld [vmem:[#allocation8 + $0x464] ss:$16 sps:$4 sm:$0xff]  }
 0x4ef   :  { %11106 = vmatpush2.bf16.msra.mxu1 %v15384_v62  ;;  %v15414_v62 = vld [vmem:[#allocation8 + $0x680] ss:$16 sps:$4 sm:$0xff]  }
 0x4f0   :  { %11107 = vmatprep.subr.bf16.mxu1 %v15392_v59  ;;  %v15420_v59 = vld [vmem:[#allocation8 + $0x660] ss:$16 sps:$4 sm:$0xff]  }
 0x4f1   :  { %11067 = vmatpush2.bf16.msra.mxu0 %v15387_v7  ;;  %v15428_v7 = vld [vmem:[#allocation8 + $0x644] ss:$16 sps:$4 sm:$0xff]  }
 0x4f2   :  { %11118 = vmatprep.subr.bf16.mxu0 %v15395_v17  ;;  %v15431_v17 = vld [vmem:[#allocation8 + $0x424] ss:$16 sps:$4 sm:$0xff]  }
 0x4f3   :  { %11108 = vmatpush2.bf16.msra.mxu1 %v15390_v52  ;;  %v15426_v52 = vld [vmem:[#allocation8 + $0x640] ss:$16 sps:$4 sm:$0xff]  }
 0x4f4   :  { %11159 = vmatprep.subr.bf16.mxu1 %v15398_v53  ;;  %v7618_v39 = vpop.f32.mrf.mxu0  ;;  %11069 = vmatmul.mubr.bf16.vlgmr.msra.gmra.mxu0 %v17096_v21  ;;  %v15432_v53 = vld [vmem:[#allocation8 + $0x620] ss:$16 sps:$4 sm:$0xff]  }
 0x4f5   :  { %v7619_v13 = vadd.f32 %v7618_v39, %v17080_v15  ;;  %11119 = vmatpush1.bf16.msra.mxu0 %v15393_v22  ;;  %11150 = vmatprep.mubr.bf16.mxu0 %v17102_v29  ;;  %v15440_v22 = vld [vmem:[#allocation8 + $0x604] ss:$16 sps:$4 sm:$0xff]   ;;  %v15441_v39 = vld [vmem:[#allocation8 + $0x5e0] ss:$16 sps:$4 sm:$0xff]  }
 0x4f6   :  { %v7659_v20 = vpop.f32.mrf.mxu1  ;;  %11110 = vmatmul.mubr.bf16.vlgmr.msra.gmra.mxu1 %v17099_v9  ;;  %v7620_v27 = vpop.f32.mrf.mxu0  ;;  %11120 = vmatprep.subr.bf16.mxu0 %v15401_v26  ;;  %v15446_v26 = vld [vmem:[#allocation8 + $0x7e4] ss:$16 sps:$4 sm:$0xff]  }
 0x4f7   :  { %11160 = vmatpush1.bf16.msra.mxu1 %v15396_v60  ;;  %v17109_v37 = vadd.f32 %v7659_v20, %v7619_v13  ;;  %11191 = vmatprep.mubr.bf16.mxu1 %v17106_v34  ;;  %v7621_v38 = vadd.f32 %v7620_v27, %v17083_v55  ;;  %v15411_v55 = vld [vmem:[#allocation8 + $0x480] ss:$16 sps:$4 sm:$0xff]   ;;  %v15449_v13 = vld [vmem:[#allocation8 + $0x5c4] ss:$16 sps:$4 sm:$0xff]   ;;  %v7834_v20 = vmin.f32 %v16982_v6, 0.0  ;;  %v7836_v27 = vmin.f32 %v17008_v44, 0.0 }
 0x4f8   :  { %v7661_v15 = vpop.f32.mrf.mxu1  ;;  %v7622_v42 = vpop.f32.mrf.mxu0  ;;  %11161 = vmatprep.subr.bf16.mxu1 %v15404_v30  ;;  %v15438_v60 = vld [vmem:[#allocation8 + $0x600] ss:$16 sps:$4 sm:$0xff]  }
 0x4f9   :  { %v17113_v45 = vadd.f32 %v7661_v15, %v7621_v38  ;;  %11121 = vmatpush1.bf16.msra.mxu0 %v15399_v49  ;;  %v15444_v30 = vld [vmem:[#allocation8 + $0x7e0] ss:$16 sps:$4 sm:$0xff]   ;;  %v15452_v49 = vld [vmem:[#allocation8 + $0x7c4] ss:$16 sps:$4 sm:$0xff]   ;;  %v7841_v38 = vmin.f32 %v17059_v57, 0.0  ;;  %vm7858_vm14 = vcmp.gt.f32.partialorder %v17109_v37, 0.0 }
 0x4fa   :  { %v7663_v47 = vpop.f32.mrf.mxu1  ;;  %v7623_v24 = vpop.f32.mrf.mxu0  ;;  %11122 = vmatprep.subr.bf16.mxu0 %v15407_v36  ;;  %v15447_v36 = vld [vmem:[#allocation8 + $0x5c0] ss:$16 sps:$4 sm:$0xff]   ;;  %v7870_v42 = vmul.f32 1.442695, %v7834_v20 }
 0x4fb   :  { %11162 = vmatpush1.bf16.msra.mxu1 %v15402_v63  ;;  %v7839_v63 = vmin.f32 %v17037_v11, 0.0  ;;  %v15450_v15 = vld [vmem:[#allocation8 + $0x7c0] ss:$16 sps:$4 sm:$0xff]   ;;  %v15458_v47 = vld [vmem:[#allocation8 + $0x7a4] ss:$16 sps:$4 sm:$0xff]   ;;  %vm7859_vm12 = vcmp.gt.f32.partialorder %v17113_v45, 0.0 }
 0x4fc   :  { %v7664_v28 = vpop.f32.mrf.mxu1  ;;  %11163 = vmatprep.subr.bf16.mxu1 %v15410_v41  ;;  %v15455_v41 = vld [vmem:[#allocation8 + $0x5a4] ss:$16 sps:$4 sm:$0xff]   ;;  %16295 = vpow2.f32 %v7870_v42  ;;  %v15483_v20 = vld [vmem:[#allocation8 + $0x500] ss:$16 sps:$4 sm:$0xff]   ;;  %v1319_v42 = vrot.slane %v17065_v54, %v1286_v61 }
 0x4fd   :  { %11123 = vmatpush1.bf16.msra.mxu0 %v15405_v48  ;;  %v7874_v48 = vmul.f32 1.442695, %v7836_v27  ;;  %v7880_v24 = vmul.f32 1.442695, %v7839_v63  ;;  %v15456_v28 = vld [vmem:[#allocation8 + $0x7a0] ss:$16 sps:$4 sm:$0xff]  }
 0x4fe   :  { %11124 = vmatprep.subr.bf16.mxu0 %v15413_v23  ;;  %v7884_v23 = vmul.f32 1.442695, %v7841_v38  ;;  %v15486_v27 = vld [vmem:[#allocation8 + $0x700] ss:$16 sps:$4 sm:$0xff]   ;;  %v15491_v63 = vld [vmem:[#allocation8 + $0x8e4] ss:$16 sps:$4 sm:$0xff]  }
 0x4ff   :  { %11164 = vmatpush1.bf16.msra.mxu1 %v15408_v2  ;;  %v15453_v2 = vld [vmem:[#allocation8 + $0x5a0] ss:$16 sps:$4 sm:$0xff]   ;;  %16297 = vpow2.f32 %v7874_v48  ;;  %v15500_v61 = vld [vmem:[#allocation8 + $0xac4] ss:$16 sps:$4 sm:$0xff]  }
 0x500   :  { %11165 = vmatprep.subr.bf16.mxu1 %v15416_v56  ;;  %v15461_v56 = vld [vmem:[#allocation8 + $0x584] ss:$16 sps:$4 sm:$0xff]   ;;  %16299 = vpow2.f32 %v7880_v24 }
 0x501   :  { %11125 = vmatpush1.bf16.msra.mxu0 %v15411_v55  ;;  %v15464_v55 = vld [vmem:[#allocation8 + $0x784] ss:$16 sps:$4 sm:$0xff]   ;;  %16301 = vpow2.f32 %v7884_v23 }
 0x502   :  { %11126 = vmatprep.subr.bf16.mxu0 %v15419_v0  ;;  %v15462_v0 = vld [vmem:[#allocation8 + $0x780] ss:$16 sps:$4 sm:$0xff]   ;;  %v15497_v23 = vld [vmem:[#allocation8 + $0x8c4] ss:$16 sps:$4 sm:$0xff]  }
 0x503   :  { %11166 = vmatpush1.bf16.msra.mxu1 %v15414_v62  ;;  %v15459_v62 = vld [vmem:[#allocation8 + $0x580] ss:$16 sps:$4 sm:$0xff]  }
 0x504   :  { %11167 = vmatprep.subr.bf16.mxu1 %v15422_v8  ;;  %v15467_v8 = vld [vmem:[#allocation8 + $0x564] ss:$16 sps:$4 sm:$0xff]  }
 0x505   :  { %11127 = vmatpush1.bf16.msra.mxu0 %v15417_v12  ;;  %v15470_v12 = vld [vmem:[#allocation8 + $0x764] ss:$16 sps:$4 sm:$0xff]  }
 0x506   :  { %11128 = vmatprep.subr.bf16.mxu0 %v15425_v5  ;;  %v15468_v5 = vld [vmem:[#allocation8 + $0x760] ss:$16 sps:$4 sm:$0xff]  }
 0x507   :  { %11168 = vmatpush1.bf16.msra.mxu1 %v15420_v59  ;;  %v15465_v59 = vld [vmem:[#allocation8 + $0x560] ss:$16 sps:$4 sm:$0xff]  }
 0x508   :  { %11169 = vmatprep.subr.bf16.mxu1 %v15428_v7  ;;  %v15473_v7 = vld [vmem:[#allocation8 + $0x544] ss:$16 sps:$4 sm:$0xff]  }
 0x509   :  { %11129 = vmatpush1.bf16.msra.mxu0 %v15423_v35  ;;  %v15476_v35 = vld [vmem:[#allocation8 + $0x744] ss:$16 sps:$4 sm:$0xff]  }
 0x50a   :  { %11130 = vmatprep.subr.bf16.mxu0 %v15431_v17  ;;  %v15474_v17 = vld [vmem:[#allocation8 + $0x740] ss:$16 sps:$4 sm:$0xff]  }
 0x50b   :  { %11170 = vmatpush1.bf16.msra.mxu1 %v15426_v52  ;;  %v15471_v52 = vld [vmem:[#allocation8 + $0x540] ss:$16 sps:$4 sm:$0xff]  }
 0x50c   :  { %11171 = vmatprep.subr.bf16.mxu1 %v15434_v18  ;;  %v15479_v18 = vld [vmem:[#allocation8 + $0x524] ss:$16 sps:$4 sm:$0xff]  }
 0x50d   :  { %11131 = vmatpush1.bf16.msra.mxu0 %v15429_v33  ;;  %v15482_v33 = vld [vmem:[#allocation8 + $0x724] ss:$16 sps:$4 sm:$0xff]  }
 0x50e   :  { %11132 = vmatprep.subr.bf16.mxu0 %v15437_v19 }
 0x50f   :  { %11172 = vmatpush1.bf16.msra.mxu1 %v15432_v53  ;;  %v16296_v53 = vpop.eup %16295 }
 0x510   :  { %11173 = vmatprep.subr.bf16.mxu1 %v15440_v22  ;;  %v16298_v19 = vpop.eup %16297  ;;  %v15477_v22 = vld [vmem:[#allocation8 + $0x520] ss:$16 sps:$4 sm:$0xff]  }
 0x511   :  { %11133 = vmatpush1.bf16.msra.mxu0 %v15435_v25  ;;  %v16300_v25 = vpop.eup %16299 }
 0x512   :  { %11134 = vmatprep.subr.bf16.mxu0 %v15443_v51  ;;  %v15485_v51 = vld [vmem:[#allocation8 + $0x504] ss:$16 sps:$4 sm:$0xff]  }
 0x513   :  { %11174 = vmatpush1.bf16.msra.mxu1 %v15438_v60  ;;  %v15480_v60 = vld [vmem:[#allocation8 + $0x720] ss:$16 sps:$4 sm:$0xff]  }
 0x514   :  { %11175 = vmatprep.subr.bf16.mxu1 %v15446_v26  ;;  %v16302_v26 = vpop.eup %16301 }
 0x515   :  { %11135 = vmatpush2.bf16.msra.mxu0 %v15441_v39  ;;  %v14469_v39 = vadd.f32 -1.0, %v16296_v53  ;;  %v15509_v53 = vld [vmem:[#allocation8 + $0x884] ss:$16 sps:$4 sm:$0xff]  }
 0x516   :  { %11136 = vmatprep.subr.bf16.mxu0 %v15449_v13  ;;  %v14471_v13 = vadd.f32 -1.0, %v16298_v19 }
 0x517   :  { %11176 = vmatpush2.bf16.msra.mxu1 %v15444_v30  ;;  %v15488_v30 = vld [vmem:[#allocation8 + $0x704] ss:$16 sps:$4 sm:$0xff]   ;;  %v7914_v38 = vsel %vm7850_vm6, %v16982_v6, %v14469_v39  ;;  %v15492_v6 = vld [vmem:[#allocation8 + $0xae0] ss:$16 sps:$4 sm:$0xff]  }
 0x518   :  { %11177 = vmatprep.subr.bf16.mxu1 %v15452_v49  ;;  %v14474_v49 = vadd.f32 -1.0, %v16300_v25  ;;  %v17129_v24 = vpack.c.bf16 %v7914_v38, %v7914_v38  ;;  %v15507_v25 = vld [vmem:[#allocation8 + $0x880] ss:$16 sps:$4 sm:$0xff]  }
 0x519   :  { %11137 = vmatpush2.bf16.msra.mxu0 %v15447_v36  ;;  %v14476_v36 = vadd.f32 -1.0, %v16302_v26  ;;  %v15518_v26 = vld [vmem:[#allocation8 + $0xa64] ss:$16 sps:$4 sm:$0xff]   ;;  %v15513_v39 = vld [vmem:[#allocation8 + $0x860] ss:$16 sps:$4 sm:$0xff]  }
 0x51a   :  { %11138 = vmatprep.subr.bf16.mxu0 %v15455_v41  ;;  %v7916_v41 = vsel %vm7852_vm7, %v17008_v44, %v14471_v13  ;;  %v7919_v48 = vsel %vm7855_vm8, %v17037_v11, %v14474_v49  ;;  %v15521_v13 = vld [vmem:[#allocation8 + $0x844] ss:$16 sps:$4 sm:$0xff]   ;;  %v15519_v49 = vld [vmem:[#allocation8 + $0x840] ss:$16 sps:$4 sm:$0xff]   ;;  %vm12293_vm7 = vcmask 261120  }
 0x51b   :  { %11178 = vmatpush2.bf16.msra.mxu1 %v15450_v15  ;;  %v15494_v15 = vld [vmem:[#allocation8 + $0xae4] ss:$16 sps:$4 sm:$0xff]   ;;  %v17132_v44 = vpack.c.bf16 %v7916_v41, %v7916_v41  ;;  %v15525_v38 = vld [vmem:[#allocation8 + $0x820] ss:$16 sps:$4 sm:$0xff]  }
 0x51c   :  { %11179 = vmatprep.subr.bf16.mxu1 %v15458_v47  ;;  %v15489_v47 = vld [vmem:[#allocation8 + $0x8e0] ss:$16 sps:$4 sm:$0xff]   ;;  %v15533_v41 = vld [vmem:[#allocation8 + $0x804] ss:$16 sps:$4 sm:$0xff]  }
 0x51d   :  { %11139 = vmatpush2.bf16.msra.mxu0 %v15453_v2  ;;  %v7921_v2 = vsel %vm7857_vm9, %v17059_v57, %v14476_v36  ;;  %v15530_v36 = vld [vmem:[#allocation8 + $0xa24] ss:$16 sps:$4 sm:$0xff]   ;;  %vm13399_vm9 = vcmask 1041408  }
 0x51e   :  { %11140 = vmatprep.subr.bf16.mxu0 %v15461_v56  ;;  %v17135_v56 = vpack.c.bf16 %v7919_v48, %v7919_v48  ;;  %v17138_v11 = vpack.c.bf16 %v7921_v2, %v7921_v2  ;;  %v15534_v48 = vld [vmem:[#allocation8 + $0xa00] ss:$16 sps:$4 sm:$0xff]   ;;  %v15542_v2 = vld [vmem:[#allocation8 + $0xbe4] ss:$16 sps:$4 sm:$0xff]  }
 0x51f   :  { %11180 = vmatpush2.bf16.msra.mxu1 %v15456_v28 }
 0x520   :  { %11181 = vmatprep.subr.bf16.mxu1 %v15464_v55 }
 0x521   :  { %11141 = vmatpush2.bf16.msra.mxu0 %v15459_v62 }
 0x522   :  { %11142 = vmatprep.subr.bf16.mxu0 %v15467_v8  ;;  %v15498_v8 = vld [vmem:[#allocation8 + $0xac0] ss:$16 sps:$4 sm:$0xff]  }
 0x523   :  { %11182 = vmatpush2.bf16.msra.mxu1 %v15462_v0  ;;  %v15495_v0 = vld [vmem:[#allocation8 + $0x8c0] ss:$16 sps:$4 sm:$0xff]  }
 0x524   :  { %11183 = vmatprep.subr.bf16.mxu1 %v15470_v12  ;;  %v15503_v12 = vld [vmem:[#allocation8 + $0x8a4] ss:$16 sps:$4 sm:$0xff]  }
 0x525   :  { %11143 = vmatpush2.bf16.msra.mxu0 %v15465_v59 }
 0x526   :  { %11144 = vmatprep.subr.bf16.mxu0 %v15473_v7  ;;  %v15506_v7 = vld [vmem:[#allocation8 + $0xaa4] ss:$16 sps:$4 sm:$0xff]  }
 0x527   :  { %11184 = vmatpush2.bf16.msra.mxu1 %v15468_v5 }
 0x528   :  { %11185 = vmatprep.subr.bf16.mxu1 %v15476_v35 }
 0x529   :  { %11145 = vmatpush2.bf16.msra.mxu0 %v15471_v52 }
 0x52a   :  { %11146 = vmatprep.subr.bf16.mxu0 %v15479_v18 }
 0x52b   :  { %11186 = vmatpush2.bf16.msra.mxu1 %v15474_v17  ;;  %v15501_v17 = vld [vmem:[#allocation8 + $0x8a0] ss:$16 sps:$4 sm:$0xff]  }
 0x52c   :  { %11187 = vmatprep.subr.bf16.mxu1 %v15482_v33  ;;  %v15504_v33 = vld [vmem:[#allocation8 + $0xaa0] ss:$16 sps:$4 sm:$0xff]  }
 0x52d   :  { %11147 = vmatpush2.bf16.msra.mxu0 %v15477_v22  ;;  %v15512_v22 = vld [vmem:[#allocation8 + $0xa84] ss:$16 sps:$4 sm:$0xff]  }
 0x52e   :  { %11148 = vmatprep.subr.bf16.mxu0 %v15485_v51  ;;  %v15515_v51 = vld [vmem:[#allocation8 + $0x864] ss:$16 sps:$4 sm:$0xff]  }
 0x52f   :  { %11188 = vmatpush2.bf16.msra.mxu1 %v15480_v60  ;;  %v15510_v60 = vld [vmem:[#allocation8 + $0xa80] ss:$16 sps:$4 sm:$0xff]  }
 0x530   :  { %11189 = vmatprep.subr.bf16.mxu1 %v15488_v30  ;;  %v15516_v30 = vld [vmem:[#allocation8 + $0xa60] ss:$16 sps:$4 sm:$0xff]  }
 0x531   :  { %11149 = vmatpush2.bf16.msra.mxu0 %v15483_v20  ;;  %v15524_v20 = vld [vmem:[#allocation8 + $0xa44] ss:$16 sps:$4 sm:$0xff]  }
 0x532   :  { %11200 = vmatprep.subr.bf16.mxu0 %v15491_v63  ;;  %v15527_v63 = vld [vmem:[#allocation8 + $0x824] ss:$16 sps:$4 sm:$0xff]  }
 0x533   :  { %11190 = vmatpush2.bf16.msra.mxu1 %v15486_v27  ;;  %v15522_v27 = vld [vmem:[#allocation8 + $0xa40] ss:$16 sps:$4 sm:$0xff]  }
 0x534   :  { %11241 = vmatprep.subr.bf16.mxu1 %v15494_v15  ;;  %v7700_v28 = vpop.f32.mrf.mxu0  ;;  %11151 = vmatmul.mubr.bf16.vlgmr.msra.gmra.mxu0 %v17129_v24  ;;  %v15528_v15 = vld [vmem:[#allocation8 + $0xa20] ss:$16 sps:$4 sm:$0xff]  }
 0x535   :  { %v7701_v55 = vadd.f32 %v7700_v28, %v1319_v42  ;;  %11201 = vmatpush1.bf16.msra.mxu0 %v15489_v47  ;;  %11232 = vmatprep.mubr.bf16.mxu0 %v17135_v56  ;;  %v15536_v42 = vld [vmem:[#allocation8 + $0xa04] ss:$16 sps:$4 sm:$0xff]   ;;  %v15531_v47 = vld [vmem:[#allocation8 + $0x800] ss:$16 sps:$4 sm:$0xff]  }
 0x536   :  { %v7741_v62 = vpop.f32.mrf.mxu1  ;;  %11192 = vmatmul.mubr.bf16.vlgmr.msra.gmra.mxu1 %v17132_v44  ;;  %v17141_v57 = vpop.f32.mrf.mxu0  ;;  %11202 = vmatprep.subr.bf16.mxu0 %v15497_v23  ;;  %v15537_v23 = vld [vmem:[#allocation8 + $0x9e0] ss:$16 sps:$4 sm:$0xff]  }
 0x537   :  { %11242 = vmatpush1.bf16.msra.mxu1 %v15492_v6  ;;  %v17143_v59 = vadd.f32 %v7741_v62, %v7701_v55  ;;  %11273 = vmatprep.mubr.bf16.mxu1 %v17138_v11  ;;  %v15539_v6 = vld [vmem:[#allocation8 + $0x9e4] ss:$16 sps:$4 sm:$0xff]   ;;  %v15540_v28 = vld [vmem:[#allocation8 + $0xbe0] ss:$16 sps:$4 sm:$0xff]   ;;  %v7838_v55 = vmin.f32 %v17032_v50, 0.0 }
 0x538   :  { %v17146_v5 = vpop.f32.mrf.mxu1  ;;  %v7704_v35 = vpop.f32.mrf.mxu0  ;;  %11243 = vmatprep.subr.bf16.mxu1 %v15500_v61  ;;  %v15545_v61 = vld [vmem:[#allocation8 + $0x9c4] ss:$16 sps:$4 sm:$0xff]  }
 0x539   :  { %11203 = vmatpush1.bf16.msra.mxu0 %v15495_v0  ;;  %v15548_v62 = vld [vmem:[#allocation8 + $0xbc4] ss:$16 sps:$4 sm:$0xff]   ;;  %v7840_v0 = vmin.f32 %v17054_v46, 0.0 }
 0x53a   :  { %v7745_v52 = vpop.f32.mrf.mxu1  ;;  %v7705_v18 = vpop.f32.mrf.mxu0  ;;  %11204 = vmatprep.subr.bf16.mxu0 %v15503_v12  ;;  %v15543_v12 = vld [vmem:[#allocation8 + $0x9c0] ss:$16 sps:$4 sm:$0xff]   ;;  %v15551_v35 = vld [vmem:[#allocation8 + $0x9a4] ss:$16 sps:$4 sm:$0xff]  }
 0x53b   :  { %11244 = vmatpush1.bf16.msra.mxu1 %v15498_v8  ;;  %v7843_v8 = vmin.f32 %v17113_v45, 0.0  ;;  %v7878_v52 = vmul.f32 1.442695, %v7838_v55  ;;  %v7882_v18 = vmul.f32 1.442695, %v7840_v0 }
 0x53c   :  { %v7746_v19 = vpop.f32.mrf.mxu1  ;;  %11245 = vmatprep.subr.bf16.mxu1 %v15506_v7  ;;  %v15546_v7 = vld [vmem:[#allocation8 + $0xbc0] ss:$16 sps:$4 sm:$0xff]  }
 0x53d   :  { %11205 = vmatpush1.bf16.msra.mxu0 %v15501_v17  ;;  %v15554_v17 = vld [vmem:[#allocation8 + $0xba4] ss:$16 sps:$4 sm:$0xff]   ;;  %v15552_v19 = vld [vmem:[#allocation8 + $0xba0] ss:$16 sps:$4 sm:$0xff]   ;;  %16303 = vpow2.f32 %v7878_v52 }
 0x53e   :  { %11206 = vmatprep.subr.bf16.mxu0 %v15509_v53  ;;  %v15549_v53 = vld [vmem:[#allocation8 + $0x9a0] ss:$16 sps:$4 sm:$0xff]   ;;  %16305 = vpow2.f32 %v7882_v18  ;;  %v15593_v18 = vld [vmem:[#allocation8 + $0xcc4] ss:$16 sps:$4 sm:$0xff]  }
 0x53f   :  { %11246 = vmatpush1.bf16.msra.mxu1 %v15504_v33  ;;  %v7888_v33 = vmul.f32 1.442695, %v7843_v8  ;;  %v15579_v55 = vld [vmem:[#allocation8 + $0x900] ss:$16 sps:$4 sm:$0xff]   ;;  %v15587_v8 = vld [vmem:[#allocation8 + $0xce4] ss:$16 sps:$4 sm:$0xff]  }
 0x540   :  { %11247 = vmatprep.subr.bf16.mxu1 %v15512_v22  ;;  %v15557_v22 = vld [vmem:[#allocation8 + $0x984] ss:$16 sps:$4 sm:$0xff]   ;;  %v15582_v0 = vld [vmem:[#allocation8 + $0xb00] ss:$16 sps:$4 sm:$0xff]  }
 0x541   :  { %11207 = vmatpush1.bf16.msra.mxu0 %v15507_v25  ;;  %v15560_v25 = vld [vmem:[#allocation8 + $0xb84] ss:$16 sps:$4 sm:$0xff]   ;;  %16307 = vpow2.f32 %v7888_v33 }
 0x542   :  { %11208 = vmatprep.subr.bf16.mxu0 %v15515_v51  ;;  %v15558_v51 = vld [vmem:[#allocation8 + $0xb80] ss:$16 sps:$4 sm:$0xff]   ;;  %v15596_v33 = vld [vmem:[#allocation8 + $0xec4] ss:$16 sps:$4 sm:$0xff]  }
 0x543   :  { %11248 = vmatpush1.bf16.msra.mxu1 %v15510_v60  ;;  %v15555_v60 = vld [vmem:[#allocation8 + $0x980] ss:$16 sps:$4 sm:$0xff]  }
 0x544   :  { %11249 = vmatprep.subr.bf16.mxu1 %v15518_v26  ;;  %v15563_v26 = vld [vmem:[#allocation8 + $0x964] ss:$16 sps:$4 sm:$0xff]  }
 0x545   :  { %11209 = vmatpush1.bf16.msra.mxu0 %v15513_v39  ;;  %v15566_v39 = vld [vmem:[#allocation8 + $0xb64] ss:$16 sps:$4 sm:$0xff]  }
 0x546   :  { %11210 = vmatprep.subr.bf16.mxu0 %v15521_v13  ;;  %v15564_v13 = vld [vmem:[#allocation8 + $0xb60] ss:$16 sps:$4 sm:$0xff]  }
 0x547   :  { %11250 = vmatpush1.bf16.msra.mxu1 %v15516_v30  ;;  %v15561_v30 = vld [vmem:[#allocation8 + $0x960] ss:$16 sps:$4 sm:$0xff]  }
 0x548   :  { %11251 = vmatprep.subr.bf16.mxu1 %v15524_v20  ;;  %v15569_v20 = vld [vmem:[#allocation8 + $0x944] ss:$16 sps:$4 sm:$0xff]  }
 0x549   :  { %11211 = vmatpush1.bf16.msra.mxu0 %v15519_v49  ;;  %v15572_v49 = vld [vmem:[#allocation8 + $0xb44] ss:$16 sps:$4 sm:$0xff]  }
 0x54a   :  { %11212 = vmatprep.subr.bf16.mxu0 %v15527_v63  ;;  %v15570_v63 = vld [vmem:[#allocation8 + $0xb40] ss:$16 sps:$4 sm:$0xff]  }
 0x54b   :  { %11252 = vmatpush1.bf16.msra.mxu1 %v15522_v27  ;;  %v15567_v27 = vld [vmem:[#allocation8 + $0x940] ss:$16 sps:$4 sm:$0xff]  }
 0x54c   :  { %11253 = vmatprep.subr.bf16.mxu1 %v15530_v36  ;;  %v15575_v36 = vld [vmem:[#allocation8 + $0x924] ss:$16 sps:$4 sm:$0xff]  }
 0x54d   :  { %11213 = vmatpush1.bf16.msra.mxu0 %v15525_v38  ;;  %v15578_v38 = vld [vmem:[#allocation8 + $0xb24] ss:$16 sps:$4 sm:$0xff]  }
 0x54e   :  { %11214 = vmatprep.subr.bf16.mxu0 %v15533_v41 }
 0x54f   :  { %11254 = vmatpush1.bf16.msra.mxu1 %v15528_v15  ;;  %v16304_v15 = vpop.eup %16303 }
 0x550   :  { %11255 = vmatprep.subr.bf16.mxu1 %v15536_v42  ;;  %v16306_v41 = vpop.eup %16305  ;;  %v15573_v42 = vld [vmem:[#allocation8 + $0x920] ss:$16 sps:$4 sm:$0xff]  }
 0x551   :  { %11215 = vmatpush1.bf16.msra.mxu0 %v15531_v47  ;;  %v16308_v47 = vpop.eup %16307 }
 0x552   :  { %11216 = vmatprep.subr.bf16.mxu0 %v15539_v6  ;;  %v15581_v6 = vld [vmem:[#allocation8 + $0x904] ss:$16 sps:$4 sm:$0xff]  }
 0x553   :  { %11256 = vmatpush1.bf16.msra.mxu1 %v15534_v48  ;;  %v15576_v48 = vld [vmem:[#allocation8 + $0xb20] ss:$16 sps:$4 sm:$0xff]  }
 0x554   :  { %11257 = vmatprep.subr.bf16.mxu1 %v15542_v2  ;;  %v14473_v2 = vadd.f32 -1.0, %v16304_v15  ;;  %v15608_v15 = vld [vmem:[#allocation8 + $0xe84] ss:$16 sps:$4 sm:$0xff]  }
 0x555   :  { %11217 = vmatpush2.bf16.msra.mxu0 %v15537_v23  ;;  %v15584_v23 = vld [vmem:[#allocation8 + $0xb04] ss:$16 sps:$4 sm:$0xff]  }
 0x556   :  { %11218 = vmatprep.subr.bf16.mxu0 %v15545_v61  ;;  %v1323_v61 = vrot.slane %v17065_v54, %v1290_v1  ;;  %v15585_v1 = vld [vmem:[#allocation8 + $0xce0] ss:$16 sps:$4 sm:$0xff]  }
 0x557   :  { %11258 = vmatpush2.bf16.msra.mxu1 %v15540_v28  ;;  %v14475_v28 = vadd.f32 -1.0, %v16306_v41 }
 0x558   :  { %11259 = vmatprep.subr.bf16.mxu1 %v15548_v62  ;;  %v14478_v62 = vadd.f32 -1.0, %v16308_v47  ;;  %v7703_v43 = vadd.f32 %v17141_v57, %v1323_v61  ;;  %v15606_v47 = vld [vmem:[#allocation8 + $0xe80] ss:$16 sps:$4 sm:$0xff]   ;;  %v15620_v61 = vld [vmem:[#allocation8 + $0xe44] ss:$16 sps:$4 sm:$0xff]  }
 0x559   :  { %11219 = vmatpush2.bf16.msra.mxu0 %v15543_v12  ;;  %v7918_v12 = vsel %vm7854_vm10, %v17032_v50, %v14473_v2  ;;  %v15609_v2 = vld [vmem:[#allocation8 + $0xc60] ss:$16 sps:$4 sm:$0xff]  }
 0x55a   :  { %11220 = vmatprep.subr.bf16.mxu0 %v15551_v35  ;;  %v7920_v35 = vsel %vm7856_vm11, %v17054_v46, %v14475_v28  ;;  %v7923_v54 = vsel %vm7859_vm12, %v17113_v45, %v14478_v62  ;;  %v17161_v52 = vpack.c.bf16 %v7918_v12, %v7918_v12  ;;  %v7744_v57 = vadd.f32 %v17146_v5, %v7703_v43  ;;  %v15591_v45 = vld [vmem:[#allocation8 + $0xcc0] ss:$16 sps:$4 sm:$0xff]   ;;  %v15617_v28 = vld [vmem:[#allocation8 + $0xc44] ss:$16 sps:$4 sm:$0xff]  }
 0x55b   :  { %11260 = vmatpush2.bf16.msra.mxu1 %v15546_v7  ;;  %v15590_v7 = vld [vmem:[#allocation8 + $0xee4] ss:$16 sps:$4 sm:$0xff]   ;;  %v17163_v50 = vpack.c.bf16 %v7920_v35, %v7920_v35  ;;  %v17168_v46 = vpack.c.bf16 %v7923_v54, %v7923_v54  ;;  %v15618_v62 = vld [vmem:[#allocation8 + $0xe40] ss:$16 sps:$4 sm:$0xff]  }
 0x55c   :  { %11261 = vmatprep.subr.bf16.mxu1 %v15554_v17  ;;  %v15588_v17 = vld [vmem:[#allocation8 + $0xee0] ss:$16 sps:$4 sm:$0xff]   ;;  %v15629_v35 = vld [vmem:[#allocation8 + $0xc04] ss:$16 sps:$4 sm:$0xff]  }
 0x55d   :  { %11221 = vmatpush2.bf16.msra.mxu0 %v15549_v53  ;;  %v15621_v12 = vld [vmem:[#allocation8 + $0xc20] ss:$16 sps:$4 sm:$0xff]   ;;  %v15632_v43 = vld [vmem:[#allocation8 + $0xe04] ss:$16 sps:$4 sm:$0xff]  }
 0x55e   :  { %11222 = vmatprep.subr.bf16.mxu0 %v15557_v22 }
 0x55f   :  { %11262 = vmatpush2.bf16.msra.mxu1 %v15552_v19 }
 0x560   :  { %11263 = vmatprep.subr.bf16.mxu1 %v15560_v25  ;;  %v15594_v25 = vld [vmem:[#allocation8 + $0xec0] ss:$16 sps:$4 sm:$0xff]  }
 0x561   :  { %11223 = vmatpush2.bf16.msra.mxu0 %v15555_v60  ;;  %v15599_v60 = vld [vmem:[#allocation8 + $0xca4] ss:$16 sps:$4 sm:$0xff]  }
 0x562   :  { %11224 = vmatprep.subr.bf16.mxu0 %v15563_v26 }
 0x563   :  { %11264 = vmatpush2.bf16.msra.mxu1 %v15558_v51 }
 0x564   :  { %11265 = vmatprep.subr.bf16.mxu1 %v15566_v39  ;;  %v15602_v39 = vld [vmem:[#allocation8 + $0xea4] ss:$16 sps:$4 sm:$0xff]  }
 0x565   :  { %11225 = vmatpush2.bf16.msra.mxu0 %v15561_v30 }
 0x566   :  { %11226 = vmatprep.subr.bf16.mxu0 %v15569_v20  ;;  %v15597_v20 = vld [vmem:[#allocation8 + $0xca0] ss:$16 sps:$4 sm:$0xff]  }
 0x567   :  { %11266 = vmatpush2.bf16.msra.mxu1 %v15564_v13 }
 0x568   :  { %11267 = vmatprep.subr.bf16.mxu1 %v15572_v49 }
 0x569   :  { %11227 = vmatpush2.bf16.msra.mxu0 %v15567_v27  ;;  %v15600_v27 = vld [vmem:[#allocation8 + $0xea0] ss:$16 sps:$4 sm:$0xff]  }
 0x56a   :  { %11228 = vmatprep.subr.bf16.mxu0 %v15575_v36 }
 0x56b   :  { %11268 = vmatpush2.bf16.msra.mxu1 %v15570_v63  ;;  %v15605_v63 = vld [vmem:[#allocation8 + $0xc84] ss:$16 sps:$4 sm:$0xff]  }
 0x56c   :  { %11269 = vmatprep.subr.bf16.mxu1 %v15578_v38 }
 0x56d   :  { %11229 = vmatpush2.bf16.msra.mxu0 %v15573_v42  ;;  %v15603_v42 = vld [vmem:[#allocation8 + $0xc80] ss:$16 sps:$4 sm:$0xff]  }
 0x56e   :  { %11230 = vmatprep.subr.bf16.mxu0 %v15581_v6  ;;  %v15614_v6 = vld [vmem:[#allocation8 + $0xe64] ss:$16 sps:$4 sm:$0xff]  }
 0x56f   :  { %11270 = vmatpush2.bf16.msra.mxu1 %v15576_v48  ;;  %v15611_v48 = vld [vmem:[#allocation8 + $0xc64] ss:$16 sps:$4 sm:$0xff]  }
 0x570   :  { %11271 = vmatprep.subr.bf16.mxu1 %v15584_v23  ;;  %v15612_v23 = vld [vmem:[#allocation8 + $0xe60] ss:$16 sps:$4 sm:$0xff]  }
 0x571   :  { %11231 = vmatpush2.bf16.msra.mxu0 %v15579_v55  ;;  %v15615_v55 = vld [vmem:[#allocation8 + $0xc40] ss:$16 sps:$4 sm:$0xff]  }
 0x572   :  { %11282 = vmatprep.subr.bf16.mxu0 %v15587_v8  ;;  %v15626_v8 = vld [vmem:[#allocation8 + $0xe24] ss:$16 sps:$4 sm:$0xff]  }
 0x573   :  { %11272 = vmatpush2.bf16.msra.mxu1 %v15582_v0  ;;  %v15623_v0 = vld [vmem:[#allocation8 + $0xc24] ss:$16 sps:$4 sm:$0xff]  }
 0x574   :  { %11323 = vmatprep.subr.bf16.mxu1 %v15590_v7  ;;  %v17165_v53 = vpop.f32.mrf.mxu0  ;;  %11233 = vmatmul.mubr.bf16.vlgmr.msra.gmra.mxu0 %v17161_v52  ;;  %v15624_v7 = vld [vmem:[#allocation8 + $0xe20] ss:$16 sps:$4 sm:$0xff]  }
 0x575   :  { %11283 = vmatpush1.bf16.msra.mxu0 %v15585_v1  ;;  %11314 = vmatprep.mubr.bf16.mxu0 %v17168_v46  ;;  %v7783_v54 = vadd.f32 %v17165_v53, %v17143_v59  ;;  %v15636_v59 = vld [vmem:[#allocation8 + $0xfe0] ss:$16 sps:$4 sm:$0xff]   ;;  %v15641_v53 = vld [vmem:[#allocation8 + $0xdc4] ss:$16 sps:$4 sm:$0xff]  }
 0x576   :  { %v17171_v19 = vpop.f32.mrf.mxu1  ;;  %11274 = vmatmul.mubr.bf16.vlgmr.msra.gmra.mxu1 %v17163_v50  ;;  %v7784_v22 = vpop.f32.mrf.mxu0  ;;  %11284 = vmatprep.subr.bf16.mxu0 %v15593_v18 }
 0x577   :  { %11324 = vmatpush1.bf16.msra.mxu1 %v15588_v17  ;;  %v7785_v51 = vadd.f32 %v7784_v22, %v7744_v57  ;;  %v15627_v17 = vld [vmem:[#allocation8 + $0xc00] ss:$16 sps:$4 sm:$0xff]   ;;  %v15638_v22 = vld [vmem:[#allocation8 + $0xfe4] ss:$16 sps:$4 sm:$0xff]  }
 0x578   :  { %v7825_v26 = vpop.f32.mrf.mxu1  ;;  %11325 = vmatprep.subr.bf16.mxu1 %v15596_v33  ;;  %v7786_v30 = vpop.f32.mrf.mxu0  ;;  %v15630_v33 = vld [vmem:[#allocation8 + $0xe00] ss:$16 sps:$4 sm:$0xff]  }
 0x579   :  { %v7826_v13 = vadd.f32 %v7825_v26, %v7785_v51  ;;  %11285 = vmatpush1.bf16.msra.mxu0 %v15591_v45  ;;  %v15635_v45 = vld [vmem:[#allocation8 + $0xde4] ss:$16 sps:$4 sm:$0xff]   ;;  %v15633_v51 = vld [vmem:[#allocation8 + $0xde0] ss:$16 sps:$4 sm:$0xff]   ;;  %v7842_v26 = vmin.f32 %v17109_v37, 0.0 }
 0x57a   :  { %v7827_v5 = vpop.f32.mrf.mxu1  ;;  %v7787_v49 = vpop.f32.mrf.mxu0  ;;  %11286 = vmatprep.subr.bf16.mxu0 %v15599_v60 }
 0x57b   :  { %11326 = vmatpush1.bf16.msra.mxu1 %v15594_v25  ;;  %v7845_v36 = vmin.f32 %v7826_v13, 0.0  ;;  %vm7861_vm13 = vcmp.gt.f32.partialorder %v7826_v13, 0.0  ;;  %v17178_v25 = vadd.f32 %v17171_v19, %v7783_v54  ;;  %v15642_v19 = vld [vmem:[#allocation8 + $0xfc0] ss:$16 sps:$4 sm:$0xff]   ;;  %v15647_v5 = vld [vmem:[#allocation8 + $0xda4] ss:$16 sps:$4 sm:$0xff]  }
 0x57c   :  { %v7828_v38 = vpop.f32.mrf.mxu1  ;;  %11327 = vmatprep.subr.bf16.mxu1 %v15602_v39  ;;  %v15644_v39 = vld [vmem:[#allocation8 + $0xfc4] ss:$16 sps:$4 sm:$0xff]  }
 0x57d   :  { %v7892_v41 = vmul.f32 1.442695, %v7845_v36  ;;  %11287 = vmatpush1.bf16.msra.mxu0 %v15597_v20  ;;  %v7844_v30 = vmin.f32 %v17178_v25, 0.0  ;;  %v7886_v20 = vmul.f32 1.442695, %v7842_v26  ;;  %vm7860_vm15 = vcmp.gt.f32.partialorder %v17178_v25, 0.0 }
 0x57e   :  { %11288 = vmatprep.subr.bf16.mxu0 %v15605_v63  ;;  %v15650_v49 = vld [vmem:[#allocation8 + $0xfa4] ss:$16 sps:$4 sm:$0xff]   ;;  %v15645_v63 = vld [vmem:[#allocation8 + $0xda0] ss:$16 sps:$4 sm:$0xff]   ;;  %v15681_v26 = vld [vmem:[#allocation8 + $0xe8] ss:$16 sps:$4 sm:$0xff]  }
 0x57f   :  { %11328 = vmatpush1.bf16.msra.mxu1 %v15600_v27  ;;  %16309 = vpow2.f32 %v7892_v41  ;;  %v7890_v27 = vmul.f32 1.442695, %v7844_v30  ;;  %v15648_v36 = vld [vmem:[#allocation8 + $0xfa0] ss:$16 sps:$4 sm:$0xff]   ;;  %v15653_v38 = vld [vmem:[#allocation8 + $0xd84] ss:$16 sps:$4 sm:$0xff]  }
 0x580   :  { %11329 = vmatprep.subr.bf16.mxu1 %v15608_v15  ;;  %16311 = vpow2.f32 %v7886_v20  ;;  %v15656_v15 = vld [vmem:[#allocation8 + $0xf84] ss:$16 sps:$4 sm:$0xff]   ;;  %v15651_v41 = vld [vmem:[#allocation8 + $0xd80] ss:$16 sps:$4 sm:$0xff]   ;;  %v15684_v30 = vld [vmem:[#allocation8 + $0x2e8] ss:$16 sps:$4 sm:$0xff]  }
 0x581   :  { %11289 = vmatpush1.bf16.msra.mxu0 %v15603_v42  ;;  %16313 = vpow2.f32 %v7890_v27  ;;  %v15654_v42 = vld [vmem:[#allocation8 + $0xf80] ss:$16 sps:$4 sm:$0xff]   ;;  %v15680_v54 = vld [vmem:[#allocation8 + $0xf04] ss:$16 sps:$4 sm:$0xff]   ;;  %v15692_v20 = vld [vmem:[#allocation8 + $0x2cc] ss:$16 sps:$4 sm:$0xff]  }
 0x582   :  { %11290 = vmatprep.subr.bf16.mxu0 %v15611_v48  ;;  %v15662_v48 = vld [vmem:[#allocation8 + $0xf64] ss:$16 sps:$4 sm:$0xff]   ;;  %v15687_v27 = vld [vmem:[#allocation8 + $0xc8] ss:$16 sps:$4 sm:$0xff]  }
 0x583   :  { %11330 = vmatpush1.bf16.msra.mxu1 %v15606_v47  ;;  %v15659_v47 = vld [vmem:[#allocation8 + $0xd64] ss:$16 sps:$4 sm:$0xff]  }
 0x584   :  { %11331 = vmatprep.subr.bf16.mxu1 %v15614_v6  ;;  %v15657_v6 = vld [vmem:[#allocation8 + $0xd60] ss:$16 sps:$4 sm:$0xff]  }
 0x585   :  { %11291 = vmatpush1.bf16.msra.mxu0 %v15609_v2  ;;  %v15660_v2 = vld [vmem:[#allocation8 + $0xf60] ss:$16 sps:$4 sm:$0xff]  }
 0x586   :  { %11292 = vmatprep.subr.bf16.mxu0 %v15617_v28  ;;  %v15668_v28 = vld [vmem:[#allocation8 + $0xf44] ss:$16 sps:$4 sm:$0xff]  }
 0x587   :  { %11332 = vmatpush1.bf16.msra.mxu1 %v15612_v23  ;;  %v15665_v23 = vld [vmem:[#allocation8 + $0xd44] ss:$16 sps:$4 sm:$0xff]  }
 0x588   :  { %11333 = vmatprep.subr.bf16.mxu1 %v15620_v61  ;;  %v15663_v61 = vld [vmem:[#allocation8 + $0xd40] ss:$16 sps:$4 sm:$0xff]  }
 0x589   :  { %11293 = vmatpush1.bf16.msra.mxu0 %v15615_v55  ;;  %v15666_v55 = vld [vmem:[#allocation8 + $0xf40] ss:$16 sps:$4 sm:$0xff]  }
 0x58a   :  { %11294 = vmatprep.subr.bf16.mxu0 %v15623_v0  ;;  %v15674_v0 = vld [vmem:[#allocation8 + $0xf24] ss:$16 sps:$4 sm:$0xff]  }
 0x58b   :  { %11334 = vmatpush1.bf16.msra.mxu1 %v15618_v62  ;;  %v15671_v62 = vld [vmem:[#allocation8 + $0xd24] ss:$16 sps:$4 sm:$0xff]  }
 0x58c   :  { %11335 = vmatprep.subr.bf16.mxu1 %v15626_v8  ;;  %v16310_v1 = vpop.eup %16309 }
 0x58d   :  { %11295 = vmatpush1.bf16.msra.mxu0 %v15621_v12  ;;  %v14480_v18 = vadd.f32 -1.0, %v16310_v1  ;;  %v16312_v8 = vpop.eup %16311 }
 0x58e   :  { %11296 = vmatprep.subr.bf16.mxu0 %v15629_v35  ;;  %v16314_v12 = vpop.eup %16313  ;;  %v15672_v35 = vld [vmem:[#allocation8 + $0xf20] ss:$16 sps:$4 sm:$0xff]   ;;  %v14477_v1 = vadd.f32 -1.0, %v16312_v8  ;;  %v15707_v8 = vld [vmem:[#allocation8 + $0x6c] ss:$16 sps:$4 sm:$0xff]  }
 0x58f   :  { %11336 = vmatpush1.bf16.msra.mxu1 %v15624_v7  ;;  %v7925_v57 = vsel %vm7861_vm13, %v7826_v13, %v14480_v18  ;;  %v15639_v13 = vld [vmem:[#allocation8 + $0xdc0] ss:$16 sps:$4 sm:$0xff]  }
 0x590   :  { %11337 = vmatprep.subr.bf16.mxu1 %v15632_v43  ;;  %v17180_v60 = vpack.c.bf16 %v7925_v57, %v7925_v57  ;;  %v15669_v7 = vld [vmem:[#allocation8 + $0xd20] ss:$16 sps:$4 sm:$0xff]   ;;  %v15677_v43 = vld [vmem:[#allocation8 + $0xd04] ss:$16 sps:$4 sm:$0xff]  }
 0x591   :  { %11297 = vmatpush1.bf16.msra.mxu0 %v15627_v17  ;;  %v14479_v17 = vadd.f32 -1.0, %v16314_v12  ;;  %v15675_v18 = vld [vmem:[#allocation8 + $0xd00] ss:$16 sps:$4 sm:$0xff]   ;;  %v15710_v12 = vld [vmem:[#allocation8 + $0x26c] ss:$16 sps:$4 sm:$0xff]  }
 0x592   :  { %11355 = vmatprep.mubr.bf16.mxu1 %v17180_v60  ;;  %11298 = vmatprep.subr.bf16.mxu0 %v15635_v45  ;;  %v8454_v57 = vld [vmem:[#allocation10] sm:$0xf]  ;;  %v15683_v45 = vld [vmem:[#allocation8 + $0xec] ss:$16 sps:$4 sm:$0xff]  }
 0x593   :  { %11338 = vmatpush1.bf16.msra.mxu1 %v15630_v33  ;;  %v15678_v33 = vld [vmem:[#allocation8 + $0xf00] ss:$16 sps:$4 sm:$0xff]  }
 0x594   :  { %11339 = vmatprep.subr.bf16.mxu1 %v15638_v22  ;;  %v7922_v22 = vsel %vm7858_vm14, %v17109_v37, %v14477_v1  ;;  %v8463_v37 = vrot.slane %v8454_v57, %v16911_v40  ;;  %v15716_v1 = vld [vmem:[#allocation8 + $0x24c] ss:$16 sps:$4 sm:$0xff]  }
 0x595   :  { %11299 = vmatpush2.bf16.msra.mxu0 %v15633_v51  ;;  %v15686_v51 = vld [vmem:[#allocation8 + $0x2ec] ss:$16 sps:$4 sm:$0xff]  }
 0x596   :  { %11300 = vmatprep.subr.bf16.mxu0 %v15641_v53  ;;  %v8459_v53 = vrot.slane %v8454_v57, %v16908_v31  ;;  %v15717_v57 = vld [vmem:[#allocation8 + $0x28] ss:$16 sps:$4 sm:$0xff]  }
 0x597   :  { %11340 = vmatpush2.bf16.msra.mxu1 %v15636_v59  ;;  %v7924_v59 = vsel %vm7860_vm15, %v17178_v25, %v14479_v17  ;;  %v15714_v17 = vld [vmem:[#allocation8 + $0x248] ss:$16 sps:$4 sm:$0xff]  }
 0x598   :  { %11341 = vmatprep.subr.bf16.mxu1 %v15644_v39  ;;  %v17190_v39 = vpack.c.bf16 %v7922_v22, %v7922_v22  ;;  %v15725_v22 = vld [vmem:[#allocation8 + $0xc] ss:$16 sps:$4 sm:$0xff]  }
 0x599   :  { %11301 = vmatpush2.bf16.msra.mxu0 %v15639_v13  ;;  %v17192_v13 = vpack.c.bf16 %v7924_v59, %v7924_v59  ;;  %v15723_v59 = vld [vmem:[#allocation8 + $0x8] ss:$16 sps:$4 sm:$0xff]  }
 0x59a   :  { %11302 = vmatprep.subr.bf16.mxu0 %v15647_v5 }
 0x59b   :  { %11342 = vmatpush2.bf16.msra.mxu1 %v15642_v19  ;;  %v15689_v19 = vld [vmem:[#allocation8 + $0xcc] ss:$16 sps:$4 sm:$0xff]  }
 0x59c   :  { %11343 = vmatprep.subr.bf16.mxu1 %v15650_v49 }
 0x59d   :  { %11303 = vmatpush2.bf16.msra.mxu0 %v15645_v63 }
 0x59e   :  { %11304 = vmatprep.subr.bf16.mxu0 %v15653_v38  ;;  %v15695_v38 = vld [vmem:[#allocation8 + $0xac] ss:$16 sps:$4 sm:$0xff]  }
 0x59f   :  { %11344 = vmatpush2.bf16.msra.mxu1 %v15648_v36  ;;  %v15690_v36 = vld [vmem:[#allocation8 + $0x2c8] ss:$16 sps:$4 sm:$0xff]  }
 0x5a0   :  { %11345 = vmatprep.subr.bf16.mxu1 %v15656_v15 }
 0x5a1   :  { %11305 = vmatpush2.bf16.msra.mxu0 %v15651_v41 }
 0x5a2   :  { %11306 = vmatprep.subr.bf16.mxu0 %v15659_v47  ;;  %v15698_v47 = vld [vmem:[#allocation8 + $0x2ac] ss:$16 sps:$4 sm:$0xff]  }
 0x5a3   :  { %11346 = vmatpush2.bf16.msra.mxu1 %v15654_v42 }
 0x5a4   :  { %11347 = vmatprep.subr.bf16.mxu1 %v15662_v48 }
 0x5a5   :  { %11307 = vmatpush2.bf16.msra.mxu0 %v15657_v6 }
 0x5a6   :  { %11308 = vmatprep.subr.bf16.mxu0 %v15665_v23  ;;  %v15693_v23 = vld [vmem:[#allocation8 + $0xa8] ss:$16 sps:$4 sm:$0xff]  }
 0x5a7   :  { %11348 = vmatpush2.bf16.msra.mxu1 %v15660_v2 }
 0x5a8   :  { %11349 = vmatprep.subr.bf16.mxu1 %v15668_v28  ;;  %v15696_v28 = vld [vmem:[#allocation8 + $0x2a8] ss:$16 sps:$4 sm:$0xff]  }
 0x5a9   :  { %11309 = vmatpush2.bf16.msra.mxu0 %v15663_v61  ;;  %v15701_v61 = vld [vmem:[#allocation8 + $0x8c] ss:$16 sps:$4 sm:$0xff]  }
 0x5aa   :  { %11310 = vmatprep.subr.bf16.mxu0 %v15671_v62  ;;  %v15704_v62 = vld [vmem:[#allocation8 + $0x28c] ss:$16 sps:$4 sm:$0xff]  }
 0x5ab   :  { %11350 = vmatpush2.bf16.msra.mxu1 %v15666_v55 }
 0x5ac   :  { %11351 = vmatprep.subr.bf16.mxu1 %v15674_v0  ;;  %v15702_v0 = vld [vmem:[#allocation8 + $0x288] ss:$16 sps:$4 sm:$0xff]  }
 0x5ad   :  { %11311 = vmatpush2.bf16.msra.mxu0 %v15669_v7  ;;  %v15705_v7 = vld [vmem:[#allocation8 + $0x68] ss:$16 sps:$4 sm:$0xff]  }
 0x5ae   :  { %11312 = vmatprep.subr.bf16.mxu0 %v15677_v43  ;;  %v15713_v43 = vld [vmem:[#allocation8 + $0x4c] ss:$16 sps:$4 sm:$0xff]  }
 0x5af   :  { %11352 = vmatpush2.bf16.msra.mxu1 %v15672_v35  ;;  %v15708_v35 = vld [vmem:[#allocation8 + $0x268] ss:$16 sps:$4 sm:$0xff]  }
 0x5b0   :  { %11353 = vmatprep.subr.bf16.mxu1 %v15680_v54  ;;  %v15711_v54 = vld [vmem:[#allocation8 + $0x48] ss:$16 sps:$4 sm:$0xff]  }
 0x5b1   :  { %11313 = vmatpush2.bf16.msra.mxu0 %v15675_v18  ;;  %v15719_v18 = vld [vmem:[#allocation8 + $0x2c] ss:$16 sps:$4 sm:$0xff]  }
 0x5b2   :  { %11364 = vmatprep.subr.bf16.mxu0 %v15683_v45  ;;  %v15720_v45 = vld [vmem:[#allocation8 + $0x228] ss:$16 sps:$4 sm:$0xff]  }
 0x5b3   :  { %11354 = vmatpush2.bf16.msra.mxu1 %v15678_v33  ;;  %v15722_v33 = vld [vmem:[#allocation8 + $0x22c] ss:$16 sps:$4 sm:$0xff]  }
 0x5b4   :  { %11405 = vmatprep.subr.bf16.mxu1 %v15686_v51  ;;  %v11070_v5 = vpop.f32.mrf.mxu0  ;;  %11315 = vmatmul.mubr.bf16.vlgmr.msra.gmra.mxu0 %v17190_v39  ;;  %v15728_v51 = vld [vmem:[#allocation8 + $0x20c] ss:$16 sps:$4 sm:$0xff]  }
 0x5b5   :  { %v11071_v25 = vadd.f32 %v11070_v5, %v8459_v53  ;;  %11365 = vmatpush1.bf16.msra.mxu0 %v15681_v26  ;;  %11396 = vmatprep.mubr.bf16.mxu0 %v17074_v3  ;;  %v15726_v53 = vld [vmem:[#allocation8 + $0x208] ss:$16 sps:$4 sm:$0xff]   ;;  %v15731_v26 = vld [vmem:[#allocation8 + $0x1ec] ss:$16 sps:$4 sm:$0xff]  }
 0x5b6   :  { %v11111_v49 = vpop.f32.mrf.mxu1  ;;  %11356 = vmatmul.mubr.bf16.vlgmr.msra.gmra.mxu1 %v17192_v13  ;;  %v11072_v63 = vpop.f32.mrf.mxu0  ;;  %11366 = vmatprep.subr.bf16.mxu0 %v15689_v19  ;;  %v15732_v19 = vld [vmem:[#allocation8 + $0x3e8] ss:$16 sps:$4 sm:$0xff]   ;;  %v15737_v5 = vld [vmem:[#allocation8 + $0x1cc] ss:$16 sps:$4 sm:$0xff]  }
 0x5b7   :  { %11406 = vmatpush1.bf16.msra.mxu1 %v15684_v30  ;;  %v17198_v15 = vadd.f32 %v11111_v49, %v11071_v25  ;;  %11437 = vmatprep.mubr.bf16.mxu1 %v17077_v58  ;;  %v11073_v41 = vadd.f32 %v11072_v63, %v8463_v37  ;;  %v15699_v58 = vld [vmem:[#allocation8 + $0x88] ss:$16 sps:$4 sm:$0xff]   ;;  %v15734_v30 = vld [vmem:[#allocation8 + $0x3ec] ss:$16 sps:$4 sm:$0xff]  }
 0x5b8   :  { %v11113_v42 = vpop.f32.mrf.mxu1  ;;  %v11074_v48 = vpop.f32.mrf.mxu0  ;;  %11407 = vmatprep.subr.bf16.mxu1 %v15692_v20  ;;  %v15729_v37 = vld [vmem:[#allocation8 + $0x1e8] ss:$16 sps:$4 sm:$0xff]   ;;  %v15740_v20 = vld [vmem:[#allocation8 + $0x3cc] ss:$16 sps:$4 sm:$0xff]  }
 0x5b9   :  { %v17201_v6 = vadd.f32 %v11113_v42, %v11073_v41  ;;  %11367 = vmatpush1.bf16.msra.mxu0 %v15687_v27  ;;  %v15735_v25 = vld [vmem:[#allocation8 + $0x1c8] ss:$16 sps:$4 sm:$0xff]   ;;  %v15743_v27 = vld [vmem:[#allocation8 + $0x1ac] ss:$16 sps:$4 sm:$0xff]  }
 0x5ba   :  { %v11115_v2 = vpop.f32.mrf.mxu1  ;;  %v11075_v3 = vpop.f32.mrf.mxu0  ;;  %11368 = vmatprep.subr.bf16.mxu0 %v15695_v38  ;;  %v15738_v49 = vld [vmem:[#allocation8 + $0x3c8] ss:$16 sps:$4 sm:$0xff]   ;;  %v15746_v63 = vld [vmem:[#allocation8 + $0x3ac] ss:$16 sps:$4 sm:$0xff]  }
 0x5bb   :  { %11408 = vmatpush1.bf16.msra.mxu1 %v15690_v36  ;;  %v15741_v36 = vld [vmem:[#allocation8 + $0x1a8] ss:$16 sps:$4 sm:$0xff]   ;;  %v15749_v41 = vld [vmem:[#allocation8 + $0x18c] ss:$16 sps:$4 sm:$0xff]  }
 0x5bc   :  { %v11116_v55 = vpop.f32.mrf.mxu1  ;;  %11409 = vmatprep.subr.bf16.mxu1 %v15698_v47  ;;  %v15744_v38 = vld [vmem:[#allocation8 + $0x3a8] ss:$16 sps:$4 sm:$0xff]   ;;  %v15752_v42 = vld [vmem:[#allocation8 + $0x38c] ss:$16 sps:$4 sm:$0xff]  }
 0x5bd   :  { %11369 = vmatpush1.bf16.msra.mxu0 %v15693_v23  ;;  %v15747_v47 = vld [vmem:[#allocation8 + $0x188] ss:$16 sps:$4 sm:$0xff]   ;;  %v15755_v2 = vld [vmem:[#allocation8 + $0x16c] ss:$16 sps:$4 sm:$0xff]  }
 0x5be   :  { %11370 = vmatprep.subr.bf16.mxu0 %v15701_v61  ;;  %v15750_v48 = vld [vmem:[#allocation8 + $0x388] ss:$16 sps:$4 sm:$0xff]   ;;  %v15758_v23 = vld [vmem:[#allocation8 + $0x36c] ss:$16 sps:$4 sm:$0xff]  }
 0x5bf   :  { %11410 = vmatpush1.bf16.msra.mxu1 %v15696_v28  ;;  %v15753_v3 = vld [vmem:[#allocation8 + $0x168] ss:$16 sps:$4 sm:$0xff]   ;;  %v15761_v61 = vld [vmem:[#allocation8 + $0x14c] ss:$16 sps:$4 sm:$0xff]  }
 0x5c0   :  { %11411 = vmatprep.subr.bf16.mxu1 %v15704_v62  ;;  %v15756_v28 = vld [vmem:[#allocation8 + $0x368] ss:$16 sps:$4 sm:$0xff]   ;;  %v15764_v55 = vld [vmem:[#allocation8 + $0x34c] ss:$16 sps:$4 sm:$0xff]  }
 0x5c1   :  { %11371 = vmatpush1.bf16.msra.mxu0 %v15699_v58  ;;  %v15759_v62 = vld [vmem:[#allocation8 + $0x148] ss:$16 sps:$4 sm:$0xff]  }
 0x5c2   :  { %11372 = vmatprep.subr.bf16.mxu0 %v15707_v8  ;;  %v15762_v58 = vld [vmem:[#allocation8 + $0x348] ss:$16 sps:$4 sm:$0xff]   ;;  %v15770_v8 = vld [vmem:[#allocation8 + $0x32c] ss:$16 sps:$4 sm:$0xff]  }
 0x5c3   :  { %11412 = vmatpush1.bf16.msra.mxu1 %v15702_v0  ;;  %v15767_v0 = vld [vmem:[#allocation8 + $0x12c] ss:$16 sps:$4 sm:$0xff]  }
 0x5c4   :  { %11413 = vmatprep.subr.bf16.mxu1 %v15710_v12  ;;  %v15765_v12 = vld [vmem:[#allocation8 + $0x128] ss:$16 sps:$4 sm:$0xff]  }
 0x5c5   :  { %11373 = vmatpush1.bf16.msra.mxu0 %v15705_v7  ;;  %v15768_v7 = vld [vmem:[#allocation8 + $0x328] ss:$16 sps:$4 sm:$0xff]  }
 0x5c6   :  { %11374 = vmatprep.subr.bf16.mxu0 %v15713_v43  ;;  %v15776_v43 = vld [vmem:[#allocation8 + $0x30c] ss:$16 sps:$4 sm:$0xff]  }
 0x5c7   :  { %11414 = vmatpush1.bf16.msra.mxu1 %v15708_v35  ;;  %v15773_v35 = vld [vmem:[#allocation8 + $0x10c] ss:$16 sps:$4 sm:$0xff]  }
 0x5c8   :  { %11415 = vmatprep.subr.bf16.mxu1 %v15716_v1  ;;  %v15771_v1 = vld [vmem:[#allocation8 + $0x108] ss:$16 sps:$4 sm:$0xff]  }
 0x5c9   :  { %11375 = vmatpush1.bf16.msra.mxu0 %v15711_v54  ;;  %v15774_v54 = vld [vmem:[#allocation8 + $0x308] ss:$16 sps:$4 sm:$0xff]  }
 0x5ca   :  { %11376 = vmatprep.subr.bf16.mxu0 %v15719_v18  ;;  %v15782_v18 = vld [vmem:[#allocation8 + $0x6ec] ss:$16 sps:$4 sm:$0xff]  }
 0x5cb   :  { %11416 = vmatpush1.bf16.msra.mxu1 %v15714_v17  ;;  %v15779_v17 = vld [vmem:[#allocation8 + $0x4ec] ss:$16 sps:$4 sm:$0xff]  }
 0x5cc   :  { %11417 = vmatprep.subr.bf16.mxu1 %v15722_v33  ;;  %v15777_v33 = vld [vmem:[#allocation8 + $0x4e8] ss:$16 sps:$4 sm:$0xff]  }
 0x5cd   :  { %11377 = vmatpush1.bf16.msra.mxu0 %v15717_v57  ;;  %v15780_v57 = vld [vmem:[#allocation8 + $0x6e8] ss:$16 sps:$4 sm:$0xff]  }
 0x5ce   :  { %11378 = vmatprep.subr.bf16.mxu0 %v15725_v22 }
 0x5cf   :  { %11418 = vmatpush1.bf16.msra.mxu1 %v15720_v45  ;;  %v15785_v45 = vld [vmem:[#allocation8 + $0x4cc] ss:$16 sps:$4 sm:$0xff]  }
 0x5d0   :  { %11419 = vmatprep.subr.bf16.mxu1 %v15728_v51  ;;  %v15788_v51 = vld [vmem:[#allocation8 + $0x6cc] ss:$16 sps:$4 sm:$0xff]  }
 0x5d1   :  { %11379 = vmatpush1.bf16.msra.mxu0 %v15723_v59 }
 0x5d2   :  { %11380 = vmatprep.subr.bf16.mxu0 %v15731_v26  ;;  %v15783_v26 = vld [vmem:[#allocation8 + $0x4c8] ss:$16 sps:$4 sm:$0xff]  }
 0x5d3   :  { %11420 = vmatpush1.bf16.msra.mxu1 %v15726_v53 }
 0x5d4   :  { %11421 = vmatprep.subr.bf16.mxu1 %v15734_v30 }
 0x5d5   :  { %11381 = vmatpush2.bf16.msra.mxu0 %v15729_v37  ;;  %v15786_v37 = vld [vmem:[#allocation8 + $0x6c8] ss:$16 sps:$4 sm:$0xff]  }
 0x5d6   :  { %11382 = vmatprep.subr.bf16.mxu0 %v15737_v5 }
 0x5d7   :  { %11422 = vmatpush2.bf16.msra.mxu1 %v15732_v19  ;;  %v15791_v19 = vld [vmem:[#allocation8 + $0x4ac] ss:$16 sps:$4 sm:$0xff]  }
 0x5d8   :  { %11423 = vmatprep.subr.bf16.mxu1 %v15740_v20 }
 0x5d9   :  { %11383 = vmatpush2.bf16.msra.mxu0 %v15735_v25 }
 0x5da   :  { %11384 = vmatprep.subr.bf16.mxu0 %v15743_v27 }
 0x5db   :  { %11424 = vmatpush2.bf16.msra.mxu1 %v15738_v49 }
 0x5dc   :  { %11425 = vmatprep.subr.bf16.mxu1 %v15746_v63  ;;  %v15792_v63 = vld [vmem:[#allocation8 + $0x6a8] ss:$16 sps:$4 sm:$0xff]  }
 0x5dd   :  { %11385 = vmatpush2.bf16.msra.mxu0 %v15741_v36  ;;  %v15797_v36 = vld [vmem:[#allocation8 + $0x48c] ss:$16 sps:$4 sm:$0xff]  }
 0x5de   :  { %11386 = vmatprep.subr.bf16.mxu0 %v15749_v41  ;;  %v15798_v41 = vld [vmem:[#allocation8 + $0x688] ss:$16 sps:$4 sm:$0xff]  }
 0x5df   :  { %11426 = vmatpush2.bf16.msra.mxu1 %v15744_v38 }
 0x5e0   :  { %11427 = vmatprep.subr.bf16.mxu1 %v15752_v42  ;;  %v15803_v42 = vld [vmem:[#allocation8 + $0x46c] ss:$16 sps:$4 sm:$0xff]  }
 0x5e1   :  { %11387 = vmatpush2.bf16.msra.mxu0 %v15747_v47  ;;  %v15806_v47 = vld [vmem:[#allocation8 + $0x66c] ss:$16 sps:$4 sm:$0xff]  }
 0x5e2   :  { %11388 = vmatprep.subr.bf16.mxu0 %v15755_v2  ;;  %v15804_v2 = vld [vmem:[#allocation8 + $0x668] ss:$16 sps:$4 sm:$0xff]  }
 0x5e3   :  { %11428 = vmatpush2.bf16.msra.mxu1 %v15750_v48  ;;  %v15801_v48 = vld [vmem:[#allocation8 + $0x468] ss:$16 sps:$4 sm:$0xff]  }
 0x5e4   :  { %11429 = vmatprep.subr.bf16.mxu1 %v15758_v23  ;;  %v15809_v23 = vld [vmem:[#allocation8 + $0x44c] ss:$16 sps:$4 sm:$0xff]  }
 0x5e5   :  { %11389 = vmatpush2.bf16.msra.mxu0 %v15753_v3  ;;  %v15812_v3 = vld [vmem:[#allocation8 + $0x64c] ss:$16 sps:$4 sm:$0xff]  }
 0x5e6   :  { %11390 = vmatprep.subr.bf16.mxu0 %v15761_v61  ;;  %v15810_v61 = vld [vmem:[#allocation8 + $0x648] ss:$16 sps:$4 sm:$0xff]  }
 0x5e7   :  { %11430 = vmatpush2.bf16.msra.mxu1 %v15756_v28  ;;  %v15807_v28 = vld [vmem:[#allocation8 + $0x448] ss:$16 sps:$4 sm:$0xff]  }
 0x5e8   :  { %11431 = vmatprep.subr.bf16.mxu1 %v15764_v55  ;;  %v15815_v55 = vld [vmem:[#allocation8 + $0x42c] ss:$16 sps:$4 sm:$0xff]  }
 0x5e9   :  { %11391 = vmatpush2.bf16.msra.mxu0 %v15759_v62  ;;  %v15818_v62 = vld [vmem:[#allocation8 + $0x62c] ss:$16 sps:$4 sm:$0xff]  }
 0x5ea   :  { %11392 = vmatprep.subr.bf16.mxu0 %v15767_v0  ;;  %v15816_v0 = vld [vmem:[#allocation8 + $0x628] ss:$16 sps:$4 sm:$0xff]  }
 0x5eb   :  { %11432 = vmatpush2.bf16.msra.mxu1 %v15762_v58  ;;  %v15813_v58 = vld [vmem:[#allocation8 + $0x428] ss:$16 sps:$4 sm:$0xff]  }
 0x5ec   :  { %11433 = vmatprep.subr.bf16.mxu1 %v15770_v8  ;;  %v15821_v8 = vld [vmem:[#allocation8 + $0x40c] ss:$16 sps:$4 sm:$0xff]  }
 0x5ed   :  { %11393 = vmatpush2.bf16.msra.mxu0 %v15765_v12  ;;  %v15824_v12 = vld [vmem:[#allocation8 + $0x60c] ss:$16 sps:$4 sm:$0xff]  }
 0x5ee   :  { %11394 = vmatprep.subr.bf16.mxu0 %v15773_v35  ;;  %v15822_v35 = vld [vmem:[#allocation8 + $0x608] ss:$16 sps:$4 sm:$0xff]  }
 0x5ef   :  { %11434 = vmatpush2.bf16.msra.mxu1 %v15768_v7  ;;  %v15819_v7 = vld [vmem:[#allocation8 + $0x408] ss:$16 sps:$4 sm:$0xff]  }
 0x5f0   :  { %11435 = vmatprep.subr.bf16.mxu1 %v15776_v43  ;;  %v15827_v43 = vld [vmem:[#allocation8 + $0x5ec] ss:$16 sps:$4 sm:$0xff]  }
 0x5f1   :  { %11395 = vmatpush2.bf16.msra.mxu0 %v15771_v1  ;;  %v15830_v1 = vld [vmem:[#allocation8 + $0x7ec] ss:$16 sps:$4 sm:$0xff]  }
 0x5f2   :  { %11446 = vmatprep.subr.bf16.mxu0 %v15779_v17  ;;  %v15828_v17 = vld [vmem:[#allocation8 + $0x7e8] ss:$16 sps:$4 sm:$0xff]  }
 0x5f3   :  { %11436 = vmatpush2.bf16.msra.mxu1 %v15774_v54  ;;  %v15825_v54 = vld [vmem:[#allocation8 + $0x5e8] ss:$16 sps:$4 sm:$0xff]  }
 0x5f4   :  { %11487 = vmatprep.subr.bf16.mxu1 %v15782_v18  ;;  %v11152_v22 = vpop.f32.mrf.mxu0  ;;  %11397 = vmatmul.mubr.bf16.vlgmr.msra.gmra.mxu0 %v17096_v21  ;;  %v15833_v18 = vld [vmem:[#allocation8 + $0x5cc] ss:$16 sps:$4 sm:$0xff]  }
 0x5f5   :  { %v11153_v59 = vadd.f32 %v11152_v22, %v17198_v15  ;;  %11447 = vmatpush1.bf16.msra.mxu0 %v15777_v33  ;;  %11478 = vmatprep.mubr.bf16.mxu0 %v17102_v29  ;;  %v15794_v15 = vld [vmem:[#allocation8 + $0x6ac] ss:$16 sps:$4 sm:$0xff]   ;;  %v15789_v29 = vld [vmem:[#allocation8 + $0x4a8] ss:$16 sps:$4 sm:$0xff]  }
 0x5f6   :  { %v11193_v53 = vpop.f32.mrf.mxu1  ;;  %11438 = vmatmul.mubr.bf16.vlgmr.msra.gmra.mxu1 %v17099_v9  ;;  %v11154_v30 = vpop.f32.mrf.mxu0  ;;  %11448 = vmatprep.subr.bf16.mxu0 %v15785_v45  ;;  %v15836_v33 = vld [vmem:[#allocation8 + $0x7cc] ss:$16 sps:$4 sm:$0xff]   ;;  %v15834_v45 = vld [vmem:[#allocation8 + $0x7c8] ss:$16 sps:$4 sm:$0xff]  }
 0x5f7   :  { %11488 = vmatpush1.bf16.msra.mxu1 %v15780_v57  ;;  %v17207_v5 = vadd.f32 %v11193_v53, %v11153_v59  ;;  %11519 = vmatprep.mubr.bf16.mxu1 %v17106_v34  ;;  %v11155_v21 = vadd.f32 %v11154_v30, %v17201_v6  ;;  %v15800_v34 = vld [vmem:[#allocation8 + $0x68c] ss:$16 sps:$4 sm:$0xff]   ;;  %v15795_v6 = vld [vmem:[#allocation8 + $0x488] ss:$16 sps:$4 sm:$0xff]  }
 0x5f8   :  { %v11195_v20 = vpop.f32.mrf.mxu1  ;;  %v11156_v25 = vpop.f32.mrf.mxu0  ;;  %11489 = vmatprep.subr.bf16.mxu1 %v15788_v51  ;;  %v15831_v57 = vld [vmem:[#allocation8 + $0x5c8] ss:$16 sps:$4 sm:$0xff]   ;;  %v15839_v22 = vld [vmem:[#allocation8 + $0x5ac] ss:$16 sps:$4 sm:$0xff]  }
 0x5f9   :  { %v17211_v9 = vadd.f32 %v11195_v20, %v11155_v21  ;;  %11449 = vmatpush1.bf16.msra.mxu0 %v15783_v26  ;;  %v15842_v51 = vld [vmem:[#allocation8 + $0x7ac] ss:$16 sps:$4 sm:$0xff]   ;;  %v15837_v59 = vld [vmem:[#allocation8 + $0x5a8] ss:$16 sps:$4 sm:$0xff]  }
 0x5fa   :  { %v11197_v49 = vpop.f32.mrf.mxu1  ;;  %v11157_v27 = vpop.f32.mrf.mxu0  ;;  %11450 = vmatprep.subr.bf16.mxu0 %v15791_v19  ;;  %v15840_v53 = vld [vmem:[#allocation8 + $0x7a8] ss:$16 sps:$4 sm:$0xff]   ;;  %v15845_v26 = vld [vmem:[#allocation8 + $0x58c] ss:$16 sps:$4 sm:$0xff]  }
 0x5fb   :  { %11490 = vmatpush1.bf16.msra.mxu1 %v15786_v37  ;;  %v15848_v30 = vld [vmem:[#allocation8 + $0x78c] ss:$16 sps:$4 sm:$0xff]   ;;  %v15843_v37 = vld [vmem:[#allocation8 + $0x588] ss:$16 sps:$4 sm:$0xff]  }
 0x5fc   :  { %v11198_v38 = vpop.f32.mrf.mxu1  ;;  %11491 = vmatprep.subr.bf16.mxu1 %v15794_v15  ;;  %v15846_v19 = vld [vmem:[#allocation8 + $0x788] ss:$16 sps:$4 sm:$0xff]   ;;  %v15851_v21 = vld [vmem:[#allocation8 + $0x56c] ss:$16 sps:$4 sm:$0xff]  }
 0x5fd   :  { %11451 = vmatpush1.bf16.msra.mxu0 %v15789_v29  ;;  %v15854_v20 = vld [vmem:[#allocation8 + $0x76c] ss:$16 sps:$4 sm:$0xff]   ;;  %v15849_v15 = vld [vmem:[#allocation8 + $0x568] ss:$16 sps:$4 sm:$0xff]  }
 0x5fe   :  { %11452 = vmatprep.subr.bf16.mxu0 %v15797_v36  ;;  %v15852_v25 = vld [vmem:[#allocation8 + $0x768] ss:$16 sps:$4 sm:$0xff]   ;;  %v15857_v49 = vld [vmem:[#allocation8 + $0x54c] ss:$16 sps:$4 sm:$0xff]  }
 0x5ff   :  { %11492 = vmatpush1.bf16.msra.mxu1 %v15792_v63  ;;  %v15860_v29 = vld [vmem:[#allocation8 + $0x74c] ss:$16 sps:$4 sm:$0xff]   ;;  %v15855_v27 = vld [vmem:[#allocation8 + $0x548] ss:$16 sps:$4 sm:$0xff]  }
 0x600   :  { %11493 = vmatprep.subr.bf16.mxu1 %v15800_v34  ;;  %v15858_v63 = vld [vmem:[#allocation8 + $0x748] ss:$16 sps:$4 sm:$0xff]   ;;  %v15863_v36 = vld [vmem:[#allocation8 + $0x52c] ss:$16 sps:$4 sm:$0xff]  }
 0x601   :  { %11453 = vmatpush1.bf16.msra.mxu0 %v15795_v6  ;;  %v15866_v38 = vld [vmem:[#allocation8 + $0x72c] ss:$16 sps:$4 sm:$0xff]   ;;  %v15861_v34 = vld [vmem:[#allocation8 + $0x528] ss:$16 sps:$4 sm:$0xff]  }
 0x602   :  { %11454 = vmatprep.subr.bf16.mxu0 %v15803_v42  ;;  %v15864_v6 = vld [vmem:[#allocation8 + $0x728] ss:$16 sps:$4 sm:$0xff]   ;;  %v15872_v42 = vld [vmem:[#allocation8 + $0x70c] ss:$16 sps:$4 sm:$0xff]  }
 0x603   :  { %11494 = vmatpush1.bf16.msra.mxu1 %v15798_v41  ;;  %v15869_v41 = vld [vmem:[#allocation8 + $0x50c] ss:$16 sps:$4 sm:$0xff]  }
 0x604   :  { %11495 = vmatprep.subr.bf16.mxu1 %v15806_v47  ;;  %v15867_v47 = vld [vmem:[#allocation8 + $0x508] ss:$16 sps:$4 sm:$0xff]  }
 0x605   :  { %11455 = vmatpush1.bf16.msra.mxu0 %v15801_v48  ;;  %v15870_v48 = vld [vmem:[#allocation8 + $0x708] ss:$16 sps:$4 sm:$0xff]  }
 0x606   :  { %11456 = vmatprep.subr.bf16.mxu0 %v15809_v23  ;;  %v15878_v23 = vld [vmem:[#allocation8 + $0xaec] ss:$16 sps:$4 sm:$0xff]  }
 0x607   :  { %11496 = vmatpush1.bf16.msra.mxu1 %v15804_v2  ;;  %v15875_v2 = vld [vmem:[#allocation8 + $0x8ec] ss:$16 sps:$4 sm:$0xff]  }
 0x608   :  { %11497 = vmatprep.subr.bf16.mxu1 %v15812_v3  ;;  %v15873_v3 = vld [vmem:[#allocation8 + $0x8e8] ss:$16 sps:$4 sm:$0xff]  }
 0x609   :  { %11457 = vmatpush1.bf16.msra.mxu0 %v15807_v28  ;;  %v15876_v28 = vld [vmem:[#allocation8 + $0xae8] ss:$16 sps:$4 sm:$0xff]  }
 0x60a   :  { %11458 = vmatprep.subr.bf16.mxu0 %v15815_v55 }
 0x60b   :  { %11498 = vmatpush1.bf16.msra.mxu1 %v15810_v61  ;;  %v15881_v61 = vld [vmem:[#allocation8 + $0x8cc] ss:$16 sps:$4 sm:$0xff]  }
 0x60c   :  { %11499 = vmatprep.subr.bf16.mxu1 %v15818_v62  ;;  %v15884_v62 = vld [vmem:[#allocation8 + $0xacc] ss:$16 sps:$4 sm:$0xff]  }
 0x60d   :  { %11459 = vmatpush1.bf16.msra.mxu0 %v15813_v58 }
 0x60e   :  { %11460 = vmatprep.subr.bf16.mxu0 %v15821_v8  ;;  %v15879_v8 = vld [vmem:[#allocation8 + $0x8c8] ss:$16 sps:$4 sm:$0xff]  }
 0x60f   :  { %11500 = vmatpush1.bf16.msra.mxu1 %v15816_v0 }
 0x610   :  { %11501 = vmatprep.subr.bf16.mxu1 %v15824_v12 }
 0x611   :  { %11461 = vmatpush1.bf16.msra.mxu0 %v15819_v7  ;;  %v15882_v7 = vld [vmem:[#allocation8 + $0xac8] ss:$16 sps:$4 sm:$0xff]  }
 0x612   :  { %11462 = vmatprep.subr.bf16.mxu0 %v15827_v43 }
 0x613   :  { %11502 = vmatpush1.bf16.msra.mxu1 %v15822_v35  ;;  %v15887_v35 = vld [vmem:[#allocation8 + $0x8ac] ss:$16 sps:$4 sm:$0xff]  }
 0x614   :  { %11503 = vmatprep.subr.bf16.mxu1 %v15830_v1 }
 0x615   :  { %11463 = vmatpush2.bf16.msra.mxu0 %v15825_v54 }
 0x616   :  { %11464 = vmatprep.subr.bf16.mxu0 %v15833_v18 }
 0x617   :  { %11504 = vmatpush2.bf16.msra.mxu1 %v15828_v17 }
 0x618   :  { %11505 = vmatprep.subr.bf16.mxu1 %v15836_v33  ;;  %v15888_v33 = vld [vmem:[#allocation8 + $0xaa8] ss:$16 sps:$4 sm:$0xff]  }
 0x619   :  { %11465 = vmatpush2.bf16.msra.mxu0 %v15831_v57  ;;  %v15893_v57 = vld [vmem:[#allocation8 + $0x88c] ss:$16 sps:$4 sm:$0xff]  }
 0x61a   :  { %11466 = vmatprep.subr.bf16.mxu0 %v15839_v22  ;;  %v15894_v22 = vld [vmem:[#allocation8 + $0xa88] ss:$16 sps:$4 sm:$0xff]  }
 0x61b   :  { %11506 = vmatpush2.bf16.msra.mxu1 %v15834_v45 }
 0x61c   :  { %11507 = vmatprep.subr.bf16.mxu1 %v15842_v51  ;;  %v15899_v51 = vld [vmem:[#allocation8 + $0x86c] ss:$16 sps:$4 sm:$0xff]  }
 0x61d   :  { %11467 = vmatpush2.bf16.msra.mxu0 %v15837_v59  ;;  %v15902_v59 = vld [vmem:[#allocation8 + $0xa6c] ss:$16 sps:$4 sm:$0xff]  }
 0x61e   :  { %11468 = vmatprep.subr.bf16.mxu0 %v15845_v26  ;;  %v15900_v26 = vld [vmem:[#allocation8 + $0xa68] ss:$16 sps:$4 sm:$0xff]  }
 0x61f   :  { %11508 = vmatpush2.bf16.msra.mxu1 %v15840_v53  ;;  %v15897_v53 = vld [vmem:[#allocation8 + $0x868] ss:$16 sps:$4 sm:$0xff]  }
 0x620   :  { %11509 = vmatprep.subr.bf16.mxu1 %v15848_v30  ;;  %v15905_v30 = vld [vmem:[#allocation8 + $0x84c] ss:$16 sps:$4 sm:$0xff]  }
 0x621   :  { %11469 = vmatpush2.bf16.msra.mxu0 %v15843_v37  ;;  %v15908_v37 = vld [vmem:[#allocation8 + $0xa4c] ss:$16 sps:$4 sm:$0xff]  }
 0x622   :  { %11470 = vmatprep.subr.bf16.mxu0 %v15851_v21  ;;  %v15906_v21 = vld [vmem:[#allocation8 + $0xa48] ss:$16 sps:$4 sm:$0xff]  }
 0x623   :  { %11510 = vmatpush2.bf16.msra.mxu1 %v15846_v19  ;;  %v15903_v19 = vld [vmem:[#allocation8 + $0x848] ss:$16 sps:$4 sm:$0xff]  }
 0x624   :  { %11511 = vmatprep.subr.bf16.mxu1 %v15854_v20  ;;  %v15911_v20 = vld [vmem:[#allocation8 + $0x82c] ss:$16 sps:$4 sm:$0xff]  }
 0x625   :  { %11471 = vmatpush2.bf16.msra.mxu0 %v15849_v15  ;;  %v15914_v15 = vld [vmem:[#allocation8 + $0xa2c] ss:$16 sps:$4 sm:$0xff]  }
 0x626   :  { %11472 = vmatprep.subr.bf16.mxu0 %v15857_v49  ;;  %v15912_v49 = vld [vmem:[#allocation8 + $0xa28] ss:$16 sps:$4 sm:$0xff]  }
 0x627   :  { %11512 = vmatpush2.bf16.msra.mxu1 %v15852_v25  ;;  %v15909_v25 = vld [vmem:[#allocation8 + $0x828] ss:$16 sps:$4 sm:$0xff]  }
 0x628   :  { %11513 = vmatprep.subr.bf16.mxu1 %v15860_v29  ;;  %v15917_v29 = vld [vmem:[#allocation8 + $0x80c] ss:$16 sps:$4 sm:$0xff]  }
 0x629   :  { %11473 = vmatpush2.bf16.msra.mxu0 %v15855_v27  ;;  %v15920_v27 = vld [vmem:[#allocation8 + $0xa0c] ss:$16 sps:$4 sm:$0xff]  }
 0x62a   :  { %11474 = vmatprep.subr.bf16.mxu0 %v15863_v36  ;;  %v15918_v36 = vld [vmem:[#allocation8 + $0xa08] ss:$16 sps:$4 sm:$0xff]  }
 0x62b   :  { %11514 = vmatpush2.bf16.msra.mxu1 %v15858_v63  ;;  %v15915_v63 = vld [vmem:[#allocation8 + $0x808] ss:$16 sps:$4 sm:$0xff]  }
 0x62c   :  { %11515 = vmatprep.subr.bf16.mxu1 %v15866_v38  ;;  %v15923_v38 = vld [vmem:[#allocation8 + $0x9ec] ss:$16 sps:$4 sm:$0xff]  }
 0x62d   :  { %11475 = vmatpush2.bf16.msra.mxu0 %v15861_v34  ;;  %v15926_v34 = vld [vmem:[#allocation8 + $0xbec] ss:$16 sps:$4 sm:$0xff]  }
 0x62e   :  { %11476 = vmatprep.subr.bf16.mxu0 %v15869_v41  ;;  %v15924_v41 = vld [vmem:[#allocation8 + $0xbe8] ss:$16 sps:$4 sm:$0xff]  }
 0x62f   :  { %11516 = vmatpush2.bf16.msra.mxu1 %v15864_v6  ;;  %v15921_v6 = vld [vmem:[#allocation8 + $0x9e8] ss:$16 sps:$4 sm:$0xff]  }
 0x630   :  { %11517 = vmatprep.subr.bf16.mxu1 %v15872_v42  ;;  %v15929_v42 = vld [vmem:[#allocation8 + $0x9cc] ss:$16 sps:$4 sm:$0xff]  }
 0x631   :  { %11477 = vmatpush2.bf16.msra.mxu0 %v15867_v47  ;;  %v15932_v47 = vld [vmem:[#allocation8 + $0xbcc] ss:$16 sps:$4 sm:$0xff]  }
 0x632   :  { %11528 = vmatprep.subr.bf16.mxu0 %v15875_v2  ;;  %v15930_v2 = vld [vmem:[#allocation8 + $0xbc8] ss:$16 sps:$4 sm:$0xff]  }
 0x633   :  { %11518 = vmatpush2.bf16.msra.mxu1 %v15870_v48  ;;  %v15927_v48 = vld [vmem:[#allocation8 + $0x9c8] ss:$16 sps:$4 sm:$0xff]  }
 0x634   :  { %11569 = vmatprep.subr.bf16.mxu1 %v15878_v23  ;;  %v11234_v55 = vpop.f32.mrf.mxu0  ;;  %11479 = vmatmul.mubr.bf16.vlgmr.msra.gmra.mxu0 %v17129_v24  ;;  %v15935_v23 = vld [vmem:[#allocation8 + $0x9ac] ss:$16 sps:$4 sm:$0xff]  }
 0x635   :  { %v11235_v58 = vadd.f32 %v11234_v55, %v17207_v5  ;;  %11529 = vmatpush1.bf16.msra.mxu0 %v15873_v3  ;;  %11560 = vmatprep.mubr.bf16.mxu0 %v17135_v56  ;;  %v15890_v5 = vld [vmem:[#allocation8 + $0xaac] ss:$16 sps:$4 sm:$0xff]   ;;  %v15885_v56 = vld [vmem:[#allocation8 + $0x8a8] ss:$16 sps:$4 sm:$0xff]  }
 0x636   :  { %v11275_v0 = vpop.f32.mrf.mxu1  ;;  %11520 = vmatmul.mubr.bf16.vlgmr.msra.gmra.mxu1 %v17132_v44  ;;  %v11236_v12 = vpop.f32.mrf.mxu0  ;;  %11530 = vmatprep.subr.bf16.mxu0 %v15881_v61  ;;  %v15938_v3 = vld [vmem:[#allocation8 + $0xbac] ss:$16 sps:$4 sm:$0xff]   ;;  %v15936_v61 = vld [vmem:[#allocation8 + $0xba8] ss:$16 sps:$4 sm:$0xff]  }
 0x637   :  { %11570 = vmatpush1.bf16.msra.mxu1 %v15876_v28  ;;  %v17217_v43 = vadd.f32 %v11275_v0, %v11235_v58  ;;  %11601 = vmatprep.mubr.bf16.mxu1 %v17138_v11  ;;  %v11237_v24 = vadd.f32 %v11236_v12, %v17211_v9  ;;  %v15896_v11 = vld [vmem:[#allocation8 + $0xa8c] ss:$16 sps:$4 sm:$0xff]   ;;  %v15891_v9 = vld [vmem:[#allocation8 + $0x888] ss:$16 sps:$4 sm:$0xff]  }
 0x638   :  { %v11277_v1 = vpop.f32.mrf.mxu1  ;;  %v11238_v54 = vpop.f32.mrf.mxu0  ;;  %11571 = vmatprep.subr.bf16.mxu1 %v15884_v62  ;;  %v15933_v28 = vld [vmem:[#allocation8 + $0x9a8] ss:$16 sps:$4 sm:$0xff]   ;;  %v15941_v55 = vld [vmem:[#allocation8 + $0x98c] ss:$16 sps:$4 sm:$0xff]  }
 0x639   :  { %v17221_v44 = vadd.f32 %v11277_v1, %v11237_v24  ;;  %11531 = vmatpush1.bf16.msra.mxu0 %v15879_v8  ;;  %v15944_v62 = vld [vmem:[#allocation8 + $0xb8c] ss:$16 sps:$4 sm:$0xff]   ;;  %v15939_v58 = vld [vmem:[#allocation8 + $0x988] ss:$16 sps:$4 sm:$0xff]  }
 0x63a   :  { %v11279_v17 = vpop.f32.mrf.mxu1  ;;  %v11239_v18 = vpop.f32.mrf.mxu0  ;;  %11532 = vmatprep.subr.bf16.mxu0 %v15887_v35  ;;  %v15942_v0 = vld [vmem:[#allocation8 + $0xb88] ss:$16 sps:$4 sm:$0xff]   ;;  %v15947_v8 = vld [vmem:[#allocation8 + $0x96c] ss:$16 sps:$4 sm:$0xff]  }
 0x63b   :  { %11572 = vmatpush1.bf16.msra.mxu1 %v15882_v7  ;;  %v15950_v12 = vld [vmem:[#allocation8 + $0xb6c] ss:$16 sps:$4 sm:$0xff]   ;;  %v15945_v7 = vld [vmem:[#allocation8 + $0x968] ss:$16 sps:$4 sm:$0xff]  }
 0x63c   :  { %v11280_v45 = vpop.f32.mrf.mxu1  ;;  %11573 = vmatprep.subr.bf16.mxu1 %v15890_v5  ;;  %v15948_v35 = vld [vmem:[#allocation8 + $0xb68] ss:$16 sps:$4 sm:$0xff]   ;;  %v15953_v24 = vld [vmem:[#allocation8 + $0x94c] ss:$16 sps:$4 sm:$0xff]  }
 0x63d   :  { %11533 = vmatpush1.bf16.msra.mxu0 %v15885_v56  ;;  %v15956_v1 = vld [vmem:[#allocation8 + $0xb4c] ss:$16 sps:$4 sm:$0xff]   ;;  %v15951_v5 = vld [vmem:[#allocation8 + $0x948] ss:$16 sps:$4 sm:$0xff]  }
 0x63e   :  { %11534 = vmatprep.subr.bf16.mxu0 %v15893_v57  ;;  %v15954_v54 = vld [vmem:[#allocation8 + $0xb48] ss:$16 sps:$4 sm:$0xff]   ;;  %v15959_v17 = vld [vmem:[#allocation8 + $0x92c] ss:$16 sps:$4 sm:$0xff]  }
 0x63f   :  { %11574 = vmatpush1.bf16.msra.mxu1 %v15888_v33  ;;  %v15962_v56 = vld [vmem:[#allocation8 + $0xb2c] ss:$16 sps:$4 sm:$0xff]   ;;  %v15957_v18 = vld [vmem:[#allocation8 + $0x928] ss:$16 sps:$4 sm:$0xff]  }
 0x640   :  { %11575 = vmatprep.subr.bf16.mxu1 %v15896_v11  ;;  %v15960_v33 = vld [vmem:[#allocation8 + $0xb28] ss:$16 sps:$4 sm:$0xff]   ;;  %v15965_v57 = vld [vmem:[#allocation8 + $0x90c] ss:$16 sps:$4 sm:$0xff]  }
 0x641   :  { %11535 = vmatpush1.bf16.msra.mxu0 %v15891_v9  ;;  %v15968_v45 = vld [vmem:[#allocation8 + $0xb0c] ss:$16 sps:$4 sm:$0xff]   ;;  %v15963_v11 = vld [vmem:[#allocation8 + $0x908] ss:$16 sps:$4 sm:$0xff]  }
 0x642   :  { %11536 = vmatprep.subr.bf16.mxu0 %v15899_v51  ;;  %v15966_v9 = vld [vmem:[#allocation8 + $0xb08] ss:$16 sps:$4 sm:$0xff]   ;;  %v15974_v51 = vld [vmem:[#allocation8 + $0xeec] ss:$16 sps:$4 sm:$0xff]  }
 0x643   :  { %11576 = vmatpush1.bf16.msra.mxu1 %v15894_v22  ;;  %v15971_v22 = vld [vmem:[#allocation8 + $0xcec] ss:$16 sps:$4 sm:$0xff]  }
 0x644   :  { %11577 = vmatprep.subr.bf16.mxu1 %v15902_v59  ;;  %v15969_v59 = vld [vmem:[#allocation8 + $0xce8] ss:$16 sps:$4 sm:$0xff]  }
 0x645   :  { %11537 = vmatpush1.bf16.msra.mxu0 %v15897_v53  ;;  %v15972_v53 = vld [vmem:[#allocation8 + $0xee8] ss:$16 sps:$4 sm:$0xff]  }
 0x646   :  { %11538 = vmatprep.subr.bf16.mxu0 %v15905_v30 }
 0x647   :  { %11578 = vmatpush1.bf16.msra.mxu1 %v15900_v26  ;;  %v15977_v26 = vld [vmem:[#allocation8 + $0xccc] ss:$16 sps:$4 sm:$0xff]  }
 0x648   :  { %11579 = vmatprep.subr.bf16.mxu1 %v15908_v37  ;;  %v15980_v37 = vld [vmem:[#allocation8 + $0xecc] ss:$16 sps:$4 sm:$0xff]  }
 0x649   :  { %11539 = vmatpush1.bf16.msra.mxu0 %v15903_v19 }
 0x64a   :  { %11540 = vmatprep.subr.bf16.mxu0 %v15911_v20  ;;  %v15975_v20 = vld [vmem:[#allocation8 + $0xcc8] ss:$16 sps:$4 sm:$0xff]  }
 0x64b   :  { %11580 = vmatpush1.bf16.msra.mxu1 %v15906_v21 }
 0x64c   :  { %11581 = vmatprep.subr.bf16.mxu1 %v15914_v15 }
 0x64d   :  { %11541 = vmatpush1.bf16.msra.mxu0 %v15909_v25  ;;  %v15978_v25 = vld [vmem:[#allocation8 + $0xec8] ss:$16 sps:$4 sm:$0xff]  }
 0x64e   :  { %11542 = vmatprep.subr.bf16.mxu0 %v15917_v29 }
 0x64f   :  { %11582 = vmatpush1.bf16.msra.mxu1 %v15912_v49  ;;  %v15983_v49 = vld [vmem:[#allocation8 + $0xcac] ss:$16 sps:$4 sm:$0xff]  }
 0x650   :  { %11583 = vmatprep.subr.bf16.mxu1 %v15920_v27 }
 0x651   :  { %11543 = vmatpush1.bf16.msra.mxu0 %v15915_v63 }
 0x652   :  { %11544 = vmatprep.subr.bf16.mxu0 %v15923_v38  ;;  %v15989_v38 = vld [vmem:[#allocation8 + $0xc8c] ss:$16 sps:$4 sm:$0xff]  }
 0x653   :  { %11584 = vmatpush1.bf16.msra.mxu1 %v15918_v36 }
 0x654   :  { %11585 = vmatprep.subr.bf16.mxu1 %v15926_v34 }
 0x655   :  { %11545 = vmatpush2.bf16.msra.mxu0 %v15921_v6  ;;  %v15992_v6 = vld [vmem:[#allocation8 + $0xe8c] ss:$16 sps:$4 sm:$0xff]  }
 0x656   :  { %11546 = vmatprep.subr.bf16.mxu0 %v15929_v42  ;;  %v15995_v42 = vld [vmem:[#allocation8 + $0xc6c] ss:$16 sps:$4 sm:$0xff]  }
 0x657   :  { %11586 = vmatpush2.bf16.msra.mxu1 %v15924_v41  ;;  %v15987_v41 = vld [vmem:[#allocation8 + $0xc88] ss:$16 sps:$4 sm:$0xff]  }
 0x658   :  { %11587 = vmatprep.subr.bf16.mxu1 %v15932_v47  ;;  %v15998_v47 = vld [vmem:[#allocation8 + $0xe6c] ss:$16 sps:$4 sm:$0xff]  }
 0x659   :  { %11547 = vmatpush2.bf16.msra.mxu0 %v15927_v48  ;;  %v15993_v48 = vld [vmem:[#allocation8 + $0xc68] ss:$16 sps:$4 sm:$0xff]  }
 0x65a   :  { %11548 = vmatprep.subr.bf16.mxu0 %v15935_v23  ;;  %v16001_v23 = vld [vmem:[#allocation8 + $0xc4c] ss:$16 sps:$4 sm:$0xff]  }
 0x65b   :  { %11588 = vmatpush2.bf16.msra.mxu1 %v15930_v2  ;;  %v15996_v2 = vld [vmem:[#allocation8 + $0xe68] ss:$16 sps:$4 sm:$0xff]  }
 0x65c   :  { %11589 = vmatprep.subr.bf16.mxu1 %v15938_v3  ;;  %v16004_v3 = vld [vmem:[#allocation8 + $0xe4c] ss:$16 sps:$4 sm:$0xff]  }
 0x65d   :  { %11549 = vmatpush2.bf16.msra.mxu0 %v15933_v28  ;;  %v15999_v28 = vld [vmem:[#allocation8 + $0xc48] ss:$16 sps:$4 sm:$0xff]  }
 0x65e   :  { %11550 = vmatprep.subr.bf16.mxu0 %v15941_v55  ;;  %v16007_v55 = vld [vmem:[#allocation8 + $0xc2c] ss:$16 sps:$4 sm:$0xff]  }
 0x65f   :  { %11590 = vmatpush2.bf16.msra.mxu1 %v15936_v61  ;;  %v16002_v61 = vld [vmem:[#allocation8 + $0xe48] ss:$16 sps:$4 sm:$0xff]  }
 0x660   :  { %11591 = vmatprep.subr.bf16.mxu1 %v15944_v62  ;;  %v16010_v62 = vld [vmem:[#allocation8 + $0xe2c] ss:$16 sps:$4 sm:$0xff]  }
 0x661   :  { %11551 = vmatpush2.bf16.msra.mxu0 %v15939_v58  ;;  %v16005_v58 = vld [vmem:[#allocation8 + $0xc28] ss:$16 sps:$4 sm:$0xff]  }
 0x662   :  { %11552 = vmatprep.subr.bf16.mxu0 %v15947_v8  ;;  %v16013_v8 = vld [vmem:[#allocation8 + $0xc0c] ss:$16 sps:$4 sm:$0xff]  }
 0x663   :  { %11592 = vmatpush2.bf16.msra.mxu1 %v15942_v0  ;;  %v16008_v0 = vld [vmem:[#allocation8 + $0xe28] ss:$16 sps:$4 sm:$0xff]  }
 0x664   :  { %11593 = vmatprep.subr.bf16.mxu1 %v15950_v12  ;;  %v16016_v12 = vld [vmem:[#allocation8 + $0xe0c] ss:$16 sps:$4 sm:$0xff]  }
 0x665   :  { %11553 = vmatpush2.bf16.msra.mxu0 %v15945_v7 }
 0x666   :  { %11554 = vmatprep.subr.bf16.mxu0 %v15953_v24  ;;  %v16014_v24 = vld [vmem:[#allocation8 + $0xe08] ss:$16 sps:$4 sm:$0xff]  }
 0x667   :  { %11594 = vmatpush2.bf16.msra.mxu1 %v15948_v35  ;;  %v16011_v35 = vld [vmem:[#allocation8 + $0xc08] ss:$16 sps:$4 sm:$0xff]  }
 0x668   :  { %11595 = vmatprep.subr.bf16.mxu1 %v15956_v1  ;;  %v16019_v1 = vld [vmem:[#allocation8 + $0xdec] ss:$16 sps:$4 sm:$0xff]  }
 0x669   :  { %11555 = vmatpush2.bf16.msra.mxu0 %v15951_v5  ;;  %v16022_v5 = vld [vmem:[#allocation8 + $0xfec] ss:$16 sps:$4 sm:$0xff]  }
 0x66a   :  { %11556 = vmatprep.subr.bf16.mxu0 %v15959_v17  ;;  %v16017_v17 = vld [vmem:[#allocation8 + $0xde8] ss:$16 sps:$4 sm:$0xff]  }
 0x66b   :  { %11596 = vmatpush2.bf16.msra.mxu1 %v15954_v54 }
 0x66c   :  { %11597 = vmatprep.subr.bf16.mxu1 %v15962_v56  ;;  %v16020_v56 = vld [vmem:[#allocation8 + $0xfe8] ss:$16 sps:$4 sm:$0xff]  }
 0x66d   :  { %11557 = vmatpush2.bf16.msra.mxu0 %v15957_v18  ;;  %v16025_v18 = vld [vmem:[#allocation8 + $0xdcc] ss:$16 sps:$4 sm:$0xff]  }
 0x66e   :  { %11558 = vmatprep.subr.bf16.mxu0 %v15965_v57  ;;  %v16023_v57 = vld [vmem:[#allocation8 + $0xdc8] ss:$16 sps:$4 sm:$0xff]  }
 0x66f   :  { %11598 = vmatpush2.bf16.msra.mxu1 %v15960_v33  ;;  %v16028_v33 = vld [vmem:[#allocation8 + $0xfcc] ss:$16 sps:$4 sm:$0xff]  }
 0x670   :  { %11599 = vmatprep.subr.bf16.mxu1 %v15968_v45  ;;  %v16026_v45 = vld [vmem:[#allocation8 + $0xfc8] ss:$16 sps:$4 sm:$0xff]  }
 0x671   :  { %11559 = vmatpush2.bf16.msra.mxu0 %v15963_v11  ;;  %v16031_v11 = vld [vmem:[#allocation8 + $0xdac] ss:$16 sps:$4 sm:$0xff]  }
 0x672   :  { %11610 = vmatprep.subr.bf16.mxu0 %v15971_v22 }
 0x673   :  { %11600 = vmatpush2.bf16.msra.mxu1 %v15966_v9  ;;  %v16034_v9 = vld [vmem:[#allocation8 + $0xfac] ss:$16 sps:$4 sm:$0xff]  }
 0x674   :  { %11651 = vmatprep.subr.bf16.mxu1 %v15974_v51  ;;  %v11316_v30 = vpop.f32.mrf.mxu0  ;;  %11561 = vmatmul.mubr.bf16.vlgmr.msra.gmra.mxu0 %v17161_v52  ;;  %v15986_v52 = vld [vmem:[#allocation8 + $0xeac] ss:$16 sps:$4 sm:$0xff]   ;;  %v16029_v51 = vld [vmem:[#allocation8 + $0xda8] ss:$16 sps:$4 sm:$0xff]  }
 0x675   :  { %v11317_v19 = vadd.f32 %v11316_v30, %v17217_v43  ;;  %11611 = vmatpush1.bf16.msra.mxu0 %v15969_v59  ;;  %11642 = vmatprep.mubr.bf16.mxu0 %v17168_v46  ;;  %v15984_v46 = vld [vmem:[#allocation8 + $0xea8] ss:$16 sps:$4 sm:$0xff]  }
 0x676   :  { %v11357_v21 = vpop.f32.mrf.mxu1  ;;  %11602 = vmatmul.mubr.bf16.vlgmr.msra.gmra.mxu1 %v17163_v50  ;;  %v11318_v15 = vpop.f32.mrf.mxu0  ;;  %11612 = vmatprep.subr.bf16.mxu0 %v15977_v26  ;;  %v15981_v50 = vld [vmem:[#allocation8 + $0xca8] ss:$16 sps:$4 sm:$0xff]   ;;  %v16040_v26 = vld [vmem:[#allocation8 + $0xf8c] ss:$16 sps:$4 sm:$0xff]  }
 0x677   :  { %11652 = vmatpush1.bf16.msra.mxu1 %v15972_v53  ;;  %v17227_v29 = vadd.f32 %v11357_v21, %v11317_v19  ;;  %11683 = vmatprep.mubr.bf16.mxu1 %v17180_v60  ;;  %v15990_v60 = vld [vmem:[#allocation8 + $0xe88] ss:$16 sps:$4 sm:$0xff]   ;;  %v11319_v7 = vadd.f32 %v11318_v15, %v17221_v44  ;;  %v16037_v53 = vld [vmem:[#allocation8 + $0xd8c] ss:$16 sps:$4 sm:$0xff]  }
 0x678   :  { %v11359_v27 = vpop.f32.mrf.mxu1  ;;  %v11320_v63 = vpop.f32.mrf.mxu0  ;;  %11653 = vmatprep.subr.bf16.mxu1 %v15980_v37  ;;  %v16032_v59 = vld [vmem:[#allocation8 + $0xfa8] ss:$16 sps:$4 sm:$0xff]   ;;  %v16043_v19 = vld [vmem:[#allocation8 + $0xd6c] ss:$16 sps:$4 sm:$0xff]  }
 0x679   :  { %11613 = vmatpush1.bf16.msra.mxu0 %v15975_v20  ;;  %v17231_v54 = vadd.f32 %v11359_v27, %v11319_v7  ;;  %v16035_v30 = vld [vmem:[#allocation8 + $0xd88] ss:$16 sps:$4 sm:$0xff]   ;;  %v16046_v21 = vld [vmem:[#allocation8 + $0xf6c] ss:$16 sps:$4 sm:$0xff]   ;;  %vm11696_vm1 = vcmp.gt.f32.partialorder %v17227_v29, 0.0 }
 0x67a   :  { %v11361_v43 = vpop.f32.mrf.mxu1  ;;  %v11321_v36 = vpop.f32.mrf.mxu0  ;;  %11614 = vmatprep.subr.bf16.mxu0 %v15983_v49  ;;  %v16038_v37 = vld [vmem:[#allocation8 + $0xf88] ss:$16 sps:$4 sm:$0xff]   ;;  %v16052_v49 = vld [vmem:[#allocation8 + $0xf4c] ss:$16 sps:$4 sm:$0xff]  }
 0x67b   :  { %11654 = vmatpush1.bf16.msra.mxu1 %v15978_v25  ;;  %v11693_v44 = vmin.f32 %v17231_v54, 0.0  ;;  %v16041_v20 = vld [vmem:[#allocation8 + $0xd68] ss:$16 sps:$4 sm:$0xff]   ;;  %v16049_v25 = vld [vmem:[#allocation8 + $0xd4c] ss:$16 sps:$4 sm:$0xff]   ;;  %vm11697_vm0 = vcmp.gt.f32.partialorder %v17231_v54, 0.0 }
 0x67c   :  { %v11362_v34 = vpop.f32.mrf.mxu1  ;;  %11655 = vmatprep.subr.bf16.mxu1 %v15986_v52  ;;  %v16044_v15 = vld [vmem:[#allocation8 + $0xf68] ss:$16 sps:$4 sm:$0xff]   ;;  %v16055_v63 = vld [vmem:[#allocation8 + $0xd2c] ss:$16 sps:$4 sm:$0xff]  }
 0x67d   :  { %11615 = vmatpush1.bf16.msra.mxu0 %v15981_v50  ;;  %v11702_v22 = vmul.f32 1.442695, %v11693_v44  ;;  %v16047_v27 = vld [vmem:[#allocation8 + $0xd48] ss:$16 sps:$4 sm:$0xff]   ;;  %v16058_v43 = vld [vmem:[#allocation8 + $0xf2c] ss:$16 sps:$4 sm:$0xff]  }
 0x67e   :  { %11616 = vmatprep.subr.bf16.mxu0 %v15989_v38  ;;  %v16050_v52 = vld [vmem:[#allocation8 + $0xf48] ss:$16 sps:$4 sm:$0xff]   ;;  %v16061_v38 = vld [vmem:[#allocation8 + $0xd0c] ss:$16 sps:$4 sm:$0xff]  }
 0x67f   :  { %11656 = vmatpush1.bf16.msra.mxu1 %v15984_v46  ;;  %16315 = vpow2.f32 %v11702_v22  ;;  %v16053_v50 = vld [vmem:[#allocation8 + $0xd28] ss:$16 sps:$4 sm:$0xff]   ;;  %v16064_v34 = vld [vmem:[#allocation8 + $0xf0c] ss:$16 sps:$4 sm:$0xff]  }
 0x680   :  { %11657 = vmatprep.subr.bf16.mxu1 %v15992_v6  ;;  %v16056_v46 = vld [vmem:[#allocation8 + $0xf28] ss:$16 sps:$4 sm:$0xff]   ;;  %v16069_v7 = vld [vmem:[#allocation11 + $0x68] sm:$0xff]   ;;  %v16081_v44 = vld [vmem:[#allocation11 + $0xf8] sm:$0xff]  }
 0x681   :  { %11617 = vmatpush1.bf16.msra.mxu0 %v15987_v41  ;;  %v16059_v6 = vld [vmem:[#allocation8 + $0xd08] ss:$16 sps:$4 sm:$0xff]  }
 0x682   :  { %11618 = vmatprep.subr.bf16.mxu0 %v15995_v42  ;;  %v16065_v42 = vld [vmem:[#allocation11 + $0x78] sm:$0xff]   ;;  %v16076_v22 = vld [vmem:[#allocation11 + $0x10] sm:$0xff]  }
 0x683   :  { %11658 = vmatpush1.bf16.msra.mxu1 %v15990_v60  ;;  %v16062_v60 = vld [vmem:[#allocation8 + $0xf08] ss:$16 sps:$4 sm:$0xff]  }
 0x684   :  { %11659 = vmatprep.subr.bf16.mxu1 %v15998_v47  ;;  %v16354_v47 = vld [vmem:[#allocation10] sm:$0xf] }
 0x685   :  { %11619 = vmatpush1.bf16.msra.mxu0 %v15993_v48  ;;  %v8467_v48 = vrot.slane %v16354_v47, %v16934_v4 }
 0x686   :  { %11620 = vmatprep.subr.bf16.mxu0 %v16001_v23 }
 0x687   :  { %11660 = vmatpush1.bf16.msra.mxu1 %v15996_v2  ;;  %v16066_v2 = vld [vmem:[#allocation11 + $0x38] sm:$0xff]  }
 0x688   :  { %11661 = vmatprep.subr.bf16.mxu1 %v16004_v3  ;;  %v16067_v3 = vld [vmem:[#allocation11 + $0x70] sm:$0xff]  }
 0x689   :  { %11621 = vmatpush1.bf16.msra.mxu0 %v15999_v28  ;;  %v11692_v28 = vmin.f32 %v17227_v29, 0.0 }
 0x68a   :  { %11622 = vmatprep.subr.bf16.mxu0 %v16007_v55 }
 0x68b   :  { %11662 = vmatpush1.bf16.msra.mxu1 %v16002_v61  ;;  %v8471_v61 = vrot.slane %v16354_v47, %v16937_v14  ;;  %v16088_v47 = vld [vmem:[#allocation11 + $0xa0] sm:$0xff]  }
 0x68c   :  { %11663 = vmatprep.subr.bf16.mxu1 %v16010_v62  ;;  %v16316_v36 = vpop.eup %16315 }
 0x68d   :  { %11623 = vmatpush1.bf16.msra.mxu0 %v16005_v58  ;;  %v14994_v41 = vadd.f32 -1.0, %v16316_v36 }
 0x68e   :  { %11624 = vmatprep.subr.bf16.mxu0 %v16013_v8  ;;  %v16068_v8 = vld [vmem:[#allocation11 + $0x30] sm:$0xff]  }
 0x68f   :  { %11664 = vmatpush1.bf16.msra.mxu1 %v16008_v0  ;;  %v11713_v23 = vsel %vm11697_vm0, %v17231_v54, %v14994_v41  ;;  %v16085_v41 = vld [vmem:[#allocation11 + $0xe8] sm:$0xff]  }
 0x690   :  { %11665 = vmatprep.subr.bf16.mxu1 %v16016_v12  ;;  %v11717_v62 = vpack.c.bf16 %v11713_v23, %v11713_v23  ;;  %v16091_v23 = vld [vmem:[#allocation11 + $0xd0] sm:$0xff]  }
 0x691   :  { %11625 = vmatpush1.bf16.msra.mxu0 %v16011_v35  ;;  %v11700_v35 = vmul.f32 1.442695, %v11692_v28  ;;  %v16093_v28 = vld [vmem:[#allocation11 + $0xc8] sm:$0xff]  }
 0x692   :  { %11626 = vmatprep.subr.bf16.mxu0 %v16019_v1 }
 0x693   :  { %11666 = vmatpush1.bf16.msra.mxu1 %v16014_v24  ;;  %16317 = vpow2.f32 %v11700_v35 }
 0x694   :  { %11667 = vmatprep.subr.bf16.mxu1 %v16022_v5 }
 0x695   :  { %11627 = vmatpush2.bf16.msra.mxu0 %v16017_v17 }
 0x696   :  { %11628 = vmatprep.subr.bf16.mxu0 %v16025_v18 }
 0x697   :  { %11668 = vmatpush2.bf16.msra.mxu1 %v16020_v56 }
 0x698   :  { %11669 = vmatprep.subr.bf16.mxu1 %v16028_v33  ;;  %v16071_v33 = vld [vmem:[#allocation11 + $0x60] sm:$0xff]  }
 0x699   :  { %11629 = vmatpush2.bf16.msra.mxu0 %v16023_v57  ;;  %v16072_v57 = vld [vmem:[#allocation11 + $0x20] sm:$0xff]  }
 0x69a   :  { %11630 = vmatprep.subr.bf16.mxu0 %v16031_v11  ;;  %v16074_v11 = vld [vmem:[#allocation11 + $0x18] sm:$0xff]  }
 0x69b   :  { %11670 = vmatpush2.bf16.msra.mxu1 %v16026_v45  ;;  %v16073_v45 = vld [vmem:[#allocation11 + $0x58] sm:$0xff]  }
 0x69c   :  { %11671 = vmatprep.subr.bf16.mxu1 %v16034_v9  ;;  %v16075_v9 = vld [vmem:[#allocation11 + $0x50] sm:$0xff]  }
 0x69d   :  { %11631 = vmatpush2.bf16.msra.mxu0 %v16029_v51  ;;  %v16077_v51 = vld [vmem:[#allocation11 + $0x48] sm:$0xff]  }
 0x69e   :  { %11632 = vmatprep.subr.bf16.mxu0 %v16037_v53  ;;  %v16078_v53 = vld [vmem:[#allocation11 + $0x8] sm:$0xff]  }
 0x69f   :  { %11672 = vmatpush2.bf16.msra.mxu1 %v16032_v59 }
 0x6a0   :  { %11673 = vmatprep.subr.bf16.mxu1 %v16040_v26  ;;  %v16318_v59 = vpop.eup %16317  ;;  %v16079_v26 = vld [vmem:[#allocation11 + $0x40] sm:$0xff]  }
 0x6a1   :  { %11633 = vmatpush2.bf16.msra.mxu0 %v16035_v30  ;;  %v14993_v30 = vadd.f32 -1.0, %v16318_v59 }
 0x6a2   :  { %11634 = vmatprep.subr.bf16.mxu0 %v16043_v19 }
 0x6a3   :  { %11674 = vmatpush2.bf16.msra.mxu1 %v16038_v37  ;;  %v16080_v37 = vld [vmem:[#allocation11] sm:$0xff]   ;;  %v11712_v19 = vsel %vm11696_vm1, %v17227_v29, %v14993_v30 }
 0x6a4   :  { %11675 = vmatprep.subr.bf16.mxu1 %v16046_v21  ;;  %v11716_v21 = vpack.c.bf16 %v11712_v19, %v11712_v19 }
 0x6a5   :  { %11635 = vmatpush2.bf16.msra.mxu0 %v16041_v20 }
 0x6a6   :  { %11636 = vmatprep.subr.bf16.mxu0 %v16049_v25 }
 0x6a7   :  { %11676 = vmatpush2.bf16.msra.mxu1 %v16044_v15  ;;  %v16082_v15 = vld [vmem:[#allocation11 + $0xb8] sm:$0xff]  }
 0x6a8   :  { %11677 = vmatprep.subr.bf16.mxu1 %v16052_v49 }
 0x6a9   :  { %11637 = vmatpush2.bf16.msra.mxu0 %v16047_v27 }
 0x6aa   :  { %11638 = vmatprep.subr.bf16.mxu0 %v16055_v63 }
 0x6ab   :  { %11678 = vmatpush2.bf16.msra.mxu1 %v16050_v52 }
 0x6ac   :  { %11679 = vmatprep.subr.bf16.mxu1 %v16058_v43 }
 0x6ad   :  { %11639 = vmatpush2.bf16.msra.mxu0 %v16053_v50  ;;  %v16083_v50 = vld [vmem:[#allocation11 + $0xf0] sm:$0xff]  }
 0x6ae   :  { %11640 = vmatprep.subr.bf16.mxu0 %v16061_v38 }
 0x6af   :  { %11680 = vmatpush2.bf16.msra.mxu1 %v16056_v46  ;;  %v16084_v46 = vld [vmem:[#allocation11 + $0xb0] sm:$0xff]  }
 0x6b0   :  { %11681 = vmatprep.subr.bf16.mxu1 %v16064_v34 }
 0x6b1   :  { %11641 = vmatpush2.bf16.msra.mxu0 %v16059_v6 }
 0x6b2   :  { %15175 = vmatprep.subr.bf16.mxu0 %v16065_v42  ;;  %v16087_v42 = vld [vmem:[#allocation11 + $0xe0] sm:$0xff]  }
 0x6b3   :  { %11682 = vmatpush2.bf16.msra.mxu1 %v16062_v60  ;;  %v16086_v60 = vld [vmem:[#allocation11 + $0xa8] sm:$0xff]  }
 0x6b4   :  { %v11398_v55 = vpop.f32.mrf.mxu0  ;;  %11643 = vmatmul.mubr.bf16.vlgmr.msra.gmra.mxu0 %v17190_v39  ;;  %v16070_v39 = vld [vmem:[#allocation11 + $0x28] sm:$0xff]   ;;  %15197 = vmatprep.subr.bf16.mxu1 %v16081_v44 }
 0x6b5   :  { %v11399_v58 = vadd.f32 %v11398_v55, %v8467_v48  ;;  %15176 = vmatpush3.bf16.msra.mxu0 %v16066_v2  ;;  %12015 = vmatprep.mubr.bf16.mxu0 %v11717_v62  ;;  %v16089_v48 = vld [vmem:[#allocation11 + $0xd8] sm:$0xff]   ;;  %v16095_v55 = vld [vmem:[#allocation11 + $0xc0] sm:$0xff]  }
 0x6b6   :  { %v11439_v0 = vpop.f32.mrf.mxu1  ;;  %11684 = vmatmul.mubr.bf16.vlgmr.msra.gmra.mxu1 %v17192_v13  ;;  %v11400_v12 = vpop.f32.mrf.mxu0  ;;  %15177 = vmatprep.subr.bf16.mxu0 %v16067_v3  ;;  %v16090_v2 = vld [vmem:[#allocation11 + $0x98] sm:$0xff]   ;;  %v16092_v3 = vld [vmem:[#allocation11 + $0x90] sm:$0xff]   ;;  %v16096_v62 = vld [vmem:[#allocation11 + $0x80] sm:$0xff]  }
 0x6b7   :  { %v11440_v24 = vadd.f32 %v11439_v0, %v11399_v58  ;;  %v11401_v1 = vadd.f32 %v11400_v12, %v8471_v61  ;;  %15198 = vmatpush3.bf16.msra.mxu1 %v16082_v15  ;;  %v16094_v61 = vld [vmem:[#allocation11 + $0x88] sm:$0xff]   ;;  %v16097_v58 = vld [vmem:[%s17342_s8 + $0x38] sm:$0xff]   ;;  %v16695_v0 = vmov 0.0  }
 0x6b8   :  { %v11441_v5 = vpop.f32.mrf.mxu1  ;;  %v11402_v54 = vpop.f32.mrf.mxu0  ;;  %15199 = vmatprep.subr.bf16.mxu1 %v16083_v50 }
 0x6b9   :  { %v11442_v17 = vadd.f32 %v11441_v5, %v11401_v1  ;;  %15178 = vmatpush3.bf16.msra.mxu0 %v16068_v8 }
 0x6ba   :  { %v11443_v56 = vpop.f32.mrf.mxu1  ;;  %v11403_v18 = vpop.f32.mrf.mxu0  ;;  %15179 = vmatprep.subr.bf16.mxu0 %v16069_v7 }
 0x6bb   :  { %15200 = vmatpush3.bf16.msra.mxu1 %v16084_v46 }
 0x6bc   :  { %v11444_v13 = vpop.f32.mrf.mxu1  ;;  %15201 = vmatprep.subr.bf16.mxu1 %v16085_v41  ;;  %v16100_v41 = vld [vmem:[%s17342_s8 + $0x20] sm:$0xff]  }
 0x6bd   :  { %15180 = vmatpush3.bf16.msra.mxu0 %v16070_v39 }
 0x6be   :  { %15181 = vmatprep.subr.bf16.mxu0 %v16071_v33 }
 0x6bf   :  { %15202 = vmatpush3.bf16.msra.mxu1 %v16086_v60  ;;  %v16101_v60 = vld [vmem:[%s17342_s8 + $0x18] sm:$0xff]  }
 0x6c0   :  { %15203 = vmatprep.subr.bf16.mxu1 %v16087_v42  ;;  %v16102_v42 = vld [vmem:[%s17342_s8 + $0x10] sm:$0xff]  }
 0x6c1   :  { %15182 = vmatpush3.bf16.msra.mxu0 %v16072_v57 }
 0x6c2   :  { %15183 = vmatprep.subr.bf16.mxu0 %v16073_v45 }
 0x6c3   :  { %15204 = vmatpush3.bf16.msra.mxu1 %v16088_v47  ;;  %v16103_v47 = vld [vmem:[%s17342_s8 + $0x8] sm:$0xff]  }
 0x6c4   :  { %15205 = vmatprep.subr.bf16.mxu1 %v16089_v48  ;;  %v16104_v48 = vld [vmem:[%s17342_s8] sm:$0xff]  }
 0x6c5   :  { %15184 = vmatpush3.bf16.msra.mxu0 %v16074_v11 }
 0x6c6   :  { %15185 = vmatprep.subr.bf16.mxu0 %v16075_v9 }
 0x6c7   :  { %15206 = vmatpush3.bf16.msra.mxu1 %v16090_v2  ;;  %v14997_v2 = vld [vmem:[#allocation13] ss:$0 sm:$0xff] }
 0x6c8   :  { %15207 = vmatprep.subr.bf16.mxu1 %v16091_v23 }
 0x6c9   :  { %15186 = vmatpush3.bf16.msra.mxu0 %v16076_v22 }
 0x6ca   :  { %15187 = vmatprep.subr.bf16.mxu0 %v16077_v51 }
 0x6cb   :  { %15208 = vmatpush3.bf16.msra.mxu1 %v16092_v3 }
 0x6cc   :  { %15209 = vmatprep.subr.bf16.mxu1 %v16093_v28 }
 0x6cd   :  { %15188 = vmatpush3.bf16.msra.mxu0 %v16078_v53 }
 0x6ce   :  { %15189 = vmatprep.subr.bf16.mxu0 %v16079_v26 }
 0x6cf   :  { %15210 = vmatpush3.bf16.msra.mxu1 %v16094_v61 }
 0x6d0   :  { %15211 = vmatprep.subr.bf16.mxu1 %v16095_v55 }
 0x6d1   :  { %15190 = vmatpush3.bf16.msra.mxu0 %v16080_v37 }
 0x6d2   :  { %15250 = vmatprep.subr.bf16.mxu0 %v16695_v0 }
 0x6d3   :  { %15212 = vmatpush3.bf16.msra.mxu1 %v16096_v62 }
 0x6d4   :  { %12016 = vmatmul.mubr.bf16.vlgmr.msra.gmra.mxu0 %v11716_v21 }
 0x6d5   :  { %15251 = vmatpush3.bf16.msra.mxu0 %v16097_v58  ;;  %15266 = vmatprep.mubr.msk.bf16.mxu0 %vm16696_vm4, %v16695_v0 }
 0x6d6   :  { %15252 = vmatprep.subr.bf16.mxu0 %v16695_v0 }
 0x6f4   :  { %v11480_v20 = vpop.f32.mrf.mxu0 }
 0x6f5   :  { %v11481_v25 = vadd.f32 %v11480_v20, %v11440_v24 }
 0x6f6   :  { %v11521_v49 = vpop.f32.mrf.mxu1  ;;  %v11482_v27 = vpop.f32.mrf.mxu0 }
 0x6f7   :  { %v11522_v52 = vadd.f32 %v11521_v49, %v11481_v25  ;;  %v11483_v63 = vadd.f32 %v11482_v27, %v11442_v17 }
 0x6f8   :  { %v11523_v43 = vpop.f32.mrf.mxu1  ;;  %v11484_v36 = vpop.f32.mrf.mxu0 }
 0x6f9   :  { %v11524_v38 = vadd.f32 %v11523_v43, %v11483_v63 }
 0x6fa   :  { %v11525_v34 = vpop.f32.mrf.mxu1  ;;  %v11485_v6 = vpop.f32.mrf.mxu0 }
 0x6fb   :  { %v16098_v6 = vld [vmem:[%s17342_s8 + $0x30] sm:$0xff]  }
 0x6fc   :  { %v11526_v29 = vpop.f32.mrf.mxu1  ;;  %15253 = vmatpush3.bf16.msra.mxu0 %v16098_v6  ;;  %v16137_v6 = vld [vmem:[#allocation17 + $0x124] ss:$24 sps:$4 sm:$0xff]  }
 0x6fd   :  { %15254 = vmatprep.subr.bf16.mxu0 %v16695_v0  ;;  %v16099_v29 = vld [vmem:[%s17342_s8 + $0x28] sm:$0xff]   ;;  %s16698_s8 = smov [#allocation25]  }
 0x6fe   :  { %s13421_s9 = sshll.u32 %s16698_s8, 4  ;;  %s13422_s9 = int_to_ptr.vmem [resolvable:$true] %s13421_s9 }
 0x6ff   :  { %s16635_s25 = scalar_lea.vmem %s13422_s9, 64  ;;  %p16640_p1 = scmp.lt.s32.totalorder %s13422_s9, %s13422_s9 }
 0x700   :  { %15255 = vmatpush3.bf16.msra.mxu0 %v16099_v29  ;;  %v16140_v29 = vld [vmem:[#allocation17 + $0xcc] ss:$24 sps:$4 sm:$0xff]   ;;  %p16636_p0 = scmp.ne.s32.totalorder %s13422_s9, %s16635_s25  ;;  %p16641_p2 = scmp.lt.s32.totalorder %s16635_s25, %s16635_s25 }
 0x701   :  { %15256 = vmatprep.subr.bf16.mxu0 %v16695_v0 }
 0x702   :  { %p16642_p3 = por %p16641_p2, %p16640_p1 }
 0x704   :  { %15257 = vmatpush3.bf16.msra.mxu0 %v16100_v41  ;;  %v16135_v41 = vld [vmem:[#allocation17 + $0x120] ss:$24 sps:$4 sm:$0xff]   ;;  %p16643_p4 = pnand %p16642_p3, %p16636_p0 }
 0x705   :  { %15258 = vmatprep.subr.bf16.mxu0 %v16695_v0 }
 0x708   :  { %15259 = vmatpush3.bf16.msra.mxu0 %v16101_v60  ;;  %v16138_v60 = vld [vmem:[#allocation17 + $0xc8] ss:$24 sps:$4 sm:$0xff]  }
 0x709   :  { %15260 = vmatprep.subr.bf16.mxu0 %v16695_v0 }
 0x70c   :  { %15261 = vmatpush3.bf16.msra.mxu0 %v16102_v42  ;;  %v16143_v42 = vld [vmem:[#allocation17 + $0xf4] ss:$24 sps:$4 sm:$0xff]  }
 0x70d   :  { %15262 = vmatprep.subr.bf16.mxu0 %v16695_v0 }
 0x710   :  { %15263 = vmatpush3.bf16.msra.mxu0 %v16103_v47  ;;  %v16146_v47 = vld [vmem:[#allocation17 + $0x9c] ss:$24 sps:$4 sm:$0xff]  }
 0x711   :  { %15264 = vmatprep.subr.bf16.mxu0 %v16695_v0  ;;  %v16105_v0 = vld [vmem:[#allocation16 + $0x30] ss:$24 sps:$4 sm:$0xff]  }
 0x714   :  { %15265 = vmatpush3.bf16.msra.mxu0 %v16104_v48  ;;  %v16141_v48 = vld [vmem:[#allocation17 + $0xf0] ss:$24 sps:$4 sm:$0xff]  }
 0x734   :  { %v11562_v8 = vpop.f32.mrf.mxu0 }
 0x735   :  { %v11563_v12 = vadd.f32 %v11562_v8, %v11522_v52 }
 0x736   :  { %v11603_v7 = vpop.f32.mrf.mxu1  ;;  %v11564_v35 = vpop.f32.mrf.mxu0 }
 0x737   :  { %v11604_v24 = vadd.f32 %v11603_v7, %v11563_v12  ;;  %v11565_v39 = vadd.f32 %v11564_v35, %v11524_v38 }
 0x738   :  { %v11605_v1 = vpop.f32.mrf.mxu1  ;;  %v11566_v5 = vpop.f32.mrf.mxu0 }
 0x739   :  { %v11606_v33 = vadd.f32 %v11605_v1, %v11565_v39  ;;  %v16107_v5 = vld [vmem:[#allocation16 + $0x34] ss:$24 sps:$4 sm:$0xff]  }
 0x73a   :  { %v11607_v54 = vpop.f32.mrf.mxu1  ;;  %v11567_v17 = vpop.f32.mrf.mxu0  ;;  %12309 = vmatprep.subr.bf16.mxu0 %v16107_v5  ;;  %v16116_v39 = vld [vmem:[#allocation16 + $0xc] ss:$24 sps:$4 sm:$0xff]   ;;  %v16170_v5 = vld [vmem:[#allocation17 + $0x2dc] ss:$24 sps:$4 sm:$0xff]  }
 0x73b   :  { %v16110_v54 = vld [vmem:[#allocation16 + $0x3c] ss:$24 sps:$4 sm:$0xff]   ;;  %v16108_v17 = vld [vmem:[#allocation16 + $0x38] ss:$24 sps:$4 sm:$0xff]  }
 0x73c   :  { %v11608_v56 = vpop.f32.mrf.mxu1  ;;  %12350 = vmatprep.subr.bf16.mxu1 %v16110_v54  ;;  %v16165_v54 = vld [vmem:[#allocation17 + $0x30] ss:$24 sps:$4 sm:$0xff]  }
 0x73d   :  { %v16113_v56 = vld [vmem:[#allocation16 + $0x4] ss:$24 sps:$4 sm:$0xff]  }
 0x774   :  { %v11644_v18 = vpop.f32.mrf.mxu0 }
 0x775   :  { %v11645_v13 = vadd.f32 %v11644_v18, %v11604_v24  ;;  %v16111_v18 = vld [vmem:[#allocation16] ss:$24 sps:$4 sm:$0xff]  }
 0x776   :  { %v11685_v44 = vpop.f32.mrf.mxu1  ;;  %v11646_v57 = vpop.f32.mrf.mxu0 }
 0x777   :  { %v11686_v45 = vadd.f32 %v11685_v44, %v11645_v13  ;;  %v11647_v11 = vadd.f32 %v11646_v57, %v11606_v33  ;;  %v16114_v33 = vld [vmem:[#allocation16 + $0x8] ss:$24 sps:$4 sm:$0xff]   ;;  %v16119_v13 = vld [vmem:[#allocation16 + $0x44] ss:$24 sps:$4 sm:$0xff]   ;;  %v16697_v44 = vmov 0  }
 0x778   :  { %v11687_v9 = vpop.f32.mrf.mxu1  ;;  %v11648_v22 = vpop.f32.mrf.mxu0  ;;  %v16122_v57 = vld [vmem:[#allocation17 + $0x15c] ss:$24 sps:$4 sm:$0xff]  }
 0x779   :  { %v11694_v51 = vmin.f32 %v11686_v45, 0.0  ;;  %v11688_v59 = vadd.f32 %v11687_v9, %v11647_v11  ;;  %vm11698_vm2 = vcmp.gt.f32.partialorder %v11686_v45, 0.0 }
 0x77a   :  { %v11689_v53 = vpop.f32.mrf.mxu1  ;;  %v11649_v26 = vpop.f32.mrf.mxu0 }
 0x77b   :  { %v11704_v30 = vmul.f32 1.442695, %v11694_v51  ;;  %v11695_v37 = vmin.f32 %v11688_v59, 0.0  ;;  %vm11699_vm3 = vcmp.gt.f32.partialorder %v11688_v59, 0.0 }
 0x77c   :  { %v11690_v19 = vpop.f32.mrf.mxu1 }
 0x77d   :  { %16319 = vpow2.f32 %v11704_v30  ;;  %v11706_v21 = vmul.f32 1.442695, %v11695_v37  ;;  %v17276_v30 = vld.sshfl [vmem:[#allocation2] sm:$0x33 pattern:$0x76325410] }
 0x77f   :  { %16321 = vpow2.f32 %v11706_v21  ;;  %v17280_v21 = vcombine.high %v17276_v30, %v17276_v30 }
 0x78a   :  { %v16320_v20 = vpop.eup %16319 }
 0x78b   :  { %v14995_v15 = vadd.f32 -1.0, %v16320_v20 }
 0x78c   :  { %v16322_v25 = vpop.eup %16321 }
 0x78d   :  { %v14996_v49 = vadd.f32 -1.0, %v16322_v25  ;;  %v11714_v27 = vsel %vm11698_vm2, %v11686_v45, %v14995_v15  ;;  %v15031_v45 = vld [vmem:[#allocation14] ss:$0 sm:$0xff]  ;;  %v16117_v15 = vld [vmem:[#allocation16 + $0x40] ss:$24 sps:$4 sm:$0xff]  }
 0x78e   :  { %v11718_v43 = vpack.c.bf16 %v11714_v27, %v11714_v27  ;;  %v16120_v25 = vld [vmem:[#allocation17 + $0x158] ss:$24 sps:$4 sm:$0xff]   ;;  %v16125_v27 = vld [vmem:[#allocation16 + $0x14] ss:$24 sps:$4 sm:$0xff]  }
 0x78f   :  { %v11715_v52 = vsel %vm11699_vm3, %v11688_v59, %v14996_v49 }
 0x790   :  { %v11719_v63 = vpack.c.bf16 %v11715_v52, %v11715_v52  ;;  %v16128_v52 = vld [vmem:[#allocation17 + $0x12c] ss:$24 sps:$4 sm:$0xff]  }
 0x792   :  { %12055 = vmatprep.mubr.bf16.mxu1 %v11719_v63  ;;  %v17284_v63 = vpack.c.bf16 %v17280_v21, %v17280_v21 }
 0x793   :  { %12056 = vmatmul.mubr.bf16.vlgmr.msra.gmra.mxu1 %v11718_v43  ;;  %v16123_v43 = vld [vmem:[#allocation16 + $0x10] ss:$24 sps:$4 sm:$0xff]  }
 0x794   :  { %v15191_v50 = vpop.f32.mrf.mxu0  ;;  %12351 = vmatpush1.bf16.msra.mxu1 %v16108_v17  ;;  %12370 = vmatprep.mubr.bf16.mxu1 %v16697_v44  ;;  %v16173_v17 = vld [vmem:[#allocation17 + $0x4] ss:$24 sps:$4 sm:$0xff]  }
 0x795   :  { %12352 = vmatprep.subr.bf16.mxu1 %v16116_v39  ;;  %v16171_v39 = vld [vmem:[#allocation17] ss:$24 sps:$4 sm:$0xff]  }
 0x796   :  { %v15192_v36 = vpop.f32.mrf.mxu0 }
 0x797   :  { %v15193_v46 = vadd.f32 %v15192_v36, %v15191_v50  ;;  %v16126_v50 = vld [vmem:[#allocation17 + $0x128] ss:$24 sps:$4 sm:$0xff]   ;;  %v16131_v36 = vld [vmem:[#allocation17 + $0x154] ss:$24 sps:$4 sm:$0xff]  }
 0x798   :  { %v15194_v38 = vpop.f32.mrf.mxu0  ;;  %12353 = vmatpush1.bf16.msra.mxu1 %v16114_v33  ;;  %v16179_v33 = vld [vmem:[#allocation17 + $0x2d4] ss:$24 sps:$4 sm:$0xff]  }
 0x799   :  { %v12018_v28 = vadd.f32 %v15193_v46, %v14997_v2  ;;  %12391 = vmatprep.subr.bf16.mxu1 %v16119_v13  ;;  %v16134_v46 = vld [vmem:[#allocation17 + $0xfc] ss:$24 sps:$4 sm:$0xff]   ;;  %v16129_v38 = vld [vmem:[#allocation17 + $0x150] ss:$24 sps:$4 sm:$0xff]  }
 0x79a   :  { %v15195_v34 = vpop.f32.mrf.mxu0  ;;  %v16144_v2 = vld [vmem:[#allocation17 + $0x98] ss:$24 sps:$4 sm:$0xff]   ;;  %v16182_v13 = vld [vmem:[#allocation17 + $0x27c] ss:$24 sps:$4 sm:$0xff]  }
 0x79b   :  { %v16132_v34 = vld [vmem:[#allocation17 + $0xf8] ss:$24 sps:$4 sm:$0xff]  }
 0x853   :  { %v15213_v23 = vpop.f32.mrf.mxu1 }
 0x855   :  { %v15214_v3 = vpop.f32.mrf.mxu1 }
 0x856   :  { %v15215_v61 = vadd.f32 %v15214_v3, %v15213_v23  ;;  %v16149_v23 = vld [vmem:[#allocation17 + $0xc4] ss:$24 sps:$4 sm:$0xff]  }
 0x857   :  { %v15216_v55 = vpop.f32.mrf.mxu1  ;;  %v16152_v3 = vld [vmem:[#allocation17 + $0x6c] ss:$24 sps:$4 sm:$0xff]  }
 0x858   :  { %v12058_v62 = vadd.f32 %v15215_v61, %v12018_v28  ;;  %v16147_v28 = vld [vmem:[#allocation17 + $0xc0] ss:$24 sps:$4 sm:$0xff]   ;;  %v16155_v55 = vld [vmem:[#allocation17 + $0x94] ss:$24 sps:$4 sm:$0xff]  }
 0x859   :  { %v15217_v58 = vpop.f32.mrf.mxu1  ;;  %v16150_v61 = vld [vmem:[#allocation17 + $0x68] ss:$24 sps:$4 sm:$0xff]  }
 0x85a   :  { %v12063_v8 = vmin.f32 %v12058_v62, 0.0  ;;  %vm12064_vm5 = vcmp.gt.f32.partialorder %v12058_v62, 0.0  ;;  %v16153_v58 = vld [vmem:[#allocation17 + $0x90] ss:$24 sps:$4 sm:$0xff]  }
 0x85c   :  { %v12065_v12 = vmul.f32 1.442695, %v12063_v8  ;;  %v16156_v8 = vld [vmem:[#allocation17 + $0x38] ss:$24 sps:$4 sm:$0xff]  }
 0x85e   :  { %16323 = vpow2.f32 %v12065_v12  ;;  %v16161_v12 = vld [vmem:[#allocation17 + $0x64] ss:$24 sps:$4 sm:$0xff]  }
 0x86b   :  { %v16324_v7 = vpop.eup %16323 }
 0x86c   :  { %v15030_v35 = vadd.f32 -1.0, %v16324_v7  ;;  %v16164_v7 = vld [vmem:[#allocation17 + $0xc] ss:$24 sps:$4 sm:$0xff]  }
 0x86e   :  { %v12068_v24 = vsel %vm12064_vm5, %v12058_v62, %v15030_v35  ;;  %v16158_v62 = vld [vmem:[#allocation17 + $0x3c] ss:$24 sps:$4 sm:$0xff]   ;;  %v16159_v35 = vld [vmem:[#allocation17 + $0x60] ss:$24 sps:$4 sm:$0xff]  }
 0x86f   :  { %v12069_v1 = vpack.c.bf16 %v12068_v24, %v12068_v24  ;;  %v16162_v24 = vld [vmem:[#allocation17 + $0x8] ss:$24 sps:$4 sm:$0xff]  }
 0x871   :  { %15267 = vmatmul.mubr.bf16.vlgmr.msra.gmra.mxu0 %v12069_v1  ;;  %v16167_v1 = vld [vmem:[#allocation17 + $0x34] ss:$24 sps:$4 sm:$0xff]  }
 0x872   :  { %12310 = vmatpush1.bf16.msra.mxu0 %v16105_v0  ;;  %12329 = vmatprep.mubr.bf16.mxu0 %v16697_v44  ;;  %v16168_v0 = vld [vmem:[#allocation17 + $0x2d8] ss:$24 sps:$4 sm:$0xff]  }
 0x873   :  { %12311 = vmatprep.subr.bf16.mxu0 %v16113_v56  ;;  %v16176_v56 = vld [vmem:[#allocation17 + $0x2ac] ss:$24 sps:$4 sm:$0xff]  }
 0x876   :  { %12312 = vmatpush1.bf16.msra.mxu0 %v16111_v18  ;;  %v16174_v18 = vld [vmem:[#allocation17 + $0x2a8] ss:$24 sps:$4 sm:$0xff]  }
 0x877   :  { %13082 = vmatprep.subr.bf16.mxu0 %v16122_v57  ;;  %v16180_v57 = vld [vmem:[#allocation17 + $0x278] ss:$24 sps:$4 sm:$0xff]  }
 0x931   :  { %v12175_v11 = vpop.f32.mrf.mxu0 }
 0x932   :  { %v12176_v9 = vadd.f32 %v15031_v45, %v12175_v11  ;;  %v16185_v45 = vld [vmem:[#allocation17 + $0x2a4] ss:$24 sps:$4 sm:$0xff]  }
 0x933   :  { %v15268_v22 = vpop.f32.mrf.mxu0  ;;  %v16188_v11 = vld [vmem:[#allocation17 + $0x24c] ss:$24 sps:$4 sm:$0xff]  }
 0x934   :  { %v12181_v51 = vmin.f32 %v12176_v9, 0.0  ;;  %vm12182_vm6 = vcmp.gt.f32.partialorder %v12176_v9, 0.0  ;;  %v16186_v22 = vld [vmem:[#allocation17 + $0x248] ss:$24 sps:$4 sm:$0xff]  }
 0x935   :  { %v12178_v59 = vpop.f32.mrf.mxu0 }
 0x936   :  { %v12183_v53 = vmul.f32 1.442695, %v12181_v51  ;;  %v16191_v51 = vld [vmem:[#allocation17 + $0x274] ss:$24 sps:$4 sm:$0xff]  }
 0x937   :  { %v15269_v26 = vpop.f32.mrf.mxu0  ;;  %v16194_v59 = vld [vmem:[#allocation17 + $0x21c] ss:$24 sps:$4 sm:$0xff]  }
 0x938   :  { %16325 = vpow2.f32 %v12183_v53  ;;  %v16189_v53 = vld [vmem:[#allocation17 + $0x270] ss:$24 sps:$4 sm:$0xff]  }
 0x939   :  { %v16192_v26 = vld [vmem:[#allocation17 + $0x218] ss:$24 sps:$4 sm:$0xff]  }
 0x945   :  { %v16326_v37 = vpop.eup %16325 }
 0x946   :  { %v15040_v19 = vadd.f32 -1.0, %v16326_v37  ;;  %v16197_v37 = vld [vmem:[#allocation17 + $0x244] ss:$24 sps:$4 sm:$0xff]  }
 0x948   :  { %v12186_v20 = vsel %vm12182_vm6, %v12176_v9, %v15040_v19  ;;  %v16183_v9 = vld [vmem:[#allocation17 + $0x2a0] ss:$24 sps:$4 sm:$0xff]   ;;  %v16200_v19 = vld [vmem:[#allocation17 + $0x1ec] ss:$24 sps:$4 sm:$0xff]  }
 0x949   :  { %v12188_v49 = vpack.c.bf16 %v12186_v20, %v12186_v20  ;;  %v16195_v20 = vld [vmem:[#allocation17 + $0x240] ss:$24 sps:$4 sm:$0xff]  }
 0x94b   :  { %15053 = vmatmul.mubr.msk.bf16.vlgmr.msra.gmra.mxu0 %vm12293_vm7, %v12188_v49  ;;  %15054 = vmatmul.mubr.msk.bf16.vlgmr.msra.gmra.mxu1 %vm12293_vm7, %v12188_v49 }
 0x94c   :  { %12392 = vmatpush1.bf16.msra.mxu1 %v16117_v15  ;;  %13083 = vmatpush1.bf16.msra.mxu0 %v16120_v25  ;;  %v16198_v15 = vld [vmem:[#allocation17 + $0x1e8] ss:$24 sps:$4 sm:$0xff]   ;;  %v16203_v25 = vld [vmem:[#allocation17 + $0x214] ss:$24 sps:$4 sm:$0xff]  }
 0x94d   :  { %12393 = vmatprep.subr.bf16.mxu1 %v16125_v27  ;;  %13084 = vmatprep.subr.bf16.mxu0 %v16128_v52  ;;  %v16201_v27 = vld [vmem:[#allocation17 + $0x210] ss:$24 sps:$4 sm:$0xff]  }
 0x94e   :  { %12411 = vmatprep.mubr.bf16.mxu1 %v16697_v44  ;;  %13114 = vmatprep.mubr.bf16.mxu0 %v17284_v63  ;;  %v16177_v44 = vld [vmem:[#allocation17 + $0x2d0] ss:$24 sps:$4 sm:$0xff]  }
 0x94f   :  { %v16204_v52 = vld [vmem:[#allocation17 + $0x1b8] ss:$24 sps:$4 sm:$0xff]  }
 0x950   :  { %12394 = vmatpush1.bf16.msra.mxu1 %v16123_v43  ;;  %13085 = vmatpush1.bf16.msra.mxu0 %v16126_v50  ;;  %v16209_v43 = vld [vmem:[#allocation17 + $0x1e4] ss:$24 sps:$4 sm:$0xff]  }
 0x951   :  { %13041 = vmatprep.subr.bf16.mxu1 %v16131_v36  ;;  %13086 = vmatprep.subr.bf16.mxu0 %v16134_v46  ;;  %v16212_v50 = vld [vmem:[#allocation17 + $0x18c] ss:$24 sps:$4 sm:$0xff]   ;;  %v16207_v36 = vld [vmem:[#allocation17 + $0x1e0] ss:$24 sps:$4 sm:$0xff]  }
 0x952   :  { %v16210_v46 = vld [vmem:[#allocation17 + $0x188] ss:$24 sps:$4 sm:$0xff]  }
 0x953   :  { %15055 = vmatmul.mubr.msk.bf16.vlgmr.msra.gmra.mxu1 %vm12293_vm7, %v12188_v49  ;;  %v16206_v49 = vld [vmem:[#allocation17 + $0x1bc] ss:$24 sps:$4 sm:$0xff]  }
 0x954   :  { %13042 = vmatpush1.bf16.msra.mxu1 %v16129_v38  ;;  %13087 = vmatpush1.bf16.msra.mxu0 %v16132_v34  ;;  %v16215_v38 = vld [vmem:[#allocation17 + $0x1b4] ss:$24 sps:$4 sm:$0xff]   ;;  %v17293_v34 = vpack.c.bf16 %v17276_v30, %v17276_v30 }
 0x955   :  { %13043 = vmatprep.subr.bf16.mxu1 %v16137_v6  ;;  %13088 = vmatprep.subr.bf16.mxu0 %v16140_v29  ;;  %v16213_v6 = vld [vmem:[#allocation17 + $0x1b0] ss:$24 sps:$4 sm:$0xff]   ;;  %v16218_v29 = vld [vmem:[#allocation17 + $0x184] ss:$24 sps:$4 sm:$0xff]  }
 0x956   :  { %13073 = vmatprep.mubr.bf16.mxu1 %v17284_v63 }
 0x958   :  { %13044 = vmatpush1.bf16.msra.mxu1 %v16135_v41  ;;  %13089 = vmatpush1.bf16.msra.mxu0 %v16138_v60  ;;  %v16216_v41 = vld [vmem:[#allocation17 + $0x180] ss:$24 sps:$4 sm:$0xff]   ;;  %v16221_v60 = vld [vmem:[#allocation17 + $0x164] ss:$24 sps:$4 sm:$0xff]  }
 0x959   :  { %13045 = vmatprep.subr.bf16.mxu1 %v16143_v42  ;;  %13090 = vmatprep.subr.bf16.mxu0 %v16146_v47  ;;  %v16219_v42 = vld [vmem:[#allocation17 + $0x160] ss:$24 sps:$4 sm:$0xff]   ;;  %v16224_v47 = vld [vmem:[#allocation17 + $0x134] ss:$24 sps:$4 sm:$0xff]  }
 0x95c   :  { %13046 = vmatpush1.bf16.msra.mxu1 %v16141_v48  ;;  %13091 = vmatpush1.bf16.msra.mxu0 %v16144_v2  ;;  %v16222_v48 = vld [vmem:[#allocation17 + $0x130] ss:$24 sps:$4 sm:$0xff]   ;;  %v16227_v2 = vld [vmem:[#allocation17 + $0x104] ss:$24 sps:$4 sm:$0xff]  }
 0x95d   :  { %13047 = vmatprep.subr.bf16.mxu1 %v16149_v23  ;;  %13092 = vmatprep.subr.bf16.mxu0 %v16152_v3  ;;  %v16225_v23 = vld [vmem:[#allocation17 + $0x100] ss:$24 sps:$4 sm:$0xff]   ;;  %v16230_v3 = vld [vmem:[#allocation17 + $0xd4] ss:$24 sps:$4 sm:$0xff]  }
 0x960   :  { %13048 = vmatpush1.bf16.msra.mxu1 %v16147_v28  ;;  %13093 = vmatpush1.bf16.msra.mxu0 %v16150_v61  ;;  %v16228_v28 = vld [vmem:[#allocation17 + $0xd0] ss:$24 sps:$4 sm:$0xff]   ;;  %v16233_v61 = vld [vmem:[#allocation17 + $0xa4] ss:$24 sps:$4 sm:$0xff]  }
 0x961   :  { %13049 = vmatprep.subr.bf16.mxu1 %v16155_v55  ;;  %13094 = vmatprep.subr.bf16.mxu0 %v16158_v62  ;;  %v16231_v55 = vld [vmem:[#allocation17 + $0xa0] ss:$24 sps:$4 sm:$0xff]   ;;  %v16236_v62 = vld [vmem:[#allocation17 + $0x74] ss:$24 sps:$4 sm:$0xff]  }
 0x964   :  { %13050 = vmatpush1.bf16.msra.mxu1 %v16153_v58  ;;  %13095 = vmatpush1.bf16.msra.mxu0 %v16156_v8  ;;  %v16234_v58 = vld [vmem:[#allocation17 + $0x70] ss:$24 sps:$4 sm:$0xff]   ;;  %v16239_v8 = vld [vmem:[#allocation17 + $0x44] ss:$24 sps:$4 sm:$0xff]  }
 0x965   :  { %13051 = vmatprep.subr.bf16.mxu1 %v16161_v12  ;;  %13096 = vmatprep.subr.bf16.mxu0 %v16164_v7  ;;  %v16242_v12 = vld [vmem:[#allocation17 + $0x14] ss:$24 sps:$4 sm:$0xff]   ;;  %v16240_v7 = vld [vmem:[#allocation17 + $0x10] ss:$24 sps:$4 sm:$0xff]  }
 0x968   :  { %13052 = vmatpush1.bf16.msra.mxu1 %v16159_v35  ;;  %13097 = vmatpush1.bf16.msra.mxu0 %v16162_v24  ;;  %v16245_v35 = vld [vmem:[#allocation17 + $0x2e4] ss:$24 sps:$4 sm:$0xff]   ;;  %v16243_v24 = vld [vmem:[#allocation17 + $0x2e0] ss:$24 sps:$4 sm:$0xff]  }
 0x969   :  { %13053 = vmatprep.subr.bf16.mxu1 %v16167_v1  ;;  %13098 = vmatprep.subr.bf16.mxu0 %v16170_v5  ;;  %v16248_v1 = vld [vmem:[#allocation17 + $0x2b4] ss:$24 sps:$4 sm:$0xff]   ;;  %v16246_v5 = vld [vmem:[#allocation17 + $0x2b0] ss:$24 sps:$4 sm:$0xff]  }
 0x96c   :  { %13054 = vmatpush1.bf16.msra.mxu1 %v16165_v54  ;;  %13099 = vmatpush2.bf16.msra.mxu0 %v16168_v0  ;;  %v16251_v54 = vld [vmem:[#allocation17 + $0x284] ss:$24 sps:$4 sm:$0xff]   ;;  %v16249_v0 = vld [vmem:[#allocation17 + $0x280] ss:$24 sps:$4 sm:$0xff]  }
 0x96d   :  { %13055 = vmatprep.subr.bf16.mxu1 %v16173_v17  ;;  %13100 = vmatprep.subr.bf16.mxu0 %v16176_v56  ;;  %v16254_v17 = vld [vmem:[#allocation17 + $0x254] ss:$24 sps:$4 sm:$0xff]   ;;  %v16252_v56 = vld [vmem:[#allocation17 + $0x250] ss:$24 sps:$4 sm:$0xff]  }
 0x970   :  { %13056 = vmatpush1.bf16.msra.mxu1 %v16171_v39  ;;  %13101 = vmatpush2.bf16.msra.mxu0 %v16174_v18  ;;  %v16257_v39 = vld [vmem:[#allocation17 + $0x224] ss:$24 sps:$4 sm:$0xff]   ;;  %v16255_v18 = vld [vmem:[#allocation17 + $0x220] ss:$24 sps:$4 sm:$0xff]  }
 0x971   :  { %13057 = vmatprep.subr.bf16.mxu1 %v16179_v33  ;;  %13102 = vmatprep.subr.bf16.mxu0 %v16182_v13  ;;  %v16260_v33 = vld [vmem:[#allocation17 + $0x1f4] ss:$24 sps:$4 sm:$0xff]   ;;  %v16258_v13 = vld [vmem:[#allocation17 + $0x1f0] ss:$24 sps:$4 sm:$0xff]  }
 0x974   :  { %13058 = vmatpush2.bf16.msra.mxu1 %v16177_v44  ;;  %13103 = vmatpush2.bf16.msra.mxu0 %v16180_v57  ;;  %v16263_v44 = vld [vmem:[#allocation17 + $0x1c4] ss:$24 sps:$4 sm:$0xff]   ;;  %v16261_v57 = vld [vmem:[#allocation17 + $0x1c0] ss:$24 sps:$4 sm:$0xff]  }
 0x975   :  { %13059 = vmatprep.subr.bf16.mxu1 %v16185_v45  ;;  %13104 = vmatprep.subr.bf16.mxu0 %v16188_v11  ;;  %v16266_v45 = vld [vmem:[#allocation17 + $0x194] ss:$24 sps:$4 sm:$0xff]   ;;  %v16264_v11 = vld [vmem:[#allocation17 + $0x190] ss:$24 sps:$4 sm:$0xff]  }
 0x978   :  { %13060 = vmatpush2.bf16.msra.mxu1 %v16183_v9  ;;  %13105 = vmatpush2.bf16.msra.mxu0 %v16186_v22  ;;  %v16267_v9 = vld [vmem:[#allocation22 + $0x78] sm:$0xff]  }
 0x979   :  { %13061 = vmatprep.subr.bf16.mxu1 %v16191_v51  ;;  %13106 = vmatprep.subr.bf16.mxu0 %v16194_v59  ;;  %v16268_v22 = vld [vmem:[#allocation22 + $0x38] sm:$0xff]  }
 0x97c   :  { %13062 = vmatpush2.bf16.msra.mxu1 %v16189_v53  ;;  %13107 = vmatpush2.bf16.msra.mxu0 %v16192_v26 }
 0x97d   :  { %13063 = vmatprep.subr.bf16.mxu1 %v16197_v37  ;;  %13108 = vmatprep.subr.bf16.mxu0 %v16200_v19 }
 0x980   :  { %13064 = vmatpush2.bf16.msra.mxu1 %v16195_v20  ;;  %13109 = vmatpush2.bf16.msra.mxu0 %v16198_v15 }
 0x981   :  { %13065 = vmatprep.subr.bf16.mxu1 %v16203_v25  ;;  %13110 = vmatprep.subr.bf16.mxu0 %v16206_v49  ;;  %v16269_v49 = vld [vmem:[#allocation22 + $0x70] sm:$0xff]  }
 0x984   :  { %13066 = vmatpush2.bf16.msra.mxu1 %v16201_v27  ;;  %13111 = vmatpush2.bf16.msra.mxu0 %v16204_v52  ;;  %v16270_v52 = vld [vmem:[#allocation22 + $0x30] sm:$0xff]  }
 0x985   :  { %13067 = vmatprep.subr.bf16.mxu1 %v16209_v43  ;;  %13112 = vmatprep.subr.bf16.mxu0 %v16212_v50  ;;  %v16271_v50 = vld [vmem:[#allocation22 + $0x68] sm:$0xff]  }
 0x988   :  { %13068 = vmatpush2.bf16.msra.mxu1 %v16207_v36  ;;  %13113 = vmatpush2.bf16.msra.mxu0 %v16210_v46  ;;  %v16272_v46 = vld [vmem:[#allocation22 + $0x28] sm:$0xff]  }
 0x989   :  { %13069 = vmatprep.subr.bf16.mxu1 %v16215_v38  ;;  %15228 = vmatprep.subr.bf16.mxu0 %v16267_v9  ;;  %v16273_v38 = vld [vmem:[#allocation22 + $0x60] sm:$0xff]  }
 0x98b   :  { %13115 = vmatmul.mubr.bf16.vlgmr.msra.gmra.mxu0 %v17293_v34 }
 0x98c   :  { %13070 = vmatpush2.bf16.msra.mxu1 %v16213_v6  ;;  %15229 = vmatpush3.bf16.msra.mxu0 %v16268_v22  ;;  %v16275_v6 = vld [vmem:[#allocation22 + $0x58] sm:$0xff]  }
 0x98d   :  { %13071 = vmatprep.subr.bf16.mxu1 %v16218_v29  ;;  %15230 = vmatprep.subr.bf16.mxu0 %v16269_v49  ;;  %v16276_v29 = vld [vmem:[#allocation22 + $0x18] sm:$0xff]  }
 0x990   :  { %13072 = vmatpush2.bf16.msra.mxu1 %v16216_v41  ;;  %15231 = vmatpush3.bf16.msra.mxu0 %v16270_v52  ;;  %v16277_v41 = vld [vmem:[#allocation22 + $0x50] sm:$0xff]  }
 0x991   :  { %13123 = vmatprep.subr.bf16.mxu1 %v16221_v60  ;;  %15232 = vmatprep.subr.bf16.mxu0 %v16271_v50  ;;  %v16278_v60 = vld [vmem:[#allocation22 + $0x10] sm:$0xff]  }
 0x993   :  { %13074 = vmatmul.mubr.bf16.vlgmr.msra.gmra.mxu1 %v17293_v34 }
 0x994   :  { %13124 = vmatpush1.bf16.msra.mxu1 %v16219_v42  ;;  %13155 = vmatprep.mubr.bf16.mxu1 %v17284_v63  ;;  %v16237_v63 = vld [vmem:[#allocation17 + $0x40] ss:$24 sps:$4 sm:$0xff]  }
 0x995   :  { %13125 = vmatprep.subr.bf16.mxu1 %v16224_v47  ;;  %15233 = vmatpush3.bf16.msra.mxu0 %v16272_v46  ;;  %v16279_v42 = vld [vmem:[#allocation22 + $0x48] sm:$0xff]  }
 0x996   :  { %15234 = vmatprep.subr.bf16.mxu0 %v16273_v38  ;;  %v16280_v47 = vld [vmem:[#allocation22 + $0x8] sm:$0xff]  }
 0x998   :  { %13126 = vmatpush1.bf16.msra.mxu1 %v16222_v48  ;;  %v16281_v48 = vld [vmem:[#allocation22 + $0x40] sm:$0xff]  }
 0x999   :  { %13127 = vmatprep.subr.bf16.mxu1 %v16227_v2  ;;  %v16282_v2 = vld [vmem:[#allocation22] sm:$0xff]  }
 0x99c   :  { %13128 = vmatpush1.bf16.msra.mxu1 %v16225_v23 }
 0x99d   :  { %13129 = vmatprep.subr.bf16.mxu1 %v16230_v3 }
 0x9a0   :  { %13130 = vmatpush1.bf16.msra.mxu1 %v16228_v28 }
 0x9a1   :  { %13131 = vmatprep.subr.bf16.mxu1 %v16233_v61 }
 0x9a4   :  { %13132 = vmatpush1.bf16.msra.mxu1 %v16231_v55 }
 0x9a5   :  { %13133 = vmatprep.subr.bf16.mxu1 %v16236_v62 }
 0x9a8   :  { %13134 = vmatpush1.bf16.msra.mxu1 %v16234_v58 }
 0x9a9   :  { %13135 = vmatprep.subr.bf16.mxu1 %v16239_v8 }
 0x9ac   :  { %13136 = vmatpush1.bf16.msra.mxu1 %v16237_v63  ;;  %v12201_v63 = vld [vmem:[#allocation19] sm:$0x3f] }
 0x9ad   :  { %13137 = vmatprep.subr.bf16.mxu1 %v16242_v12  ;;  %v12529_v12 = vld [vmem:[#allocation20] sm:$0x3f] }
 0x9ae   :  { %v12550_v49 = vrot.slane %v12529_v12, %v16960_v10 }
 0x9b0   :  { %13138 = vmatpush1.bf16.msra.mxu1 %v16240_v7  ;;  %v12534_v7 = vrot.slane %v12529_v12, %v16908_v31 }
 0x9b1   :  { %13139 = vmatprep.subr.bf16.mxu1 %v16245_v35  ;;  %v12206_v35 = vrot.slane %v12201_v63, %v16908_v31  ;;  %v12218_v31 = vrot.slane %v12201_v63, %v16937_v14 }
 0x9b4   :  { %13140 = vmatpush2.bf16.msra.mxu1 %v16243_v24  ;;  %v12538_v24 = vrot.slane %v12529_v12, %v16911_v40 }
 0x9b5   :  { %13141 = vmatprep.subr.bf16.mxu1 %v16248_v1  ;;  %v12210_v1 = vrot.slane %v12201_v63, %v16911_v40 }
 0x9b8   :  { %13142 = vmatpush2.bf16.msra.mxu1 %v16246_v5 }
 0x9b9   :  { %13143 = vmatprep.subr.bf16.mxu1 %v16251_v54 }
 0x9bc   :  { %13144 = vmatpush2.bf16.msra.mxu1 %v16249_v0 }
 0x9bd   :  { %13145 = vmatprep.subr.bf16.mxu1 %v16254_v17 }
 0x9c0   :  { %13146 = vmatpush2.bf16.msra.mxu1 %v16252_v56 }
 0x9c1   :  { %13147 = vmatprep.subr.bf16.mxu1 %v16257_v39 }
 0x9c4   :  { %13148 = vmatpush2.bf16.msra.mxu1 %v16255_v18 }
 0x9c5   :  { %13149 = vmatprep.subr.bf16.mxu1 %v16260_v33  ;;  %v12542_v33 = vrot.slane %v12529_v12, %v16934_v4 }
 0x9c8   :  { %13150 = vmatpush2.bf16.msra.mxu1 %v16258_v13 }
 0x9c9   :  { %13151 = vmatprep.subr.bf16.mxu1 %v16263_v44  ;;  %v12214_v44 = vrot.slane %v12201_v63, %v16934_v4 }
 0x9cc   :  { %13152 = vmatpush2.bf16.msra.mxu1 %v16261_v57  ;;  %v12546_v57 = vrot.slane %v12529_v12, %v16937_v14 }
 0x9cd   :  { %13153 = vmatprep.subr.bf16.mxu1 %v16266_v45 }
 0x9d0   :  { %13154 = vmatpush2.bf16.msra.mxu1 %v16264_v11 }
 0x9d3   :  { %13156 = vmatmul.mubr.bf16.vlgmr.msra.gmra.mxu1 %v17293_v34  ;;  %v16274_v34 = vld [vmem:[#allocation22 + $0x20] sm:$0xff]  }
 0x9d4   :  { %15235 = vmatpush3.bf16.msra.mxu0 %v16274_v34 }
 0x9d5   :  { %15236 = vmatprep.subr.bf16.mxu0 %v16275_v6 }
 0x9d8   :  { %15237 = vmatpush3.bf16.msra.mxu0 %v16276_v29 }
 0x9d9   :  { %15238 = vmatprep.subr.bf16.mxu0 %v16277_v41 }
 0x9dc   :  { %15239 = vmatpush3.bf16.msra.mxu0 %v16278_v60 }
 0x9dd   :  { %15240 = vmatprep.subr.bf16.mxu0 %v16279_v42 }
 0x9e0   :  { %15241 = vmatpush3.bf16.msra.mxu0 %v16280_v47 }
 0x9e1   :  { %15242 = vmatprep.subr.bf16.mxu0 %v16281_v48 }
 0x9e4   :  { %15243 = vmatpush3.bf16.msra.mxu0 %v16282_v2 }
 0xa0b   :  { %v12331_v51 = vpop.f32.mrf.mxu0  ;;  %v17299_v59 = vpop.f32.mrf.mxu1 }
 0xa0c   :  { %v12332_v54 = vadd.f32 %v12331_v51, %v12206_v35  ;;  %v12373_v40 = vadd.f32 %v17299_v59, %v12214_v44  ;;  %v12222_v59 = vrot.slane %v12201_v63, %v16960_v10 }
 0xa0d   :  { %v12333_v53 = vpop.f32.mrf.mxu0  ;;  %v17301_v26 = vpop.f32.mrf.mxu1 }
 0xa0e   :  { %v12334_v17 = vadd.f32 %v12333_v53, %v12210_v1  ;;  %v12375_v9 = vadd.f32 %v17301_v26, %v12218_v31  ;;  %v12554_v26 = vrot.slane %v12529_v12, %v16963_v16 }
 0xa0f   :  { %v12335_v37 = vpop.f32.mrf.mxu0  ;;  %v12376_v19 = vpop.f32.mrf.mxu1 }
 0xa11   :  { %v12336_v20 = vpop.f32.mrf.mxu0  ;;  %v12377_v15 = vpop.f32.mrf.mxu1 }
 0xa13   :  { %v17303_v25 = vpop.f32.mrf.mxu1 }
 0xa14   :  { %v12414_v29 = vadd.f32 %v17303_v25, %v12222_v59 }
 0xa15   :  { %v17305_v27 = vpop.f32.mrf.mxu1 }
 0xa17   :  { %v12417_v43 = vpop.f32.mrf.mxu1 }
 0xa19   :  { %v12418_v36 = vpop.f32.mrf.mxu1 }
 0xa1a   :  { %v12226_v36 = vrot.slane %v12201_v63, %v16963_v16 }
 0xa1c   :  { %v12416_v48 = vadd.f32 %v17305_v27, %v12226_v36 }
 0xa4b   :  { %v13116_v23 = vpop.f32.mrf.mxu0 }
 0xa4c   :  { %v13117_v45 = vadd.f32 %v13116_v23, %v12542_v33 }
 0xa4d   :  { %v13118_v3 = vpop.f32.mrf.mxu0 }
 0xa4e   :  { %v13119_v11 = vadd.f32 %v13118_v3, %v12546_v57  ;;  %v13178_v22 = vadd.f32 %v13117_v45, %v12373_v40 }
 0xa4f   :  { %v13120_v28 = vpop.f32.mrf.mxu0 }
 0xa50   :  { %v13179_v51 = vadd.f32 %v13119_v11, %v12375_v9  ;;  %v15155_v53 = vmul.f32 -1.442695, %v13178_v22 }
 0xa51   :  { %v13121_v61 = vpop.f32.mrf.mxu0 }
 0xa52   :  { %v15156_v37 = vmul.f32 -1.442695, %v13179_v51 }
 0xa53   :  { %v13075_v55 = vpop.f32.mrf.mxu1 }
 0xa54   :  { %v13076_v5 = vadd.f32 %v13075_v55, %v12534_v7 }
 0xa55   :  { %v13077_v62 = vpop.f32.mrf.mxu1 }
 0xa56   :  { %v13078_v0 = vadd.f32 %v13077_v62, %v12538_v24  ;;  %v13164_v56 = vadd.f32 %v13076_v5, %v12332_v54  ;;  %v13396_v54 = vand.u32 127, %v1260_v32 }
 0xa57   :  { %v13079_v58 = vpop.f32.mrf.mxu1 }
 0xa58   :  { %v13165_v39 = vadd.f32 %v13078_v0, %v12334_v17  ;;  %v15153_v18 = vmul.f32 -1.442695, %v13164_v56  ;;  %v15158_v0 = vld [vmem:[#allocation23] ss:$0 sm:$0xff]  ;;  %vm13397_vm8 = vcmp.lt.s32.totalorder %v13396_v54, 6 }
 0xa59   :  { %v13080_v8 = vpop.f32.mrf.mxu1 }
 0xa5a   :  { %v15154_v13 = vmul.f32 -1.442695, %v13165_v39  ;;  %16327 = vpow2.f32 %v15153_v18 }
 0xa5c   :  { %16329 = vpow2.f32 %v15154_v13 }
 0xa5d   :  { %16331 = vpow2.f32 %v15155_v53 }
 0xa5e   :  { %16333 = vpow2.f32 %v15156_v37 }
 0xa67   :  { %v16328_v19 = vpop.eup %16327 }
 0xa68   :  { %v13172_v4 = vadd.f32 1.0, %v16328_v19 }
 0xa69   :  { %v16330_v20 = vpop.eup %16329 }
 0xa6a   :  { %v13173_v15 = vadd.f32 1.0, %v16330_v20  ;;  %16335 = vrcp.f32 %v13172_v4  ;;  %v16332_v14 = vpop.eup %16331 }
 0xa6b   :  { %v16334_v52 = vpop.eup %16333  ;;  %v13186_v43 = vadd.f32 1.0, %v16332_v14 }
 0xa6c   :  { %16337 = vrcp.f32 %v13173_v15  ;;  %v13187_v46 = vadd.f32 1.0, %v16334_v52 }
 0xa6d   :  { %16339 = vrcp.f32 %v13186_v43 }
 0xa6e   :  { %16341 = vrcp.f32 %v13187_v46 }
 0xa77   :  { %v16336_v34 = vpop.eup %16335 }
 0xa79   :  { %v16338_v42 = vpop.eup %16337 }
 0xa7a   :  { %v16340_v16 = vpop.eup %16339 }
 0xa7b   :  { %v16342_v28 = vpop.eup %16341  ;;  %v13198_v61 = vsub.f32 1.0, %v16340_v16  ;;  %v13202_v58 = vmul.f32 %v16340_v16, %v17276_v30 }
 0xa7c   :  { %v13199_v62 = vsub.f32 1.0, %v16342_v28  ;;  %v13203_v12 = vmul.f32 %v16342_v28, %v17280_v21 }
 0xa93   :  { %v13157_v50 = vpop.f32.mrf.mxu1 }
 0xa94   :  { %v13158_v38 = vadd.f32 %v13157_v50, %v12550_v49 }
 0xa95   :  { %v13159_v6 = vpop.f32.mrf.mxu1 }
 0xa96   :  { %v13192_v41 = vmul.f32 %v16336_v34, %v13158_v38  ;;  %v13160_v60 = vadd.f32 %v13159_v6, %v12554_v26 }
 0xa97   :  { %v13161_v47 = vpop.f32.mrf.mxu1 }
 0xa98   :  { %v13194_v10 = vadd.f32 %v13192_v41, %v12414_v29  ;;  %v13193_v2 = vmul.f32 %v16338_v42, %v13160_v60 }
 0xa99   :  { %v13162_v23 = vpop.f32.mrf.mxu1 }
 0xa9a   :  { %16343 = vtanh.f32 %v13194_v10  ;;  %v13195_v3 = vadd.f32 %v13193_v2, %v12416_v48 }
 0xa9c   :  { %16345 = vtanh.f32 %v13195_v3 }
 0xaa7   :  { %v16344_v55 = vpop.eup %16343 }
 0xaa8   :  { %v13200_v25 = vmul.f32 %v16344_v55, %v13198_v61 }
 0xaa9   :  { %v16346_v8 = vpop.eup %16345 }
 0xaaa   :  { %v13201_v63 = vmul.f32 %v16346_v8, %v13199_v62  ;;  %v13204_v27 = vadd.f32 %v13202_v58, %v13200_v25 }
 0xaac   :  { %v13205_v7 = vadd.f32 %v13203_v12, %v13201_v63  ;;  %v13218_v1 = vpack.c.bf16 %v13204_v27, %v13204_v27 }
 0xaae   :  { %v13219_v35 = vpack.c.bf16 %v13205_v7, %v13205_v7  ;;  %v13208_v24 = vcombine.low %v13204_v27, %v13205_v7 }
 0xab0   :  { %13387 = vmatprep.mubr.bf16.mxu0 %v13219_v35  ;;  %15157 = vst.sshfl [vmem:[#allocation25] sm:$0x33 pattern:$0x76325410] %v13208_v24 }
 0xab1   :  { %13388 = vmatmul.mubr.bf16.vlgmr.msra.gmra.mxu0 %v13218_v1 }
 0xb71   :  { %v15244_v5 = vpop.f32.mrf.mxu0 }
 0xb73   :  { %v15245_v17 = vpop.f32.mrf.mxu0 }
 0xb74   :  { %v15246_v56 = vadd.f32 %v15245_v17, %v15244_v5 }
 0xb75   :  { %v15247_v39 = vpop.f32.mrf.mxu0 }
 0xb76   :  { %v13390_v30 = vadd.f32 %v15246_v56, %v15158_v0 }
 0xb77   :  { %v15248_v18 = vpop.f32.mrf.mxu0 }
 0xb78   :  { %v13398_v21 = vsel %vm13397_vm8, %v13390_v30, -1e+30 }
 0xb79   :  { %v13400_v33 = vsel %vm13399_vm9, %v13398_v21, -inf }
 0xb7a   :  { %13401 = vmax.xlane.f32.xlu0 %v13400_v33 }
 0xc03   :  { %v13402_v13 = vpop.xlane.xlu0 %13401 }
 0xc04   :  { %v13403_v44 = vsub.f32 %v13398_v21, %v13402_v13 }
 0xc06   :  { %v13404_v57 = vmul.f32 1.442695, %v13403_v44 }
 0xc08   :  { %16347 = vpow2.f32 %v13404_v57 }
 0xc15   :  { %v16348_v31 = vpop.eup %16347 }
 0xc16   :  { %v13406_v45 = vsel %vm13399_vm9, %v16348_v31, 0.0 }
 0xc17   :  { %13407 = vadd.xlane.f32.xlu0 %v13406_v45 }
 0xc18   :  { %16646 = shalt.err (!%p16643_p4)
}
 0xc19   :  { %13424 = dma.vmem_to_hbm [thread:$0]  %s13422_s9, 64, %s17350_s16, [#allocation4]  }
 0xca0   :  { %v13408_v32 = vpop.xlane.xlu0 %13407 }
 0xca1   :  { %16349 = vlog2.f32 %v13408_v32 }
 0xcae   :  { %v16350_v40 = vpop.eup %16349 }
 0xcaf   :  { %v13410_v11 = vmul.f32 0.6931472, %v16350_v40 }
 0xcb1   :  { %v13411_v9 = vadd.f32 %v13410_v11, %v13402_v13 }
 0xcb3   :  { %v13412_v22 = vsub.f32 %v13390_v30, %v13411_v9 }
 0xcb5   :  { %v13413_v51 = vsel %vm13397_vm8, %v13412_v22, %v13390_v30 }
 0xcb6   :  { %13414 = vst [vmem:[%s17351_s17] sm:$0x3] %v13413_v51 }
 0xcb7   :  { %16671 = dma.done.wait [#allocation4], 64  }
 0xcb8   :  { %16672 = vsyncadd [#allocation4], 4294967232 }
 0xcb9   :  { %13432 = vsyncpa [#allocation3], 1 }
 0xcba   :  { %13433 = vsyncpa [#allocation6], 1 }
 0xcbb   :  { %13434 = vsyncpa [#allocation9], 1 }
 0xcbc   :  { %13435 = vsyncpa [#allocation12], 1 }
 0xcbd   :  { %13436 = vsyncpa [#allocation15], 1 }
 0xcbe   :  { %13437 = vsyncpa [#allocation18], 1 }
 0xcbf   :  { %13438 = vsyncpa [#allocation21], 1 }
 0xcc0   :  { %13439 = vsyncpa [#allocation24], 1 }
 0xcc1   :  { %13440 = vsyncpa [#allocation4], 1 }

</bundles_post_ra>
